<compile_context>
chip_gen: v6e
topology: v6e:2x2x1
jax: 0.10.0
libtpu: 0.0.40
codegen_flags: <defaults>
</compile_context>

<pallas_src>
import math

import jax
import jax.numpy as jnp
from jax import lax
from jax.experimental import pallas as pl
from jax.experimental.pallas import tpu as pltpu

D_MODEL = 256
NHEAD = 8
HEAD_DIM = D_MODEL // NHEAD
LN_EPS = 1e-5


def _layernorm(y, gamma, beta):
    mu = jnp.mean(y, axis=-1, keepdims=True)
    var = jnp.mean((y - mu) ** 2, axis=-1, keepdims=True)
    return (y - mu) * lax.rsqrt(var + LN_EPS) * gamma + beta


def encoder_layer_kernel(
    x_ref,        # (S, D)    f32   this batch element's activations
    in_wt_ref,    # (D, 3D)   bf16  in_proj weight, pre-transposed, Q rows pre-scaled
    out_wt_ref,   # (D, D)    bf16  out_proj weight, pre-transposed
    w1t_ref,      # (D, 4D)   bf16  FFN linear1 weight, pre-transposed
    w2t_ref,      # (4D, D)   bf16  FFN linear2 weight, pre-transposed
    vecs_ref,     # (1, 13D)  f32   [in_b | out_b | b1 | b2 | g1 | be1 | g2 | be2]
    o_ref,        # (S, D)    f32
    acc_sc,       # (S, D)    f32   VMEM accumulator for attention output projection
):
    D = D_MODEL
    x = x_ref[...]                                   # (S, D) f32
    x_bf = x.astype(jnp.bfloat16)

    # Lane-aligned static slices of the packed small-vector block (all offsets % 128 == 0).
    in_b  = vecs_ref[:, 0 * D:3 * D]                 # (1, 3D)  (Q part pre-scaled)
    out_b = vecs_ref[:, 3 * D:4 * D]                 # (1, D)
    b1    = vecs_ref[:, 4 * D:8 * D]                 # (1, 4D)
    b2    = vecs_ref[:, 8 * D:9 * D]                 # (1, D)
    g1    = vecs_ref[:, 9 * D:10 * D]                # (1, D)
    be1   = vecs_ref[:, 10 * D:11 * D]               # (1, D)
    g2    = vecs_ref[:, 11 * D:12 * D]               # (1, D)
    be2   = vecs_ref[:, 12 * D:13 * D]               # (1, D)

    # --- self-attention: QKV projection (MXU, bf16 x bf16 -> f32) ---
    qkv = jnp.dot(x_bf, in_wt_ref[...], preferred_element_type=jnp.float32)
    qkv = qkv + in_b                                 # (S, 3D) f32

    q_bf = qkv[:, 0:D].astype(jnp.bfloat16)          # 1/sqrt(dh) already folded into weights
    k_bf = qkv[:, D:2 * D].astype(jnp.bfloat16)
    v_bf = qkv[:, 2 * D:3 * D].astype(jnp.bfloat16)

    # Accumulator starts at the out-proj bias; each head adds its contribution to the
    # projected output directly (fused out-projection, no concat scratch).
    acc_sc[...] = jnp.broadcast_to(out_b, x.shape)

    for h in range(NHEAD):                           # static loop; acc ref serializes heads
        lo, hi = h * HEAD_DIM, (h + 1) * HEAD_DIM
        qh = q_bf[:, lo:hi]                          # (S, dh)
        kh = k_bf[:, lo:hi]                          # (S, dh)
        vh = v_bf[:, lo:hi]                          # (S, dh)
        # QK^T: contract last dims directly (no materialized transpose of K).
        s = lax.dot_general(qh, kh, (((1,), (1,)), ((), ())),
                            preferred_element_type=jnp.float32)        # (S, S) f32
        s = s - jnp.max(s, axis=-1, keepdims=True)
        p = jnp.exp(s)
        p = p * pl.reciprocal(jnp.sum(p, axis=-1, keepdims=True), approx=True)
        oh = jnp.dot(p.astype(jnp.bfloat16), vh,
                     preferred_element_type=jnp.float32)               # (S, dh) f32
        # Fused out-projection for this head: (S, dh) x (dh, D) accumulated in f32.
        acc_sc[...] += jnp.dot(oh.astype(jnp.bfloat16), out_wt_ref[lo:hi, :],
                               preferred_element_type=jnp.float32)

    attn = acc_sc[...]                               # (S, D) f32 (bias already included)

    # --- residual + norm1 (f32) ---
    x1 = _layernorm(x + attn, g1, be1)

    # --- FFN (bf16 matmuls, f32 accumulate / elementwise) ---
    h1 = jnp.dot(x1.astype(jnp.bfloat16), w1t_ref[...],
                 preferred_element_type=jnp.float32)
    h1 = jnp.maximum(h1 + b1, 0.0)                   # ReLU, (S, 4D) f32
    h2 = jnp.dot(h1.astype(jnp.bfloat16), w2t_ref[...],
                 preferred_element_type=jnp.float32)
    h2 = h2 + b2                                     # (S, D) f32

    # --- residual + norm2 (f32) ---
    o_ref[...] = _layernorm(x1 + h2, g2, be2)


def init_params(key, d_model=D_MODEL):
    ks = jax.random.split(key, 8)
    s = 0.02
    return {
        "in_w":  jax.random.normal(ks[0], (3 * d_model, d_model), jnp.float32) * s,
        "in_b":  jax.random.normal(ks[1], (3 * d_model,), jnp.float32) * s,
        "out_w": jax.random.normal(ks[2], (d_model, d_model), jnp.float32) * s,
        "out_b": jax.random.normal(ks[3], (d_model,), jnp.float32) * s,
        "w1":    jax.random.normal(ks[4], (4 * d_model, d_model), jnp.float32) * s,
        "b1":    jax.random.normal(ks[5], (4 * d_model,), jnp.float32) * s,
        "w2":    jax.random.normal(ks[6], (d_model, 4 * d_model), jnp.float32) * s,
        "b2":    jax.random.normal(ks[7], (d_model,), jnp.float32) * s,
        "g1":    jnp.ones((d_model,), jnp.float32),
        "be1":   jnp.zeros((d_model,), jnp.float32),
        "g2":    jnp.ones((d_model,), jnp.float32),
        "be2":   jnp.zeros((d_model,), jnp.float32),
    }


def prepare_params(params):
    """One-time weight preprocessing (do NOT call per forward step).

    Folds 1/sqrt(head_dim) into the Q rows of in_proj, pre-transposes and bf16-casts
    all matmul weights, and packs the eight small f32 vectors into one lane-aligned
    (1, 13*D) array.
    """
    D = D_MODEL
    scale = 1.0 / math.sqrt(HEAD_DIM)
    in_w = params["in_w"].at[:D].multiply(scale)     # exact fold, done in f32
    in_b = params["in_b"].at[:D].multiply(scale)
    vecs = jnp.concatenate([
        in_b,                                        # (3D,)  offset 0
        params["out_b"],                             # (D,)   offset 3D
        params["b1"],                                # (4D,)  offset 4D
        params["b2"],                                # (D,)   offset 8D
        params["g1"], params["be1"],                 # (D,) each, offsets 9D, 10D
        params["g2"], params["be2"],                 # (D,) each, offsets 11D, 12D
    ]).reshape(1, -1).astype(jnp.float32)            # (1, 13D)
    return {
        "in_wt":  in_w.T.astype(jnp.bfloat16),               # (D, 3D)
        "out_wt": params["out_w"].T.astype(jnp.bfloat16),     # (D, D)
        "w1t":    params["w1"].T.astype(jnp.bfloat16),        # (D, 4D)
        "w2t":    params["w2"].T.astype(jnp.bfloat16),        # (4D, D)
        "vecs":   vecs,                                       # (1, 13D) f32
    }


@jax.jit
def transformer_encoder_layer(x_sbd, prep):
    """x_sbd: (S, B, D) float32 (PyTorch MHA convention). `prep` from prepare_params.

    Returns (S, B, D) float32.
    """
    S, B, D = x_sbd.shape

    # Free reshape of the contiguous (S, B, D) input: batch b lives in lane columns
    # [b*D, (b+1)*D) of a (S, B*D) view. No layout transpose, no extra HBM round trip.
    x2d = x_sbd.reshape(S, B * D)

    weights = (prep["in_wt"], prep["out_wt"], prep["w1t"], prep["w2t"], prep["vecs"])
    weight_specs = [pl.BlockSpec(w.shape, lambda b: (0, 0)) for w in weights]

    out2d = pl.pallas_call(
        encoder_layer_kernel,
        out_shape=jax.ShapeDtypeStruct((S, B * D), jnp.float32),
        grid_spec=pltpu.PrefetchScalarGridSpec(
            num_scalar_prefetch=0,
            grid=(B,),
            in_specs=[pl.BlockSpec((S, D), lambda b: (0, b))] + weight_specs,
            out_specs=pl.BlockSpec((S, D), lambda b: (0, b)),
            scratch_shapes=[pltpu.VMEM((S, D), jnp.float32)],
        ),
        compiler_params=pltpu.CompilerParams(
            dimension_semantics=("parallel",),       # v7x: one batch element per TensorCore
            vmem_limit_bytes=48 * 1024 * 1024,       # safe on v7x (64 MiB physical per TC)
        ),
    )(x2d, *weights)

    return out2d.reshape(S, B, D)


def reference_forward(x_sbd, P):
    """Pure-JAX f32 reference matching PyTorch semantics (dropout = identity)."""
    S, B, D = x_sbd.shape
    H, dh = NHEAD, D // NHEAD

    def per_batch(x):                                # x: (S, D)
        qkv = x @ P["in_w"].T + P["in_b"]
        q, k, v = qkv[:, :D], qkv[:, D:2 * D], qkv[:, 2 * D:]
        q = q.reshape(S, H, dh).transpose(1, 0, 2) * (dh ** -0.5)
        k = k.reshape(S, H, dh).transpose(1, 0, 2)
        v = v.reshape(S, H, dh).transpose(1, 0, 2)
        s = jnp.einsum("hqd,hkd->hqk", q, k)
        p = jax.nn.softmax(s, axis=-1)
        o = jnp.einsum("hqk,hkd->hqd", p, v).transpose(1, 0, 2).reshape(S, D)
        attn = o @ P["out_w"].T + P["out_b"]
        x1 = _layernorm(x + attn, P["g1"], P["be1"])
        h = jnp.maximum(x1 @ P["w1"].T + P["b1"], 0.0)
        ff = h @ P["w2"].T + P["b2"]
        return _layernorm(x1 + ff, P["g2"], P["be2"])

    return jax.vmap(per_batch, in_axes=1, out_axes=1)(x_sbd)


if __name__ == "__main__":
    key = jax.random.PRNGKey(0)
    k_param, k_x = jax.random.split(key)

    S, B = 128, 2                                    # small seq/batch; d_model fixed by module
    params = init_params(k_param)
    prep = prepare_params(params)                    # one-time preprocessing (hoisted)
    x = jax.random.normal(k_x, (S, B, D_MODEL), jnp.float32)

    out = transformer_encoder_layer(x, prep)
    out = jax.block_until_ready(out)

    ref = reference_forward(x, params)
    assert out.shape == (S, B, D_MODEL)
    # bf16 matmuls (f32 accumulation) + approx softmax reciprocal vs. pure-f32 reference:
    # errors are ~1e-3 on O(1) layernormed outputs; 3e-2 still catches any structural bug.
    max_err = float(jnp.max(jnp.abs(out - ref)))
    assert jnp.allclose(out, ref, atol=3e-2, rtol=3e-2), max_err

    print("KERNEL_OK")
</pallas_src>

<mosaic_0001>
module attributes {stable_mosaic.version = 11 : i64} {
  func.func @encoder_layer_kernel(%arg0: i32, %arg1: memref<128x256xf32, #tpu.memory_space<vmem>>, %arg2: memref<256x768xbf16, #tpu.memory_space<vmem>>, %arg3: memref<256x256xbf16, #tpu.memory_space<vmem>>, %arg4: memref<256x1024xbf16, #tpu.memory_space<vmem>>, %arg5: memref<1024x256xbf16, #tpu.memory_space<vmem>>, %arg6: memref<1x3328xf32, #tpu.memory_space<vmem>>, %arg7: memref<128x256xf32, #tpu.memory_space<vmem>>, %arg8: memref<128x256xf32, #tpu.memory_space<vmem>>) attributes {dimension_semantics = [#tpu.dimension_semantics<parallel>], iteration_bounds = array<i64: 2>, scalar_prefetch = 0 : i64, scratch_operands = 1 : i64, tpu.core_type = #tpu.core_type<tc>, window_params = [{transform_indices = @transform_0, window_bounds = array<i64: 128, 256>}, {pipeline_mode = #tpu.pipeline_mode<synchronous>, transform_indices = @transform_1, window_bounds = array<i64: 256, 768>}, {pipeline_mode = #tpu.pipeline_mode<synchronous>, transform_indices = @transform_2, window_bounds = array<i64: 256, 256>}, {pipeline_mode = #tpu.pipeline_mode<synchronous>, transform_indices = @transform_3, window_bounds = array<i64: 256, 1024>}, {pipeline_mode = #tpu.pipeline_mode<synchronous>, transform_indices = @transform_4, window_bounds = array<i64: 1024, 256>}, {pipeline_mode = #tpu.pipeline_mode<synchronous>, transform_indices = @transform_5, window_bounds = array<i64: 1, 3328>}, {transform_indices = @transform_6, window_bounds = array<i64: 128, 256>}]} {
    %c0 = arith.constant 0 : index
    %c0_0 = arith.constant 0 : index
    %0 = vector.load %arg1[%c0, %c0_0] : memref<128x256xf32, #tpu.memory_space<vmem>>, vector<128x256xf32>
    %1 = arith.truncf %0 : vector<128x256xf32> to vector<128x256xbf16>
    %c0_1 = arith.constant 0 : index
    %c0_2 = arith.constant 0 : index
    %2 = vector.load %arg6[%c0_1, %c0_2] : memref<1x3328xf32, #tpu.memory_space<vmem>>, vector<1x768xf32>
    %c0_3 = arith.constant 0 : index
    %c768 = arith.constant 768 : index
    %3 = vector.load %arg6[%c0_3, %c768] : memref<1x3328xf32, #tpu.memory_space<vmem>>, vector<1x256xf32>
    %c0_4 = arith.constant 0 : index
    %c1024 = arith.constant 1024 : index
    %4 = vector.load %arg6[%c0_4, %c1024] : memref<1x3328xf32, #tpu.memory_space<vmem>>, vector<1x1024xf32>
    %c0_5 = arith.constant 0 : index
    %c2048 = arith.constant 2048 : index
    %5 = vector.load %arg6[%c0_5, %c2048] : memref<1x3328xf32, #tpu.memory_space<vmem>>, vector<1x256xf32>
    %c0_6 = arith.constant 0 : index
    %c2304 = arith.constant 2304 : index
    %6 = vector.load %arg6[%c0_6, %c2304] : memref<1x3328xf32, #tpu.memory_space<vmem>>, vector<1x256xf32>
    %c0_7 = arith.constant 0 : index
    %c2560 = arith.constant 2560 : index
    %7 = vector.load %arg6[%c0_7, %c2560] : memref<1x3328xf32, #tpu.memory_space<vmem>>, vector<1x256xf32>
    %c0_8 = arith.constant 0 : index
    %c2816 = arith.constant 2816 : index
    %8 = vector.load %arg6[%c0_8, %c2816] : memref<1x3328xf32, #tpu.memory_space<vmem>>, vector<1x256xf32>
    %c0_9 = arith.constant 0 : index
    %c3072 = arith.constant 3072 : index
    %9 = vector.load %arg6[%c0_9, %c3072] : memref<1x3328xf32, #tpu.memory_space<vmem>>, vector<1x256xf32>
    %c0_10 = arith.constant 0 : index
    %c0_11 = arith.constant 0 : index
    %10 = vector.load %arg2[%c0_10, %c0_11] : memref<256x768xbf16, #tpu.memory_space<vmem>>, vector<256x768xbf16>
    %cst = arith.constant dense<0.000000e+00> : vector<128x768xf32>
    %11 = tpu.matmul %1, %10, %cst {dimension_numbers = #tpu.dot_dimension_numbers<[1], [0], [0], [1], [0, 0, 1, 1], [], []>} : vector<128x256xbf16>, vector<256x768xbf16>, vector<128x768xf32> -> vector<128x768xf32>
    %12 = vector.broadcast %2 : vector<1x768xf32> to vector<128x768xf32>
    %13 = arith.addf %11, %12 : vector<128x768xf32>
    %14 = vector.extract_strided_slice %13 {offsets = [0, 0], sizes = [128, 256], strides = [1, 1]} : vector<128x768xf32> to vector<128x256xf32>
    %15 = arith.truncf %14 : vector<128x256xf32> to vector<128x256xbf16>
    %16 = vector.extract_strided_slice %13 {offsets = [0, 256], sizes = [128, 256], strides = [1, 1]} : vector<128x768xf32> to vector<128x256xf32>
    %17 = arith.truncf %16 : vector<128x256xf32> to vector<128x256xbf16>
    %18 = vector.extract_strided_slice %13 {offsets = [0, 512], sizes = [128, 256], strides = [1, 1]} : vector<128x768xf32> to vector<128x256xf32>
    %19 = arith.truncf %18 : vector<128x256xf32> to vector<128x256xbf16>
    %20 = vector.shape_cast %3 : vector<1x256xf32> to vector<1x256xf32>
    %21 = vector.broadcast %20 : vector<1x256xf32> to vector<128x256xf32>
    %c0_12 = arith.constant 0 : index
    %c0_13 = arith.constant 0 : index
    %22 = vector.load %arg8[%c0_12, %c0_13] : memref<128x256xf32, #tpu.memory_space<vmem>>, vector<128x256xf32>
    tpu.vector_store %arg8[%c0_12, %c0_13], %21 {strides = array<i32>} : memref<128x256xf32, #tpu.memory_space<vmem>>, vector<128x256xf32>,
    %23 = vector.extract_strided_slice %15 {offsets = [0, 0], sizes = [128, 32], strides = [1, 1]} : vector<128x256xbf16> to vector<128x32xbf16>
    %24 = vector.extract_strided_slice %17 {offsets = [0, 0], sizes = [128, 32], strides = [1, 1]} : vector<128x256xbf16> to vector<128x32xbf16>
    %25 = vector.extract_strided_slice %19 {offsets = [0, 0], sizes = [128, 32], strides = [1, 1]} : vector<128x256xbf16> to vector<128x32xbf16>
    %cst_14 = arith.constant dense<0.000000e+00> : vector<128x128xf32>
    %26 = tpu.matmul %23, %24, %cst_14 {dimension_numbers = #tpu.dot_dimension_numbers<[1], [1], [0], [0], [0, 0, 1, 0], [], []>} : vector<128x32xbf16>, vector<128x32xbf16>, vector<128x128xf32> -> vector<128x128xf32>
    %cst_15 = arith.constant dense<0xFF800000> : vector<128xf32>
    %27 = vector.multi_reduction <maximumf>, %26, %cst_15 [1] : vector<128x128xf32> to vector<128xf32>
    %28 = vector.shape_cast %27 : vector<128xf32> to vector<128x1xf32>
    %29 = vector.broadcast %28 : vector<128x1xf32> to vector<128x128xf32>
    %30 = arith.subf %26, %29 : vector<128x128xf32>
    %31 = math.exp %30 : vector<128x128xf32>
    %cst_16 = arith.constant dense<0.000000e+00> : vector<128xf32>
    %32 = vector.multi_reduction <add>, %31, %cst_16 [1] : vector<128x128xf32> to vector<128xf32>
    %33 = vector.shape_cast %32 : vector<128xf32> to vector<128x1xf32>
    %34 = tpu.reciprocal %33 {approx = true} : vector<128x1xf32> -> vector<128x1xf32>
    %35 = vector.broadcast %34 : vector<128x1xf32> to vector<128x128xf32>
    %36 = arith.mulf %31, %35 : vector<128x128xf32>
    %37 = arith.truncf %36 : vector<128x128xf32> to vector<128x128xbf16>
    %cst_17 = arith.constant dense<0.000000e+00> : vector<128x32xf32>
    %38 = tpu.matmul %37, %25, %cst_17 {dimension_numbers = #tpu.dot_dimension_numbers<[1], [0], [0], [1], [0, 0, 1, 1], [], []>} : vector<128x128xbf16>, vector<128x32xbf16>, vector<128x32xf32> -> vector<128x32xf32>
    %c0_18 = arith.constant 0 : index
    %c0_19 = arith.constant 0 : index
    %39 = vector.load %arg8[%c0_18, %c0_19] : memref<128x256xf32, #tpu.memory_space<vmem>>, vector<128x256xf32>
    %40 = arith.truncf %38 : vector<128x32xf32> to vector<128x32xbf16>
    %c0_20 = arith.constant 0 : index
    %c0_21 = arith.constant 0 : index
    %41 = vector.load %arg3[%c0_20, %c0_21] : memref<256x256xbf16, #tpu.memory_space<vmem>>, vector<32x256xbf16>
    %cst_22 = arith.constant dense<0.000000e+00> : vector<128x256xf32>
    %42 = tpu.matmul %40, %41, %cst_22 {dimension_numbers = #tpu.dot_dimension_numbers<[1], [0], [0], [1], [0, 0, 1, 1], [], []>} : vector<128x32xbf16>, vector<32x256xbf16>, vector<128x256xf32> -> vector<128x256xf32>
    %43 = arith.addf %39, %42 : vector<128x256xf32>
    %c0_23 = arith.constant 0 : index
    %c0_24 = arith.constant 0 : index
    %44 = vector.load %arg8[%c0_23, %c0_24] : memref<128x256xf32, #tpu.memory_space<vmem>>, vector<128x256xf32>
    tpu.vector_store %arg8[%c0_23, %c0_24], %43 {strides = array<i32>} : memref<128x256xf32, #tpu.memory_space<vmem>>, vector<128x256xf32>,
    %45 = vector.extract_strided_slice %15 {offsets = [0, 32], sizes = [128, 32], strides = [1, 1]} : vector<128x256xbf16> to vector<128x32xbf16>
    %46 = vector.extract_strided_slice %17 {offsets = [0, 32], sizes = [128, 32], strides = [1, 1]} : vector<128x256xbf16> to vector<128x32xbf16>
    %47 = vector.extract_strided_slice %19 {offsets = [0, 32], sizes = [128, 32], strides = [1, 1]} : vector<128x256xbf16> to vector<128x32xbf16>
    %cst_25 = arith.constant dense<0.000000e+00> : vector<128x128xf32>
    %48 = tpu.matmul %45, %46, %cst_25 {dimension_numbers = #tpu.dot_dimension_numbers<[1], [1], [0], [0], [0, 0, 1, 0], [], []>} : vector<128x32xbf16>, vector<128x32xbf16>, vector<128x128xf32> -> vector<128x128xf32>
    %cst_26 = arith.constant dense<0xFF800000> : vector<128xf32>
    %49 = vector.multi_reduction <maximumf>, %48, %cst_26 [1] : vector<128x128xf32> to vector<128xf32>
    %50 = vector.shape_cast %49 : vector<128xf32> to vector<128x1xf32>
    %51 = vector.broadcast %50 : vector<128x1xf32> to vector<128x128xf32>
    %52 = arith.subf %48, %51 : vector<128x128xf32>
    %53 = math.exp %52 : vector<128x128xf32>
    %cst_27 = arith.constant dense<0.000000e+00> : vector<128xf32>
    %54 = vector.multi_reduction <add>, %53, %cst_27 [1] : vector<128x128xf32> to vector<128xf32>
    %55 = vector.shape_cast %54 : vector<128xf32> to vector<128x1xf32>
    %56 = tpu.reciprocal %55 {approx = true} : vector<128x1xf32> -> vector<128x1xf32>
    %57 = vector.broadcast %56 : vector<128x1xf32> to vector<128x128xf32>
    %58 = arith.mulf %53, %57 : vector<128x128xf32>
    %59 = arith.truncf %58 : vector<128x128xf32> to vector<128x128xbf16>
    %cst_28 = arith.constant dense<0.000000e+00> : vector<128x32xf32>
    %60 = tpu.matmul %59, %47, %cst_28 {dimension_numbers = #tpu.dot_dimension_numbers<[1], [0], [0], [1], [0, 0, 1, 1], [], []>} : vector<128x128xbf16>, vector<128x32xbf16>, vector<128x32xf32> -> vector<128x32xf32>
    %c0_29 = arith.constant 0 : index
    %c0_30 = arith.constant 0 : index
    %61 = vector.load %arg8[%c0_29, %c0_30] : memref<128x256xf32, #tpu.memory_space<vmem>>, vector<128x256xf32>
    %62 = arith.truncf %60 : vector<128x32xf32> to vector<128x32xbf16>
    %c32 = arith.constant 32 : index
    %c0_31 = arith.constant 0 : index
    %63 = vector.load %arg3[%c32, %c0_31] : memref<256x256xbf16, #tpu.memory_space<vmem>>, vector<32x256xbf16>
    %cst_32 = arith.constant dense<0.000000e+00> : vector<128x256xf32>
    %64 = tpu.matmul %62, %63, %cst_32 {dimension_numbers = #tpu.dot_dimension_numbers<[1], [0], [0], [1], [0, 0, 1, 1], [], []>} : vector<128x32xbf16>, vector<32x256xbf16>, vector<128x256xf32> -> vector<128x256xf32>
    %65 = arith.addf %61, %64 : vector<128x256xf32>
    %c0_33 = arith.constant 0 : index
    %c0_34 = arith.constant 0 : index
    %66 = vector.load %arg8[%c0_33, %c0_34] : memref<128x256xf32, #tpu.memory_space<vmem>>, vector<128x256xf32>
    tpu.vector_store %arg8[%c0_33, %c0_34], %65 {strides = array<i32>} : memref<128x256xf32, #tpu.memory_space<vmem>>, vector<128x256xf32>,
    %67 = vector.extract_strided_slice %15 {offsets = [0, 64], sizes = [128, 32], strides = [1, 1]} : vector<128x256xbf16> to vector<128x32xbf16>
    %68 = vector.extract_strided_slice %17 {offsets = [0, 64], sizes = [128, 32], strides = [1, 1]} : vector<128x256xbf16> to vector<128x32xbf16>
    %69 = vector.extract_strided_slice %19 {offsets = [0, 64], sizes = [128, 32], strides = [1, 1]} : vector<128x256xbf16> to vector<128x32xbf16>
    %cst_35 = arith.constant dense<0.000000e+00> : vector<128x128xf32>
    %70 = tpu.matmul %67, %68, %cst_35 {dimension_numbers = #tpu.dot_dimension_numbers<[1], [1], [0], [0], [0, 0, 1, 0], [], []>} : vector<128x32xbf16>, vector<128x32xbf16>, vector<128x128xf32> -> vector<128x128xf32>
    %cst_36 = arith.constant dense<0xFF800000> : vector<128xf32>
    %71 = vector.multi_reduction <maximumf>, %70, %cst_36 [1] : vector<128x128xf32> to vector<128xf32>
    %72 = vector.shape_cast %71 : vector<128xf32> to vector<128x1xf32>
    %73 = vector.broadcast %72 : vector<128x1xf32> to vector<128x128xf32>
    %74 = arith.subf %70, %73 : vector<128x128xf32>
    %75 = math.exp %74 : vector<128x128xf32>
    %cst_37 = arith.constant dense<0.000000e+00> : vector<128xf32>
    %76 = vector.multi_reduction <add>, %75, %cst_37 [1] : vector<128x128xf32> to vector<128xf32>
    %77 = vector.shape_cast %76 : vector<128xf32> to vector<128x1xf32>
    %78 = tpu.reciprocal %77 {approx = true} : vector<128x1xf32> -> vector<128x1xf32>
    %79 = vector.broadcast %78 : vector<128x1xf32> to vector<128x128xf32>
    %80 = arith.mulf %75, %79 : vector<128x128xf32>
    %81 = arith.truncf %80 : vector<128x128xf32> to vector<128x128xbf16>
    %cst_38 = arith.constant dense<0.000000e+00> : vector<128x32xf32>
    %82 = tpu.matmul %81, %69, %cst_38 {dimension_numbers = #tpu.dot_dimension_numbers<[1], [0], [0], [1], [0, 0, 1, 1], [], []>} : vector<128x128xbf16>, vector<128x32xbf16>, vector<128x32xf32> -> vector<128x32xf32>
    %c0_39 = arith.constant 0 : index
    %c0_40 = arith.constant 0 : index
    %83 = vector.load %arg8[%c0_39, %c0_40] : memref<128x256xf32, #tpu.memory_space<vmem>>, vector<128x256xf32>
    %84 = arith.truncf %82 : vector<128x32xf32> to vector<128x32xbf16>
    %c64 = arith.constant 64 : index
    %c0_41 = arith.constant 0 : index
    %85 = vector.load %arg3[%c64, %c0_41] : memref<256x256xbf16, #tpu.memory_space<vmem>>, vector<32x256xbf16>
    %cst_42 = arith.constant dense<0.000000e+00> : vector<128x256xf32>
    %86 = tpu.matmul %84, %85, %cst_42 {dimension_numbers = #tpu.dot_dimension_numbers<[1], [0], [0], [1], [0, 0, 1, 1], [], []>} : vector<128x32xbf16>, vector<32x256xbf16>, vector<128x256xf32> -> vector<128x256xf32>
    %87 = arith.addf %83, %86 : vector<128x256xf32>
    %c0_43 = arith.constant 0 : index
    %c0_44 = arith.constant 0 : index
    %88 = vector.load %arg8[%c0_43, %c0_44] : memref<128x256xf32, #tpu.memory_space<vmem>>, vector<128x256xf32>
    tpu.vector_store %arg8[%c0_43, %c0_44], %87 {strides = array<i32>} : memref<128x256xf32, #tpu.memory_space<vmem>>, vector<128x256xf32>,
    %89 = vector.extract_strided_slice %15 {offsets = [0, 96], sizes = [128, 32], strides = [1, 1]} : vector<128x256xbf16> to vector<128x32xbf16>
    %90 = vector.extract_strided_slice %17 {offsets = [0, 96], sizes = [128, 32], strides = [1, 1]} : vector<128x256xbf16> to vector<128x32xbf16>
    %91 = vector.extract_strided_slice %19 {offsets = [0, 96], sizes = [128, 32], strides = [1, 1]} : vector<128x256xbf16> to vector<128x32xbf16>
    %cst_45 = arith.constant dense<0.000000e+00> : vector<128x128xf32>
    %92 = tpu.matmul %89, %90, %cst_45 {dimension_numbers = #tpu.dot_dimension_numbers<[1], [1], [0], [0], [0, 0, 1, 0], [], []>} : vector<128x32xbf16>, vector<128x32xbf16>, vector<128x128xf32> -> vector<128x128xf32>
    %cst_46 = arith.constant dense<0xFF800000> : vector<128xf32>
    %93 = vector.multi_reduction <maximumf>, %92, %cst_46 [1] : vector<128x128xf32> to vector<128xf32>
    %94 = vector.shape_cast %93 : vector<128xf32> to vector<128x1xf32>
    %95 = vector.broadcast %94 : vector<128x1xf32> to vector<128x128xf32>
    %96 = arith.subf %92, %95 : vector<128x128xf32>
    %97 = math.exp %96 : vector<128x128xf32>
    %cst_47 = arith.constant dense<0.000000e+00> : vector<128xf32>
    %98 = vector.multi_reduction <add>, %97, %cst_47 [1] : vector<128x128xf32> to vector<128xf32>
    %99 = vector.shape_cast %98 : vector<128xf32> to vector<128x1xf32>
    %100 = tpu.reciprocal %99 {approx = true} : vector<128x1xf32> -> vector<128x1xf32>
    %101 = vector.broadcast %100 : vector<128x1xf32> to vector<128x128xf32>
    %102 = arith.mulf %97, %101 : vector<128x128xf32>
    %103 = arith.truncf %102 : vector<128x128xf32> to vector<128x128xbf16>
    %cst_48 = arith.constant dense<0.000000e+00> : vector<128x32xf32>
    %104 = tpu.matmul %103, %91, %cst_48 {dimension_numbers = #tpu.dot_dimension_numbers<[1], [0], [0], [1], [0, 0, 1, 1], [], []>} : vector<128x128xbf16>, vector<128x32xbf16>, vector<128x32xf32> -> vector<128x32xf32>
    %c0_49 = arith.constant 0 : index
    %c0_50 = arith.constant 0 : index
    %105 = vector.load %arg8[%c0_49, %c0_50] : memref<128x256xf32, #tpu.memory_space<vmem>>, vector<128x256xf32>
    %106 = arith.truncf %104 : vector<128x32xf32> to vector<128x32xbf16>
    %c96 = arith.constant 96 : index
    %c0_51 = arith.constant 0 : index
    %107 = vector.load %arg3[%c96, %c0_51] : memref<256x256xbf16, #tpu.memory_space<vmem>>, vector<32x256xbf16>
    %cst_52 = arith.constant dense<0.000000e+00> : vector<128x256xf32>
    %108 = tpu.matmul %106, %107, %cst_52 {dimension_numbers = #tpu.dot_dimension_numbers<[1], [0], [0], [1], [0, 0, 1, 1], [], []>} : vector<128x32xbf16>, vector<32x256xbf16>, vector<128x256xf32> -> vector<128x256xf32>
    %109 = arith.addf %105, %108 : vector<128x256xf32>
    %c0_53 = arith.constant 0 : index
    %c0_54 = arith.constant 0 : index
    %110 = vector.load %arg8[%c0_53, %c0_54] : memref<128x256xf32, #tpu.memory_space<vmem>>, vector<128x256xf32>
    tpu.vector_store %arg8[%c0_53, %c0_54], %109 {strides = array<i32>} : memref<128x256xf32, #tpu.memory_space<vmem>>, vector<128x256xf32>,
    %111 = vector.extract_strided_slice %15 {offsets = [0, 128], sizes = [128, 32], strides = [1, 1]} : vector<128x256xbf16> to vector<128x32xbf16>
    %112 = vector.extract_strided_slice %17 {offsets = [0, 128], sizes = [128, 32], strides = [1, 1]} : vector<128x256xbf16> to vector<128x32xbf16>
    %113 = vector.extract_strided_slice %19 {offsets = [0, 128], sizes = [128, 32], strides = [1, 1]} : vector<128x256xbf16> to vector<128x32xbf16>
    %cst_55 = arith.constant dense<0.000000e+00> : vector<128x128xf32>
    %114 = tpu.matmul %111, %112, %cst_55 {dimension_numbers = #tpu.dot_dimension_numbers<[1], [1], [0], [0], [0, 0, 1, 0], [], []>} : vector<128x32xbf16>, vector<128x32xbf16>, vector<128x128xf32> -> vector<128x128xf32>
    %cst_56 = arith.constant dense<0xFF800000> : vector<128xf32>
    %115 = vector.multi_reduction <maximumf>, %114, %cst_56 [1] : vector<128x128xf32> to vector<128xf32>
    %116 = vector.shape_cast %115 : vector<128xf32> to vector<128x1xf32>
    %117 = vector.broadcast %116 : vector<128x1xf32> to vector<128x128xf32>
    %118 = arith.subf %114, %117 : vector<128x128xf32>
    %119 = math.exp %118 : vector<128x128xf32>
    %cst_57 = arith.constant dense<0.000000e+00> : vector<128xf32>
    %120 = vector.multi_reduction <add>, %119, %cst_57 [1] : vector<128x128xf32> to vector<128xf32>
    %121 = vector.shape_cast %120 : vector<128xf32> to vector<128x1xf32>
    %122 = tpu.reciprocal %121 {approx = true} : vector<128x1xf32> -> vector<128x1xf32>
    %123 = vector.broadcast %122 : vector<128x1xf32> to vector<128x128xf32>
    %124 = arith.mulf %119, %123 : vector<128x128xf32>
    %125 = arith.truncf %124 : vector<128x128xf32> to vector<128x128xbf16>
    %cst_58 = arith.constant dense<0.000000e+00> : vector<128x32xf32>
    %126 = tpu.matmul %125, %113, %cst_58 {dimension_numbers = #tpu.dot_dimension_numbers<[1], [0], [0], [1], [0, 0, 1, 1], [], []>} : vector<128x128xbf16>, vector<128x32xbf16>, vector<128x32xf32> -> vector<128x32xf32>
    %c0_59 = arith.constant 0 : index
    %c0_60 = arith.constant 0 : index
    %127 = vector.load %arg8[%c0_59, %c0_60] : memref<128x256xf32, #tpu.memory_space<vmem>>, vector<128x256xf32>
    %128 = arith.truncf %126 : vector<128x32xf32> to vector<128x32xbf16>
    %c128 = arith.constant 128 : index
    %c0_61 = arith.constant 0 : index
    %129 = vector.load %arg3[%c128, %c0_61] : memref<256x256xbf16, #tpu.memory_space<vmem>>, vector<32x256xbf16>
    %cst_62 = arith.constant dense<0.000000e+00> : vector<128x256xf32>
    %130 = tpu.matmul %128, %129, %cst_62 {dimension_numbers = #tpu.dot_dimension_numbers<[1], [0], [0], [1], [0, 0, 1, 1], [], []>} : vector<128x32xbf16>, vector<32x256xbf16>, vector<128x256xf32> -> vector<128x256xf32>
    %131 = arith.addf %127, %130 : vector<128x256xf32>
    %c0_63 = arith.constant 0 : index
    %c0_64 = arith.constant 0 : index
    %132 = vector.load %arg8[%c0_63, %c0_64] : memref<128x256xf32, #tpu.memory_space<vmem>>, vector<128x256xf32>
    tpu.vector_store %arg8[%c0_63, %c0_64], %131 {strides = array<i32>} : memref<128x256xf32, #tpu.memory_space<vmem>>, vector<128x256xf32>,
    %133 = vector.extract_strided_slice %15 {offsets = [0, 160], sizes = [128, 32], strides = [1, 1]} : vector<128x256xbf16> to vector<128x32xbf16>
    %134 = vector.extract_strided_slice %17 {offsets = [0, 160], sizes = [128, 32], strides = [1, 1]} : vector<128x256xbf16> to vector<128x32xbf16>
    %135 = vector.extract_strided_slice %19 {offsets = [0, 160], sizes = [128, 32], strides = [1, 1]} : vector<128x256xbf16> to vector<128x32xbf16>
    %cst_65 = arith.constant dense<0.000000e+00> : vector<128x128xf32>
    %136 = tpu.matmul %133, %134, %cst_65 {dimension_numbers = #tpu.dot_dimension_numbers<[1], [1], [0], [0], [0, 0, 1, 0], [], []>} : vector<128x32xbf16>, vector<128x32xbf16>, vector<128x128xf32> -> vector<128x128xf32>
    %cst_66 = arith.constant dense<0xFF800000> : vector<128xf32>
    %137 = vector.multi_reduction <maximumf>, %136, %cst_66 [1] : vector<128x128xf32> to vector<128xf32>
    %138 = vector.shape_cast %137 : vector<128xf32> to vector<128x1xf32>
    %139 = vector.broadcast %138 : vector<128x1xf32> to vector<128x128xf32>
    %140 = arith.subf %136, %139 : vector<128x128xf32>
    %141 = math.exp %140 : vector<128x128xf32>
    %cst_67 = arith.constant dense<0.000000e+00> : vector<128xf32>
    %142 = vector.multi_reduction <add>, %141, %cst_67 [1] : vector<128x128xf32> to vector<128xf32>
    %143 = vector.shape_cast %142 : vector<128xf32> to vector<128x1xf32>
    %144 = tpu.reciprocal %143 {approx = true} : vector<128x1xf32> -> vector<128x1xf32>
    %145 = vector.broadcast %144 : vector<128x1xf32> to vector<128x128xf32>
    %146 = arith.mulf %141, %145 : vector<128x128xf32>
    %147 = arith.truncf %146 : vector<128x128xf32> to vector<128x128xbf16>
    %cst_68 = arith.constant dense<0.000000e+00> : vector<128x32xf32>
    %148 = tpu.matmul %147, %135, %cst_68 {dimension_numbers = #tpu.dot_dimension_numbers<[1], [0], [0], [1], [0, 0, 1, 1], [], []>} : vector<128x128xbf16>, vector<128x32xbf16>, vector<128x32xf32> -> vector<128x32xf32>
    %c0_69 = arith.constant 0 : index
    %c0_70 = arith.constant 0 : index
    %149 = vector.load %arg8[%c0_69, %c0_70] : memref<128x256xf32, #tpu.memory_space<vmem>>, vector<128x256xf32>
    %150 = arith.truncf %148 : vector<128x32xf32> to vector<128x32xbf16>
    %c160 = arith.constant 160 : index
    %c0_71 = arith.constant 0 : index
    %151 = vector.load %arg3[%c160, %c0_71] : memref<256x256xbf16, #tpu.memory_space<vmem>>, vector<32x256xbf16>
    %cst_72 = arith.constant dense<0.000000e+00> : vector<128x256xf32>
    %152 = tpu.matmul %150, %151, %cst_72 {dimension_numbers = #tpu.dot_dimension_numbers<[1], [0], [0], [1], [0, 0, 1, 1], [], []>} : vector<128x32xbf16>, vector<32x256xbf16>, vector<128x256xf32> -> vector<128x256xf32>
    %153 = arith.addf %149, %152 : vector<128x256xf32>
    %c0_73 = arith.constant 0 : index
    %c0_74 = arith.constant 0 : index
    %154 = vector.load %arg8[%c0_73, %c0_74] : memref<128x256xf32, #tpu.memory_space<vmem>>, vector<128x256xf32>
    tpu.vector_store %arg8[%c0_73, %c0_74], %153 {strides = array<i32>} : memref<128x256xf32, #tpu.memory_space<vmem>>, vector<128x256xf32>,
    %155 = vector.extract_strided_slice %15 {offsets = [0, 192], sizes = [128, 32], strides = [1, 1]} : vector<128x256xbf16> to vector<128x32xbf16>
    %156 = vector.extract_strided_slice %17 {offsets = [0, 192], sizes = [128, 32], strides = [1, 1]} : vector<128x256xbf16> to vector<128x32xbf16>
    %157 = vector.extract_strided_slice %19 {offsets = [0, 192], sizes = [128, 32], strides = [1, 1]} : vector<128x256xbf16> to vector<128x32xbf16>
    %cst_75 = arith.constant dense<0.000000e+00> : vector<128x128xf32>
    %158 = tpu.matmul %155, %156, %cst_75 {dimension_numbers = #tpu.dot_dimension_numbers<[1], [1], [0], [0], [0, 0, 1, 0], [], []>} : vector<128x32xbf16>, vector<128x32xbf16>, vector<128x128xf32> -> vector<128x128xf32>
    %cst_76 = arith.constant dense<0xFF800000> : vector<128xf32>
    %159 = vector.multi_reduction <maximumf>, %158, %cst_76 [1] : vector<128x128xf32> to vector<128xf32>
    %160 = vector.shape_cast %159 : vector<128xf32> to vector<128x1xf32>
    %161 = vector.broadcast %160 : vector<128x1xf32> to vector<128x128xf32>
    %162 = arith.subf %158, %161 : vector<128x128xf32>
    %163 = math.exp %162 : vector<128x128xf32>
    %cst_77 = arith.constant dense<0.000000e+00> : vector<128xf32>
    %164 = vector.multi_reduction <add>, %163, %cst_77 [1] : vector<128x128xf32> to vector<128xf32>
    %165 = vector.shape_cast %164 : vector<128xf32> to vector<128x1xf32>
    %166 = tpu.reciprocal %165 {approx = true} : vector<128x1xf32> -> vector<128x1xf32>
    %167 = vector.broadcast %166 : vector<128x1xf32> to vector<128x128xf32>
    %168 = arith.mulf %163, %167 : vector<128x128xf32>
    %169 = arith.truncf %168 : vector<128x128xf32> to vector<128x128xbf16>
    %cst_78 = arith.constant dense<0.000000e+00> : vector<128x32xf32>
    %170 = tpu.matmul %169, %157, %cst_78 {dimension_numbers = #tpu.dot_dimension_numbers<[1], [0], [0], [1], [0, 0, 1, 1], [], []>} : vector<128x128xbf16>, vector<128x32xbf16>, vector<128x32xf32> -> vector<128x32xf32>
    %c0_79 = arith.constant 0 : index
    %c0_80 = arith.constant 0 : index
    %171 = vector.load %arg8[%c0_79, %c0_80] : memref<128x256xf32, #tpu.memory_space<vmem>>, vector<128x256xf32>
    %172 = arith.truncf %170 : vector<128x32xf32> to vector<128x32xbf16>
    %c192 = arith.constant 192 : index
    %c0_81 = arith.constant 0 : index
    %173 = vector.load %arg3[%c192, %c0_81] : memref<256x256xbf16, #tpu.memory_space<vmem>>, vector<32x256xbf16>
    %cst_82 = arith.constant dense<0.000000e+00> : vector<128x256xf32>
    %174 = tpu.matmul %172, %173, %cst_82 {dimension_numbers = #tpu.dot_dimension_numbers<[1], [0], [0], [1], [0, 0, 1, 1], [], []>} : vector<128x32xbf16>, vector<32x256xbf16>, vector<128x256xf32> -> vector<128x256xf32>
    %175 = arith.addf %171, %174 : vector<128x256xf32>
    %c0_83 = arith.constant 0 : index
    %c0_84 = arith.constant 0 : index
    %176 = vector.load %arg8[%c0_83, %c0_84] : memref<128x256xf32, #tpu.memory_space<vmem>>, vector<128x256xf32>
    tpu.vector_store %arg8[%c0_83, %c0_84], %175 {strides = array<i32>} : memref<128x256xf32, #tpu.memory_space<vmem>>, vector<128x256xf32>,
    %177 = vector.extract_strided_slice %15 {offsets = [0, 224], sizes = [128, 32], strides = [1, 1]} : vector<128x256xbf16> to vector<128x32xbf16>
    %178 = vector.extract_strided_slice %17 {offsets = [0, 224], sizes = [128, 32], strides = [1, 1]} : vector<128x256xbf16> to vector<128x32xbf16>
    %179 = vector.extract_strided_slice %19 {offsets = [0, 224], sizes = [128, 32], strides = [1, 1]} : vector<128x256xbf16> to vector<128x32xbf16>
    %cst_85 = arith.constant dense<0.000000e+00> : vector<128x128xf32>
    %180 = tpu.matmul %177, %178, %cst_85 {dimension_numbers = #tpu.dot_dimension_numbers<[1], [1], [0], [0], [0, 0, 1, 0], [], []>} : vector<128x32xbf16>, vector<128x32xbf16>, vector<128x128xf32> -> vector<128x128xf32>
    %cst_86 = arith.constant dense<0xFF800000> : vector<128xf32>
    %181 = vector.multi_reduction <maximumf>, %180, %cst_86 [1] : vector<128x128xf32> to vector<128xf32>
    %182 = vector.shape_cast %181 : vector<128xf32> to vector<128x1xf32>
    %183 = vector.broadcast %182 : vector<128x1xf32> to vector<128x128xf32>
    %184 = arith.subf %180, %183 : vector<128x128xf32>
    %185 = math.exp %184 : vector<128x128xf32>
    %cst_87 = arith.constant dense<0.000000e+00> : vector<128xf32>
    %186 = vector.multi_reduction <add>, %185, %cst_87 [1] : vector<128x128xf32> to vector<128xf32>
    %187 = vector.shape_cast %186 : vector<128xf32> to vector<128x1xf32>
    %188 = tpu.reciprocal %187 {approx = true} : vector<128x1xf32> -> vector<128x1xf32>
    %189 = vector.broadcast %188 : vector<128x1xf32> to vector<128x128xf32>
    %190 = arith.mulf %185, %189 : vector<128x128xf32>
    %191 = arith.truncf %190 : vector<128x128xf32> to vector<128x128xbf16>
    %cst_88 = arith.constant dense<0.000000e+00> : vector<128x32xf32>
    %192 = tpu.matmul %191, %179, %cst_88 {dimension_numbers = #tpu.dot_dimension_numbers<[1], [0], [0], [1], [0, 0, 1, 1], [], []>} : vector<128x128xbf16>, vector<128x32xbf16>, vector<128x32xf32> -> vector<128x32xf32>
    %c0_89 = arith.constant 0 : index
    %c0_90 = arith.constant 0 : index
    %193 = vector.load %arg8[%c0_89, %c0_90] : memref<128x256xf32, #tpu.memory_space<vmem>>, vector<128x256xf32>
    %194 = arith.truncf %192 : vector<128x32xf32> to vector<128x32xbf16>
    %c224 = arith.constant 224 : index
    %c0_91 = arith.constant 0 : index
    %195 = vector.load %arg3[%c224, %c0_91] : memref<256x256xbf16, #tpu.memory_space<vmem>>, vector<32x256xbf16>
    %cst_92 = arith.constant dense<0.000000e+00> : vector<128x256xf32>
    %196 = tpu.matmul %194, %195, %cst_92 {dimension_numbers = #tpu.dot_dimension_numbers<[1], [0], [0], [1], [0, 0, 1, 1], [], []>} : vector<128x32xbf16>, vector<32x256xbf16>, vector<128x256xf32> -> vector<128x256xf32>
    %197 = arith.addf %193, %196 : vector<128x256xf32>
    %c0_93 = arith.constant 0 : index
    %c0_94 = arith.constant 0 : index
    %198 = vector.load %arg8[%c0_93, %c0_94] : memref<128x256xf32, #tpu.memory_space<vmem>>, vector<128x256xf32>
    tpu.vector_store %arg8[%c0_93, %c0_94], %197 {strides = array<i32>} : memref<128x256xf32, #tpu.memory_space<vmem>>, vector<128x256xf32>,
    %c0_95 = arith.constant 0 : index
    %c0_96 = arith.constant 0 : index
    %199 = vector.load %arg8[%c0_95, %c0_96] : memref<128x256xf32, #tpu.memory_space<vmem>>, vector<128x256xf32>
    %200 = arith.addf %0, %199 : vector<128x256xf32>
    %cst_97 = arith.constant dense<0.000000e+00> : vector<128xf32>
    %201 = vector.multi_reduction <add>, %200, %cst_97 [1] : vector<128x256xf32> to vector<128xf32>
    %202 = vector.shape_cast %201 : vector<128xf32> to vector<128x1xf32>
    %cst_98 = arith.constant 2.560000e+02 : f32
    %203 = vector.broadcast %cst_98 : f32 to vector<128x1xf32>
    %204 = arith.divf %202, %203 : vector<128x1xf32>
    %205 = vector.broadcast %204 : vector<128x1xf32> to vector<128x256xf32>
    %206 = arith.subf %200, %205 : vector<128x256xf32>
    %207 = arith.mulf %206, %206 : vector<128x256xf32>
    %cst_99 = arith.constant dense<0.000000e+00> : vector<128xf32>
    %208 = vector.multi_reduction <add>, %207, %cst_99 [1] : vector<128x256xf32> to vector<128xf32>
    %209 = vector.shape_cast %208 : vector<128xf32> to vector<128x1xf32>
    %cst_100 = arith.constant 2.560000e+02 : f32
    %210 = vector.broadcast %cst_100 : f32 to vector<128x1xf32>
    %211 = arith.divf %209, %210 : vector<128x1xf32>
    %212 = vector.broadcast %204 : vector<128x1xf32> to vector<128x256xf32>
    %213 = arith.subf %200, %212 : vector<128x256xf32>
    %cst_101 = arith.constant 9.99999974E-6 : f32
    %214 = vector.broadcast %cst_101 : f32 to vector<128x1xf32>
    %215 = arith.addf %211, %214 : vector<128x1xf32>
    %216 = math.rsqrt %215 : vector<128x1xf32>
    %217 = vector.broadcast %216 : vector<128x1xf32> to vector<128x256xf32>
    %218 = arith.mulf %213, %217 : vector<128x256xf32>
    %219 = vector.broadcast %6 : vector<1x256xf32> to vector<128x256xf32>
    %220 = arith.mulf %218, %219 : vector<128x256xf32>
    %221 = vector.broadcast %7 : vector<1x256xf32> to vector<128x256xf32>
    %222 = arith.addf %220, %221 : vector<128x256xf32>
    %223 = arith.truncf %222 : vector<128x256xf32> to vector<128x256xbf16>
    %c0_102 = arith.constant 0 : index
    %c0_103 = arith.constant 0 : index
    %224 = vector.load %arg4[%c0_102, %c0_103] : memref<256x1024xbf16, #tpu.memory_space<vmem>>, vector<256x1024xbf16>
    %cst_104 = arith.constant dense<0.000000e+00> : vector<128x1024xf32>
    %225 = tpu.matmul %223, %224, %cst_104 {dimension_numbers = #tpu.dot_dimension_numbers<[1], [0], [0], [1], [0, 0, 1, 1], [], []>} : vector<128x256xbf16>, vector<256x1024xbf16>, vector<128x1024xf32> -> vector<128x1024xf32>
    %226 = vector.broadcast %4 : vector<1x1024xf32> to vector<128x1024xf32>
    %227 = arith.addf %225, %226 : vector<128x1024xf32>
    %cst_105 = arith.constant 0.000000e+00 : f32
    %228 = vector.broadcast %cst_105 : f32 to vector<128x1024xf32>
    %229 = arith.maximumf %227, %228 : vector<128x1024xf32>
    %230 = arith.truncf %229 : vector<128x1024xf32> to vector<128x1024xbf16>
    %c0_106 = arith.constant 0 : index
    %c0_107 = arith.constant 0 : index
    %231 = vector.load %arg5[%c0_106, %c0_107] : memref<1024x256xbf16, #tpu.memory_space<vmem>>, vector<1024x256xbf16>
    %cst_108 = arith.constant dense<0.000000e+00> : vector<128x256xf32>
    %232 = tpu.matmul %230, %231, %cst_108 {dimension_numbers = #tpu.dot_dimension_numbers<[1], [0], [0], [1], [0, 0, 1, 1], [], []>} : vector<128x1024xbf16>, vector<1024x256xbf16>, vector<128x256xf32> -> vector<128x256xf32>
    %233 = vector.broadcast %5 : vector<1x256xf32> to vector<128x256xf32>
    %234 = arith.addf %232, %233 : vector<128x256xf32>
    %235 = arith.addf %222, %234 : vector<128x256xf32>
    %cst_109 = arith.constant dense<0.000000e+00> : vector<128xf32>
    %236 = vector.multi_reduction <add>, %235, %cst_109 [1] : vector<128x256xf32> to vector<128xf32>
    %237 = vector.shape_cast %236 : vector<128xf32> to vector<128x1xf32>
    %cst_110 = arith.constant 2.560000e+02 : f32
    %238 = vector.broadcast %cst_110 : f32 to vector<128x1xf32>
    %239 = arith.divf %237, %238 : vector<128x1xf32>
    %240 = vector.broadcast %239 : vector<128x1xf32> to vector<128x256xf32>
    %241 = arith.subf %235, %240 : vector<128x256xf32>
    %242 = arith.mulf %241, %241 : vector<128x256xf32>
    %cst_111 = arith.constant dense<0.000000e+00> : vector<128xf32>
    %243 = vector.multi_reduction <add>, %242, %cst_111 [1] : vector<128x256xf32> to vector<128xf32>
    %244 = vector.shape_cast %243 : vector<128xf32> to vector<128x1xf32>
    %cst_112 = arith.constant 2.560000e+02 : f32
    %245 = vector.broadcast %cst_112 : f32 to vector<128x1xf32>
    %246 = arith.divf %244, %245 : vector<128x1xf32>
    %247 = vector.broadcast %239 : vector<128x1xf32> to vector<128x256xf32>
    %248 = arith.subf %235, %247 : vector<128x256xf32>
    %cst_113 = arith.constant 9.99999974E-6 : f32
    %249 = vector.broadcast %cst_113 : f32 to vector<128x1xf32>
    %250 = arith.addf %246, %249 : vector<128x1xf32>
    %251 = math.rsqrt %250 : vector<128x1xf32>
    %252 = vector.broadcast %251 : vector<128x1xf32> to vector<128x256xf32>
    %253 = arith.mulf %248, %252 : vector<128x256xf32>
    %254 = vector.broadcast %8 : vector<1x256xf32> to vector<128x256xf32>
    %255 = arith.mulf %253, %254 : vector<128x256xf32>
    %256 = vector.broadcast %9 : vector<1x256xf32> to vector<128x256xf32>
    %257 = arith.addf %255, %256 : vector<128x256xf32>
    %c0_114 = arith.constant 0 : index
    %c0_115 = arith.constant 0 : index
    %258 = vector.load %arg7[%c0_114, %c0_115] : memref<128x256xf32, #tpu.memory_space<vmem>>, vector<128x256xf32>
    tpu.vector_store %arg7[%c0_114, %c0_115], %257 {strides = array<i32>} : memref<128x256xf32, #tpu.memory_space<vmem>>, vector<128x256xf32>,
    return
  }
  func.func @transform_0(%arg0: i32) -> (i32, i32) {
    %c0_i32 = arith.constant 0 : i32
    %c0_i32_0 = arith.constant 0 : i32
    return %c0_i32, %arg0 : i32, i32
  }
  func.func @transform_1(%arg0: i32) -> (i32, i32) {
    %c0_i32 = arith.constant 0 : i32
    %c0_i32_0 = arith.constant 0 : i32
    %c0_i32_1 = arith.constant 0 : i32
    return %c0_i32, %c0_i32_0 : i32, i32
  }
  func.func @transform_2(%arg0: i32) -> (i32, i32) {
    %c0_i32 = arith.constant 0 : i32
    %c0_i32_0 = arith.constant 0 : i32
    %c0_i32_1 = arith.constant 0 : i32
    return %c0_i32, %c0_i32_0 : i32, i32
  }
  func.func @transform_3(%arg0: i32) -> (i32, i32) {
    %c0_i32 = arith.constant 0 : i32
    %c0_i32_0 = arith.constant 0 : i32
    %c0_i32_1 = arith.constant 0 : i32
    return %c0_i32, %c0_i32_0 : i32, i32
  }
  func.func @transform_4(%arg0: i32) -> (i32, i32) {
    %c0_i32 = arith.constant 0 : i32
    %c0_i32_0 = arith.constant 0 : i32
    %c0_i32_1 = arith.constant 0 : i32
    return %c0_i32, %c0_i32_0 : i32, i32
  }
  func.func @transform_5(%arg0: i32) -> (i32, i32) {
    %c0_i32 = arith.constant 0 : i32
    %c0_i32_0 = arith.constant 0 : i32
    %c0_i32_1 = arith.constant 0 : i32
    return %c0_i32, %c0_i32_0 : i32, i32
  }
  func.func @transform_6(%arg0: i32) -> (i32, i32) {
    %c0_i32 = arith.constant 0 : i32
    %c0_i32_0 = arith.constant 0 : i32
    return %c0_i32, %arg0 : i32, i32
  }
}

</mosaic_0001>

<bundles_post_ra>
// kernel: transformer_encoder_layer.1
= control target key start
LH: loop header
LB: loop body
LE: loop exit
PB: predicated region body
PF: predicated region fallthrough
CT: control target
= control target key end

     0   :  { %11 = vsyncpa [#allocation5], 0  ;;  %s18412_s0 = inlined_call_operand.vmem [shape: f32[128,512], index: 0, kind: input, shape index: {}]   ;;  %s18413_s1 = inlined_call_operand.hbm [shape: bf16[256,768], index: 1, kind: input, shape index: {}]   ;;  %s18414_s2 = inlined_call_operand.hbm [shape: bf16[256,256], index: 2, kind: input, shape index: {}]   ;;  %s18415_s3 = inlined_call_operand.vmem [shape: bf16[256,1024], index: 3, kind: input, shape index: {}]   ;;  %s18416_s4 = inlined_call_operand.hbm [shape: bf16[1024,256], index: 4, kind: input, shape index: {}]   ;;  %s18417_s5 = inlined_call_operand.hbm [shape: f32[1,3328], index: 5, kind: input, shape index: {}]   ;;  %s18418_s6 = inlined_call_operand.vmem [shape: f32[128,512], index: 6, kind: output, shape index: {}]  }
   0x1   :  { %12 = vsyncpa [#allocation7], 0 }
   0x2   :  { %13 = vsyncpa [#allocation10], 0  ;;  %s13459_s21 = smov 0   ;;  %s13461_s22 = smov 0  }
   0x3   :  { %s13463_s23 = smov 0  }
   0x4 LB: > { %s13475_s24 = sadd.s32 4294967295, %s13410_s23   ;;  %s13478_s25 = sadd.s32 1, %s13410_s23   ;;  %s13410_s23 = sphi %s13463_s23, %s18919_s23   ;;  %s13406_s22 = sphi %s13461_s22, %s18918_s22   ;;  %s13402_s21 = sphi %s13459_s21, %s18917_s21  }
   0x5   : > { %s23_s26 = ssub.s32 %s13410_s23, %s13478_s25  ;;  %s26_s27 = sadd.s32 1, %s13406_s22 }
   0x6   : > { %p24_p0 = scmp.eq.s32.totalorder %s23_s26, 0  ;;  %p33_p1 = scmp.ne.s32.totalorder %s13406_s22, %s13402_s21 }
   0x7   : > { %p34_p2 = scmp.eq.s32.totalorder %s13410_s23, 0  ;;  %p168_p3 = scmp.eq.s32.totalorder %s13475_s24, 1 }
   0x8   : > { %s13488_s28 = scalar_select %p24_p0, %s13406_s22, %s26_s27  }
   0x9   : > { %p13490_p4 = por %p34_p2, %p33_p1  ;;  %p13494_p5 = por %p168_p3, %p33_p1 }
   0xa   : > { %p10839_p6 = scmp.ge.s32.totalorder %s13410_s23, 1  ;;  %p181_p7 = scmp.lt.s32.totalorder %s13410_s23, 3 }
   0xb   : > { %p18419_p8 = scmp.eq.s32.totalorder %s13475_s24, 0  ;;  %s13412_s8 = smov [#allocation6]  }
   0xc   : > { %p13501_p9 = pnand %p10839_p6, %p181_p7  ;;  %s206_s9 = sshll.u32 %s13412_s8, 4  ;;  %s207_s9 = int_to_ptr.vmem [resolvable:$true] %s206_s9 }
   0xd   : > { %s13413_s11 = smov [#allocation4]   ;;  %s13283_s13 = scalar_lea.vmem %s207_s9, 4096 }
   0xe   : > { %p12222_p10 = pneg %p13501_p9  ;;  %s193_s12 = sshll.u32 %s13413_s11, 4  ;;  %s194_s12 = int_to_ptr.vmem [resolvable:$true] %s193_s12 }
   0xf   : > { %p13284_p13 = scmp.ne.s32.totalorder %s207_s9, %s13283_s13  ;;  %p13291_p2 = scmp.lt.s32.totalorder %s207_s9, %s207_s9 }
  0x10   : > { %p13509_p11 = pnand %p18419_p8, %p12222_p10  ;;  %p13292_p3 = scmp.lt.s32.totalorder %s13283_s13, %s13283_s13 }
  0x12   : > { %p13274_p12 = pneg %p13509_p11  ;;  %p13293_p6 = por %p13292_p3, %p13291_p2 }
  0x14   : > { %p13286_p0 = pnand %p13284_p13, %p13274_p12 }
  0x16   : > { %p13287_p1 = pneg %p13286_p0 }
  0x18   : > { %p13294_p7 = pnand %p13293_p6, %p13287_p1 }
  0x1a   : > { %13297 = shalt.err (!%p13294_p7)
}
  0x1b   : > { %s13414_s14 = smov 128   ;;  %s13415_s15 = smov 8  }
  0x1c   : > { %12228 = dma.hbm_to_vmem [thread:$0]  (!%p13509_p11), %s18414_s2, 4096, %s207_s9, [#allocation7], %s13414_s14, %s13414_s14, %s13415_s15  }
  0x1d   : > { %s13309_s18 = scalar_lea.vmem %s194_s12, 12288  ;;  %p13317_p1 = scmp.lt.s32.totalorder %s194_s12, %s194_s12 }
  0x1e   : > { %p13310_p10 = scmp.ne.s32.totalorder %s194_s12, %s13309_s18  ;;  %p13318_p2 = scmp.lt.s32.totalorder %s13309_s18, %s13309_s18 }
  0x20   : > { %p13312_p13 = pnand %p13310_p10, %p13274_p12  ;;  %p13319_p3 = por %p13318_p2, %p13317_p1 }
  0x22   : > { %p13313_p0 = pneg %p13312_p13 }
  0x24   : > { %p13320_p6 = pnand %p13319_p3, %p13313_p0 }
  0x26   : > { %13323 = shalt.err (!%p13320_p6)
}
  0x27   : > { %s13416_s19 = smov 384   ;;  %s13417_s20 = smov 24  }
  0x28   : > { %12225 = dma.hbm_to_vmem [thread:$0]  (!%p13509_p11), %s18413_s1, 12288, %s194_s12, [#allocation5], %s13416_s19, %s13416_s19, %s13417_s20  }
  0x29   : > { %s13418_s8 = smov [#allocation8]   ;;  %s13419_s11 = smov [#allocation9]  }
  0x2a   : > { %s222_s9 = sshll.u32 %s13418_s8, 4  ;;  %s236_s13 = sshll.u32 %s13419_s11, 4  ;;  %s223_s9 = int_to_ptr.vmem [resolvable:$true] %s222_s9  ;;  %s237_s13 = int_to_ptr.vmem [resolvable:$true] %s236_s13 }
  0x2b   : > { %s13335_s16 = scalar_lea.vmem %s223_s9, 16384  ;;  %p13343_p0 = scmp.lt.s32.totalorder %s223_s9, %s223_s9 }
  0x2c   : > { %p13336_p7 = scmp.ne.s32.totalorder %s223_s9, %s13335_s16  ;;  %p13344_p1 = scmp.lt.s32.totalorder %s13335_s16, %s13335_s16 }
  0x2e   : > { %p13338_p10 = pnand %p13336_p7, %p13274_p12  ;;  %p13345_p2 = por %p13344_p1, %p13343_p0 }
  0x30   : > { %p13339_p13 = pneg %p13338_p10 }
  0x32   : > { %p13346_p3 = pnand %p13345_p2, %p13339_p13 }
  0x34   : > { %13349 = shalt.err (!%p13346_p3)
}
  0x35   : > { %12231 = dma.hbm_to_vmem [thread:$0]  (!%p13509_p11), %s18416_s4, 16384, %s223_s9, [#allocation7], %s13414_s14, %s13414_s14, %s13415_s15  }
  0x36   : > { %s13361_s18 = scalar_lea.vmem %s237_s13, 416  ;;  %p13369_p8 = scmp.lt.s32.totalorder %s237_s13, %s237_s13 }
  0x37   : > { %p13362_p6 = scmp.ne.s32.totalorder %s237_s13, %s13361_s18  ;;  %p13370_p0 = scmp.lt.s32.totalorder %s13361_s18, %s13361_s18 }
  0x39   : > { %p13364_p7 = pnand %p13362_p6, %p13274_p12  ;;  %p13371_p13 = por %p13370_p0, %p13369_p8 }
  0x3b   : > { %p13365_p10 = pneg %p13364_p7 }
  0x3d   : > { %p13372_p1 = pnand %p13371_p13, %p13365_p10 }
  0x3f   : > { %13375 = shalt.err (!%p13372_p1)
}
  0x40   : > { %12234 = dma.hbm_to_vmem [thread:$0]  (!%p13509_p11), %s18417_s5, 416, %s237_s13, [#allocation10]  }
  0x41   : > { %p10844_p2 = scmp.ge.s32.totalorder %s13410_s23, 2 }
  0x43   : > { %243 = sbr.rel (%p10844_p2) target bundleno = 92 (0x5c), region = 36 }
  0x48   : > { %246 = sbr.rel (!%p13490_p4) target bundleno = 92 (0x5c), region = 40  ;;  %s248_s14 = sand.u32 (%p13490_p4), 1, %s13406_s22  }
  0x49   : > { %s11372_s15 = sshll.u32 (%p13490_p4), %s13410_s23, 4  ;;  %s10845_s26 = sshll.u32 (%p13490_p4), %s248_s14, 8 }
  0x4a   : > { %s13561_s9 = scalar_lea.vmem (%p13490_p4), %s18412_s0, %s11372_s15  ;;  %s13566_s29 = scalar_lea.vmem (%p13490_p4), [#allocation3], %s10845_s26 }
  0x4b   : > { %v266_v0 = vld [vmem:[%s13561_s9] sm:$0xff] (%p13490_p4)  ;;  %v268_v1 = vld [vmem:[%s13561_s9 + $0x8] sm:$0xff] (%p13490_p4) }
  0x4c   : > { %v270_v2 = vld [vmem:[%s13561_s9 + $0x20] sm:$0xff] (%p13490_p4)  ;;  %267 = vst [vmem:[%s13566_s29] sm:$0xff] (%p13490_p4), %v266_v0  ;;  %269 = vst [vmem:[%s13566_s29 + $0x8] sm:$0xff] (%p13490_p4), %v268_v1  ;;  %v272_v3 = vld [vmem:[%s13561_s9 + $0x28] sm:$0xff] (%p13490_p4) }
  0x4d   : > { %271 = vst [vmem:[%s13566_s29 + $0x10] sm:$0xff] %v270_v2  ;;  %v274_v4 = vld [vmem:[%s13561_s9 + $0x40] sm:$0xff]  ;;  %v276_v5 = vld [vmem:[%s13561_s9 + $0x48] sm:$0xff]  ;;  %273 = vst [vmem:[%s13566_s29 + $0x18] sm:$0xff] %v272_v3 }
  0x4e   : > { %275 = vst [vmem:[%s13566_s29 + $0x20] sm:$0xff] %v274_v4  ;;  %277 = vst [vmem:[%s13566_s29 + $0x28] sm:$0xff] %v276_v5  ;;  %v278_v6 = vld [vmem:[%s13561_s9 + $0x60] sm:$0xff]  ;;  %v280_v7 = vld [vmem:[%s13561_s9 + $0x68] sm:$0xff] }
  0x4f   : > { %v282_v8 = vld [vmem:[%s13561_s9 + $0x80] sm:$0xff]  ;;  %279 = vst [vmem:[%s13566_s29 + $0x30] sm:$0xff] %v278_v6  ;;  %281 = vst [vmem:[%s13566_s29 + $0x38] sm:$0xff] %v280_v7  ;;  %v284_v9 = vld [vmem:[%s13561_s9 + $0x88] sm:$0xff] }
  0x50   : > { %283 = vst [vmem:[%s13566_s29 + $0x40] sm:$0xff] %v282_v8  ;;  %v286_v10 = vld [vmem:[%s13561_s9 + $0xa0] sm:$0xff]  ;;  %v288_v11 = vld [vmem:[%s13561_s9 + $0xa8] sm:$0xff]  ;;  %285 = vst [vmem:[%s13566_s29 + $0x48] sm:$0xff] %v284_v9 }
  0x51   : > { %287 = vst [vmem:[%s13566_s29 + $0x50] sm:$0xff] %v286_v10  ;;  %289 = vst [vmem:[%s13566_s29 + $0x58] sm:$0xff] %v288_v11  ;;  %v290_v12 = vld [vmem:[%s13561_s9 + $0xc0] sm:$0xff]  ;;  %v292_v13 = vld [vmem:[%s13561_s9 + $0xc8] sm:$0xff] }
  0x52   : > { %v294_v14 = vld [vmem:[%s13561_s9 + $0xe0] sm:$0xff]  ;;  %291 = vst [vmem:[%s13566_s29 + $0x60] sm:$0xff] %v290_v12  ;;  %293 = vst [vmem:[%s13566_s29 + $0x68] sm:$0xff] %v292_v13  ;;  %v296_v15 = vld [vmem:[%s13561_s9 + $0xe8] sm:$0xff] }
  0x53   : > { %295 = vst [vmem:[%s13566_s29 + $0x70] sm:$0xff] %v294_v14  ;;  %v298_v16 = vld [vmem:[%s13561_s9 + $0x100] sm:$0xff]  ;;  %v300_v17 = vld [vmem:[%s13561_s9 + $0x108] sm:$0xff]  ;;  %297 = vst [vmem:[%s13566_s29 + $0x78] sm:$0xff] %v296_v15 }
  0x54   : > { %299 = vst [vmem:[%s13566_s29 + $0x80] sm:$0xff] %v298_v16  ;;  %301 = vst [vmem:[%s13566_s29 + $0x88] sm:$0xff] %v300_v17  ;;  %v302_v18 = vld [vmem:[%s13561_s9 + $0x120] sm:$0xff]  ;;  %v304_v19 = vld [vmem:[%s13561_s9 + $0x128] sm:$0xff] }
  0x55   : > { %v306_v20 = vld [vmem:[%s13561_s9 + $0x140] sm:$0xff]  ;;  %303 = vst [vmem:[%s13566_s29 + $0x90] sm:$0xff] %v302_v18  ;;  %305 = vst [vmem:[%s13566_s29 + $0x98] sm:$0xff] %v304_v19  ;;  %v308_v21 = vld [vmem:[%s13561_s9 + $0x148] sm:$0xff] }
  0x56   : > { %307 = vst [vmem:[%s13566_s29 + $0xa0] sm:$0xff] %v306_v20  ;;  %v310_v22 = vld [vmem:[%s13561_s9 + $0x160] sm:$0xff]  ;;  %v312_v23 = vld [vmem:[%s13561_s9 + $0x168] sm:$0xff]  ;;  %309 = vst [vmem:[%s13566_s29 + $0xa8] sm:$0xff] %v308_v21 }
  0x57   : > { %311 = vst [vmem:[%s13566_s29 + $0xb0] sm:$0xff] %v310_v22  ;;  %313 = vst [vmem:[%s13566_s29 + $0xb8] sm:$0xff] %v312_v23  ;;  %v314_v24 = vld [vmem:[%s13561_s9 + $0x180] sm:$0xff]  ;;  %v316_v25 = vld [vmem:[%s13561_s9 + $0x188] sm:$0xff] }
  0x58   : > { %v318_v26 = vld [vmem:[%s13561_s9 + $0x1a0] sm:$0xff]  ;;  %315 = vst [vmem:[%s13566_s29 + $0xc0] sm:$0xff] %v314_v24  ;;  %317 = vst [vmem:[%s13566_s29 + $0xc8] sm:$0xff] %v316_v25  ;;  %v320_v27 = vld [vmem:[%s13561_s9 + $0x1a8] sm:$0xff] }
  0x59   : > { %319 = vst [vmem:[%s13566_s29 + $0xd0] sm:$0xff] %v318_v26  ;;  %v322_v28 = vld [vmem:[%s13561_s9 + $0x1c0] sm:$0xff]  ;;  %v324_v29 = vld [vmem:[%s13561_s9 + $0x1c8] sm:$0xff]  ;;  %321 = vst [vmem:[%s13566_s29 + $0xd8] sm:$0xff] %v320_v27 }
  0x5a   : > { %323 = vst [vmem:[%s13566_s29 + $0xe0] sm:$0xff] %v322_v28  ;;  %325 = vst [vmem:[%s13566_s29 + $0xe8] sm:$0xff] %v324_v29  ;;  %v326_v30 = vld [vmem:[%s13561_s9 + $0x1e0] sm:$0xff]  ;;  %v328_v31 = vld [vmem:[%s13561_s9 + $0x1e8] sm:$0xff] }
  0x5b   : > { %327 = vst [vmem:[%s13566_s29 + $0xf0] sm:$0xff] %v326_v30  ;;  %329 = vst [vmem:[%s13566_s29 + $0xf8] sm:$0xff] %v328_v31 }
  0x5c PF: > { %338 = sbr.rel (%p13501_p9) target bundleno = 6836 (0x1ab4), region = 63 }
  0x61   : > { %s341_s23 = sand.u32 1, %s13402_s21   ;;  %p18507_p4 = scmp.eq.s32.totalorder %s13475_s24, 0 }
  0x62   : > { %s13632_s10 = sshll.u32 %s341_s23, 8 }
  0x63   : > { %s13635_s11 = scalar_lea.vmem [#allocation3], %s13632_s10 }
  0x64   : > { %13389 = dma.done.wait (%p18507_p4), [#allocation5], 12288   ;;  %p18508_p8 = pmov %p18507_p4 }
  0x65   : > { %p18509_p11 = pmov %p18507_p4 }
  0x66   : > { %13391 = vsyncadd (%p18508_p8), [#allocation5], 4294955008 }
  0x67   : > { %13393 = dma.done.wait (%p18509_p11), [#allocation7], 20480   ;;  %p18510_p12 = pmov %p18507_p4 }
  0x68   : > { %p18511_p9 = pmov %p18507_p4 }
  0x69   : > { %13395 = vsyncadd (%p18510_p12), [#allocation7], 4294946816 }
  0x6a   : > { %13397 = dma.done.wait (%p18511_p9), [#allocation10], 416   ;;  %p18512_p3 = pmov %p18507_p4 }
  0x6b   : > { %v12279_v32 = vld [vmem:[#allocation4 + $0x15c] ss:$24 sps:$4 sm:$0xff]   ;;  %v12281_v33 = vld [vmem:[#allocation4 + $0x158] ss:$24 sps:$4 sm:$0xff]   ;;  %v12282_v34 = vld [vmem:[#allocation4 + $0x12c] ss:$24 sps:$4 sm:$0xff]  }
  0x6c   : > { %13399 = vsyncadd (%p18512_p3), [#allocation10], 4294966880  ;;  %1164 = vmatprep.subr.bf16.mxu1 %v12279_v32  ;;  %v12284_v35 = vld [vmem:[#allocation4 + $0x128] ss:$24 sps:$4 sm:$0xff]   ;;  %v12285_v36 = vld [vmem:[#allocation4 + $0xfc] ss:$24 sps:$4 sm:$0xff]  }
  0x6d   : > { %1165 = vmatpush1.bf16.msra.mxu1 %v12281_v33  ;;  %v12287_v37 = vld [vmem:[#allocation4 + $0xf8] ss:$24 sps:$4 sm:$0xff]   ;;  %v12288_v38 = vld [vmem:[#allocation4 + $0xcc] ss:$24 sps:$4 sm:$0xff]   ;;  %v12290_v41 = vld [vmem:[#allocation4 + $0xc8] ss:$24 sps:$4 sm:$0xff]  }
  0x6e   : > { %1166 = vmatprep.subr.bf16.mxu1 %v12282_v34  ;;  %v12296_v39 = vld [vmem:[#allocation4 + $0x154] ss:$24 sps:$4 sm:$0xff]   ;;  %v12299_v40 = vld [vmem:[#allocation4 + $0x150] ss:$24 sps:$4 sm:$0xff]   ;;  %v12302_v42 = vld [vmem:[#allocation4 + $0x124] ss:$24 sps:$4 sm:$0xff]  }
  0x6f   : > { %1051 = vmatprep.subr.bf16.mxu0 %v12296_v39  ;;  %v12305_v43 = vld [vmem:[#allocation4 + $0x120] ss:$24 sps:$4 sm:$0xff]   ;;  %v12291_v44 = vld [vmem:[#allocation4 + $0x9c] ss:$24 sps:$4 sm:$0xff]   ;;  %v12311_v47 = vld [vmem:[#allocation4 + $0xf0] ss:$24 sps:$4 sm:$0xff]  }
  0x70   : > { %1052 = vmatpush1.bf16.msra.mxu0 %v12299_v40  ;;  %v12308_v45 = vld [vmem:[#allocation4 + $0xf4] ss:$24 sps:$4 sm:$0xff]   ;;  %v12293_v46 = vld [vmem:[#allocation4 + $0x98] ss:$24 sps:$4 sm:$0xff]   ;;  %v12314_v49 = vld [vmem:[#allocation4 + $0xc4] ss:$24 sps:$4 sm:$0xff]  }
  0x71   : > { %1167 = vmatpush1.bf16.msra.mxu1 %v12284_v35  ;;  %1053 = vmatprep.subr.bf16.mxu0 %v12302_v42  ;;  %v12294_v48 = vld [vmem:[#allocation4 + $0x6c] ss:$24 sps:$4 sm:$0xff]   ;;  %v12298_v50 = vld [vmem:[#allocation4 + $0x68] ss:$24 sps:$4 sm:$0xff]   ;;  %v12300_v51 = vld [vmem:[#allocation4 + $0x3c] ss:$24 sps:$4 sm:$0xff]  }
  0x72   : > { %1168 = vmatprep.subr.bf16.mxu1 %v12285_v36  ;;  %v12317_v52 = vld [vmem:[#allocation4 + $0xc0] ss:$24 sps:$4 sm:$0xff]   ;;  %v12320_v53 = vld [vmem:[#allocation4 + $0x94] ss:$24 sps:$4 sm:$0xff]   ;;  %v12323_v55 = vld [vmem:[#allocation4 + $0x90] ss:$24 sps:$4 sm:$0xff]  }
  0x73   : > { %v12304_v54 = vld [vmem:[#allocation4 + $0x38] ss:$24 sps:$4 sm:$0xff]   ;;  %v12306_v56 = vld [vmem:[#allocation4 + $0xc] ss:$24 sps:$4 sm:$0xff]   ;;  %v12310_v58 = vld [vmem:[#allocation4 + $0x8] ss:$24 sps:$4 sm:$0xff]  }
  0x74   : > { %1054 = vmatpush1.bf16.msra.mxu0 %v12305_v43  ;;  %v12326_v57 = vld [vmem:[#allocation4 + $0x64] ss:$24 sps:$4 sm:$0xff]   ;;  %v12329_v60 = vld [vmem:[#allocation4 + $0x60] ss:$24 sps:$4 sm:$0xff]   ;;  %v12332_v61 = vld [vmem:[#allocation4 + $0x34] ss:$24 sps:$4 sm:$0xff]  }
  0x75   : > { %1169 = vmatpush1.bf16.msra.mxu1 %v12287_v37  ;;  %1055 = vmatprep.subr.bf16.mxu0 %v12308_v45  ;;  %v12312_v59 = vld [vmem:[#allocation4 + $0x2dc] ss:$24 sps:$4 sm:$0xff]   ;;  %v12316_v62 = vld [vmem:[#allocation4 + $0x2d8] ss:$24 sps:$4 sm:$0xff]   ;;  %v12318_v0 = vld [vmem:[#allocation4 + $0x2ac] ss:$24 sps:$4 sm:$0xff]  }
  0x76   : > { %1170 = vmatprep.subr.bf16.mxu1 %v12288_v38  ;;  %v12335_v63 = vld [vmem:[#allocation4 + $0x30] ss:$24 sps:$4 sm:$0xff]   ;;  %v12338_v1 = vld [vmem:[#allocation4 + $0x4] ss:$24 sps:$4 sm:$0xff]   ;;  %v12341_v4 = vld [vmem:[#allocation4] ss:$24 sps:$4 sm:$0xff]  }
  0x77   : > { %v12322_v2 = vld [vmem:[#allocation4 + $0x2a8] ss:$24 sps:$4 sm:$0xff]   ;;  %v12324_v3 = vld [vmem:[#allocation4 + $0x27c] ss:$24 sps:$4 sm:$0xff]   ;;  %v12328_v9 = vld [vmem:[#allocation4 + $0x278] ss:$24 sps:$4 sm:$0xff]  }
  0x78   : > { %1056 = vmatpush1.bf16.msra.mxu0 %v12311_v47  ;;  %v12344_v5 = vld [vmem:[#allocation4 + $0x2d4] ss:$24 sps:$4 sm:$0xff]   ;;  %v391_v7 = vld [vmem:[%s13635_s11 + $0x18] sm:$0xff]  ;;  %v12347_v10 = vld [vmem:[#allocation4 + $0x2d0] ss:$24 sps:$4 sm:$0xff]   ;;  %vm1481_vm0 = vcmask 261120  }
  0x79   : > { %1171 = vmatpush1.bf16.msra.mxu1 %v12290_v41  ;;  %1057 = vmatprep.subr.bf16.mxu0 %v12314_v49  ;;  %v389_v6 = vld [vmem:[%s13635_s11 + $0x8] sm:$0xff]  ;;  %v12350_v12 = vld [vmem:[#allocation4 + $0x2a4] ss:$24 sps:$4 sm:$0xff]   ;;  %v12353_v14 = vld [vmem:[#allocation4 + $0x2a0] ss:$24 sps:$4 sm:$0xff]   ;;  %s13420_s21 = smov 96  }
  0x7a   : > { %1172 = vmatprep.subr.bf16.mxu1 %v12291_v44  ;;  %v13651_v8 = vpack.c.bf16 %v391_v7, %v389_v6  ;;  %v12330_v11 = vld [vmem:[#allocation4 + $0x24c] ss:$24 sps:$4 sm:$0xff]   ;;  %v12334_v13 = vld [vmem:[#allocation4 + $0x248] ss:$24 sps:$4 sm:$0xff]   ;;  %v12336_v15 = vld [vmem:[#allocation4 + $0x21c] ss:$24 sps:$4 sm:$0xff]  }
  0x7b   : > { %v12356_v16 = vld [vmem:[#allocation4 + $0x274] ss:$24 sps:$4 sm:$0xff]   ;;  %v12340_v17 = vld [vmem:[#allocation4 + $0x218] ss:$24 sps:$4 sm:$0xff]   ;;  %v12360_v20 = vld [vmem:[#allocation4 + $0x244] ss:$24 sps:$4 sm:$0xff]  }
  0x7c   : > { %1058 = vmatpush1.bf16.msra.mxu0 %v12317_v52  ;;  %1196 = vmatprep.mubr.bf16.mxu1 %v13651_v8  ;;  %v12359_v18 = vld [vmem:[#allocation4 + $0x270] ss:$24 sps:$4 sm:$0xff]   ;;  %v12342_v19 = vld [vmem:[#allocation4 + $0x1ec] ss:$24 sps:$4 sm:$0xff]   ;;  %v12362_v22 = vld [vmem:[#allocation4 + $0x240] ss:$24 sps:$4 sm:$0xff]  }
  0x7d   : > { %1173 = vmatpush1.bf16.msra.mxu1 %v12293_v46  ;;  %1059 = vmatprep.subr.bf16.mxu0 %v12320_v53  ;;  %v12346_v21 = vld [vmem:[#allocation4 + $0x1e8] ss:$24 sps:$4 sm:$0xff]   ;;  %v12348_v23 = vld [vmem:[#allocation4 + $0x1bc] ss:$24 sps:$4 sm:$0xff]   ;;  %v12352_v25 = vld [vmem:[#allocation4 + $0x1b8] ss:$24 sps:$4 sm:$0xff]  }
  0x7e   : > { %1174 = vmatprep.subr.bf16.mxu1 %v12294_v48  ;;  %1083 = vmatprep.mubr.bf16.mxu0 %v13651_v8  ;;  %v12363_v24 = vld [vmem:[#allocation4 + $0x214] ss:$24 sps:$4 sm:$0xff]   ;;  %v12365_v26 = vld [vmem:[#allocation4 + $0x210] ss:$24 sps:$4 sm:$0xff]   ;;  %v12366_v28 = vld [vmem:[#allocation4 + $0x1e4] ss:$24 sps:$4 sm:$0xff]  }
  0x7f   : > { %v12354_v27 = vld [vmem:[#allocation4 + $0x18c] ss:$24 sps:$4 sm:$0xff]   ;;  %v12358_v29 = vld [vmem:[#allocation4 + $0x188] ss:$24 sps:$4 sm:$0xff]   ;;  %v390_v31 = vld [vmem:[%s13635_s11 + $0x10] sm:$0xff]  ;;  %s13422_s7 = smov 64  }
  0x80   : > { %1060 = vmatpush1.bf16.msra.mxu0 %v12323_v55  ;;  %v388_v30 = vld [vmem:[%s13635_s11] sm:$0xff]  ;;  %v393_v33 = vld [vmem:[%s13635_s11 + $0x28] sm:$0xff]  ;;  %v395_v34 = vld [vmem:[%s13635_s11 + $0x38] sm:$0xff]  ;;  %s13423_s13 = smov 32   ;;  %s18208_s19 = scalar_lea.vmem [#allocation11], %s13632_s10 }
  0x81   : > { %1175 = vmatpush1.bf16.msra.mxu1 %v12298_v50  ;;  %1061 = vmatprep.subr.bf16.mxu0 %v12326_v57  ;;  %v12368_v32 = vld [vmem:[#allocation4 + $0x1e0] ss:$24 sps:$4 sm:$0xff]   ;;  %v12369_v35 = vld [vmem:[#allocation4 + $0x1b4] ss:$24 sps:$4 sm:$0xff]   ;;  %v13659_v36 = vpack.c.bf16 %v390_v31, %v388_v30  ;;  %v13661_v37 = vpack.c.bf16 %v395_v34, %v393_v33  ;;  %v12371_v38 = vld [vmem:[#allocation4 + $0x1b0] ss:$24 sps:$4 sm:$0xff]  }
  0x82   : > { %1176 = vmatprep.subr.bf16.mxu1 %v12300_v51  ;;  %v12372_v39 = vld [vmem:[#allocation4 + $0x184] ss:$24 sps:$4 sm:$0xff]   ;;  %v394_v41 = vld [vmem:[%s13635_s11 + $0x30] sm:$0xff]  ;;  %v397_v42 = vld [vmem:[%s13635_s11 + $0x48] sm:$0xff]  ;;  %s11373_s10 = sshll.u32 (%p13494_p5), %s13475_s24, 4 }
  0x83   : > { %v392_v40 = vld [vmem:[%s13635_s11 + $0x20] sm:$0xff]  ;;  %v399_v43 = vld [vmem:[%s13635_s11 + $0x58] sm:$0xff]  ;;  %v12380_v49 = vld [vmem:[#allocation4 + $0x134] ss:$24 sps:$4 sm:$0xff]   ;;  %s18339_s15 = scalar_lea.vmem (%p13494_p5), %s18418_s6, %s11373_s10 }
  0x84   : > { %1062 = vmatpush1.bf16.msra.mxu0 %v12329_v60  ;;  %v12374_v44 = vld [vmem:[#allocation4 + $0x180] ss:$24 sps:$4 sm:$0xff]   ;;  %v12377_v45 = vld [vmem:[#allocation4 + $0x164] ss:$24 sps:$4 sm:$0xff]   ;;  %v13669_v46 = vpack.c.bf16 %v394_v41, %v392_v40  ;;  %v13671_v47 = vpack.c.bf16 %v399_v43, %v397_v42  ;;  %v398_v51 = vld [vmem:[%s13635_s11 + $0x50] sm:$0xff] }
  0x85   : > { %1177 = vmatpush1.bf16.msra.mxu1 %v12304_v54  ;;  %1063 = vmatprep.subr.bf16.mxu0 %v12332_v61  ;;  %v12375_v48 = vld [vmem:[#allocation4 + $0x160] ss:$24 sps:$4 sm:$0xff]   ;;  %v401_v52 = vld [vmem:[%s13635_s11 + $0x68] sm:$0xff]  ;;  %v12383_v55 = vld [vmem:[#allocation4 + $0x104] ss:$24 sps:$4 sm:$0xff]  }
  0x86   : > { %1178 = vmatprep.subr.bf16.mxu1 %v12306_v56  ;;  %v396_v50 = vld [vmem:[%s13635_s11 + $0x40] sm:$0xff]  ;;  %v403_v53 = vld [vmem:[%s13635_s11 + $0x78] sm:$0xff]  ;;  %v12378_v54 = vld [vmem:[#allocation4 + $0x130] ss:$24 sps:$4 sm:$0xff]  }
  0x87   : > { %v12381_v56 = vld [vmem:[#allocation4 + $0x100] ss:$24 sps:$4 sm:$0xff]   ;;  %v13681_v57 = vpack.c.bf16 %v398_v51, %v396_v50  ;;  %v402_v61 = vld [vmem:[%s13635_s11 + $0x70] sm:$0xff]  ;;  %v417_v30 = vld [vmem:[%s13635_s11 + $0xe8] sm:$0xff] }
  0x88   : > { %1064 = vmatpush1.bf16.msra.mxu0 %v12335_v63  ;;  %v400_v60 = vld [vmem:[%s13635_s11 + $0x60] sm:$0xff]  ;;  %v405_v63 = vld [vmem:[%s13635_s11 + $0x88] sm:$0xff]  ;;  %v406_v7 = vld [vmem:[%s13635_s11 + $0x90] sm:$0xff] }
  0x89   : > { %1179 = vmatpush1.bf16.msra.mxu1 %v12310_v58  ;;  %1065 = vmatprep.subr.bf16.mxu0 %v12338_v1  ;;  %v12386_v58 = vld [vmem:[#allocation4 + $0xd4] ss:$24 sps:$4 sm:$0xff]   ;;  %v12389_v1 = vld [vmem:[#allocation4 + $0xa4] ss:$24 sps:$4 sm:$0xff]   ;;  %v12405_v33 = vld [vmem:[#allocation4 + $0x280] ss:$24 sps:$4 sm:$0xff]  }
  0x8a   : > { %1180 = vmatprep.subr.bf16.mxu1 %v12312_v59  ;;  %v13683_v59 = vpack.c.bf16 %v403_v53, %v401_v52  ;;  %v404_v6 = vld [vmem:[%s13635_s11 + $0x80] sm:$0xff]  ;;  %v419_v31 = vld [vmem:[%s13635_s11 + $0xf8] sm:$0xff]  ;;  %v418_v40 = vld [vmem:[%s13635_s11 + $0xf0] sm:$0xff] }
  0x8b   : > { %v12408_v41 = vld [vmem:[#allocation4 + $0x250] ss:$24 sps:$4 sm:$0xff]   ;;  %v12413_v42 = vld [vmem:[#allocation4 + $0x224] ss:$24 sps:$4 sm:$0xff]   ;;  %v12411_v43 = vld [vmem:[#allocation4 + $0x220] ss:$24 sps:$4 sm:$0xff]  }
  0x8c   : > { %1066 = vmatpush1.bf16.msra.mxu0 %v12341_v4  ;;  %v12392_v4 = vld [vmem:[#allocation4 + $0x74] ss:$24 sps:$4 sm:$0xff]   ;;  %v12417_v50 = vld [vmem:[#allocation4 + $0x1c0] ss:$24 sps:$4 sm:$0xff]   ;;  %v12420_v52 = vld [vmem:[#allocation4 + $0x190] ss:$24 sps:$4 sm:$0xff]  }
  0x8d   : > { %1181 = vmatpush2.bf16.msra.mxu1 %v12316_v62  ;;  %1067 = vmatprep.subr.bf16.mxu0 %v12344_v5  ;;  %v12384_v62 = vld [vmem:[#allocation4 + $0xd0] ss:$24 sps:$4 sm:$0xff]   ;;  %v12422_v51 = vld [vmem:[#allocation4 + $0x194] ss:$24 sps:$4 sm:$0xff]  }
  0x8e   : > { %1182 = vmatprep.subr.bf16.mxu1 %v12318_v0  ;;  %v407_v0 = vld [vmem:[%s13635_s11 + $0x98] sm:$0xff] }
  0x8f   : > { %v13695_v5 = vpack.c.bf16 %v407_v0, %v405_v63 }
  0x90   : > { %1068 = vmatpush2.bf16.msra.mxu0 %v12347_v10  ;;  %v409_v10 = vld [vmem:[%s13635_s11 + $0xa8] sm:$0xff] }
  0x91   : > { %1183 = vmatpush2.bf16.msra.mxu1 %v12322_v2  ;;  %1069 = vmatprep.subr.bf16.mxu0 %v12350_v12  ;;  %v12387_v2 = vld [vmem:[#allocation4 + $0xa0] ss:$24 sps:$4 sm:$0xff]   ;;  %v12395_v12 = vld [vmem:[#allocation4 + $0x44] ss:$24 sps:$4 sm:$0xff]  }
  0x92   : > { %1184 = vmatprep.subr.bf16.mxu1 %v12324_v3  ;;  %v13693_v3 = vpack.c.bf16 %v402_v61, %v400_v60 }
  0x94   : > { %1070 = vmatpush2.bf16.msra.mxu0 %v12353_v14  ;;  %v13705_v14 = vpack.c.bf16 %v406_v7, %v404_v6 }
  0x95   : > { %1185 = vmatpush2.bf16.msra.mxu1 %v12328_v9  ;;  %1071 = vmatprep.subr.bf16.mxu0 %v12356_v16  ;;  %v12390_v9 = vld [vmem:[#allocation4 + $0x70] ss:$24 sps:$4 sm:$0xff]  }
  0x96   : > { %1186 = vmatprep.subr.bf16.mxu1 %v12330_v11  ;;  %v411_v11 = vld [vmem:[%s13635_s11 + $0xb8] sm:$0xff] }
  0x97   : > { %v13707_v16 = vpack.c.bf16 %v411_v11, %v409_v10 }
  0x98   : > { %1072 = vmatpush2.bf16.msra.mxu0 %v12359_v18  ;;  %v410_v18 = vld [vmem:[%s13635_s11 + $0xb0] sm:$0xff] }
  0x99   : > { %1187 = vmatpush2.bf16.msra.mxu1 %v12334_v13  ;;  %1073 = vmatprep.subr.bf16.mxu0 %v12360_v20  ;;  %v12393_v13 = vld [vmem:[#allocation4 + $0x40] ss:$24 sps:$4 sm:$0xff]   ;;  %v413_v20 = vld [vmem:[%s13635_s11 + $0xc8] sm:$0xff] }
  0x9a   : > { %1188 = vmatprep.subr.bf16.mxu1 %v12336_v15  ;;  %v12398_v15 = vld [vmem:[#allocation4 + $0x14] ss:$24 sps:$4 sm:$0xff]  }
  0x9c   : > { %1074 = vmatpush2.bf16.msra.mxu0 %v12362_v22  ;;  %v12401_v22 = vld [vmem:[#allocation4 + $0x2e4] ss:$24 sps:$4 sm:$0xff]  }
  0x9d   : > { %1189 = vmatpush2.bf16.msra.mxu1 %v12340_v17  ;;  %1075 = vmatprep.subr.bf16.mxu0 %v12363_v24  ;;  %v408_v17 = vld [vmem:[%s13635_s11 + $0xa0] sm:$0xff] }
  0x9e   : > { %1190 = vmatprep.subr.bf16.mxu1 %v12342_v19  ;;  %v12396_v19 = vld [vmem:[#allocation4 + $0x10] ss:$24 sps:$4 sm:$0xff]   ;;  %v13717_v24 = vpack.c.bf16 %v410_v18, %v408_v17 }
  0xa0   : > { %1076 = vmatpush2.bf16.msra.mxu0 %v12365_v26 }
  0xa1   : > { %1191 = vmatpush2.bf16.msra.mxu1 %v12346_v21  ;;  %1077 = vmatprep.subr.bf16.mxu0 %v12366_v28  ;;  %v415_v21 = vld [vmem:[%s13635_s11 + $0xd8] sm:$0xff]  ;;  %v414_v28 = vld [vmem:[%s13635_s11 + $0xd0] sm:$0xff] }
  0xa2   : > { %1192 = vmatprep.subr.bf16.mxu1 %v12348_v23  ;;  %v12399_v23 = vld [vmem:[#allocation4 + $0x2e0] ss:$24 sps:$4 sm:$0xff]   ;;  %v13719_v26 = vpack.c.bf16 %v415_v21, %v413_v20 }
  0xa4   : > { %1078 = vmatpush2.bf16.msra.mxu0 %v12368_v32  ;;  %v12407_v32 = vld [vmem:[#allocation4 + $0x284] ss:$24 sps:$4 sm:$0xff]  }
  0xa5   : > { %1193 = vmatpush2.bf16.msra.mxu1 %v12352_v25  ;;  %1079 = vmatprep.subr.bf16.mxu0 %v12369_v35  ;;  %v12404_v25 = vld [vmem:[#allocation4 + $0x2b4] ss:$24 sps:$4 sm:$0xff]  }
  0xa6   : > { %1194 = vmatprep.subr.bf16.mxu1 %v12354_v27  ;;  %v412_v27 = vld [vmem:[%s13635_s11 + $0xc0] sm:$0xff]  ;;  %v12410_v35 = vld [vmem:[#allocation4 + $0x254] ss:$24 sps:$4 sm:$0xff]  }
  0xa7   : > { %v432_v34 = vpack.c.bf16 %v414_v28, %v412_v27 }
  0xa8   : > { %1080 = vmatpush2.bf16.msra.mxu0 %v12371_v38  ;;  %v435_v38 = vpack.c.bf16 %v419_v31, %v417_v30 }
  0xa9   : > { %1195 = vmatpush2.bf16.msra.mxu1 %v12358_v29  ;;  %1081 = vmatprep.subr.bf16.mxu0 %v12372_v39  ;;  %v12402_v29 = vld [vmem:[#allocation4 + $0x2b0] ss:$24 sps:$4 sm:$0xff]   ;;  %v416_v39 = vld [vmem:[%s13635_s11 + $0xe0] sm:$0xff] }
  0xac   : > { %1197 = vmatmul.mubr.bf16.vlgmr.msra.gmra.mxu1 %v13659_v36  ;;  %1082 = vmatpush2.bf16.msra.mxu0 %v12374_v44  ;;  %v434_v44 = vpack.c.bf16 %v418_v40, %v416_v39 }
  0xad   : > { %1206 = vmatprep.mubr.bf16.mxu1 %v13661_v37  ;;  %1277 = vmatprep.subr.bf16.mxu0 %v12377_v45  ;;  %v12416_v45 = vld [vmem:[#allocation4 + $0x1f4] ss:$24 sps:$4 sm:$0xff]  }
  0xaf   : > { %1084 = vmatmul.mubr.bf16.vlgmr.msra.gmra.mxu0 %v13659_v36 }
  0xb0   : > { %1278 = vmatpush1.bf16.msra.mxu0 %v12375_v48  ;;  %1093 = vmatprep.mubr.bf16.mxu0 %v13661_v37  ;;  %v12414_v48 = vld [vmem:[#allocation4 + $0x1f0] ss:$24 sps:$4 sm:$0xff]  }
  0xb1   : > { %1279 = vmatprep.subr.bf16.mxu0 %v12380_v49  ;;  %v12419_v49 = vld [vmem:[#allocation4 + $0x1c4] ss:$24 sps:$4 sm:$0xff]  }
  0xb4   : > { %1207 = vmatmul.mubr.bf16.gmra.mxu1 %v13669_v46  ;;  %1280 = vmatpush1.bf16.msra.mxu0 %v12378_v54 }
  0xb5   : > { %1216 = vmatprep.mubr.bf16.mxu1 %v13671_v47  ;;  %1281 = vmatprep.subr.bf16.mxu0 %v12383_v55 }
  0xb7   : > { %1094 = vmatmul.mubr.bf16.gmra.mxu0 %v13669_v46 }
  0xb8   : > { %1282 = vmatpush1.bf16.msra.mxu0 %v12381_v56  ;;  %1103 = vmatprep.mubr.bf16.mxu0 %v13671_v47 }
  0xb9   : > { %1283 = vmatprep.subr.bf16.mxu0 %v12386_v58 }
  0xbc   : > { %1217 = vmatmul.mubr.bf16.gmra.mxu1 %v13681_v57  ;;  %1284 = vmatpush1.bf16.msra.mxu0 %v12384_v62 }
  0xbd   : > { %1226 = vmatprep.mubr.bf16.mxu1 %v13683_v59  ;;  %1285 = vmatprep.subr.bf16.mxu0 %v12389_v1 }
  0xbf   : > { %1104 = vmatmul.mubr.bf16.gmra.mxu0 %v13681_v57 }
  0xc0   : > { %1286 = vmatpush1.bf16.msra.mxu0 %v12387_v2  ;;  %1113 = vmatprep.mubr.bf16.mxu0 %v13683_v59 }
  0xc1   : > { %1287 = vmatprep.subr.bf16.mxu0 %v12392_v4 }
  0xc4   : > { %1227 = vmatmul.mubr.bf16.gmra.mxu1 %v13693_v3  ;;  %1288 = vmatpush1.bf16.msra.mxu0 %v12390_v9 }
  0xc5   : > { %1236 = vmatprep.mubr.bf16.mxu1 %v13695_v5  ;;  %1289 = vmatprep.subr.bf16.mxu0 %v12395_v12 }
  0xc7   : > { %1114 = vmatmul.mubr.bf16.gmra.mxu0 %v13693_v3 }
  0xc8   : > { %1290 = vmatpush1.bf16.msra.mxu0 %v12393_v13  ;;  %1123 = vmatprep.mubr.bf16.mxu0 %v13695_v5 }
  0xc9   : > { %1291 = vmatprep.subr.bf16.mxu0 %v12398_v15 }
  0xcc   : > { %1237 = vmatmul.mubr.bf16.gmra.mxu1 %v13705_v14  ;;  %1292 = vmatpush1.bf16.msra.mxu0 %v12396_v19 }
  0xcd   : > { %1246 = vmatprep.mubr.bf16.mxu1 %v13707_v16  ;;  %1293 = vmatprep.subr.bf16.mxu0 %v12401_v22 }
  0xcf   : > { %1124 = vmatmul.mubr.bf16.gmra.mxu0 %v13705_v14 }
  0xd0   : > { %1294 = vmatpush2.bf16.msra.mxu0 %v12399_v23  ;;  %1133 = vmatprep.mubr.bf16.mxu0 %v13707_v16 }
  0xd1   : > { %1295 = vmatprep.subr.bf16.mxu0 %v12404_v25 }
  0xd4   : > { %1247 = vmatmul.mubr.bf16.gmra.mxu1 %v13717_v24  ;;  %1296 = vmatpush2.bf16.msra.mxu0 %v12402_v29 }
  0xd5   : > { %1256 = vmatprep.mubr.bf16.mxu1 %v13719_v26  ;;  %1297 = vmatprep.subr.bf16.mxu0 %v12407_v32 }
  0xd7   : > { %1134 = vmatmul.mubr.bf16.gmra.mxu0 %v13717_v24 }
  0xd8   : > { %1298 = vmatpush2.bf16.msra.mxu0 %v12405_v33  ;;  %1143 = vmatprep.mubr.bf16.mxu0 %v13719_v26 }
  0xd9   : > { %1299 = vmatprep.subr.bf16.mxu0 %v12410_v35 }
  0xdc   : > { %1257 = vmatmul.mubr.bf16.gmra.mxu1 %v432_v34  ;;  %1300 = vmatpush2.bf16.msra.mxu0 %v12408_v41 }
  0xdd   : > { %1266 = vmatprep.mubr.bf16.mxu1 %v435_v38  ;;  %1301 = vmatprep.subr.bf16.mxu0 %v12413_v42 }
  0xdf   : > { %1144 = vmatmul.mubr.bf16.gmra.mxu0 %v432_v34 }
  0xe0   : > { %1302 = vmatpush2.bf16.msra.mxu0 %v12411_v43  ;;  %1153 = vmatprep.mubr.bf16.mxu0 %v435_v38 }
  0xe1   : > { %1303 = vmatprep.subr.bf16.mxu0 %v12416_v45 }
  0xe4   : > { %1267 = vmatmul.mubr.bf16.gmra.mxu1 %v434_v44  ;;  %1304 = vmatpush2.bf16.msra.mxu0 %v12414_v48 }
  0xe5   : > { %1305 = vmatprep.subr.bf16.mxu0 %v12419_v49 }
  0xe7   : > { %1154 = vmatmul.mubr.bf16.gmra.mxu0 %v434_v44 }
  0xe8   : > { %1306 = vmatpush2.bf16.msra.mxu0 %v12417_v50  ;;  %1309 = vmatprep.mubr.bf16.mxu0 %v13651_v8  ;;  %v541_v8 = vlaneseq }
  0xe9   : > { %1307 = vmatprep.subr.bf16.mxu0 %v12422_v51 }
  0xec   : > { %1308 = vmatpush2.bf16.msra.mxu0 %v12420_v52 }
  0xef   : > { %1310 = vmatmul.mubr.bf16.vlgmr.msra.gmra.mxu0 %v13659_v36  ;;  %v13746_v36 = vshrl.u32 %v541_v8, 7 }
  0xf0   : > { %1319 = vmatprep.mubr.bf16.mxu0 %v13661_v37 }
  0xf1   : > { %18513 = vst [vmem:[#allocation15_spill] sm:$0xff] %v13746_v36  ;;  %v18422_v37 = vsub.s32 3, %v13746_v36  ;;  %v13764_v58 = vsub.s32 0, %v13746_v36 }
  0xf3   : > { %18515 = vst [vmem:[#allocation17_spill] sm:$0xff] %v13764_v58 }
  0xf7   : > { %1320 = vmatmul.mubr.bf16.gmra.mxu0 %v13669_v46  ;;  %v18421_v46 = vsub.s32 2, %v13746_v36 }
  0xf8   : > { %1329 = vmatprep.mubr.bf16.mxu0 %v13671_v47  ;;  %v13750_v47 = vld [vmem:[#allocation9] sm:$0x3f] }
  0xf9   : > { %v13755_v53 = vrot.slane %v13750_v47, %v18422_v37  ;;  %v13760_v55 = vrot.slane %v13750_v47, %v18421_v46  ;;  %v13773_v1 = vrot.slane %v13750_v47, %v13764_v58 }
  0xfb   : > { %18514 = vst [vmem:[#allocation16_spill] sm:$0xff] %v13755_v53 }
  0xff   : > { %1330 = vmatmul.mubr.bf16.gmra.mxu0 %v13681_v57 }
 0x100   : > { %1339 = vmatprep.mubr.bf16.mxu0 %v13683_v59 }
 0x107   : > { %1340 = vmatmul.mubr.bf16.gmra.mxu0 %v13693_v3 }
 0x108   : > { %1349 = vmatprep.mubr.bf16.mxu0 %v13695_v5 }
 0x10f   : > { %1350 = vmatmul.mubr.bf16.gmra.mxu0 %v13705_v14 }
 0x110   : > { %1359 = vmatprep.mubr.bf16.mxu0 %v13707_v16 }
 0x117   : > { %1360 = vmatmul.mubr.bf16.gmra.mxu0 %v13717_v24 }
 0x118   : > { %1369 = vmatprep.mubr.bf16.mxu0 %v13719_v26 }
 0x11f   : > { %1370 = vmatmul.mubr.bf16.gmra.mxu0 %v432_v34 }
 0x120   : > { %1379 = vmatprep.mubr.bf16.mxu0 %v435_v38 }
 0x127   : > { %1380 = vmatmul.mubr.bf16.gmra.mxu0 %v434_v44 }
 0x16c   : > { %v1198_v54 = vpop.f32.mrf.mxu1 }
 0x16d   : > { %v1199_v60 = vadd.f32 %v1198_v54, %v13760_v55 }
 0x16e   : > { %v1200_v56 = vpop.f32.mrf.mxu1 }
 0x16f   : > { %v1201_v57 = vadd.f32 %v1200_v56, %v13755_v53  ;;  %v1085_v3 = vpop.f32.mrf.mxu0 }
 0x170   : > { %v1202_v59 = vpop.f32.mrf.mxu1  ;;  %v1086_v9 = vadd.f32 %v1085_v3, %v13773_v1 }
 0x171   : > { %v1203_v61 = vadd.f32 %v1202_v59, %v13760_v55  ;;  %v13777_v6 = vpop.f32.mrf.mxu0 }
 0x172   : > { %v1204_v62 = vpop.f32.mrf.mxu1  ;;  %18517 = vst [vmem:[#allocation19_spill] sm:$0xff] %v13777_v6 }
 0x173   : > { %v13768_v63 = vpack.c.bf16 %v1203_v61, %v1199_v60  ;;  %v1205_v0 = vadd.f32 %v1204_v62, %v13755_v53  ;;  %v1089_v11 = vpop.f32.mrf.mxu0 }
 0x174   : > { %v1208_v2 = vpop.f32.mrf.mxu1  ;;  %v1090_v14 = vadd.f32 %v1089_v11, %v13773_v1 }
 0x175   : > { %v13775_v4 = vpack.c.bf16 %v1205_v0, %v1201_v57  ;;  %v1209_v12 = vadd.f32 %v1208_v2, %v13760_v55  ;;  %v13784_v16 = vpop.f32.mrf.mxu0 }
 0x176   : > { %v1210_v5 = vpop.f32.mrf.mxu1  ;;  %18518 = vst [vmem:[#allocation20_spill] sm:$0xff] %v13784_v16  ;;  %v13789_v19 = vpack.c.bf16 %v1090_v14, %v1086_v9 }
 0x177   : > { %18516 = vst [vmem:[#allocation18_spill] sm:$0xff] %v13775_v4  ;;  %v1211_v7 = vadd.f32 %v1210_v5, %v13755_v53  ;;  %v1095_v21 = vpop.f32.mrf.mxu0 }
 0x178   : > { %v1212_v10 = vpop.f32.mrf.mxu1  ;;  %v1096_v23 = vadd.f32 %v1095_v21, %v13773_v1  ;;  %11646 = vmatprep.mubr.msk.bf16.mxu1 %vm1481_vm0, %v13789_v19 }
 0x179   : > { %v1213_v13 = vadd.f32 %v1212_v10, %v13760_v55  ;;  %v13796_v25 = vpop.f32.mrf.mxu0 }
 0x17a   : > { %v1214_v15 = vpop.f32.mrf.mxu1  ;;  %18520 = vst [vmem:[#allocation22_spill] sm:$0xff] %v13796_v25 }
 0x17b   : > { %v13786_v17 = vpack.c.bf16 %v1213_v13, %v1209_v12  ;;  %v1215_v18 = vadd.f32 %v1214_v15, %v13755_v53  ;;  %v1099_v28 = vpop.f32.mrf.mxu0 }
 0x17c   : > { %v1218_v20 = vpop.f32.mrf.mxu1  ;;  %v1100_v31 = vadd.f32 %v1099_v28, %v13773_v1 }
 0x17d   : > { %v13791_v22 = vpack.c.bf16 %v1215_v18, %v1211_v7  ;;  %v1219_v29 = vadd.f32 %v1218_v20, %v13760_v55  ;;  %v13802_v33 = vpop.f32.mrf.mxu0 }
 0x17e   : > { %v1220_v24 = vpop.f32.mrf.mxu1  ;;  %18521 = vst [vmem:[#allocation23_spill] sm:$0xff] %v13802_v33  ;;  %v13807_v38 = vpack.c.bf16 %v1100_v31, %v1096_v23 }
 0x17f   : > { %18519 = vst [vmem:[#allocation21_spill] sm:$0xff] %v13791_v22  ;;  %v1221_v26 = vadd.f32 %v1220_v24, %v13755_v53  ;;  %v1105_v40 = vpop.f32.mrf.mxu0 }
 0x180   : > { %v1222_v27 = vpop.f32.mrf.mxu1  ;;  %v1106_v42 = vadd.f32 %v1105_v40, %v13773_v1 }
 0x181   : > { %v1223_v30 = vadd.f32 %v1222_v27, %v13760_v55  ;;  %v13814_v44 = vpop.f32.mrf.mxu0 }
 0x182   : > { %v1224_v32 = vpop.f32.mrf.mxu1  ;;  %18523 = vst [vmem:[#allocation25_spill] sm:$0xff] %v13814_v44 }
 0x183   : > { %v13804_v34 = vpack.c.bf16 %v1223_v30, %v1219_v29  ;;  %v1225_v35 = vadd.f32 %v1224_v32, %v13755_v53  ;;  %v1109_v49 = vpop.f32.mrf.mxu0 }
 0x184   : > { %v13809_v39 = vpop.f32.mrf.mxu1  ;;  %v1110_v50 = vadd.f32 %v1109_v49, %v13773_v1 }
 0x185   : > { %v13811_v41 = vpack.c.bf16 %v1225_v35, %v1221_v26  ;;  %v13820_v52 = vpop.f32.mrf.mxu0 }
 0x186   : > { %v1230_v43 = vpop.f32.mrf.mxu1  ;;  %18524 = vst [vmem:[#allocation26_spill] sm:$0xff] %v13820_v52  ;;  %v13823_v54 = vpack.c.bf16 %v1110_v50, %v1106_v42 }
 0x187   : > { %18522 = vst [vmem:[#allocation24_spill] sm:$0xff] %v13811_v41  ;;  %v1231_v45 = vadd.f32 %v1230_v43, %v13755_v53  ;;  %v1115_v57 = vpop.f32.mrf.mxu0 }
 0x188   : > { %v13817_v48 = vpop.f32.mrf.mxu1  ;;  %v1116_v60 = vadd.f32 %v1115_v57, %v13773_v1 }
 0x189   : > { %v13830_v62 = vpop.f32.mrf.mxu0 }
 0x18a   : > { %v1234_v51 = vpop.f32.mrf.mxu1  ;;  %18526 = vst [vmem:[#allocation28_spill] sm:$0xff] %v13830_v62 }
 0x18b   : > { %v1235_v8 = vadd.f32 %v1234_v51, %v13755_v53  ;;  %v1119_v3 = vpop.f32.mrf.mxu0 }
 0x18c   : > { %v13825_v56 = vpop.f32.mrf.mxu1  ;;  %v1120_v5 = vadd.f32 %v1119_v3, %v13773_v1 }
 0x18d   : > { %v13827_v59 = vpack.c.bf16 %v1235_v8, %v1231_v45  ;;  %v13836_v9 = vpop.f32.mrf.mxu0 }
 0x18e   : > { %v1240_v61 = vpop.f32.mrf.mxu1  ;;  %18527 = vst [vmem:[#allocation29_spill] sm:$0xff] %v13836_v9  ;;  %v13839_v11 = vpack.c.bf16 %v1120_v5, %v1116_v60 }
 0x18f   : > { %18525 = vst [vmem:[#allocation27_spill] sm:$0xff] %v13827_v59  ;;  %v1241_v0 = vadd.f32 %v1240_v61, %v13755_v53  ;;  %v1125_v13 = vpop.f32.mrf.mxu0 }
 0x190   : > { %v13833_v2 = vpop.f32.mrf.mxu1  ;;  %v1126_v15 = vadd.f32 %v1125_v13, %v13773_v1 }
 0x191   : > { %v13844_v20 = vpop.f32.mrf.mxu0 }
 0x192   : > { %v1244_v7 = vpop.f32.mrf.mxu1  ;;  %18529 = vst [vmem:[#allocation31_spill] sm:$0xff] %v13844_v20 }
 0x193   : > { %v1245_v10 = vadd.f32 %v1244_v7, %v13755_v53  ;;  %v1129_v24 = vpop.f32.mrf.mxu0 }
 0x194   : > { %v1248_v12 = vpop.f32.mrf.mxu1  ;;  %v1130_v26 = vadd.f32 %v1129_v24, %v13773_v1 }
 0x195   : > { %v13841_v14 = vpack.c.bf16 %v1245_v10, %v1241_v0  ;;  %v13848_v28 = vpop.f32.mrf.mxu0 }
 0x196   : > { %v1250_v18 = vpop.f32.mrf.mxu1  ;;  %18530 = vst [vmem:[#allocation32_spill] sm:$0xff] %v13848_v28  ;;  %v13851_v30 = vpack.c.bf16 %v1130_v26, %v1126_v15 }
 0x197   : > { %18528 = vst [vmem:[#allocation30_spill] sm:$0xff] %v13841_v14  ;;  %v1251_v21 = vadd.f32 %v1250_v18, %v13755_v53  ;;  %v1135_v32 = vpop.f32.mrf.mxu0 }
 0x198   : > { %v1252_v23 = vpop.f32.mrf.mxu1  ;;  %v1136_v40 = vadd.f32 %v1135_v32, %v13773_v1 }
 0x199   : > { %v13858_v43 = vpop.f32.mrf.mxu0 }
 0x19a   : > { %v1254_v27 = vpop.f32.mrf.mxu1  ;;  %18533 = vst [vmem:[#allocation35_spill] sm:$0xff] %v13858_v43 }
 0x19b   : > { %v1255_v29 = vadd.f32 %v1254_v27, %v13755_v53  ;;  %v1139_v49 = vpop.f32.mrf.mxu0 }
 0x19c   : > { %v1258_v31 = vpop.f32.mrf.mxu1  ;;  %v1140_v8 = vadd.f32 %v1139_v49, %v13773_v1 }
 0x19d   : > { %v13853_v35 = vpack.c.bf16 %v1255_v29, %v1251_v21  ;;  %v1259_v50 = vadd.f32 %v1258_v31, %v13760_v55  ;;  %v13865_v60 = vpop.f32.mrf.mxu0 }
 0x19e   : > { %v13856_v42 = vpop.f32.mrf.mxu1  ;;  %18535 = vst [vmem:[#allocation37_spill] sm:$0xff] %v13865_v60  ;;  %v13869_v0 = vpack.c.bf16 %v1140_v8, %v1136_v40 }
 0x19f   : > { %18531 = vst [vmem:[#allocation33_spill] sm:$0xff] %v13853_v35  ;;  %18532 = vst [vmem:[#allocation34_spill] sm:$0xff] %v13856_v42  ;;  %v1145_v5 = vpop.f32.mrf.mxu0 }
 0x1a0   : > { %v1262_v45 = vpop.f32.mrf.mxu1  ;;  %v1146_v7 = vadd.f32 %v1145_v5, %v13773_v1 }
 0x1a1   : > { %v1263_v51 = vadd.f32 %v1262_v45, %v13760_v55  ;;  %v13876_v13 = vpop.f32.mrf.mxu0 }
 0x1a2   : > { %v13863_v57 = vpop.f32.mrf.mxu1  ;;  %18537 = vst [vmem:[#allocation39_spill] sm:$0xff] %v13876_v13 }
 0x1a3   : > { %18534 = vst [vmem:[#allocation36_spill] sm:$0xff] %v13863_v57  ;;  %v13867_v61 = vpack.c.bf16 %v1263_v51, %v1259_v50  ;;  %v1149_v18 = vpop.f32.mrf.mxu0  ;;  %v1253_v51 = vadd.f32 %v1252_v23, %v13760_v55 }
 0x1a4   : > { %v1268_v3 = vpop.f32.mrf.mxu1  ;;  %v1150_v26 = vadd.f32 %v1149_v18, %v13773_v1 }
 0x1a5   : > { %2185 = vrot.lane.b32.xlu1 %v13867_v61, %s13420_s21  ;;  %v1269_v21 = vadd.f32 %v1268_v3, %v13760_v55  ;;  %v13881_v27 = vpop.f32.mrf.mxu0  ;;  %v18420_v3 = vsub.s32 4, %v13746_v36 }
 0x1a6   : > { %v13874_v10 = vpop.f32.mrf.mxu1  ;;  %18538 = vst [vmem:[#allocation40_spill] sm:$0xff] %v13881_v27  ;;  %v13885_v31 = vpack.c.bf16 %v1150_v26, %v1146_v7  ;;  %v1249_v7 = vadd.f32 %v1248_v12, %v13760_v55 }
 0x1a7   : > { %18536 = vst [vmem:[#allocation38_spill] sm:$0xff] %v13874_v10  ;;  %v1155_v32 = vpop.f32.mrf.mxu0  ;;  %v13913_v23 = vrot.slane %v13750_v47, %v18420_v3  ;;  %v1239_v47 = vadd.f32 %v13825_v56, %v13760_v55  ;;  %v1233_v56 = vadd.f32 %v13817_v48, %v13760_v55 }
 0x1a8   : > { %v1272_v15 = vpop.f32.mrf.mxu1  ;;  %18539 = vst [vmem:[#allocation41_spill] sm:$0xff] %v13885_v31  ;;  %v1156_v45 = vadd.f32 %v1155_v32, %v13773_v1  ;;  %v1243_v32 = vadd.f32 %v13833_v2, %v13760_v55 }
 0x1a9   : > { %v1273_v24 = vadd.f32 %v1272_v15, %v13760_v55  ;;  %v13894_v49 = vpop.f32.mrf.mxu0 }
 0x1aa   : > { %18540 = vst [vmem:[#allocation42_spill] sm:$0xff] %v13894_v49 }
 0x1ab   : > { %v13883_v29 = vpack.c.bf16 %v1273_v24, %v1269_v21  ;;  %v1159_v50 = vpop.f32.mrf.mxu0  ;;  %v13906_v21 = vpack.c.bf16 %v1253_v51, %v1249_v7  ;;  %v1525_v24 = vsel %vm1481_vm0, %v13867_v61, 0 }
 0x1ac   : > { %v1160_v8 = vadd.f32 %v1159_v50, %v13773_v1 }
 0x1ad   : > { %2187 = vrot.lane.b32.xlu0 %v13883_v29, %s13420_s21  ;;  %12142 = vmatprep.subr.msk.bf16.mxu1 %vm1481_vm0, %v13883_v29  ;;  %v1528_v40 = vsel %vm1481_vm0, %v13883_v29, 0  ;;  %v13901_v5 = vpop.f32.mrf.mxu0  ;;  %v1522_v7 = vsel %vm1481_vm0, %v13906_v21, 0 }
 0x1ae   : > { %11631 = vmatpush3.bf16.xpose.msra.mxu1 %v1528_v40  ;;  %18541 = vst [vmem:[#allocation43_spill] sm:$0xff] %v13901_v5  ;;  %v13904_v15 = vpack.c.bf16 %v1160_v8, %v1156_v45  ;;  %v13929_v8 = vpack.c.bf16 %v1243_v32, %v1239_v47  ;;  %v1229_v32 = vadd.f32 %v13809_v39, %v13760_v55 }
 0x1af   : > { %12143 = vmatprep.subr.msk.bf16.mxu1 %vm1481_vm0, %v13867_v61  ;;  %v1311_v18 = vpop.f32.mrf.mxu0 }
 0x1b0   : > { %v1312_v12 = vadd.f32 %v1311_v18, %v13913_v23 }
 0x1b1   : > { %v13915_v1 = vpop.f32.mrf.mxu0 }
 0x1b2   : > { %18542 = vst [vmem:[#allocation44_spill] sm:$0xff] %v13915_v1  ;;  %v1510_v1 = vsel %vm1481_vm0, %v13786_v17, 0 }
 0x1b3   : > { %v1315_v26 = vpop.f32.mrf.mxu0 }
 0x1b4   : > { %v1316_v40 = vadd.f32 %v1315_v26, %v13913_v23 }
 0x1b5   : > { %v13923_v45 = vpop.f32.mrf.mxu0 }
 0x1b6   : > { %11633 = vmatpush3.bf16.xpose.msra.mxu1 %v1525_v24  ;;  %18543 = vst [vmem:[#allocation45_spill] sm:$0xff] %v13923_v45  ;;  %v13927_v50 = vpack.c.bf16 %v1316_v40, %v1312_v12 }
 0x1b7   : > { %12144 = vmatprep.subr.msk.bf16.mxu1 %vm1481_vm0, %v13906_v21  ;;  %v1321_v51 = vpop.f32.mrf.mxu0 }
 0x1b8   : > { %18544 = vst [vmem:[#allocation46_spill] sm:$0xff] %v13927_v50  ;;  %v1322_v2 = vadd.f32 %v1321_v51, %v13913_v23  ;;  %v1519_v51 = vsel %vm1481_vm0, %v13929_v8, 0 }
 0x1b9   : > { %v13933_v18 = vpop.f32.mrf.mxu0 }
 0x1ba   : > { %18545 = vst [vmem:[#allocation47_spill] sm:$0xff] %v13933_v18 }
 0x1bb   : > { %v1325_v24 = vpop.f32.mrf.mxu0 }
 0x1bc   : > { %v1326_v12 = vadd.f32 %v1325_v24, %v13913_v23 }
 0x1bd   : > { %v13941_v26 = vpop.f32.mrf.mxu0 }
 0x1be   : > { %11635 = vmatpush3.bf16.xpose.msra.mxu1 %v1522_v7  ;;  %18546 = vst [vmem:[#allocation48_spill] sm:$0xff] %v13941_v26  ;;  %v13945_v40 = vpack.c.bf16 %v1326_v12, %v1322_v2  ;;  %v13949_v7 = vpack.c.bf16 %v1233_v56, %v1229_v32  ;;  %v1513_v32 = vsel %vm1481_vm0, %v13804_v34, 0 }
 0x1bf   : > { %12145 = vmatprep.subr.msk.bf16.mxu1 %vm1481_vm0, %v13929_v8  ;;  %v13947_v47 = vpop.f32.mrf.mxu0 }
 0x1c0   : > { %18547 = vst [vmem:[#allocation49_spill] sm:$0xff] %v13945_v40  ;;  %v1516_v55 = vsel %vm1481_vm0, %v13949_v7, 0 }
 0x1c1   : > { %v13953_v3 = vpop.f32.mrf.mxu0 }
 0x1c2   : > { %18548 = vst [vmem:[#allocation50_spill] sm:$0xff] %v13953_v3  ;;  %v1507_v3 = vsel %vm1481_vm0, %v13768_v63, 0 }
 0x1c3   : > { %v1335_v48 = vpop.f32.mrf.mxu0 }
 0x1c5   : > { %v13957_v24 = vpop.f32.mrf.mxu0 }
 0x1c6   : > { %11637 = vmatpush3.bf16.xpose.msra.mxu1 %v1519_v51  ;;  %18549 = vst [vmem:[#allocation51_spill] sm:$0xff] %v13957_v24 }
 0x1c7   : > { %12146 = vmatprep.subr.msk.bf16.mxu1 %vm1481_vm0, %v13949_v7  ;;  %v1341_v46 = vpop.f32.mrf.mxu0 }
 0x1c9   : > { %v13961_v39 = vpop.f32.mrf.mxu0 }
 0x1ca   : > { %18550 = vst [vmem:[#allocation52_spill] sm:$0xff] %v13961_v39 }
 0x1cb   : > { %v1345_v2 = vpop.f32.mrf.mxu0 }
 0x1cd   : > { %v13965_v56 = vpop.f32.mrf.mxu0 }
 0x1ce   : > { %11639 = vmatpush3.bf16.xpose.msra.mxu1 %v1516_v55  ;;  %18551 = vst [vmem:[#allocation53_spill] sm:$0xff] %v13965_v56 }
 0x1cf   : > { %12147 = vmatprep.subr.msk.bf16.mxu1 %vm1481_vm0, %v13804_v34  ;;  %v1351_v12 = vpop.f32.mrf.mxu0 }
 0x1d1   : > { %v13969_v51 = vpop.f32.mrf.mxu0 }
 0x1d2   : > { %18552 = vst [vmem:[#allocation54_spill] sm:$0xff] %v13969_v51 }
 0x1d3   : > { %v1355_v37 = vpop.f32.mrf.mxu0 }
 0x1d5   : > { %v13973_v55 = vpop.f32.mrf.mxu0 }
 0x1d6   : > { %11641 = vmatpush3.bf16.xpose.msra.mxu1 %v1513_v32  ;;  %18553 = vst [vmem:[#allocation55_spill] sm:$0xff] %v13973_v55 }
 0x1d7   : > { %12148 = vmatprep.subr.msk.bf16.mxu1 %vm1481_vm0, %v13786_v17  ;;  %v1361_v45 = vpop.f32.mrf.mxu0 }
 0x1d9   : > { %v13977_v26 = vpop.f32.mrf.mxu0 }
 0x1da   : > { %18554 = vst [vmem:[#allocation56_spill] sm:$0xff] %v13977_v26 }
 0x1db   : > { %v1365_v18 = vpop.f32.mrf.mxu0 }
 0x1dc   : > { %v1366_v49 = vadd.f32 %v1365_v18, %v13913_v23  ;;  %v1342_v18 = vadd.f32 %v1341_v46, %v13913_v23 }
 0x1dd   : > { %v13981_v32 = vpop.f32.mrf.mxu0 }
 0x1de   : > { %11643 = vmatpush3.bf16.xpose.msra.mxu1 %v1510_v1  ;;  %18555 = vst [vmem:[#allocation57_spill] sm:$0xff] %v13981_v32 }
 0x1df   : > { %12149 = vmatprep.subr.msk.bf16.mxu1 %vm1481_vm0, %v13768_v63  ;;  %v1371_v24 = vpop.f32.mrf.mxu0 }
 0x1e0   : > { %v1372_v32 = vadd.f32 %v1371_v24, %v13913_v23 }
 0x1e1   : > { %v13985_v56 = vpop.f32.mrf.mxu0 }
 0x1e2   : > { %18556 = vst [vmem:[#allocation58_spill] sm:$0xff] %v13985_v56 }
 0x1e3   : > { %v1375_v39 = vpop.f32.mrf.mxu0 }
 0x1e4   : > { %v1376_v26 = vadd.f32 %v1375_v39, %v13913_v23 }
 0x1e5   : > { %v13987_v55 = vpop.f32.mrf.mxu0 }
 0x1e6   : > { %11645 = vmatpush3.bf16.xpose.msra.mxu1 %v1507_v3  ;;  %18557 = vst [vmem:[#allocation59_spill] sm:$0xff] %v13987_v55  ;;  %v1362_v55 = vadd.f32 %v1361_v45, %v13913_v23  ;;  %v14001_v27 = vpack.c.bf16 %v1376_v26, %v1372_v32  ;;  %v1356_v45 = vadd.f32 %v1355_v37, %v13913_v23 }
 0x1e7   : > { %v1381_v51 = vpop.f32.mrf.mxu0  ;;  %v1346_v26 = vadd.f32 %v1345_v2, %v13913_v23  ;;  %v1332_v37 = vadd.f32 %v13947_v47, %v13913_v23  ;;  %v14050_v47 = vpop.f32.mrf.mxu1 }
 0x1e8   : > { %v1382_v3 = vadd.f32 %v1381_v51, %v13913_v23  ;;  %v14013_v24 = vpack.c.bf16 %v1366_v49, %v1362_v55  ;;  %v1336_v49 = vadd.f32 %v1335_v48, %v13913_v23  ;;  %18564 = vst [vmem:[#allocation66_spill] sm:$0xff] %v14050_v47 }
 0x1e9   : > { %v13993_v1 = vpop.f32.mrf.mxu0  ;;  %v14030_v46 = vpack.c.bf16 %v1346_v26, %v1342_v18 }
 0x1ea   : > { %18558 = vst [vmem:[#allocation60_spill] sm:$0xff] %v13993_v1  ;;  %18560 = vst [vmem:[#allocation62_spill] sm:$0xff] %v14013_v24  ;;  %v14034_v2 = vpack.c.bf16 %v1336_v49, %v1332_v37 }
 0x1eb   : > { %v1385_v5 = vpop.f32.mrf.mxu0  ;;  %18562 = vst [vmem:[#allocation64_spill] sm:$0xff] %v14030_v46 }
 0x1ec   : > { %v1386_v56 = vadd.f32 %v1385_v5, %v13913_v23  ;;  %v1352_v5 = vadd.f32 %v1351_v12, %v13913_v23  ;;  %18563 = vst [vmem:[#allocation65_spill] sm:$0xff] %v14034_v2 }
 0x1ed   : > { %11647 = vmatmul.mubr.msk.bf16.vlgmr.msra.gmra.mxu1 %vm1481_vm0, %v13807_v38 }
 0x1ee   : > { %11650 = vmatprep.mubr.msk.bf16.mxu1 %vm1481_vm0, %v13823_v54  ;;  %v14003_v13 = vpack.c.bf16 %v1386_v56, %v1382_v3  ;;  %v14019_v39 = vpack.c.bf16 %v1356_v45, %v1352_v5 }
 0x1f0   : > { %18559 = vst [vmem:[#allocation61_spill] sm:$0xff] %v14003_v13  ;;  %11662 = vmatprep.subr.bf16.mxu1 %v14003_v13  ;;  %18561 = vst [vmem:[#allocation63_spill] sm:$0xff] %v14019_v39 }
 0x1f1   : > { %11663 = vmatpush3.bf16.msra.mxu1 %v14003_v13 }
 0x1f2   : > { %11664 = vmatprep.subr.bf16.mxu1 %v14001_v27 }
 0x1f5   : > { %11651 = vmatmul.mubr.msk.bf16.gmra.mxu1 %vm1481_vm0, %v13839_v11 }
 0x1f6   : > { %11654 = vmatprep.mubr.msk.bf16.mxu1 %vm1481_vm0, %v13851_v30  ;;  %11665 = vmatpush3.bf16.msra.mxu1 %v14001_v27 }
 0x1f7   : > { %11666 = vmatprep.subr.bf16.mxu1 %v14013_v24 }
 0x1fa   : > { %11667 = vmatpush3.bf16.msra.mxu1 %v14013_v24 }
 0x1fb   : > { %11668 = vmatprep.subr.bf16.mxu1 %v14019_v39 }
 0x1fd   : > { %11655 = vmatmul.mubr.msk.bf16.gmra.mxu1 %vm1481_vm0, %v13869_v0 }
 0x1fe   : > { %11658 = vmatprep.mubr.msk.bf16.mxu1 %vm1481_vm0, %v13885_v31  ;;  %11669 = vmatpush3.bf16.msra.mxu1 %v14019_v39 }
 0x1ff   : > { %11670 = vmatprep.subr.bf16.mxu1 %v14030_v46 }
 0x202   : > { %11671 = vmatpush3.bf16.msra.mxu1 %v14030_v46 }
 0x203   : > { %11672 = vmatprep.subr.bf16.mxu1 %v14034_v2 }
 0x205   : > { %11659 = vmatmul.mubr.msk.bf16.gmra.mxu1 %vm1481_vm0, %v13904_v15 }
 0x206   : > { %11673 = vmatpush3.bf16.msra.mxu1 %v14034_v2 }
 0x207   : > { %11674 = vmatprep.subr.bf16.mxu1 %v13945_v40 }
 0x20a   : > { %11675 = vmatpush3.bf16.msra.mxu1 %v13945_v40 }
 0x20b   : > { %11676 = vmatprep.subr.bf16.mxu1 %v13927_v50 }
 0x20e   : > { %11677 = vmatpush3.bf16.msra.mxu1 %v13927_v50 }
 0x217   : > { %v14086_v20 = vpop.permute.xlu1 %2185 }
 0x21f   : > { %v14046_v23 = vpop.permute.xlu0 %2187 }
 0x220   : > { %12150 = vmatprep.subr.msk.bf16.mxu1 %vm1481_vm0, %v14046_v23 }
 0x2ad   : > { %v11648_v48 = vpop.f32.mrf.mxu1 }
 0x2ae   : > { %1631 = vmax.xlane.f32.xlu1 %v11648_v48 }
 0x2af   : > { %v1564_v56 = vpop.f32.mrf.mxu1 }
 0x2b0   : > { %1627 = vmax.xlane.f32.xlu0 %v1564_v56 }
 0x2b1   : > { %v11649_v12 = vpop.f32.mrf.mxu1 }
 0x2b2   : > { %1633 = vmax.xlane.f32.xlu1 %v11649_v12 }
 0x2b3   : > { %v1567_v51 = vpop.f32.mrf.mxu1 }
 0x2b4   : > { %1629 = vmax.xlane.f32.xlu0 %v1567_v51 }
 0x2b5   : > { %v11652_v55 = vpop.f32.mrf.mxu1 }
 0x2b7   : > { %v14052_v32 = vpop.f32.mrf.mxu1 }
 0x2b8   : > { %1639 = vmax.xlane.f32.xlu0 %v11652_v55 }
 0x2b9   : > { %v14054_v3 = vpop.f32.mrf.mxu1 }
 0x2ba   : > { %1641 = vmax.xlane.f32.xlu1 %v14054_v3 }
 0x2bb   : > { %v14057_v5 = vpop.f32.mrf.mxu1 }
 0x2bc   : > { %1635 = vmax.xlane.f32.xlu0 %v14052_v32 }
 0x2bd   : > { %v14060_v45 = vpop.f32.mrf.mxu1 }
 0x2be   : > { %1637 = vmax.xlane.f32.xlu1 %v14057_v5 }
 0x2bf   : > { %v14063_v18 = vpop.f32.mrf.mxu1 }
 0x2c0   : > { %1647 = vmax.xlane.f32.xlu0 %v14060_v45 }
 0x2c1   : > { %v14066_v26 = vpop.f32.mrf.mxu1 }
 0x2c2   : > { %1649 = vmax.xlane.f32.xlu1 %v14066_v26 }
 0x2c3   : > { %v14069_v37 = vpop.f32.mrf.mxu1 }
 0x2c4   : > { %1643 = vmax.xlane.f32.xlu0 %v14063_v18 }
 0x2c5   : > { %v11660_v49 = vpop.f32.mrf.mxu1 }
 0x2c6   : > { %1645 = vmax.xlane.f32.xlu1 %v14069_v37 }
 0x2c7   : > { %v14073_v60 = vpop.f32.mrf.mxu1 }
 0x2c8   : > { %1655 = vmax.xlane.f32.xlu0 %v11660_v49 }
 0x2c9   : > { %v14080_v43 = vpop.f32.mrf.mxu1 }
 0x2cb   : > { %v14083_v28 = vpop.f32.mrf.mxu1 }
 0x2cc   : > { %1651 = vmax.xlane.f32.xlu0 %v14073_v60 }
 0x2d7   : > { %2181 = vrot.lane.b32.xlu1 %v13929_v8, %s13420_s21 }
 0x2e2   : > { %2183 = vrot.lane.b32.xlu0 %v13906_v21, %s13420_s21 }
 0x2fb   : > { %1657 = vmax.xlane.f32.xlu1 %v14080_v43 }
 0x2ff   : > { %1653 = vmax.xlane.f32.xlu1 %v14083_v28 }
 0x337   : > { %v1632_v9 = vpop.xlane.xlu1 %1631 }
 0x338   : > { %v1661_v62 = vsub.f32 %v11648_v48, %v1632_v9 }
 0x339   : > { %v1628_v52 = vpop.xlane.xlu0 %1627 }
 0x33a   : > { %v1679_v44 = vmul.f32 1.442695, %v1661_v62  ;;  %v1659_v33 = vsub.f32 %v1564_v56, %v1628_v52 }
 0x33b   : > { %v1634_v25 = vpop.xlane.xlu1 %1633 }
 0x33c   : > { %12663 = vpow2.f32 %v1679_v44  ;;  %v1675_v16 = vmul.f32 1.442695, %v1659_v33  ;;  %v1662_v6 = vsub.f32 %v11649_v12, %v1634_v25 }
 0x33d   : > { %v1630_v4 = vpop.xlane.xlu0 %1629 }
 0x33e   : > { %v1681_v22 = vmul.f32 1.442695, %v1662_v6  ;;  %v1660_v41 = vsub.f32 %v1567_v51, %v1630_v4  ;;  %12665 = vpow2.f32 %v1675_v16 }
 0x340   : > { %12667 = vpow2.f32 %v1681_v22  ;;  %v1677_v59 = vmul.f32 1.442695, %v1660_v41 }
 0x341   : > { %v1640_v4 = vpop.xlane.xlu0 %1639 }
 0x342   : > { %12669 = vpow2.f32 %v1677_v59  ;;  %v1665_v41 = vsub.f32 %v11652_v55, %v1640_v4 }
 0x343   : > { %v1642_v22 = vpop.xlane.xlu1 %1641 }
 0x344   : > { %v1687_v62 = vmul.f32 1.442695, %v1665_v41  ;;  %v1666_v56 = vsub.f32 %v14054_v3, %v1642_v22 }
 0x345   : > { %v1636_v6 = vpop.xlane.xlu0 %1635 }
 0x346   : > { %v1663_v52 = vsub.f32 %v14052_v32, %v1636_v6  ;;  %12671 = vpow2.f32 %v1687_v62  ;;  %v1689_v57 = vmul.f32 1.442695, %v1666_v56 }
 0x347   : > { %v1638_v44 = vpop.xlane.xlu1 %1637 }
 0x348   : > { %v1664_v48 = vsub.f32 %v14057_v5, %v1638_v44  ;;  %v1683_v12 = vmul.f32 1.442695, %v1663_v52 }
 0x349   : > { %v14088_v14 = vpop.eup %12663  ;;  %v1648_v16 = vpop.xlane.xlu0 %1647 }
 0x34a   : > { %1711 = vadd.xlane.f32.xlu0 %v14088_v14  ;;  %v1685_v10 = vmul.f32 1.442695, %v1664_v48  ;;  %12673 = vpow2.f32 %v1683_v12  ;;  %v1669_v53 = vsub.f32 %v14060_v45, %v1648_v16 }
 0x34b   : > { %v14091_v35 = vpop.eup %12665  ;;  %v1650_v51 = vpop.xlane.xlu1 %1649 }
 0x34c   : > { %12675 = vpow2.f32 %v1685_v10  ;;  %v1695_v6 = vmul.f32 1.442695, %v1669_v53  ;;  %v1670_v22 = vsub.f32 %v14066_v26, %v1650_v51 }
 0x34d   : > { %v14093_v9 = vpop.eup %12667  ;;  %v1644_v33 = vpop.xlane.xlu0 %1643  ;;  %12677 = vpow2.f32 %v1689_v57 }
 0x34e   : > { %1707 = vadd.xlane.f32.xlu0 %v14091_v35  ;;  %1713 = vadd.xlane.f32.xlu1 %v14093_v9  ;;  %v1667_v5 = vsub.f32 %v14063_v18, %v1644_v33  ;;  %v1697_v10 = vmul.f32 1.442695, %v1670_v22 }
 0x34f   : > { %v14097_v25 = vpop.eup %12669  ;;  %v1646_v4 = vpop.xlane.xlu1 %1645 }
 0x350   : > { %v1691_v41 = vmul.f32 1.442695, %v1667_v5  ;;  %v1668_v53 = vsub.f32 %v14069_v37, %v1646_v4  ;;  %v12428_v4 = vld [vmem:[#allocation6 + $0x4] ss:$8 sps:$4 sm:$0xff]   ;;  %v12426_v5 = vld [vmem:[#allocation6] ss:$8 sps:$4 sm:$0xff]  }
 0x351   : > { %v1656_v59 = vpop.xlane.xlu0 %1655 }
 0x352   : > { %1709 = vadd.xlane.f32.xlu1 %v14097_v25  ;;  %v1673_v47 = vsub.f32 %v11660_v49, %v1656_v59  ;;  %v1693_v16 = vmul.f32 1.442695, %v1668_v53 }
 0x353   : > { %v14111_v49 = vpop.permute.xlu1 %2181  ;;  %v14113_v44 = vpop.eup %12671 }
 0x354   : > { %v1703_v55 = vmul.f32 1.442695, %v1673_v47 }
 0x355   : > { %v1652_v42 = vpop.xlane.xlu0 %1651 }
 0x356   : > { %v1671_v32 = vsub.f32 %v14073_v60, %v1652_v42  ;;  %12679 = vpow2.f32 %v1703_v55  ;;  %v12425_v55 = vld [vmem:[#allocation6 + $0x14] ss:$8 sps:$4 sm:$0xff]  }
 0x357   : > { %12681 = vpow2.f32 %v1695_v6  ;;  %v14116_v60 = vpop.eup %12673  ;;  %1976 = vmatprep.subr.bf16.mxu0 %v12425_v55 }
 0x358   : > { %v1699_v3 = vmul.f32 1.442695, %v1671_v32  ;;  %v12423_v32 = vld [vmem:[#allocation6 + $0x10] ss:$8 sps:$4 sm:$0xff]  }
 0x359   : > { %v14120_v47 = vpop.eup %12675  ;;  %v2184_v51 = vpop.permute.xlu0 %2183  ;;  %1977 = vmatpush1.bf16.msra.mxu0 %v12423_v32  ;;  %v2235_v32 = vsel %vm1481_vm0, %v14046_v23, 0 }
 0x35a   : > { %12683 = vpow2.f32 %v1699_v3  ;;  %v14124_v26 = vpop.eup %12677  ;;  %1978 = vmatprep.subr.bf16.mxu0 %v12428_v4 }
 0x35b   : > { %12685 = vpow2.f32 %v1691_v41 }
 0x35c   : > { %12687 = vpow2.f32 %v1697_v10 }
 0x35d   : > { %1979 = vmatpush1.bf16.msra.mxu0 %v12426_v5 }
 0x363   : > { %2177 = vrot.lane.b32.xlu1 %v13804_v34, %s13420_s21  ;;  %v14127_v52 = vpop.eup %12679 }
 0x364   : > { %2179 = vrot.lane.b32.xlu0 %v13949_v7, %s13420_s21 }
 0x383   : > { %1719 = vadd.xlane.f32.xlu0 %v14113_v44 }
 0x384   : > { %v1658_v42 = vpop.xlane.xlu1 %1657 }
 0x385   : > { %v1674_v57 = vsub.f32 %v14080_v43, %v1658_v42  ;;  %v14131_v43 = vpop.eup %12681 }
 0x386   : > { %v14133_v59 = vpop.eup %12683 }
 0x387   : > { %v1705_v45 = vmul.f32 1.442695, %v1674_v57  ;;  %1717 = vadd.xlane.f32.xlu0 %v14120_v47  ;;  %1715 = vadd.xlane.f32.xlu1 %v14116_v60  ;;  %v14137_v62 = vpop.eup %12685 }
 0x388   : > { %v1654_v18 = vpop.xlane.xlu1 %1653 }
 0x389   : > { %12689 = vpow2.f32 %v1705_v45  ;;  %v1672_v33 = vsub.f32 %v14083_v28, %v1654_v18  ;;  %v14140_v28 = vpop.eup %12687 }
 0x38a   : > { %12691 = vpow2.f32 %v1693_v16 }
 0x38b   : > { %1735 = vadd.xlane.f32.xlu0 %v14127_v52  ;;  %1721 = vadd.xlane.f32.xlu1 %v14124_v26  ;;  %v1701_v37 = vmul.f32 1.442695, %v1672_v33 }
 0x38d   : > { %12693 = vpow2.f32 %v1701_v37 }
 0x38f   : > { %1731 = vadd.xlane.f32.xlu0 %v14133_v59  ;;  %1727 = vadd.xlane.f32.xlu1 %v14131_v43 }
 0x393   : > { %1723 = vadd.xlane.f32.xlu1 %v14137_v62 }
 0x396   : > { %v14142_v48 = vpop.eup %12689 }
 0x397   : > { %1737 = vadd.xlane.f32.xlu0 %v14142_v48  ;;  %1729 = vadd.xlane.f32.xlu1 %v14140_v28  ;;  %v14146_v56 = vpop.eup %12691 }
 0x39a   : > { %v14149_v12 = vpop.eup %12693 }
 0x39b   : > { %1725 = vadd.xlane.f32.xlu1 %v14146_v56 }
 0x39f   : > { %1733 = vadd.xlane.f32.xlu1 %v14149_v12 }
 0x3ad   : > { %2175 = vrot.lane.b32.xlu0 %v13786_v17, %s13420_s21 }
 0x3b0   : > { %2173 = vrot.lane.b32.xlu1 %v13768_v63, %s13420_s21 }
 0x3b1   : > { %2149 = vrot.lane.b32.xlu0 %v13789_v19, %s13420_s21 }
 0x3b4   : > { %2151 = vrot.lane.b32.xlu1 %v13807_v38, %s13420_s21 }
 0x3b5   : > { %2153 = vrot.lane.b32.xlu0 %v13823_v54, %s13420_s21 }
 0x3b8   : > { %2155 = vrot.lane.b32.xlu1 %v13839_v11, %s13420_s21 }
 0x3b9   : > { %2157 = vrot.lane.b32.xlu0 %v13851_v30, %s13420_s21 }
 0x3bc   : > { %2159 = vrot.lane.b32.xlu1 %v13869_v0, %s13420_s21 }
 0x3bd   : > { %2161 = vrot.lane.b32.xlu0 %v13885_v31, %s13420_s21 }
 0x3c0   : > { %2163 = vrot.lane.b32.xlu1 %v13904_v15, %s13420_s21 }
 0x3c1   : > { %2508 = vrot.lane.b32.xlu0 %v14003_v13, %s13420_s21 }
 0x3c4   : > { %2506 = vrot.lane.b32.xlu1 %v14001_v27, %s13420_s21 }
 0x3c5   : > { %2504 = vrot.lane.b32.xlu0 %v14013_v24, %s13420_s21 }
 0x3c8   : > { %2498 = vrot.lane.b32.xlu1 %v14034_v2, %s13420_s21 }
 0x3c9   : > { %2502 = vrot.lane.b32.xlu0 %v14019_v39, %s13420_s21 }
 0x3cc   : > { %2494 = vrot.lane.b32.xlu1 %v13927_v50, %s13420_s21 }
 0x3cd   : > { %2500 = vrot.lane.b32.xlu0 %v14030_v46, %s13420_s21 }
 0x3d3   : > { %v1712_v6 = vpop.xlane.xlu0 %1711 }
 0x3d7   : > { %v1708_v3 = vpop.xlane.xlu0 %1707  ;;  %v1714_v22 = vpop.xlane.xlu1 %1713 }
 0x3d8   : > { %12695 = vrcp.f32 %v1714_v22 }
 0x3d9   : > { %12697 = vrcp.f32 %v1708_v3 }
 0x3da   : > { %12699 = vrcp.f32 %v1712_v6 }
 0x3db   : > { %v1710_v41 = vpop.xlane.xlu1 %1709  ;;  %v2180_v23 = vpop.permute.xlu0 %2179 }
 0x3dc   : > { %12701 = vrcp.f32 %v1710_v41 }
 0x3e5   : > { %v12696_v10 = vpop.eup %12695 }
 0x3e6   : > { %v12698_v42 = vpop.eup %12697  ;;  %v1758_v45 = vmul.f32 %v12696_v10, %v14093_v9  ;;  %v2232_v9 = vsel %vm1481_vm0, %v14086_v20, 0 }
 0x3e7   : > { %v12700_v53 = vpop.eup %12699  ;;  %v1755_v18 = vmul.f32 %v12698_v42, %v14091_v35  ;;  %v2229_v35 = vsel %vm1481_vm0, %v2184_v51, 0 }
 0x3e8   : > { %v1757_v33 = vmul.f32 %v12700_v53, %v14088_v14  ;;  %v2226_v14 = vsel %vm1481_vm0, %v14111_v49, 0 }
 0x3e9   : > { %v12702_v57 = vpop.eup %12701 }
 0x3ea   : > { %v1756_v16 = vmul.f32 %v12702_v57, %v14097_v25  ;;  %v1772_v55 = vpack.c.bf16 %v1758_v45, %v1757_v33  ;;  %v2178_v25 = vpop.permute.xlu1 %2177 }
 0x3ec   : > { %v1771_v37 = vpack.c.bf16 %v1756_v16, %v1755_v18 }
 0x3ee   : > { %11678 = vmatprep.mubr.bf16.mxu1 %v1771_v37 }
 0x3ef   : > { %11679 = vmatmul.mubr.bf16.vlgmr.msra.gmra.mxu1 %v1772_v55 }
 0x3f0   : > { %11695 = vmatpush3.bf16.xpose.msra.mxu1 %v2235_v32 }
 0x3f1   : > { %12151 = vmatprep.subr.msk.bf16.mxu1 %vm1481_vm0, %v14086_v20  ;;  %v2223_v20 = vsel %vm1481_vm0, %v2180_v23, 0 }
 0x3f8   : > { %11697 = vmatpush3.bf16.xpose.msra.mxu1 %v2232_v9 }
 0x3f9   : > { %12152 = vmatprep.subr.msk.bf16.mxu1 %vm1481_vm0, %v2184_v51 }
 0x400   : > { %11699 = vmatpush3.bf16.xpose.msra.mxu1 %v2229_v35 }
 0x401   : > { %12153 = vmatprep.subr.msk.bf16.mxu1 %vm1481_vm0, %v14111_v49  ;;  %v2220_v49 = vsel %vm1481_vm0, %v2178_v25, 0 }
 0x408   : > { %11701 = vmatpush3.bf16.xpose.msra.mxu1 %v2226_v14 }
 0x409   : > { %12154 = vmatprep.subr.msk.bf16.mxu1 %vm1481_vm0, %v2180_v23 }
 0x40c   : > { %v1720_v4 = vpop.xlane.xlu0 %1719 }
 0x410   : > { %11703 = vmatpush3.bf16.xpose.msra.mxu1 %v2223_v20  ;;  %v1718_v6 = vpop.xlane.xlu0 %1717  ;;  %v1716_v5 = vpop.xlane.xlu1 %1715 }
 0x411   : > { %12703 = vrcp.f32 %v1718_v6  ;;  %12155 = vmatprep.subr.msk.bf16.mxu1 %vm1481_vm0, %v2178_v25 }
 0x412   : > { %12705 = vrcp.f32 %v1716_v5 }
 0x413   : > { %12707 = vrcp.f32 %v1720_v4 }
 0x414   : > { %v1722_v51 = vpop.xlane.xlu1 %1721  ;;  %v1736_v3 = vpop.xlane.xlu0 %1735 }
 0x415   : > { %12709 = vrcp.f32 %v1722_v51 }
 0x418   : > { %11705 = vmatpush3.bf16.xpose.msra.mxu1 %v2220_v49  ;;  %v1728_v22 = vpop.xlane.xlu1 %1727  ;;  %v1732_v41 = vpop.xlane.xlu0 %1731 }
 0x41c   : > { %v1724_v10 = vpop.xlane.xlu1 %1723 }
 0x41e   : > { %v12704_v42 = vpop.eup %12703 }
 0x41f   : > { %v12706_v53 = vpop.eup %12705  ;;  %v1760_v57 = vmul.f32 %v12704_v42, %v14120_v47 }
 0x420   : > { %v1738_v45 = vpop.xlane.xlu0 %1737  ;;  %v1730_v18 = vpop.xlane.xlu1 %1729  ;;  %v1759_v16 = vmul.f32 %v12706_v53, %v14116_v60 }
 0x421   : > { %v12708_v33 = vpop.eup %12707  ;;  %12711 = vrcp.f32 %v1730_v18 }
 0x422   : > { %v1773_v37 = vpack.c.bf16 %v1760_v57, %v1759_v16  ;;  %v12710_v55 = vpop.eup %12709  ;;  %12713 = vrcp.f32 %v1724_v10  ;;  %v1761_v35 = vmul.f32 %v12708_v33, %v14113_v44 }
 0x423   : > { %12715 = vrcp.f32 %v1728_v22  ;;  %v1762_v14 = vmul.f32 %v12710_v55, %v14124_v26  ;;  %v18431_v55 = vmov 0  }
 0x424   : > { %11682 = vmatprep.mubr.bf16.mxu1 %v1773_v37  ;;  %v2176_v32 = vpop.permute.xlu0 %2175  ;;  %v1726_v9 = vpop.xlane.xlu1 %1725  ;;  %1996 = vmatprep.mubr.bf16.mxu0 %v18431_v55 }
 0x425   : > { %12717 = vrcp.f32 %v1726_v9  ;;  %12156 = vmatprep.subr.msk.bf16.mxu1 %vm1481_vm0, %v2176_v32  ;;  %v2217_v47 = vsel %vm1481_vm0, %v2176_v32, 0  ;;  %v1774_v60 = vpack.c.bf16 %v1762_v14, %v1761_v35 }
 0x426   : > { %11707 = vmatpush3.bf16.xpose.msra.mxu1 %v2217_v47  ;;  %12719 = vrcp.f32 %v1732_v41 }
 0x427   : > { %11683 = vmatmul.mubr.bf16.gmra.mxu1 %v1774_v60 }
 0x428   : > { %v2150_v23 = vpop.permute.xlu0 %2149  ;;  %v1734_v25 = vpop.xlane.xlu1 %1733 }
 0x429   : > { %12721 = vrcp.f32 %v1734_v25 }
 0x42a   : > { %12723 = vrcp.f32 %v1738_v45 }
 0x42b   : > { %12725 = vrcp.f32 %v1736_v3 }
 0x42c   : > { %v2154_v4 = vpop.permute.xlu0 %2153  ;;  %v2174_v20 = vpop.permute.xlu1 %2173 }
 0x42d   : > { %12157 = vmatprep.subr.msk.bf16.mxu1 %vm1481_vm0, %v2174_v20  ;;  %v2214_v44 = vsel %vm1481_vm0, %v2174_v20, 0 }
 0x42e   : > { %11709 = vmatpush3.bf16.xpose.msra.mxu1 %v2214_v44  ;;  %v12712_v26 = vpop.eup %12711 }
 0x42f   : > { %v12714_v6 = vpop.eup %12713  ;;  %v1766_v22 = vmul.f32 %v12712_v26, %v14140_v28 }
 0x430   : > { %v2158_v5 = vpop.permute.xlu0 %2157  ;;  %v12716_v51 = vpop.eup %12715  ;;  %v1763_v41 = vmul.f32 %v12714_v6, %v14137_v62 }
 0x431   : > { %v1765_v53 = vmul.f32 %v12716_v51, %v14131_v43 }
 0x432   : > { %v12718_v49 = vpop.eup %12717 }
 0x433   : > { %v1764_v10 = vmul.f32 %v12718_v49, %v14146_v56  ;;  %v12720_v42 = vpop.eup %12719  ;;  %v1776_v18 = vpack.c.bf16 %v1766_v22, %v1765_v53 }
 0x434   : > { %v2162_v3 = vpop.permute.xlu0 %2161  ;;  %v1767_v33 = vmul.f32 %v12720_v42, %v14133_v59  ;;  %v2152_v59 = vpop.permute.xlu1 %2151 }
 0x435   : > { %v1775_v57 = vpack.c.bf16 %v1764_v10, %v1763_v41 }
 0x436   : > { %v12722_v45 = vpop.eup %12721 }
 0x437   : > { %v12724_v16 = vpop.eup %12723  ;;  %11686 = vmatprep.mubr.bf16.mxu1 %v1775_v57  ;;  %v1768_v37 = vmul.f32 %v12722_v45, %v14149_v12 }
 0x438   : > { %v2509_v28 = vpop.permute.xlu0 %2508  ;;  %11687 = vmatmul.mubr.bf16.gmra.mxu1 %v1776_v18  ;;  %v12726_v62 = vpop.eup %12725  ;;  %v1770_v32 = vmul.f32 %v12724_v16, %v14142_v48 }
 0x439   : > { %v1777_v56 = vpack.c.bf16 %v1768_v37, %v1767_v33  ;;  %11726 = vmatprep.subr.bf16.mxu0 %v2509_v28  ;;  %v1769_v43 = vmul.f32 %v12726_v62, %v14127_v52  ;;  %v2156_v12 = vpop.permute.xlu1 %2155 }
 0x43b   : > { %11690 = vmatprep.mubr.bf16.mxu1 %v1777_v56  ;;  %v1778_v9 = vpack.c.bf16 %v1770_v32, %v1769_v43 }
 0x43c   : > { %v2505_v25 = vpop.permute.xlu0 %2504 }
 0x43d   : > { %v2160_v35 = vpop.permute.xlu1 %2159 }
 0x440   : > { %11691 = vmatmul.mubr.bf16.gmra.mxu1 %v1778_v9  ;;  %v2503_v44 = vpop.permute.xlu0 %2502 }
 0x441   : > { %11710 = vmatprep.mubr.msk.bf16.mxu1 %vm1481_vm0, %v2150_v23  ;;  %v2164_v52 = vpop.permute.xlu1 %2163 }
 0x444   : > { %v2501_v26 = vpop.permute.xlu0 %2500 }
 0x448   : > { %11711 = vmatmul.mubr.msk.bf16.vlgmr.msra.gmra.mxu1 %vm1481_vm0, %v2152_v59 }
 0x449   : > { %11714 = vmatprep.mubr.msk.bf16.mxu1 %vm1481_vm0, %v2154_v4  ;;  %v2507_v4 = vpop.permute.xlu1 %2506 }
 0x44d   : > { %v2499_v6 = vpop.permute.xlu1 %2498 }
 0x450   : > { %11715 = vmatmul.mubr.msk.bf16.gmra.mxu1 %vm1481_vm0, %v2156_v12 }
 0x451   : > { %11718 = vmatprep.mubr.msk.bf16.mxu1 %vm1481_vm0, %v2158_v5 }
 0x458   : > { %11719 = vmatmul.mubr.msk.bf16.gmra.mxu1 %vm1481_vm0, %v2160_v35 }
 0x459   : > { %11722 = vmatprep.mubr.msk.bf16.mxu1 %vm1481_vm0, %v2162_v3 }
 0x460   : > { %11723 = vmatmul.mubr.msk.bf16.gmra.mxu1 %vm1481_vm0, %v2164_v52 }
 0x461   : > { %2735 = vmatprep.mubr.bf16.mxu1 %v18431_v55 }
 0x4af   : > { %v11680_v48 = vpop.f32.mrf.mxu1 }
 0x4b1   : > { %v1813_v14 = vpop.f32.mrf.mxu1 }
 0x4b3   : > { %v11681_v47 = vpop.f32.mrf.mxu1 }
 0x4b4   : > { %v1909_v20 = vpack.c.bf16 %v11681_v47, %v11680_v48 }
 0x4b5   : > { %v1816_v60 = vpop.f32.mrf.mxu1 }
 0x4b6   : > { %v1908_v23 = vpack.c.bf16 %v1816_v60, %v1813_v14 }
 0x4b8   : > { %10963 = vmatmul.mubr.msk.bf16.vlgmr.msra.gmra.mxu0 %vm1481_vm0, %v1908_v23 }
 0x4b9   : > { %11727 = vmatpush3.bf16.msra.mxu0 %v2509_v28  ;;  %2006 = vmatprep.mubr.bf16.mxu0 %v18431_v55 }
 0x4ba   : > { %11728 = vmatprep.subr.bf16.mxu0 %v2507_v4 }
 0x4bd   : > { %11729 = vmatpush3.bf16.msra.mxu0 %v2507_v4 }
 0x4be   : > { %11730 = vmatprep.subr.bf16.mxu0 %v2505_v25 }
 0x4c0   : > { %10964 = vmatmul.mubr.msk.bf16.gmra.mxu0 %vm1481_vm0, %v1909_v20 }
 0x4c1   : > { %11731 = vmatpush3.bf16.msra.mxu0 %v2505_v25  ;;  %2016 = vmatprep.mubr.bf16.mxu0 %v18431_v55 }
 0x4c2   : > { %11732 = vmatprep.subr.bf16.mxu0 %v2503_v44 }
 0x4c5   : > { %11733 = vmatpush3.bf16.msra.mxu0 %v2503_v44 }
 0x4c6   : > { %11734 = vmatprep.subr.bf16.mxu0 %v2501_v26 }
 0x4c9   : > { %11735 = vmatpush3.bf16.msra.mxu0 %v2501_v26 }
 0x4ca   : > { %11736 = vmatprep.subr.bf16.mxu0 %v2499_v6 }
 0x4cd   : > { %11737 = vmatpush3.bf16.msra.mxu0 %v2499_v6 }
 0x4e7   : > { %v11684_v5 = vpop.f32.mrf.mxu1 }
 0x4e9   : > { %v1829_v51 = vpop.f32.mrf.mxu1 }
 0x4eb   : > { %v11685_v49 = vpop.f32.mrf.mxu1 }
 0x4ec   : > { %v1911_v10 = vpack.c.bf16 %v11685_v49, %v11684_v5  ;;  %v2495_v5 = vpop.permute.xlu1 %2494 }
 0x4ed   : > { %v1832_v22 = vpop.f32.mrf.mxu1 }
 0x4ee   : > { %v1910_v41 = vpack.c.bf16 %v1832_v22, %v1829_v51 }
 0x4f0   : > { %10965 = vmatmul.mubr.msk.bf16.gmra.mxu0 %vm1481_vm0, %v1910_v41 }
 0x4f1   : > { %2026 = vmatprep.mubr.bf16.mxu0 %v18431_v55 }
 0x4f8   : > { %v11688_v42 = vpop.f32.mrf.mxu1  ;;  %10966 = vmatmul.mubr.msk.bf16.gmra.mxu0 %vm1481_vm0, %v1911_v10 }
 0x4f9   : > { %2036 = vmatprep.mubr.bf16.mxu0 %v18431_v55 }
 0x4fa   : > { %v1845_v3 = vpop.f32.mrf.mxu1 }
 0x4fc   : > { %v11689_v53 = vpop.f32.mrf.mxu1 }
 0x4fd   : > { %v1913_v28 = vpack.c.bf16 %v11689_v53, %v11688_v42 }
 0x4fe   : > { %v1848_v57 = vpop.f32.mrf.mxu1 }
 0x4ff   : > { %v1912_v45 = vpack.c.bf16 %v1848_v57, %v1845_v3 }
 0x500   : > { %v11692_v18 = vpop.f32.mrf.mxu1 }
 0x501   : > { %10967 = vmatmul.mubr.msk.bf16.gmra.mxu0 %vm1481_vm0, %v1912_v45 }
 0x502   : > { %v1861_v16 = vpop.f32.mrf.mxu1  ;;  %2046 = vmatprep.mubr.bf16.mxu0 %v18431_v55 }
 0x504   : > { %v11693_v33 = vpop.f32.mrf.mxu1 }
 0x505   : > { %v1915_v48 = vpack.c.bf16 %v11693_v33, %v11692_v18 }
 0x506   : > { %v1864_v37 = vpop.f32.mrf.mxu1 }
 0x507   : > { %v1914_v9 = vpack.c.bf16 %v1864_v37, %v1861_v16 }
 0x508   : > { %v11712_v62 = vpop.f32.mrf.mxu1 }
 0x509   : > { %10968 = vmatmul.mubr.msk.bf16.gmra.mxu0 %vm1481_vm0, %v1913_v28  ;;  %2338 = vmax.xlane.f32.xlu0 %v11712_v62 }
 0x50a   : > { %v2271_v56 = vpop.f32.mrf.mxu1  ;;  %2056 = vmatprep.mubr.bf16.mxu0 %v18431_v55 }
 0x50c   : > { %v11713_v32 = vpop.f32.mrf.mxu1 }
 0x50d   : > { %2334 = vmax.xlane.f32.xlu0 %v2271_v56 }
 0x50e   : > { %v2274_v43 = vpop.f32.mrf.mxu1 }
 0x50f   : > { %2336 = vmax.xlane.f32.xlu1 %v2274_v43 }
 0x510   : > { %v14244_v59 = vpop.f32.mrf.mxu1 }
 0x511   : > { %10969 = vmatmul.mubr.msk.bf16.gmra.mxu0 %vm1481_vm0, %v1914_v9  ;;  %2340 = vmax.xlane.f32.xlu0 %v11713_v32 }
 0x512   : > { %v14247_v12 = vpop.f32.mrf.mxu1  ;;  %2066 = vmatprep.mubr.bf16.mxu0 %v18431_v55 }
 0x514   : > { %v14250_v35 = vpop.f32.mrf.mxu1 }
 0x515   : > { %2348 = vmax.xlane.f32.xlu1 %v14250_v35 }
 0x516   : > { %v14253_v52 = vpop.f32.mrf.mxu1 }
 0x518   : > { %v14255_v14 = vpop.f32.mrf.mxu1 }
 0x519   : > { %10970 = vmatmul.mubr.msk.bf16.gmra.mxu0 %vm1481_vm0, %v1915_v48  ;;  %2344 = vmax.xlane.f32.xlu1 %v14253_v52 }
 0x51a   : > { %v14259_v47 = vpop.f32.mrf.mxu1 }
 0x51c   : > { %v14261_v60 = vpop.f32.mrf.mxu1 }
 0x51d   : > { %2356 = vmax.xlane.f32.xlu1 %v14261_v60 }
 0x51e   : > { %v14264_v23 = vpop.f32.mrf.mxu1 }
 0x520   : > { %v14276_v25 = vpop.f32.mrf.mxu1 }
 0x521   : > { %2352 = vmax.xlane.f32.xlu1 %v14264_v23 }
 0x522   : > { %v14279_v4 = vpop.f32.mrf.mxu1 }
 0x524   : > { %v14282_v20 = vpop.f32.mrf.mxu1 }
 0x526   : > { %v14286_v44 = vpop.f32.mrf.mxu1 }
 0x527   : > { %2496 = vrot.lane.b32.xlu0 %v13945_v40, %s13420_s21 }
 0x532   : > { %2908 = vrot.lane.b32.xlu1 %v13867_v61, %s13422_s7 }
 0x536   : > { %2904 = vrot.lane.b32.xlu1 %v13929_v8, %s13422_s7 }
 0x546   : > { %2346 = vmax.xlane.f32.xlu0 %v14244_v59 }
 0x54a   : > { %2342 = vmax.xlane.f32.xlu0 %v14247_v12 }
 0x54e   : > { %2354 = vmax.xlane.f32.xlu0 %v14255_v14 }
 0x552   : > { %2350 = vmax.xlane.f32.xlu0 %v14259_v47 }
 0x556   : > { %2362 = vmax.xlane.f32.xlu0 %v14276_v25 }
 0x55a   : > { %2358 = vmax.xlane.f32.xlu0 %v14279_v4  ;;  %2364 = vmax.xlane.f32.xlu1 %v14282_v20 }
 0x55e   : > { %2360 = vmax.xlane.f32.xlu1 %v14286_v44 }
 0x570   : > { %2910 = vrot.lane.b32.xlu0 %v13883_v29, %s13422_s7 }
 0x574   : > { %2906 = vrot.lane.b32.xlu0 %v13906_v21, %s13422_s7 }
 0x578   : > { %2902 = vrot.lane.b32.xlu0 %v13949_v7, %s13422_s7 }
 0x592   : > { %v2339_v26 = vpop.xlane.xlu0 %2338 }
 0x593   : > { %v2368_v6 = vsub.f32 %v11712_v62, %v2339_v26 }
 0x595   : > { %v2386_v51 = vmul.f32 1.442695, %v2368_v6 }
 0x596   : > { %v2335_v49 = vpop.xlane.xlu0 %2334 }
 0x597   : > { %12727 = vpow2.f32 %v2386_v51  ;;  %v2366_v22 = vsub.f32 %v2271_v56, %v2335_v49 }
 0x598   : > { %v2337_v41 = vpop.xlane.xlu1 %2336 }
 0x599   : > { %v2382_v10 = vmul.f32 1.442695, %v2366_v22  ;;  %v2367_v3 = vsub.f32 %v2274_v43, %v2337_v41 }
 0x59a   : > { %v2341_v42 = vpop.xlane.xlu0 %2340 }
 0x59b   : > { %12729 = vpow2.f32 %v2382_v10  ;;  %v2369_v53 = vsub.f32 %v11713_v32, %v2341_v42  ;;  %v2384_v18 = vmul.f32 1.442695, %v2367_v3 }
 0x59d   : > { %v2388_v57 = vmul.f32 1.442695, %v2369_v53 }
 0x59e   : > { %v2497_v45 = vpop.permute.xlu0 %2496  ;;  %v2349_v62 = vpop.xlane.xlu1 %2348 }
 0x59f   : > { %12731 = vpow2.f32 %v2388_v57  ;;  %11738 = vmatprep.subr.bf16.mxu0 %v2497_v45  ;;  %v2373_v6 = vsub.f32 %v14250_v35, %v2349_v62 }
 0x5a0   : > { %11739 = vmatpush3.bf16.msra.mxu0 %v2497_v45  ;;  %12733 = vpow2.f32 %v2384_v18 }
 0x5a1   : > { %11740 = vmatprep.subr.bf16.mxu0 %v2495_v5  ;;  %v2396_v10 = vmul.f32 1.442695, %v2373_v6 }
 0x5a2   : > { %v2345_v56 = vpop.xlane.xlu1 %2344 }
 0x5a3   : > { %v2371_v43 = vsub.f32 %v14253_v52, %v2345_v56 }
 0x5a4   : > { %v14295_v16 = vpop.eup %12727  ;;  %11741 = vmatpush3.bf16.msra.mxu0 %v2495_v5 }
 0x5a5   : > { %2418 = vadd.xlane.f32.xlu1 %v14295_v16  ;;  %v2392_v5 = vmul.f32 1.442695, %v2371_v43 }
 0x5a6   : > { %v2357_v32 = vpop.xlane.xlu1 %2356 }
 0x5a8   : > { %v14298_v33 = vpop.eup %12729 }
 0x5a9   : > { %2414 = vadd.xlane.f32.xlu1 %v14298_v33 }
 0x5aa   : > { %v2353_v51 = vpop.xlane.xlu1 %2352 }
 0x5ac   : > { %v14301_v37 = vpop.eup %12731 }
 0x5ad   : > { %2420 = vadd.xlane.f32.xlu1 %v14301_v37  ;;  %v14304_v28 = vpop.eup %12733 }
 0x5ae   : > { %v14314_v52 = vpop.permute.xlu1 %2908 }
 0x5b1   : > { %2416 = vadd.xlane.f32.xlu1 %v14304_v28 }
 0x5b2   : > { %v14319_v62 = vpop.permute.xlu1 %2904 }
 0x5c2   : > { %2900 = vrot.lane.b32.xlu1 %v13804_v34, %s13422_s7 }
 0x5cf   : > { %v2347_v9 = vpop.xlane.xlu0 %2346 }
 0x5d0   : > { %v2372_v48 = vsub.f32 %v14244_v59, %v2347_v9  ;;  %v2377_v59 = vsub.f32 %v14261_v60, %v2357_v32 }
 0x5d2   : > { %v2394_v26 = vmul.f32 1.442695, %v2372_v48  ;;  %v2404_v18 = vmul.f32 1.442695, %v2377_v59 }
 0x5d3   : > { %v2343_v49 = vpop.xlane.xlu0 %2342 }
 0x5d4   : > { %12735 = vpow2.f32 %v2394_v26  ;;  %v2370_v22 = vsub.f32 %v14247_v12, %v2343_v49  ;;  %v2375_v12 = vsub.f32 %v14264_v23, %v2353_v51 }
 0x5d5   : > { %12737 = vpow2.f32 %v2392_v5 }
 0x5d6   : > { %v2390_v41 = vmul.f32 1.442695, %v2370_v22  ;;  %v2400_v60 = vmul.f32 1.442695, %v2375_v12  ;;  %v12432_v12 = vld [vmem:[#allocation6 + $0x20] ss:$8 sps:$4 sm:$0xff]  }
 0x5d7   : > { %v2355_v42 = vpop.xlane.xlu0 %2354 }
 0x5d8   : > { %12739 = vpow2.f32 %v2390_v41  ;;  %v2376_v3 = vsub.f32 %v14255_v14, %v2355_v42 }
 0x5d9   : > { %12741 = vpow2.f32 %v2396_v10 }
 0x5da   : > { %v2402_v53 = vmul.f32 1.442695, %v2376_v3 }
 0x5db   : > { %v2351_v35 = vpop.xlane.xlu0 %2350 }
 0x5dc   : > { %12743 = vpow2.f32 %v2402_v53  ;;  %v2374_v57 = vsub.f32 %v14259_v47, %v2351_v35 }
 0x5de   : > { %v2398_v45 = vmul.f32 1.442695, %v2374_v57  ;;  %v12431_v57 = vld [vmem:[#allocation6 + $0x34] ss:$8 sps:$4 sm:$0xff]  }
 0x5df   : > { %v2363_v56 = vpop.xlane.xlu0 %2362  ;;  %2715 = vmatprep.subr.bf16.mxu1 %v12431_v57 }
 0x5e0   : > { %12745 = vpow2.f32 %v2398_v45  ;;  %v2380_v14 = vsub.f32 %v14276_v25, %v2363_v56  ;;  %v12429_v45 = vld [vmem:[#allocation6 + $0x30] ss:$8 sps:$4 sm:$0xff]  }
 0x5e1   : > { %v14322_v43 = vpop.eup %12735  ;;  %12747 = vpow2.f32 %v2404_v18  ;;  %v12434_v18 = vld [vmem:[#allocation6 + $0x24] ss:$8 sps:$4 sm:$0xff]   ;;  %2716 = vmatpush1.bf16.msra.mxu1 %v12429_v45 }
 0x5e2   : > { %v2410_v9 = vmul.f32 1.442695, %v2380_v14  ;;  %2426 = vadd.xlane.f32.xlu0 %v14322_v43  ;;  %v14325_v47 = vpop.eup %12737  ;;  %2717 = vmatprep.subr.bf16.mxu1 %v12434_v18 }
 0x5e3   : > { %v2359_v32 = vpop.xlane.xlu0 %2358  ;;  %v2365_v48 = vpop.xlane.xlu1 %2364 }
 0x5e4   : > { %12749 = vpow2.f32 %v2410_v9  ;;  %v2378_v23 = vsub.f32 %v14279_v4, %v2359_v32  ;;  %v2381_v26 = vsub.f32 %v14282_v20, %v2365_v48 }
 0x5e5   : > { %v14329_v6 = vpop.eup %12739  ;;  %12751 = vpow2.f32 %v2400_v60  ;;  %2718 = vmatpush1.bf16.msra.mxu1 %v12432_v12 }
 0x5e6   : > { %v2406_v5 = vmul.f32 1.442695, %v2378_v23  ;;  %2422 = vadd.xlane.f32.xlu0 %v14329_v6  ;;  %2424 = vadd.xlane.f32.xlu1 %v14325_v47  ;;  %v2412_v25 = vmul.f32 1.442695, %v2381_v26  ;;  %v14335_v22 = vpop.eup %12741 }
 0x5e7   : > { %v14333_v51 = vpop.permute.xlu0 %2910  ;;  %v2361_v49 = vpop.xlane.xlu1 %2360 }
 0x5e8   : > { %12753 = vpow2.f32 %v2406_v5  ;;  %v2379_v41 = vsub.f32 %v14286_v44, %v2361_v49  ;;  %12158 = vmatprep.subr.msk.bf16.mxu0 %vm1481_vm0, %v14333_v51  ;;  %v2958_v45 = vsel %vm1481_vm0, %v14333_v51, 0 }
 0x5e9   : > { %v14340_v4 = vpop.eup %12743  ;;  %12755 = vpow2.f32 %v2412_v25 }
 0x5ea   : > { %v2408_v20 = vmul.f32 1.442695, %v2379_v41  ;;  %2428 = vadd.xlane.f32.xlu0 %v14335_v22  ;;  %2434 = vadd.xlane.f32.xlu1 %v14340_v4 }
 0x5eb   : > { %v2907_v18 = vpop.permute.xlu0 %2906 }
 0x5ec   : > { %12757 = vpow2.f32 %v2408_v20 }
 0x5ed   : > { %v14344_v10 = vpop.eup %12745 }
 0x5ee   : > { %2430 = vadd.xlane.f32.xlu1 %v14344_v10  ;;  %v14347_v42 = vpop.eup %12747 }
 0x5f1   : > { %v14349_v3 = vpop.eup %12749 }
 0x5f2   : > { %2442 = vadd.xlane.f32.xlu0 %v14349_v3  ;;  %2436 = vadd.xlane.f32.xlu1 %v14347_v42  ;;  %v14353_v44 = vpop.eup %12751 }
 0x5f5   : > { %v14355_v53 = vpop.eup %12753 }
 0x5f6   : > { %2438 = vadd.xlane.f32.xlu0 %v14355_v53  ;;  %2432 = vadd.xlane.f32.xlu1 %v14353_v44  ;;  %v14359_v59 = vpop.eup %12755 }
 0x5f9   : > { %v14361_v35 = vpop.eup %12757 }
 0x5fa   : > { %2444 = vadd.xlane.f32.xlu0 %v14359_v59  ;;  %2440 = vadd.xlane.f32.xlu1 %v14361_v35 }
 0x60b   : > { %2896 = vrot.lane.b32.xlu1 %v13768_v63, %s13422_s7 }
 0x60f   : > { %2882 = vrot.lane.b32.xlu1 %v13807_v38, %s13422_s7 }
 0x610   : > { %2898 = vrot.lane.b32.xlu0 %v13786_v17, %s13422_s7 }
 0x613   : > { %2886 = vrot.lane.b32.xlu1 %v13839_v11, %s13422_s7 }
 0x614   : > { %2880 = vrot.lane.b32.xlu0 %v13789_v19, %s13422_s7 }
 0x617   : > { %2890 = vrot.lane.b32.xlu1 %v13869_v0, %s13422_s7 }
 0x618   : > { %2884 = vrot.lane.b32.xlu0 %v13823_v54, %s13422_s7 }
 0x61b   : > { %2894 = vrot.lane.b32.xlu1 %v13904_v15, %s13422_s7 }
 0x61c   : > { %2888 = vrot.lane.b32.xlu0 %v13851_v30, %s13422_s7 }
 0x61f   : > { %3221 = vrot.lane.b32.xlu1 %v14001_v27, %s13422_s7 }
 0x620   : > { %2892 = vrot.lane.b32.xlu0 %v13885_v31, %s13422_s7 }
 0x623   : > { %3213 = vrot.lane.b32.xlu1 %v14034_v2, %s13422_s7 }
 0x624   : > { %3223 = vrot.lane.b32.xlu0 %v14003_v13, %s13422_s7 }
 0x627   : > { %3209 = vrot.lane.b32.xlu1 %v13927_v50, %s13422_s7 }
 0x628   : > { %3219 = vrot.lane.b32.xlu0 %v14013_v24, %s13422_s7 }
 0x62c   : > { %3217 = vrot.lane.b32.xlu0 %v14019_v39, %s13422_s7 }
 0x62e   : > { %v2419_v56 = vpop.xlane.xlu1 %2418 }
 0x630   : > { %3215 = vrot.lane.b32.xlu0 %v14030_v46, %s13422_s7 }
 0x632   : > { %v2415_v14 = vpop.xlane.xlu1 %2414 }
 0x636   : > { %v2421_v9 = vpop.xlane.xlu1 %2420 }
 0x637   : > { %12759 = vrcp.f32 %v2421_v9 }
 0x638   : > { %12761 = vrcp.f32 %v2415_v14 }
 0x639   : > { %12763 = vrcp.f32 %v2419_v56 }
 0x63a   : > { %v2417_v60 = vpop.xlane.xlu1 %2416 }
 0x63b   : > { %12765 = vrcp.f32 %v2417_v60 }
 0x63e   : > { %v2901_v51 = vpop.permute.xlu1 %2900 }
 0x644   : > { %v12760_v32 = vpop.eup %12759 }
 0x645   : > { %v12762_v48 = vpop.eup %12761  ;;  %v2465_v5 = vmul.f32 %v12760_v32, %v14301_v37  ;;  %v2955_v37 = vsel %vm1481_vm0, %v14314_v52, 0 }
 0x646   : > { %v12764_v23 = vpop.eup %12763  ;;  %v2462_v25 = vmul.f32 %v12762_v48, %v14298_v33  ;;  %v2949_v33 = vsel %vm1481_vm0, %v14319_v62, 0 }
 0x647   : > { %v2464_v41 = vmul.f32 %v12764_v23, %v14295_v16  ;;  %v2952_v16 = vsel %vm1481_vm0, %v2907_v18, 0 }
 0x648   : > { %v12766_v26 = vpop.eup %12765 }
 0x649   : > { %v2463_v49 = vmul.f32 %v12766_v26, %v14304_v28  ;;  %v2479_v57 = vpack.c.bf16 %v2465_v5, %v2464_v41  ;;  %v2903_v28 = vpop.permute.xlu0 %2902 }
 0x64b   : > { %v2478_v20 = vpack.c.bf16 %v2463_v49, %v2462_v25 }
 0x64d   : > { %11742 = vmatprep.mubr.bf16.mxu0 %v2478_v20 }
 0x64e   : > { %11743 = vmatmul.mubr.bf16.vlgmr.msra.gmra.mxu0 %v2479_v57 }
 0x64f   : > { %11759 = vmatpush3.bf16.xpose.msra.mxu0 %v2958_v45 }
 0x650   : > { %12159 = vmatprep.subr.msk.bf16.mxu0 %vm1481_vm0, %v14314_v52  ;;  %v2946_v52 = vsel %vm1481_vm0, %v2903_v28, 0 }
 0x657   : > { %11761 = vmatpush3.bf16.xpose.msra.mxu0 %v2955_v37 }
 0x658   : > { %12160 = vmatprep.subr.msk.bf16.mxu0 %vm1481_vm0, %v2907_v18 }
 0x65f   : > { %11763 = vmatpush3.bf16.xpose.msra.mxu0 %v2952_v16 }
 0x660   : > { %12161 = vmatprep.subr.msk.bf16.mxu0 %vm1481_vm0, %v14319_v62  ;;  %v2943_v62 = vsel %vm1481_vm0, %v2901_v51, 0 }
 0x667   : > { %11765 = vmatpush3.bf16.xpose.msra.mxu0 %v2949_v33 }
 0x668   : > { %12162 = vmatprep.subr.msk.bf16.mxu0 %vm1481_vm0, %v2903_v28 }
 0x66b   : > { %v2427_v12 = vpop.xlane.xlu0 %2426 }
 0x66f   : > { %11767 = vmatpush3.bf16.xpose.msra.mxu0 %v2946_v52  ;;  %v2423_v56 = vpop.xlane.xlu0 %2422  ;;  %v2425_v14 = vpop.xlane.xlu1 %2424 }
 0x670   : > { %12767 = vrcp.f32 %v2423_v56  ;;  %12163 = vmatprep.subr.msk.bf16.mxu0 %vm1481_vm0, %v2901_v51 }
 0x671   : > { %12769 = vrcp.f32 %v2425_v14 }
 0x672   : > { %12771 = vrcp.f32 %v2427_v12 }
 0x673   : > { %v2429_v9 = vpop.xlane.xlu0 %2428  ;;  %v2435_v60 = vpop.xlane.xlu1 %2434 }
 0x674   : > { %12773 = vrcp.f32 %v2429_v9 }
 0x677   : > { %11769 = vmatpush3.bf16.xpose.msra.mxu0 %v2943_v62  ;;  %v2431_v32 = vpop.xlane.xlu1 %2430 }
 0x67b   : > { %v2443_v48 = vpop.xlane.xlu0 %2442  ;;  %v2437_v23 = vpop.xlane.xlu1 %2436 }
 0x67c   : > { %12775 = vrcp.f32 %v2437_v23  ;;  %v14429_v23 = vpop.f32.mrf.mxu0 }
 0x67d   : > { %v12768_v26 = vpop.eup %12767  ;;  %12777 = vrcp.f32 %v2431_v32  ;;  %18565 = vst [vmem:[#allocation67_spill] sm:$0xff] %v14429_v23 }
 0x67e   : > { %v12770_v5 = vpop.eup %12769  ;;  %v2466_v25 = vmul.f32 %v12768_v26, %v14329_v6  ;;  %12779 = vrcp.f32 %v2435_v60 }
 0x67f   : > { %v12772_v49 = vpop.eup %12771  ;;  %v2439_v41 = vpop.xlane.xlu0 %2438  ;;  %v2467_v57 = vmul.f32 %v12770_v5, %v14325_v47 }
 0x680   : > { %v2433_v20 = vpop.xlane.xlu1 %2432  ;;  %v2468_v18 = vmul.f32 %v12772_v49, %v14322_v43 }
 0x681   : > { %v12774_v45 = vpop.eup %12773  ;;  %12781 = vrcp.f32 %v2433_v20  ;;  %v2480_v37 = vpack.c.bf16 %v2467_v57, %v2466_v25 }
 0x682   : > { %v2469_v16 = vmul.f32 %v12774_v45, %v14335_v22  ;;  %12783 = vrcp.f32 %v2439_v41  ;;  %v14433_v41 = vpop.f32.mrf.mxu0 }
 0x683   : > { %11746 = vmatprep.mubr.bf16.mxu0 %v2480_v37  ;;  %v2445_v33 = vpop.xlane.xlu0 %2444 }
 0x684   : > { %v2441_v28 = vpop.xlane.xlu1 %2440  ;;  %v2481_v51 = vpack.c.bf16 %v2469_v16, %v2468_v18  ;;  %v14437_v18 = vpop.f32.mrf.mxu0 }
 0x685   : > { %12785 = vrcp.f32 %v2441_v28 }
 0x686   : > { %12787 = vrcp.f32 %v2445_v33  ;;  %11747 = vmatmul.mubr.bf16.gmra.mxu0 %v2481_v51  ;;  %v14441_v28 = vpop.f32.mrf.mxu0 }
 0x687   : > { %v2899_v6 = vpop.permute.xlu0 %2898  ;;  %12789 = vrcp.f32 %v2443_v48 }
 0x688   : > { %12164 = vmatprep.subr.msk.bf16.mxu0 %vm1481_vm0, %v2899_v6  ;;  %v2940_v47 = vsel %vm1481_vm0, %v2899_v6, 0  ;;  %v2897_v12 = vpop.permute.xlu1 %2896 }
 0x689   : > { %11771 = vmatpush3.bf16.xpose.msra.mxu0 %v2940_v47  ;;  %v12776_v43 = vpop.eup %12775  ;;  %v2937_v26 = vsel %vm1481_vm0, %v2897_v12, 0 }
 0x68a   : > { %12165 = vmatprep.subr.msk.bf16.mxu0 %vm1481_vm0, %v2897_v12  ;;  %v12778_v52 = vpop.eup %12777  ;;  %v2473_v9 = vmul.f32 %v12776_v43, %v14347_v42 }
 0x68b   : > { %v2881_v22 = vpop.permute.xlu0 %2880  ;;  %v12780_v56 = vpop.eup %12779  ;;  %v2470_v62 = vmul.f32 %v12778_v52, %v14344_v10 }
 0x68c   : > { %v2472_v5 = vmul.f32 %v12780_v56, %v14340_v4  ;;  %v2883_v47 = vpop.permute.xlu1 %2882 }
 0x68e   : > { %v12782_v14 = vpop.eup %12781  ;;  %v2483_v20 = vpack.c.bf16 %v2473_v9, %v2472_v5 }
 0x68f   : > { %v2885_v60 = vpop.permute.xlu0 %2884  ;;  %v2471_v32 = vmul.f32 %v12782_v14, %v14353_v44  ;;  %v12784_v48 = vpop.eup %12783 }
 0x690   : > { %v2474_v10 = vmul.f32 %v12784_v48, %v14355_v53  ;;  %v14444_v53 = vpop.f32.mrf.mxu0  ;;  %v2887_v12 = vpop.permute.xlu1 %2886 }
 0x691   : > { %11773 = vmatpush3.bf16.xpose.msra.mxu0 %v2937_v26  ;;  %v2482_v25 = vpack.c.bf16 %v2471_v32, %v2470_v62  ;;  %18566 = vst [vmem:[#allocation68_spill] sm:$0xff] %v14444_v53 }
 0x692   : > { %v12786_v49 = vpop.eup %12785 }
 0x693   : > { %v12788_v57 = vpop.eup %12787  ;;  %11750 = vmatprep.mubr.bf16.mxu0 %v2482_v25  ;;  %v2889_v42 = vpop.permute.xlu0 %2888  ;;  %v2475_v44 = vmul.f32 %v12786_v49, %v14361_v35 }
 0x694   : > { %11751 = vmatmul.mubr.bf16.gmra.mxu0 %v2483_v20  ;;  %v12790_v45 = vpop.eup %12789  ;;  %v2477_v4 = vmul.f32 %v12788_v57, %v14359_v59  ;;  %v14446_v35 = vpop.f32.mrf.mxu0 }
 0x695   : > { %v2484_v37 = vpack.c.bf16 %v2475_v44, %v2474_v10  ;;  %v2476_v33 = vmul.f32 %v12790_v45, %v14349_v3  ;;  %v2891_v52 = vpop.permute.xlu1 %2890 }
 0x696   : > { %v14450_v59 = vpop.f32.mrf.mxu0 }
 0x697   : > { %11754 = vmatprep.mubr.bf16.mxu0 %v2484_v37  ;;  %v2893_v16 = vpop.permute.xlu0 %2892  ;;  %v2485_v51 = vpack.c.bf16 %v2477_v4, %v2476_v33 }
 0x698   : > { %v14452_v3 = vpop.f32.mrf.mxu0 }
 0x699   : > { %v2895_v9 = vpop.permute.xlu1 %2894 }
 0x69a   : > { %v14456_v43 = vpop.f32.mrf.mxu0 }
 0x69b   : > { %v3224_v6 = vpop.permute.xlu0 %3223  ;;  %18567 = vst [vmem:[#allocation69_spill] sm:$0xff] %v14456_v43  ;;  %v18574_v43 = vmov 0  }
 0x69c   : > { %11755 = vmatmul.mubr.bf16.gmra.mxu0 %v2485_v51  ;;  %11790 = vmatprep.subr.bf16.mxu1 %v3224_v6 }
 0x69d   : > { %11774 = vmatprep.mubr.msk.bf16.mxu0 %vm1481_vm0, %v2881_v22  ;;  %v14458_v22 = vpop.f32.mrf.mxu0 }
 0x69f   : > { %v14460_v56 = vpop.f32.mrf.mxu0 }
 0x6a1   : > { %v14464_v14 = vpop.f32.mrf.mxu0 }
 0x6a4   : > { %11775 = vmatmul.mubr.msk.bf16.vlgmr.msra.gmra.mxu0 %vm1481_vm0, %v2883_v47 }
 0x6a5   : > { %11778 = vmatprep.mubr.msk.bf16.mxu0 %vm1481_vm0, %v2885_v60  ;;  %v14466_v60 = vpop.f32.mrf.mxu0 }
 0x6a6   : > { %18568 = vst [vmem:[#allocation70_spill] sm:$0xff] %v14466_v60  ;;  %v3220_v60 = vpop.permute.xlu0 %3219 }
 0x6a7   : > { %v14470_v62 = vpop.f32.mrf.mxu0 }
 0x6a9   : > { %v14472_v32 = vpop.f32.mrf.mxu0 }
 0x6aa   : > { %v3218_v53 = vpop.permute.xlu0 %3217 }
 0x6ab   : > { %v14474_v48 = vpop.f32.mrf.mxu0 }
 0x6ac   : > { %11779 = vmatmul.mubr.msk.bf16.gmra.mxu0 %vm1481_vm0, %v2887_v12 }
 0x6ad   : > { %11782 = vmatprep.mubr.msk.bf16.mxu0 %vm1481_vm0, %v2889_v42  ;;  %v14476_v26 = vpop.f32.mrf.mxu0 }
 0x6ae   : > { %18569 = vst [vmem:[#allocation71_spill] sm:$0xff] %v14476_v26  ;;  %v3222_v26 = vpop.permute.xlu1 %3221 }
 0x6af   : > { %v14478_v5 = vpop.f32.mrf.mxu0 }
 0x6b1   : > { %v14480_v25 = vpop.f32.mrf.mxu0 }
 0x6b3   : > { %v14482_v49 = vpop.f32.mrf.mxu0 }
 0x6b4   : > { %11783 = vmatmul.mubr.msk.bf16.gmra.mxu0 %vm1481_vm0, %v2891_v52 }
 0x6b5   : > { %11786 = vmatprep.mubr.msk.bf16.mxu0 %vm1481_vm0, %v2893_v16  ;;  %v14484_v20 = vpop.f32.mrf.mxu0 }
 0x6b6   : > { %18570 = vst [vmem:[#allocation72_spill] sm:$0xff] %v14484_v20 }
 0x6b7   : > { %v14486_v57 = vpop.f32.mrf.mxu0 }
 0x6b9   : > { %v14488_v42 = vpop.f32.mrf.mxu0 }
 0x6bb   : > { %v14490_v10 = vpop.f32.mrf.mxu0 }
 0x6bc   : > { %11787 = vmatmul.mubr.msk.bf16.gmra.mxu0 %vm1481_vm0, %v2895_v9 }
 0x6bd   : > { %3450 = vmatprep.mubr.bf16.mxu0 %v18431_v55  ;;  %v14492_v44 = vpop.f32.mrf.mxu0 }
 0x6be   : > { %18571 = vst [vmem:[#allocation73_spill] sm:$0xff] %v14492_v44 }
 0x6bf   : > { %v14494_v45 = vpop.f32.mrf.mxu0 }
 0x6c1   : > { %v14496_v37 = vpop.f32.mrf.mxu0 }
 0x6c3   : > { %v14498_v4 = vpop.f32.mrf.mxu0 }
 0x6c5   : > { %v14500_v16 = vpop.f32.mrf.mxu0 }
 0x6c6   : > { %18572 = vst [vmem:[#allocation74_spill] sm:$0xff] %v14500_v16 }
 0x6c7   : > { %v14502_v33 = vpop.f32.mrf.mxu0 }
 0x6c9   : > { %v14504_v51 = vpop.f32.mrf.mxu0 }
 0x6cb   : > { %v14506_v47 = vpop.f32.mrf.mxu0 }
 0x6cd   : > { %v14508_v12 = vpop.f32.mrf.mxu0 }
 0x6ce   : > { %18573 = vst [vmem:[#allocation75_spill] sm:$0xff] %v14508_v12  ;;  %v3216_v12 = vpop.permute.xlu0 %3215 }
 0x70e   : > { %v11744_v52 = vpop.f32.mrf.mxu0 }
 0x710   : > { %v2552_v9 = vpop.f32.mrf.mxu0 }
 0x712   : > { %v11745_v55 = vpop.f32.mrf.mxu0 }
 0x713   : > { %v2648_v16 = vpack.c.bf16 %v11745_v55, %v11744_v52 }
 0x714   : > { %v2555_v44 = vpop.f32.mrf.mxu0 }
 0x715   : > { %v2647_v20 = vpack.c.bf16 %v2555_v44, %v2552_v9 }
 0x717   : > { %10983 = vmatmul.mubr.msk.bf16.vlgmr.msra.gmra.mxu1 %vm1481_vm0, %v2647_v20  ;;  %v3214_v20 = vpop.permute.xlu1 %3213 }
 0x718   : > { %11791 = vmatpush3.bf16.msra.mxu1 %v3224_v6  ;;  %2745 = vmatprep.mubr.bf16.mxu1 %v18574_v43 }
 0x719   : > { %11792 = vmatprep.subr.bf16.mxu1 %v3222_v26 }
 0x71c   : > { %11793 = vmatpush3.bf16.msra.mxu1 %v3222_v26 }
 0x71d   : > { %11794 = vmatprep.subr.bf16.mxu1 %v3220_v60 }
 0x71f   : > { %10984 = vmatmul.mubr.msk.bf16.gmra.mxu1 %vm1481_vm0, %v2648_v16 }
 0x720   : > { %11795 = vmatpush3.bf16.msra.mxu1 %v3220_v60  ;;  %2755 = vmatprep.mubr.bf16.mxu1 %v18574_v43 }
 0x721   : > { %11796 = vmatprep.subr.bf16.mxu1 %v3218_v53 }
 0x724   : > { %11797 = vmatpush3.bf16.msra.mxu1 %v3218_v53 }
 0x725   : > { %11798 = vmatprep.subr.bf16.mxu1 %v3216_v12 }
 0x728   : > { %11799 = vmatpush3.bf16.msra.mxu1 %v3216_v12 }
 0x729   : > { %11800 = vmatprep.subr.bf16.mxu1 %v3214_v20 }
 0x72c   : > { %11801 = vmatpush3.bf16.msra.mxu1 %v3214_v20 }
 0x746   : > { %v11748_v6 = vpop.f32.mrf.mxu0 }
 0x748   : > { %v2568_v44 = vpop.f32.mrf.mxu0 }
 0x74a   : > { %v11749_v9 = vpop.f32.mrf.mxu0 }
 0x74b   : > { %v2650_v16 = vpack.c.bf16 %v11749_v9, %v11748_v6 }
 0x74c   : > { %v2571_v26 = vpop.f32.mrf.mxu0 }
 0x74d   : > { %v2649_v55 = vpack.c.bf16 %v2571_v26, %v2568_v44 }
 0x74f   : > { %10985 = vmatmul.mubr.msk.bf16.gmra.mxu1 %vm1481_vm0, %v2649_v55 }
 0x750   : > { %2765 = vmatprep.mubr.bf16.mxu1 %v18574_v43 }
 0x754   : > { %v11752_v60 = vpop.f32.mrf.mxu0 }
 0x756   : > { %v2584_v52 = vpop.f32.mrf.mxu0 }
 0x757   : > { %10986 = vmatmul.mubr.msk.bf16.gmra.mxu1 %vm1481_vm0, %v2650_v16 }
 0x758   : > { %v11753_v53 = vpop.f32.mrf.mxu0  ;;  %2775 = vmatprep.mubr.bf16.mxu1 %v18574_v43 }
 0x759   : > { %v2652_v55 = vpack.c.bf16 %v11753_v53, %v11752_v60 }
 0x75a   : > { %v2587_v12 = vpop.f32.mrf.mxu0 }
 0x75b   : > { %v2651_v20 = vpack.c.bf16 %v2587_v12, %v2584_v52 }
 0x75c   : > { %v11756_v50 = vpop.f32.mrf.mxu0 }
 0x75e   : > { %v2600_v46 = vpop.f32.mrf.mxu0 }
 0x75f   : > { %10987 = vmatmul.mubr.msk.bf16.gmra.mxu1 %vm1481_vm0, %v2651_v20 }
 0x760   : > { %v11757_v39 = vpop.f32.mrf.mxu0  ;;  %2785 = vmatprep.mubr.bf16.mxu1 %v18574_v43 }
 0x761   : > { %v2654_v24 = vpack.c.bf16 %v11757_v39, %v11756_v50 }
 0x762   : > { %v2603_v44 = vpop.f32.mrf.mxu0 }
 0x763   : > { %v2653_v12 = vpack.c.bf16 %v2603_v44, %v2600_v46 }
 0x764   : > { %v14520_v26 = vpop.f32.mrf.mxu0 }
 0x765   : > { %3061 = vmax.xlane.f32.xlu0 %v14520_v26 }
 0x766   : > { %v14523_v6 = vpop.f32.mrf.mxu0 }
 0x767   : > { %10988 = vmatmul.mubr.msk.bf16.gmra.mxu1 %vm1481_vm0, %v2652_v55 }
 0x768   : > { %v14526_v9 = vpop.f32.mrf.mxu0  ;;  %2795 = vmatprep.mubr.bf16.mxu1 %v18574_v43 }
 0x769   : > { %3057 = vmax.xlane.f32.xlu0 %v14523_v6 }
 0x76a   : > { %v14530_v16 = vpop.f32.mrf.mxu0 }
 0x76b   : > { %3059 = vmax.xlane.f32.xlu1 %v14530_v16 }
 0x76c   : > { %v14533_v52 = vpop.f32.mrf.mxu0 }
 0x76d   : > { %3063 = vmax.xlane.f32.xlu0 %v14526_v9 }
 0x76e   : > { %v14536_v60 = vpop.f32.mrf.mxu0 }
 0x76f   : > { %10989 = vmatmul.mubr.msk.bf16.gmra.mxu1 %vm1481_vm0, %v2653_v12 }
 0x770   : > { %v14539_v53 = vpop.f32.mrf.mxu0  ;;  %2805 = vmatprep.mubr.bf16.mxu1 %v18574_v43 }
 0x771   : > { %3071 = vmax.xlane.f32.xlu1 %v14539_v53 }
 0x772   : > { %v14543_v20 = vpop.f32.mrf.mxu0 }
 0x774   : > { %v14545_v55 = vpop.f32.mrf.mxu0 }
 0x775   : > { %3067 = vmax.xlane.f32.xlu1 %v14543_v20 }
 0x776   : > { %v14548_v46 = vpop.f32.mrf.mxu0 }
 0x777   : > { %10990 = vmatmul.mubr.msk.bf16.gmra.mxu1 %vm1481_vm0, %v2654_v24 }
 0x778   : > { %v14551_v44 = vpop.f32.mrf.mxu0 }
 0x779   : > { %3079 = vmax.xlane.f32.xlu1 %v14551_v44 }
 0x77a   : > { %v14554_v12 = vpop.f32.mrf.mxu0 }
 0x77c   : > { %v14566_v50 = vpop.f32.mrf.mxu0 }
 0x77d   : > { %3075 = vmax.xlane.f32.xlu1 %v14554_v12 }
 0x77e   : > { %v14569_v24 = vpop.f32.mrf.mxu0 }
 0x780   : > { %v14572_v39 = vpop.f32.mrf.mxu0 }
 0x783   : > { %3211 = vrot.lane.b32.xlu0 %v13945_v40, %s13422_s7  ;;  %v14584_v40 = vsub.s32 1, %v13746_v36 }
 0x785   : > { %18575 = vst [vmem:[#allocation76_spill] sm:$0xff] %v14584_v40 }
 0x78e   : > { %3623 = vrot.lane.b32.xlu1 %v13867_v61, %s13423_s13  ;;  %v14576_v61 = vpop.f32.mrf.mxu0 }
 0x792   : > { %3619 = vrot.lane.b32.xlu1 %v13929_v8, %s13423_s13  ;;  %v437_v8 = vld [vmem:[#allocation9 + $0x6] sm:$0x3] }
 0x793   : > { %v14587_v2 = vrot.slane %v437_v8, %v13764_v58  ;;  %v14590_v13 = vrot.slane %v437_v8, %v14584_v40 }
 0x795   : > { %18576 = vst [vmem:[#allocation77_spill] sm:$0xff] %v14590_v13  ;;  %v2077_v43 = vadd.f32 %v14433_v41, %v14587_v2  ;;  %v2078_v23 = vadd.f32 %v14437_v18, %v14590_v13  ;;  %v2079_v58 = vadd.f32 %v14441_v28, %v14587_v2  ;;  %v2082_v18 = vadd.f32 %v14450_v59, %v14590_v13 }
 0x796   : > { %v2083_v28 = vadd.f32 %v14452_v3, %v14587_v2 }
 0x7a2   : > { %3069 = vmax.xlane.f32.xlu0 %v14533_v52 }
 0x7a6   : > { %3065 = vmax.xlane.f32.xlu0 %v14536_v60 }
 0x7aa   : > { %3077 = vmax.xlane.f32.xlu0 %v14545_v55 }
 0x7ae   : > { %3073 = vmax.xlane.f32.xlu0 %v14548_v46 }
 0x7b2   : > { %3085 = vmax.xlane.f32.xlu0 %v14566_v50 }
 0x7b6   : > { %3081 = vmax.xlane.f32.xlu0 %v14569_v24  ;;  %3087 = vmax.xlane.f32.xlu1 %v14572_v39 }
 0x7ba   : > { %3083 = vmax.xlane.f32.xlu1 %v14576_v61 }
 0x7cc   : > { %3625 = vrot.lane.b32.xlu0 %v13883_v29, %s13423_s13 }
 0x7d0   : > { %3621 = vrot.lane.b32.xlu0 %v13906_v21, %s13423_s13 }
 0x7d4   : > { %3617 = vrot.lane.b32.xlu0 %v13949_v7, %s13423_s13  ;;  %v2081_v7 = vadd.f32 %v14446_v35, %v14587_v2 }
 0x7d7   : > { %v2737_v29 = vpop.f32.mrf.mxu1 }
 0x7d8   : > { %v14598_v21 = vadd.f32 %v2737_v29, %v2077_v43 }
 0x7d9   : > { %v2739_v1 = vpop.f32.mrf.mxu1 }
 0x7da   : > { %v14602_v36 = vadd.f32 %v2739_v1, %v2078_v23 }
 0x7db   : > { %v2741_v8 = vpop.f32.mrf.mxu1 }
 0x7dc   : > { %18577 = vst [vmem:[#allocation78_spill] sm:$0xff] %v14602_v36  ;;  %v14604_v40 = vadd.f32 %v2741_v8, %v2079_v58 }
 0x7dd   : > { %v14606_v31 = vpop.f32.mrf.mxu1 }
 0x7de   : > { %18578 = vst [vmem:[#allocation79_spill] sm:$0xff] %v14604_v40  ;;  %18579 = vst [vmem:[#allocation80_spill] sm:$0xff] %v14606_v31  ;;  %v3210_v40 = vpop.permute.xlu1 %3209 }
 0x7df   : > { %v2747_v41 = vpop.f32.mrf.mxu1 }
 0x7e0   : > { %v14612_v43 = vadd.f32 %v2747_v41, %v2081_v7 }
 0x7e1   : > { %v2749_v29 = vpop.f32.mrf.mxu1 }
 0x7e2   : > { %18580 = vst [vmem:[#allocation81_spill] sm:$0xff] %v14612_v43  ;;  %v14616_v1 = vadd.f32 %v2749_v29, %v2082_v18 }
 0x7e3   : > { %v2751_v23 = vpop.f32.mrf.mxu1 }
 0x7e4   : > { %v14618_v58 = vadd.f32 %v2751_v23, %v2083_v28 }
 0x7ee   : > { %v3062_v8 = vpop.xlane.xlu0 %3061 }
 0x7ef   : > { %v3091_v31 = vsub.f32 %v14520_v26, %v3062_v8 }
 0x7f1   : > { %v3109_v35 = vmul.f32 1.442695, %v3091_v31 }
 0x7f2   : > { %v3058_v36 = vpop.xlane.xlu0 %3057 }
 0x7f3   : > { %12791 = vpow2.f32 %v3109_v35  ;;  %v3089_v59 = vsub.f32 %v14523_v6, %v3058_v36 }
 0x7f4   : > { %v3060_v7 = vpop.xlane.xlu1 %3059 }
 0x7f5   : > { %v3105_v41 = vmul.f32 1.442695, %v3089_v59  ;;  %v3090_v3 = vsub.f32 %v14530_v16, %v3060_v7  ;;  %v2085_v16 = vadd.f32 %v14458_v22, %v14587_v2  ;;  %v2087_v59 = vadd.f32 %v14464_v14, %v14587_v2 }
 0x7f6   : > { %v3064_v43 = vpop.xlane.xlu0 %3063  ;;  %v2089_v22 = vadd.f32 %v14470_v62, %v14587_v2  ;;  %v2091_v14 = vadd.f32 %v14474_v48, %v14587_v2  ;;  %v2093_v62 = vadd.f32 %v14478_v5, %v14587_v2 }
 0x7f7   : > { %12793 = vpow2.f32 %v3105_v41  ;;  %v3092_v18 = vsub.f32 %v14526_v9, %v3064_v43  ;;  %v3107_v23 = vmul.f32 1.442695, %v3090_v3  ;;  %v14635_v9 = vpop.f32.mrf.mxu1  ;;  %v2086_v43 = vadd.f32 %v14460_v56, %v14590_v13 }
 0x7f8   : > { %18581 = vst [vmem:[#allocation82_spill] sm:$0xff] %v14635_v9  ;;  %v2090_v56 = vadd.f32 %v14472_v32, %v14590_v13 }
 0x7f9   : > { %v3111_v29 = vmul.f32 1.442695, %v3092_v18 }
 0x7fa   : > { %v3212_v28 = vpop.permute.xlu0 %3211 }
 0x7fb   : > { %12795 = vpow2.f32 %v3111_v29  ;;  %11802 = vmatprep.subr.bf16.mxu1 %v3212_v28 }
 0x7fc   : > { %11803 = vmatpush3.bf16.msra.mxu1 %v3212_v28  ;;  %12797 = vpow2.f32 %v3107_v23 }
 0x7fd   : > { %11804 = vmatprep.subr.bf16.mxu1 %v3210_v40 }
 0x800   : > { %v14624_v31 = vpop.eup %12791  ;;  %11805 = vmatpush3.bf16.msra.mxu1 %v3210_v40 }
 0x801   : > { %3141 = vadd.xlane.f32.xlu1 %v14624_v31 }
 0x804   : > { %v14627_v36 = vpop.eup %12793 }
 0x805   : > { %3137 = vadd.xlane.f32.xlu1 %v14627_v36 }
 0x808   : > { %v14630_v26 = vpop.eup %12795 }
 0x809   : > { %3143 = vadd.xlane.f32.xlu1 %v14630_v26  ;;  %v14633_v6 = vpop.eup %12797 }
 0x80d   : > { %3139 = vadd.xlane.f32.xlu1 %v14633_v6 }
 0x80f   : > { %v2757_v40 = vpop.f32.mrf.mxu1 }
 0x810   : > { %v14642_v8 = vadd.f32 %v2757_v40, %v2085_v16 }
 0x811   : > { %v2759_v35 = vpop.f32.mrf.mxu1 }
 0x812   : > { %v14646_v7 = vadd.f32 %v2759_v35, %v2086_v43  ;;  %v3072_v43 = vpop.xlane.xlu1 %3071 }
 0x813   : > { %v2761_v41 = vpop.f32.mrf.mxu1 }
 0x814   : > { %v14648_v3 = vadd.f32 %v2761_v41, %v2087_v59  ;;  %v2094_v41 = vadd.f32 %v14480_v25, %v14590_v13  ;;  %v2098_v25 = vadd.f32 %v14488_v42, %v14590_v13  ;;  %v2101_v42 = vadd.f32 %v14494_v45, %v14587_v2 }
 0x815   : > { %v14650_v18 = vpop.f32.mrf.mxu1 }
 0x816   : > { %18582 = vst [vmem:[#allocation83_spill] sm:$0xff] %v14650_v18 }
 0x817   : > { %v2767_v29 = vpop.f32.mrf.mxu1 }
 0x818   : > { %v14656_v28 = vadd.f32 %v2767_v29, %v2089_v22  ;;  %v2095_v29 = vadd.f32 %v14482_v49, %v14587_v2  ;;  %v2099_v49 = vadd.f32 %v14490_v10, %v14587_v2 }
 0x819   : > { %v2769_v23 = vpop.f32.mrf.mxu1 }
 0x81a   : > { %v14660_v16 = vadd.f32 %v2769_v23, %v2090_v56  ;;  %v3068_v56 = vpop.xlane.xlu1 %3067 }
 0x81b   : > { %v2771_v40 = vpop.f32.mrf.mxu1 }
 0x81c   : > { %v14662_v35 = vadd.f32 %v2771_v40, %v2091_v14 }
 0x81d   : > { %v14664_v59 = vpop.f32.mrf.mxu1 }
 0x81e   : > { %18583 = vst [vmem:[#allocation84_spill] sm:$0xff] %v14664_v59  ;;  %3615 = vrot.lane.b32.xlu1 %v13804_v34, %s13423_s13  ;;  %v2097_v34 = vadd.f32 %v14486_v57, %v14587_v2 }
 0x81f   : > { %v2777_v32 = vpop.f32.mrf.mxu1 }
 0x820   : > { %v14672_v22 = vadd.f32 %v2777_v32, %v2093_v62  ;;  %v3080_v62 = vpop.xlane.xlu1 %3079 }
 0x821   : > { %v2779_v48 = vpop.f32.mrf.mxu1 }
 0x822   : > { %v14676_v23 = vadd.f32 %v2779_v48, %v2094_v41  ;;  %v3094_v48 = vsub.f32 %v14543_v20, %v3068_v56  ;;  %v2102_v20 = vadd.f32 %v14496_v37, %v14590_v13 }
 0x823   : > { %v2781_v14 = vpop.f32.mrf.mxu1 }
 0x824   : > { %v14678_v40 = vadd.f32 %v2781_v14, %v2095_v29  ;;  %v3115_v10 = vmul.f32 1.442695, %v3094_v48 }
 0x825   : > { %v14680_v5 = vpop.f32.mrf.mxu1 }
 0x826   : > { %18584 = vst [vmem:[#allocation85_spill] sm:$0xff] %v14680_v5 }
 0x827   : > { %v2787_v59 = vpop.f32.mrf.mxu1 }
 0x828   : > { %v14686_v32 = vadd.f32 %v2787_v59, %v2097_v34  ;;  %v3076_v59 = vpop.xlane.xlu1 %3075 }
 0x829   : > { %v2789_v18 = vpop.f32.mrf.mxu1 }
 0x82a   : > { %18585 = vst [vmem:[#allocation86_spill] sm:$0xff] %v14686_v32  ;;  %v14690_v41 = vadd.f32 %v2789_v18, %v2098_v25  ;;  %v3096_v32 = vsub.f32 %v14539_v53, %v3072_v43 }
 0x82b   : > { %v3070_v29 = vpop.xlane.xlu0 %3069  ;;  %v2791_v14 = vpop.f32.mrf.mxu1 }
 0x82c   : > { %v3095_v5 = vsub.f32 %v14533_v52, %v3070_v29  ;;  %v14694_v57 = vadd.f32 %v2791_v14, %v2099_v49  ;;  %v2103_v29 = vadd.f32 %v14498_v4, %v14587_v2  ;;  %v14710_v48 = vpop.permute.xlu1 %3623 }
 0x82d   : > { %v14696_v9 = vpop.f32.mrf.mxu1 }
 0x82e   : > { %18586 = vst [vmem:[#allocation87_spill] sm:$0xff] %v14696_v9  ;;  %v3117_v34 = vmul.f32 1.442695, %v3095_v5  ;;  %v3119_v5 = vmul.f32 1.442695, %v3096_v32 }
 0x82f   : > { %v3066_v18 = vpop.xlane.xlu0 %3065  ;;  %v2797_v25 = vpop.f32.mrf.mxu1 }
 0x830   : > { %12799 = vpow2.f32 %v3117_v34  ;;  %v3093_v52 = vsub.f32 %v14536_v60, %v3066_v18  ;;  %v14704_v56 = vadd.f32 %v2797_v25, %v2101_v42  ;;  %v2105_v42 = vadd.f32 %v14502_v33, %v14587_v2 }
 0x831   : > { %v2799_v49 = vpop.f32.mrf.mxu1  ;;  %12801 = vpow2.f32 %v3115_v10  ;;  %v3100_v18 = vsub.f32 %v14551_v44, %v3080_v62  ;;  %v2106_v25 = vadd.f32 %v14504_v51, %v14590_v13  ;;  %v3098_v62 = vsub.f32 %v14554_v12, %v3076_v59 }
 0x832   : > { %v3113_v45 = vmul.f32 1.442695, %v3093_v52  ;;  %v14708_v14 = vadd.f32 %v2799_v49, %v2102_v20  ;;  %v2107_v49 = vadd.f32 %v14506_v47, %v14587_v2 }
 0x833   : > { %v3078_v53 = vpop.xlane.xlu0 %3077  ;;  %v2801_v43 = vpop.f32.mrf.mxu1  ;;  %v3127_v44 = vmul.f32 1.442695, %v3100_v18  ;;  %v3123_v2 = vmul.f32 1.442695, %v3098_v62 }
 0x834   : > { %12803 = vpow2.f32 %v3113_v45  ;;  %v3099_v37 = vsub.f32 %v14545_v55, %v3078_v53  ;;  %v14713_v34 = vadd.f32 %v2801_v43, %v2103_v29  ;;  %v14727_v29 = vpop.permute.xlu1 %3619 }
 0x835   : > { %v14715_v60 = vpop.f32.mrf.mxu1  ;;  %12805 = vpow2.f32 %v3119_v5 }
 0x836   : > { %18587 = vst [vmem:[#allocation88_spill] sm:$0xff] %v14715_v60  ;;  %v3125_v4 = vmul.f32 1.442695, %v3099_v37 }
 0x837   : > { %v3074_v32 = vpop.xlane.xlu0 %3073  ;;  %v2807_v10 = vpop.f32.mrf.mxu1 }
 0x838   : > { %12807 = vpow2.f32 %v3125_v4  ;;  %v3097_v20 = vsub.f32 %v14548_v46, %v3074_v32  ;;  %v14723_v55 = vadd.f32 %v2807_v10, %v2105_v42 }
 0x839   : > { %v2809_v52 = vpop.f32.mrf.mxu1 }
 0x83a   : > { %v3121_v33 = vmul.f32 1.442695, %v3097_v20  ;;  %v14729_v45 = vadd.f32 %v2809_v52, %v2106_v25 }
 0x83b   : > { %v3086_v5 = vpop.xlane.xlu0 %3085  ;;  %v2811_v53 = vpop.f32.mrf.mxu1 }
 0x83c   : > { %12809 = vpow2.f32 %v3121_v33  ;;  %v3103_v51 = vsub.f32 %v14566_v50, %v3086_v5  ;;  %v14733_v46 = vadd.f32 %v2811_v53, %v2107_v49 }
 0x83d   : > { %v14735_v43 = vpop.eup %12799  ;;  %12811 = vpow2.f32 %v3127_v44 }
 0x83e   : > { %v3133_v37 = vmul.f32 1.442695, %v3103_v51  ;;  %3149 = vadd.xlane.f32.xlu0 %v14735_v43  ;;  %v14738_v4 = vpop.eup %12801 }
 0x83f   : > { %v3082_v47 = vpop.xlane.xlu0 %3081  ;;  %v3088_v42 = vpop.xlane.xlu1 %3087 }
 0x840   : > { %12813 = vpow2.f32 %v3133_v37  ;;  %v3101_v12 = vsub.f32 %v14569_v24, %v3082_v47  ;;  %v3104_v59 = vsub.f32 %v14572_v39, %v3088_v42 }
 0x841   : > { %v14742_v18 = vpop.eup %12803  ;;  %12815 = vpow2.f32 %v3123_v2 }
 0x842   : > { %v3129_v50 = vmul.f32 1.442695, %v3101_v12  ;;  %3145 = vadd.xlane.f32.xlu0 %v14742_v18  ;;  %3147 = vadd.xlane.f32.xlu1 %v14738_v4  ;;  %v3135_v32 = vmul.f32 1.442695, %v3104_v59  ;;  %v14746_v20 = vpop.eup %12805  ;;  %v3670_v59 = vsel %vm1481_vm0, %v14710_v48, 0 }
 0x843   : > { %v3626_v10 = vpop.permute.xlu0 %3625  ;;  %v3084_v25 = vpop.xlane.xlu1 %3083 }
 0x844   : > { %12817 = vpow2.f32 %v3129_v50  ;;  %v3102_v52 = vsub.f32 %v14576_v61, %v3084_v25  ;;  %12166 = vmatprep.subr.msk.bf16.mxu1 %vm1481_vm0, %v3626_v10  ;;  %v3673_v12 = vsel %vm1481_vm0, %v3626_v10, 0 }
 0x845   : > { %v14750_v24 = vpop.eup %12807  ;;  %12819 = vpow2.f32 %v3135_v32 }
 0x846   : > { %v3131_v39 = vmul.f32 1.442695, %v3102_v52  ;;  %3151 = vadd.xlane.f32.xlu0 %v14746_v20  ;;  %3157 = vadd.xlane.f32.xlu1 %v14750_v24 }
 0x848   : > { %12821 = vpow2.f32 %v3131_v39 }
 0x849   : > { %v14754_v49 = vpop.eup %12809 }
 0x84a   : > { %3153 = vadd.xlane.f32.xlu1 %v14754_v49  ;;  %v14757_v33 = vpop.eup %12811 }
 0x84d   : > { %v14759_v44 = vpop.eup %12813 }
 0x84e   : > { %3165 = vadd.xlane.f32.xlu0 %v14759_v44  ;;  %3159 = vadd.xlane.f32.xlu1 %v14757_v33  ;;  %v14763_v61 = vpop.eup %12815 }
 0x851   : > { %v14765_v62 = vpop.eup %12817 }
 0x852   : > { %3161 = vadd.xlane.f32.xlu0 %v14765_v62  ;;  %3155 = vadd.xlane.f32.xlu1 %v14763_v61  ;;  %v14769_v5 = vpop.eup %12819 }
 0x855   : > { %v14771_v53 = vpop.eup %12821 }
 0x856   : > { %3167 = vadd.xlane.f32.xlu0 %v14769_v5  ;;  %3163 = vadd.xlane.f32.xlu1 %v14771_v53 }
 0x867   : > { %3611 = vrot.lane.b32.xlu1 %v13768_v63, %s13423_s13  ;;  %v18588_v63 = vld [vmem:[#allocation41_spill] sm:$0xff] }
 0x86b   : > { %3597 = vrot.lane.b32.xlu1 %v13807_v38, %s13423_s13 }
 0x86c   : > { %3613 = vrot.lane.b32.xlu0 %v13786_v17, %s13423_s13 }
 0x86f   : > { %3601 = vrot.lane.b32.xlu1 %v13839_v11, %s13423_s13 }
 0x870   : > { %3595 = vrot.lane.b32.xlu0 %v13789_v19, %s13423_s13 }
 0x873   : > { %3605 = vrot.lane.b32.xlu1 %v13869_v0, %s13423_s13 }
 0x874   : > { %3599 = vrot.lane.b32.xlu0 %v13823_v54, %s13423_s13 }
 0x877   : > { %3609 = vrot.lane.b32.xlu1 %v13904_v15, %s13423_s13 }
 0x878   : > { %3603 = vrot.lane.b32.xlu0 %v13851_v30, %s13423_s13 }
 0x87b   : > { %3936 = vrot.lane.b32.xlu1 %v14001_v27, %s13423_s13 }
 0x87c   : > { %3607 = vrot.lane.b32.xlu0 %v18588_v63, %s13423_s13 }
 0x88a   : > { %v3142_v17 = vpop.xlane.xlu1 %3141 }
 0x88e   : > { %v3138_v19 = vpop.xlane.xlu1 %3137 }
 0x892   : > { %v3144_v38 = vpop.xlane.xlu1 %3143 }
 0x893   : > { %12823 = vrcp.f32 %v3144_v38 }
 0x894   : > { %12825 = vrcp.f32 %v3138_v19 }
 0x895   : > { %12827 = vrcp.f32 %v3142_v17 }
 0x896   : > { %v3140_v11 = vpop.xlane.xlu1 %3139 }
 0x897   : > { %12829 = vrcp.f32 %v3140_v11 }
 0x89a   : > { %v3616_v50 = vpop.permute.xlu1 %3615 }
 0x8a0   : > { %v12824_v54 = vpop.eup %12823 }
 0x8a1   : > { %v12826_v0 = vpop.eup %12825  ;;  %v3188_v30 = vmul.f32 %v12824_v54, %v14630_v26  ;;  %v3622_v26 = vpop.permute.xlu0 %3621 }
 0x8a2   : > { %v12828_v15 = vpop.eup %12827  ;;  %v3185_v37 = vmul.f32 %v12826_v0, %v14627_v36  ;;  %v3667_v36 = vsel %vm1481_vm0, %v3622_v26, 0 }
 0x8a3   : > { %v3187_v2 = vmul.f32 %v12828_v15, %v14624_v31  ;;  %v3664_v31 = vsel %vm1481_vm0, %v14727_v29, 0 }
 0x8a4   : > { %v12830_v51 = vpop.eup %12829 }
 0x8a5   : > { %v3186_v27 = vmul.f32 %v12830_v51, %v14633_v6  ;;  %v3202_v42 = vpack.c.bf16 %v3188_v30, %v3187_v2  ;;  %v3618_v6 = vpop.permute.xlu0 %3617 }
 0x8a7   : > { %v3201_v47 = vpack.c.bf16 %v3186_v27, %v3185_v37 }
 0x8a9   : > { %11806 = vmatprep.mubr.bf16.mxu1 %v3201_v47 }
 0x8aa   : > { %11807 = vmatmul.mubr.bf16.vlgmr.msra.gmra.mxu1 %v3202_v42 }
 0x8ab   : > { %11823 = vmatpush3.bf16.xpose.msra.mxu1 %v3673_v12 }
 0x8ac   : > { %12167 = vmatprep.subr.msk.bf16.mxu1 %vm1481_vm0, %v14710_v48  ;;  %v3661_v48 = vsel %vm1481_vm0, %v3618_v6, 0 }
 0x8b3   : > { %11825 = vmatpush3.bf16.xpose.msra.mxu1 %v3670_v59 }
 0x8b4   : > { %12168 = vmatprep.subr.msk.bf16.mxu1 %vm1481_vm0, %v3622_v26 }
 0x8bb   : > { %11827 = vmatpush3.bf16.xpose.msra.mxu1 %v3667_v36 }
 0x8bc   : > { %12169 = vmatprep.subr.msk.bf16.mxu1 %vm1481_vm0, %v14727_v29  ;;  %v3658_v29 = vsel %vm1481_vm0, %v3616_v50, 0 }
 0x8c3   : > { %11829 = vmatpush3.bf16.xpose.msra.mxu1 %v3664_v31 }
 0x8c4   : > { %12170 = vmatprep.subr.msk.bf16.mxu1 %vm1481_vm0, %v3618_v6 }
 0x8c7   : > { %v3150_v32 = vpop.xlane.xlu0 %3149 }
 0x8cb   : > { %11831 = vmatpush3.bf16.xpose.msra.mxu1 %v3661_v48  ;;  %v3146_v10 = vpop.xlane.xlu0 %3145  ;;  %v3148_v25 = vpop.xlane.xlu1 %3147  ;;  %v12443_v48 = vld [vmem:[#allocation6 + $0x54] ss:$8 sps:$4 sm:$0xff]  }
 0x8cc   : > { %12831 = vrcp.f32 %v3146_v10  ;;  %12171 = vmatprep.subr.msk.bf16.mxu1 %vm1481_vm0, %v3616_v50  ;;  %v12437_v50 = vld [vmem:[#allocation6 + $0x74] ss:$8 sps:$4 sm:$0xff]   ;;  %3430 = vmatprep.subr.bf16.mxu0 %v12443_v48 }
 0x8cd   : > { %12833 = vrcp.f32 %v3148_v25 }
 0x8ce   : > { %12835 = vrcp.f32 %v3150_v32  ;;  %v12441_v32 = vld [vmem:[#allocation6 + $0x50] ss:$8 sps:$4 sm:$0xff]  }
 0x8cf   : > { %v3152_v52 = vpop.xlane.xlu0 %3151  ;;  %v3158_v39 = vpop.xlane.xlu1 %3157  ;;  %3431 = vmatpush1.bf16.msra.mxu0 %v12441_v32 }
 0x8d0   : > { %12837 = vrcp.f32 %v3152_v52  ;;  %v14856_v32 = vpop.f32.mrf.mxu1 }
 0x8d1   : > { %18593 = vst [vmem:[#allocation41_spill] sm:$0xff] %v14856_v32  ;;  %v18609_v32 = vld [vmem:[#allocation86_spill] sm:$0xff] }
 0x8d3   : > { %11833 = vmatpush3.bf16.xpose.msra.mxu1 %v3658_v29  ;;  %v3154_v63 = vpop.xlane.xlu1 %3153 }
 0x8d7   : > { %v3166_v17 = vpop.xlane.xlu0 %3165  ;;  %v3160_v19 = vpop.xlane.xlu1 %3159 }
 0x8d8   : > { %12839 = vrcp.f32 %v3160_v19 }
 0x8d9   : > { %v12832_v38 = vpop.eup %12831  ;;  %12841 = vrcp.f32 %v3154_v63 }
 0x8da   : > { %v12834_v11 = vpop.eup %12833  ;;  %v3189_v54 = vmul.f32 %v12832_v38, %v14742_v18  ;;  %12843 = vrcp.f32 %v3158_v39 }
 0x8db   : > { %v12836_v0 = vpop.eup %12835  ;;  %v3162_v15 = vpop.xlane.xlu0 %3161  ;;  %v3190_v30 = vmul.f32 %v12834_v11, %v14738_v4  ;;  %v12444_v11 = vld [vmem:[#allocation6 + $0x40] ss:$8 sps:$4 sm:$0xff]  }
 0x8dc   : > { %v3156_v51 = vpop.xlane.xlu1 %3155  ;;  %v3191_v2 = vmul.f32 %v12836_v0, %v14735_v43 }
 0x8dd   : > { %v12838_v37 = vpop.eup %12837  ;;  %12845 = vrcp.f32 %v3156_v51  ;;  %v3203_v27 = vpack.c.bf16 %v3190_v30, %v3189_v54 }
 0x8de   : > { %v3192_v47 = vmul.f32 %v12838_v37, %v14746_v20  ;;  %12847 = vrcp.f32 %v3162_v15 }
 0x8df   : > { %11810 = vmatprep.mubr.bf16.mxu1 %v3203_v27  ;;  %v3168_v42 = vpop.xlane.xlu0 %3167  ;;  %v14834_v27 = vld [vmem:[#allocation9] sm:$0x3f] }
 0x8e0   : > { %v3164_v12 = vpop.xlane.xlu1 %3163  ;;  %v3204_v59 = vpack.c.bf16 %v3192_v47, %v3191_v2 }
 0x8e1   : > { %12849 = vrcp.f32 %v3164_v12  ;;  %v18591_v12 = vld [vmem:[#allocation67_spill] sm:$0xff] }
 0x8e2   : > { %12851 = vrcp.f32 %v3168_v42  ;;  %11811 = vmatmul.mubr.bf16.gmra.mxu1 %v3204_v59  ;;  %v18590_v42 = vld [vmem:[#allocation60_spill] sm:$0xff] }
 0x8e3   : > { %v3614_v18 = vpop.permute.xlu0 %3613  ;;  %12853 = vrcp.f32 %v3166_v17 }
 0x8e4   : > { %12172 = vmatprep.subr.msk.bf16.mxu1 %vm1481_vm0, %v3614_v18  ;;  %v3655_v4 = vsel %vm1481_vm0, %v3614_v18, 0  ;;  %v3612_v26 = vpop.permute.xlu1 %3611 }
 0x8e5   : > { %11835 = vmatpush3.bf16.xpose.msra.mxu1 %v3655_v4  ;;  %v12840_v43 = vpop.eup %12839  ;;  %v3652_v39 = vsel %vm1481_vm0, %v3612_v26, 0  ;;  %v12438_v4 = vld [vmem:[#allocation6 + $0x60] ss:$8 sps:$4 sm:$0xff]  }
 0x8e6   : > { %12173 = vmatprep.subr.msk.bf16.mxu1 %vm1481_vm0, %v3612_v26  ;;  %v12842_v20 = vpop.eup %12841  ;;  %v3196_v6 = vmul.f32 %v12840_v43, %v14757_v33 }
 0x8e7   : > { %v12844_v36 = vpop.eup %12843  ;;  %v3193_v10 = vmul.f32 %v12842_v20, %v14754_v49  ;;  %v3596_v30 = vpop.permute.xlu0 %3595 }
 0x8e8   : > { %v3195_v29 = vmul.f32 %v12844_v36, %v14750_v24  ;;  %v3598_v47 = vpop.permute.xlu1 %3597 }
 0x8ea   : > { %v12846_v31 = vpop.eup %12845  ;;  %v3206_v19 = vpack.c.bf16 %v3196_v6, %v3195_v29 }
 0x8eb   : > { %v3194_v25 = vmul.f32 %v12846_v31, %v14763_v61  ;;  %v12848_v52 = vpop.eup %12847  ;;  %v12446_v61 = vld [vmem:[#allocation6 + $0x44] ss:$8 sps:$4 sm:$0xff]   ;;  %v3600_v18 = vpop.permute.xlu0 %3599 }
 0x8ec   : > { %v3197_v38 = vmul.f32 %v12848_v52, %v14765_v62  ;;  %3432 = vmatprep.subr.bf16.mxu0 %v12446_v61  ;;  %v18589_v62 = vld [vmem:[#allocation15_spill] sm:$0xff]  ;;  %v3602_v43 = vpop.permute.xlu1 %3601 }
 0x8ed   : > { %11837 = vmatpush3.bf16.xpose.msra.mxu1 %v3652_v39  ;;  %v3205_v63 = vpack.c.bf16 %v3194_v25, %v3193_v10  ;;  %3433 = vmatpush1.bf16.msra.mxu0 %v12444_v11  ;;  %v18448_v37 = vsub.s32 5, %v18589_v62 }
 0x8ee   : > { %v12850_v17 = vpop.eup %12849  ;;  %4145 = vmatprep.subr.bf16.mxu1 %v12437_v50  ;;  %v18592_v50 = vmov 0  }
 0x8ef   : > { %v12852_v33 = vpop.eup %12851  ;;  %11814 = vmatprep.mubr.bf16.mxu1 %v3205_v63  ;;  %v3198_v49 = vmul.f32 %v12850_v17, %v14771_v53  ;;  %v12435_v53 = vld [vmem:[#allocation6 + $0x70] ss:$8 sps:$4 sm:$0xff]   ;;  %v14839_v2 = vrot.slane %v14834_v27, %v18448_v37  ;;  %v3604_v20 = vpop.permute.xlu0 %3603 }
 0x8f0   : > { %11815 = vmatmul.mubr.bf16.gmra.mxu1 %v3206_v19  ;;  %v12854_v54 = vpop.eup %12853  ;;  %v3200_v24 = vmul.f32 %v12852_v33, %v14769_v5  ;;  %v12440_v5 = vld [vmem:[#allocation6 + $0x64] ss:$8 sps:$4 sm:$0xff]   ;;  %v3606_v36 = vpop.permute.xlu1 %3605 }
 0x8f1   : > { %v3207_v0 = vpack.c.bf16 %v3198_v49, %v3197_v38  ;;  %v3199_v15 = vmul.f32 %v12854_v54, %v14759_v44  ;;  %v1384_v44 = vadd.f32 %v18590_v42, %v14839_v2  ;;  %v1388_v59 = vadd.f32 %v18591_v12, %v14839_v2 }
 0x8f3   : > { %11818 = vmatprep.mubr.bf16.mxu1 %v3207_v0  ;;  %v3208_v51 = vpack.c.bf16 %v3200_v24, %v3199_v15  ;;  %v14847_v26 = vpack.c.bf16 %v1388_v59, %v1384_v44  ;;  %v3608_v31 = vpop.permute.xlu0 %3607 }
 0x8f4   : > { %v3610_v6 = vpop.permute.xlu1 %3609 }
 0x8f8   : > { %11819 = vmatmul.mubr.bf16.gmra.mxu1 %v3208_v51 }
 0x8f9   : > { %11838 = vmatprep.mubr.msk.bf16.mxu1 %vm1481_vm0, %v3596_v30 }
 0x900   : > { %11839 = vmatmul.mubr.msk.bf16.vlgmr.msra.gmra.mxu1 %vm1481_vm0, %v3598_v47 }
 0x901   : > { %4146 = vmatpush1.bf16.msra.mxu1 %v12435_v53  ;;  %11842 = vmatprep.mubr.msk.bf16.mxu1 %vm1481_vm0, %v3600_v18 }
 0x902   : > { %4147 = vmatprep.subr.bf16.mxu1 %v12440_v5 }
 0x905   : > { %4148 = vmatpush1.bf16.msra.mxu1 %v12438_v4 }
 0x906   : > { %11918 = vmatprep.subr.bf16.mxu1 %v14847_v26 }
 0x908   : > { %11843 = vmatmul.mubr.msk.bf16.gmra.mxu1 %vm1481_vm0, %v3602_v43 }
 0x909   : > { %11846 = vmatprep.mubr.msk.bf16.mxu1 %vm1481_vm0, %v3604_v20 }
 0x910   : > { %11847 = vmatmul.mubr.msk.bf16.gmra.mxu1 %vm1481_vm0, %v3606_v36 }
 0x911   : > { %11850 = vmatprep.mubr.msk.bf16.mxu1 %vm1481_vm0, %v3608_v31 }
 0x918   : > { %11851 = vmatmul.mubr.msk.bf16.gmra.mxu1 %vm1481_vm0, %v3610_v6 }
 0x919   : > { %4165 = vmatprep.mubr.bf16.mxu1 %v18592_v50 }
 0x96a   : > { %v11808_v48 = vpop.f32.mrf.mxu1 }
 0x96c   : > { %v3267_v10 = vpop.f32.mrf.mxu1 }
 0x96e   : > { %v11809_v25 = vpop.f32.mrf.mxu1 }
 0x96f   : > { %v3363_v29 = vpack.c.bf16 %v11809_v25, %v11808_v48 }
 0x970   : > { %v3270_v52 = vpop.f32.mrf.mxu1 }
 0x971   : > { %v3362_v39 = vpack.c.bf16 %v3270_v52, %v3267_v10 }
 0x973   : > { %11003 = vmatmul.mubr.msk.bf16.vlgmr.msra.gmra.mxu0 %vm1481_vm0, %v3362_v39 }
 0x974   : > { %3460 = vmatprep.mubr.bf16.mxu0 %v18592_v50 }
 0x97b   : > { %11004 = vmatmul.mubr.msk.bf16.gmra.mxu0 %vm1481_vm0, %v3363_v29  ;;  %v18594_v29 = vld [vmem:[#allocation61_spill] sm:$0xff] }
 0x97c   : > { %3470 = vmatprep.mubr.bf16.mxu0 %v18592_v50 }
 0x9a2   : > { %v11812_v63 = vpop.f32.mrf.mxu1 }
 0x9a4   : > { %v3283_v17 = vpop.f32.mrf.mxu1 }
 0x9a6   : > { %v11813_v19 = vpop.f32.mrf.mxu1 }
 0x9a7   : > { %v3365_v11 = vpack.c.bf16 %v11813_v19, %v11812_v63  ;;  %v18596_v19 = vld [vmem:[#allocation62_spill] sm:$0xff] }
 0x9a8   : > { %v3286_v33 = vpop.f32.mrf.mxu1 }
 0x9a9   : > { %v3364_v38 = vpack.c.bf16 %v3286_v33, %v3283_v17  ;;  %v18595_v17 = vld [vmem:[#allocation65_spill] sm:$0xff]  ;;  %v18597_v33 = vld [vmem:[#allocation63_spill] sm:$0xff] }
 0x9ab   : > { %11005 = vmatmul.mubr.msk.bf16.gmra.mxu0 %vm1481_vm0, %v3364_v38  ;;  %v18598_v38 = vld [vmem:[#allocation64_spill] sm:$0xff] }
 0x9ac   : > { %3480 = vmatprep.mubr.bf16.mxu0 %v18592_v50 }
 0x9b0   : > { %v11816_v49 = vpop.f32.mrf.mxu1 }
 0x9b2   : > { %v3299_v61 = vpop.f32.mrf.mxu1 }
 0x9b3   : > { %11006 = vmatmul.mubr.msk.bf16.gmra.mxu0 %vm1481_vm0, %v3365_v11 }
 0x9b4   : > { %v11817_v54 = vpop.f32.mrf.mxu1  ;;  %3490 = vmatprep.mubr.bf16.mxu0 %v18592_v50 }
 0x9b5   : > { %v3367_v47 = vpack.c.bf16 %v11817_v54, %v11816_v49 }
 0x9b6   : > { %v3302_v0 = vpop.f32.mrf.mxu1 }
 0x9b7   : > { %v3366_v15 = vpack.c.bf16 %v3302_v0, %v3299_v61  ;;  %v18599_v61 = vld [vmem:[#allocation49_spill] sm:$0xff]  ;;  %v18600_v0 = vld [vmem:[#allocation78_spill] sm:$0xff] }
 0x9b8   : > { %v11820_v24 = vpop.f32.mrf.mxu1 }
 0x9ba   : > { %v3315_v51 = vpop.f32.mrf.mxu1 }
 0x9bb   : > { %11007 = vmatmul.mubr.msk.bf16.gmra.mxu0 %vm1481_vm0, %v3366_v15 }
 0x9bc   : > { %v11821_v30 = vpop.f32.mrf.mxu1  ;;  %3500 = vmatprep.mubr.bf16.mxu0 %v18592_v50 }
 0x9bd   : > { %v3369_v31 = vpack.c.bf16 %v11821_v30, %v11820_v24 }
 0x9be   : > { %v3318_v53 = vpop.f32.mrf.mxu1 }
 0x9bf   : > { %v3368_v18 = vpack.c.bf16 %v3318_v53, %v3315_v51  ;;  %v18601_v51 = vld [vmem:[#allocation79_spill] sm:$0xff] }
 0x9c0   : > { %v11840_v5 = vpop.f32.mrf.mxu1 }
 0x9c1   : > { %3776 = vmax.xlane.f32.xlu0 %v11840_v5 }
 0x9c2   : > { %v14868_v42 = vpop.f32.mrf.mxu1 }
 0x9c3   : > { %11008 = vmatmul.mubr.msk.bf16.gmra.mxu0 %vm1481_vm0, %v3367_v47 }
 0x9c4   : > { %v14871_v44 = vpop.f32.mrf.mxu1  ;;  %3510 = vmatprep.mubr.bf16.mxu0 %v18592_v50 }
 0x9c5   : > { %3772 = vmax.xlane.f32.xlu0 %v14868_v42 }
 0x9c6   : > { %v14875_v12 = vpop.f32.mrf.mxu1 }
 0x9c7   : > { %3774 = vmax.xlane.f32.xlu1 %v14875_v12 }
 0x9c8   : > { %v14878_v59 = vpop.f32.mrf.mxu1 }
 0x9c9   : > { %3778 = vmax.xlane.f32.xlu0 %v14871_v44 }
 0x9ca   : > { %v14881_v4 = vpop.f32.mrf.mxu1 }
 0x9cb   : > { %11009 = vmatmul.mubr.msk.bf16.gmra.mxu0 %vm1481_vm0, %v3368_v18  ;;  %v18603_v18 = vld [vmem:[#allocation81_spill] sm:$0xff] }
 0x9cc   : > { %v14884_v43 = vpop.f32.mrf.mxu1  ;;  %3520 = vmatprep.mubr.bf16.mxu0 %v18592_v50 }
 0x9cd   : > { %3786 = vmax.xlane.f32.xlu1 %v14884_v43 }
 0x9ce   : > { %v14888_v20 = vpop.f32.mrf.mxu1 }
 0x9d0   : > { %v14890_v36 = vpop.f32.mrf.mxu1 }
 0x9d1   : > { %3782 = vmax.xlane.f32.xlu1 %v14888_v20 }
 0x9d2   : > { %v14893_v6 = vpop.f32.mrf.mxu1 }
 0x9d3   : > { %11010 = vmatmul.mubr.msk.bf16.gmra.mxu0 %vm1481_vm0, %v3369_v31 }
 0x9d4   : > { %v14896_v48 = vpop.f32.mrf.mxu1 }
 0x9d5   : > { %3794 = vmax.xlane.f32.xlu1 %v14896_v48 }
 0x9d6   : > { %v14899_v10 = vpop.f32.mrf.mxu1 }
 0x9d8   : > { %v14901_v25 = vpop.f32.mrf.mxu1 }
 0x9d9   : > { %3790 = vmax.xlane.f32.xlu1 %v14899_v10 }
 0x9da   : > { %v14904_v52 = vpop.f32.mrf.mxu1 }
 0x9dc   : > { %v14906_v39 = vpop.f32.mrf.mxu1 }
 0x9dd   : > { %3802 = vmax.xlane.f32.xlu1 %v14906_v39 }
 0x9de   : > { %v14911_v63 = vpop.f32.mrf.mxu1 }
 0x9df   : > { %3938 = vrot.lane.b32.xlu0 %v18594_v29, %s13423_s13 }
 0x9e1   : > { %3798 = vmax.xlane.f32.xlu1 %v14911_v63 }
 0x9f2   : > { %3928 = vrot.lane.b32.xlu1 %v18595_v17, %s13423_s13 }
 0x9fe   : > { %3784 = vmax.xlane.f32.xlu0 %v14878_v59 }
 0xa02   : > { %3780 = vmax.xlane.f32.xlu0 %v14881_v4 }
 0xa06   : > { %3792 = vmax.xlane.f32.xlu0 %v14890_v36 }
 0xa0a   : > { %3788 = vmax.xlane.f32.xlu0 %v14893_v6 }
 0xa0e   : > { %3800 = vmax.xlane.f32.xlu0 %v14901_v25 }
 0xa12   : > { %3796 = vmax.xlane.f32.xlu0 %v14904_v52 }
 0xa28   : > { %3934 = vrot.lane.b32.xlu0 %v18596_v19, %s13423_s13 }
 0xa2c   : > { %3932 = vrot.lane.b32.xlu0 %v18597_v33, %s13423_s13 }
 0xa30   : > { %3930 = vrot.lane.b32.xlu0 %v18598_v38, %s13423_s13 }
 0xa33   : > { %v3452_v49 = vpop.f32.mrf.mxu0 }
 0xa34   : > { %v14929_v11 = vadd.f32 %v3452_v49, %v14598_v21  ;;  %3926 = vrot.lane.b32.xlu0 %v18599_v61, %s13423_s13  ;;  %v3937_v49 = vpop.permute.xlu1 %3936 }
 0xa35   : > { %v3454_v54 = vpop.f32.mrf.mxu0 }
 0xa36   : > { %v14934_v24 = vadd.f32 %v3454_v54, %v18600_v0 }
 0xa37   : > { %v3456_v15 = vpop.f32.mrf.mxu0 }
 0xa38   : > { %v14937_v30 = vadd.f32 %v3456_v15, %v18601_v51 }
 0xa39   : > { %v14939_v53 = vpop.f32.mrf.mxu0 }
 0xa3a   : > { %18602 = vst [vmem:[#allocation60_spill] sm:$0xff] %v14939_v53 }
 0xa3b   : > { %v3462_v47 = vpop.f32.mrf.mxu0 }
 0xa3c   : > { %v14942_v31 = vadd.f32 %v3462_v47, %v18603_v18 }
 0xa3d   : > { %v3464_v29 = vpop.f32.mrf.mxu0 }
 0xa3e   : > { %v14945_v21 = vadd.f32 %v3464_v29, %v14616_v1 }
 0xa3f   : > { %v3466_v17 = vpop.f32.mrf.mxu0 }
 0xa40   : > { %v14948_v19 = vadd.f32 %v3466_v17, %v14618_v58 }
 0xa41   : > { %v14964_v17 = vpop.f32.mrf.mxu0 }
 0xa42   : > { %18604 = vst [vmem:[#allocation67_spill] sm:$0xff] %v14964_v17 }
 0xa4a   : > { %v3777_v33 = vpop.xlane.xlu0 %3776 }
 0xa4b   : > { %v3806_v38 = vsub.f32 %v11840_v5, %v3777_v33 }
 0xa4d   : > { %v3824_v61 = vmul.f32 1.442695, %v3806_v38 }
 0xa4e   : > { %v3773_v54 = vpop.xlane.xlu0 %3772 }
 0xa4f   : > { %12855 = vpow2.f32 %v3824_v61  ;;  %v3804_v0 = vsub.f32 %v14868_v42, %v3773_v54 }
 0xa50   : > { %v3775_v15 = vpop.xlane.xlu1 %3774 }
 0xa51   : > { %v3820_v51 = vmul.f32 1.442695, %v3804_v0  ;;  %v3805_v18 = vsub.f32 %v14875_v12, %v3775_v15 }
 0xa52   : > { %v3779_v47 = vpop.xlane.xlu0 %3778 }
 0xa53   : > { %12857 = vpow2.f32 %v3820_v51  ;;  %v3807_v1 = vsub.f32 %v14871_v44, %v3779_v47  ;;  %v3822_v58 = vmul.f32 1.442695, %v3805_v18 }
 0xa55   : > { %v3826_v29 = vmul.f32 1.442695, %v3807_v1 }
 0xa56   : > { %v3939_v37 = vpop.permute.xlu0 %3938  ;;  %v3787_v15 = vpop.xlane.xlu1 %3786 }
 0xa57   : > { %12859 = vpow2.f32 %v3826_v29  ;;  %11854 = vmatprep.subr.bf16.mxu0 %v3939_v37 }
 0xa58   : > { %11855 = vmatpush3.bf16.msra.mxu0 %v3939_v37  ;;  %12861 = vpow2.f32 %v3822_v58 }
 0xa59   : > { %11856 = vmatprep.subr.bf16.mxu0 %v3937_v49 }
 0xa5a   : > { %v3783_v29 = vpop.xlane.xlu1 %3782 }
 0xa5c   : > { %v14953_v5 = vpop.eup %12855  ;;  %11857 = vmatpush3.bf16.msra.mxu0 %v3937_v49 }
 0xa5d   : > { %3856 = vadd.xlane.f32.xlu1 %v14953_v5 }
 0xa60   : > { %v14956_v42 = vpop.eup %12857 }
 0xa61   : > { %3852 = vadd.xlane.f32.xlu1 %v14956_v42 }
 0xa64   : > { %v14959_v12 = vpop.eup %12859 }
 0xa65   : > { %3858 = vadd.xlane.f32.xlu1 %v14959_v12  ;;  %v14962_v44 = vpop.eup %12861 }
 0xa69   : > { %3854 = vadd.xlane.f32.xlu1 %v14962_v44 }
 0xa6b   : > { %v3472_v37 = vpop.f32.mrf.mxu0 }
 0xa6c   : > { %v14968_v33 = vadd.f32 %v3472_v37, %v14642_v8 }
 0xa6d   : > { %v3474_v38 = vpop.f32.mrf.mxu0 }
 0xa6e   : > { %v14971_v49 = vadd.f32 %v3474_v38, %v14646_v7 }
 0xa6f   : > { %v3476_v61 = vpop.f32.mrf.mxu0 }
 0xa70   : > { %v14974_v54 = vadd.f32 %v3476_v61, %v14648_v3  ;;  %v18607_v3 = vld [vmem:[#allocation46_spill] sm:$0xff]  ;;  %v3795_v61 = vpop.xlane.xlu1 %3794 }
 0xa71   : > { %v14976_v0 = vpop.f32.mrf.mxu0 }
 0xa72   : > { %18605 = vst [vmem:[#allocation61_spill] sm:$0xff] %v14976_v0 }
 0xa73   : > { %v3482_v51 = vpop.f32.mrf.mxu0 }
 0xa74   : > { %v14979_v47 = vadd.f32 %v3482_v51, %v14656_v28  ;;  %v3791_v62 = vpop.xlane.xlu1 %3790 }
 0xa75   : > { %v3484_v18 = vpop.f32.mrf.mxu0 }
 0xa76   : > { %v14982_v1 = vadd.f32 %v3484_v18, %v14660_v16 }
 0xa77   : > { %v3486_v8 = vpop.f32.mrf.mxu0 }
 0xa78   : > { %v14985_v7 = vadd.f32 %v3486_v8, %v14662_v35 }
 0xa79   : > { %v14987_v58 = vpop.f32.mrf.mxu0 }
 0xa7a   : > { %18606 = vst [vmem:[#allocation65_spill] sm:$0xff] %v14987_v58  ;;  %3924 = vrot.lane.b32.xlu1 %v18607_v3, %s13423_s13  ;;  %v3813_v58 = vsub.f32 %v14899_v10, %v3791_v62  ;;  %v3815_v10 = vsub.f32 %v14896_v48, %v3795_v61 }
 0xa7b   : > { %v3492_v37 = vpop.f32.mrf.mxu0 }
 0xa7c   : > { %v14992_v38 = vadd.f32 %v3492_v37, %v14672_v22  ;;  %v3809_v37 = vsub.f32 %v14888_v20, %v3783_v29 }
 0xa7d   : > { %v3494_v28 = vpop.f32.mrf.mxu0 }
 0xa7e   : > { %v14995_v51 = vadd.f32 %v3494_v28, %v14676_v23 }
 0xa7f   : > { %v3496_v16 = vpop.f32.mrf.mxu0 }
 0xa80   : > { %v14998_v18 = vadd.f32 %v3496_v16, %v14678_v40  ;;  %v3803_v16 = vpop.xlane.xlu1 %3802 }
 0xa81   : > { %v15000_v35 = vpop.f32.mrf.mxu0 }
 0xa82   : > { %18608 = vst [vmem:[#allocation62_spill] sm:$0xff] %v15000_v35  ;;  %v3830_v35 = vmul.f32 1.442695, %v3809_v37  ;;  %v3838_v37 = vmul.f32 1.442695, %v3813_v58 }
 0xa83   : > { %v3502_v8 = vpop.f32.mrf.mxu0 }
 0xa84   : > { %v15003_v60 = vadd.f32 %v3502_v8, %v18609_v32  ;;  %12863 = vpow2.f32 %v3830_v35  ;;  %v3799_v17 = vpop.xlane.xlu1 %3798 }
 0xa85   : > { %v3504_v3 = vpop.f32.mrf.mxu0 }
 0xa86   : > { %v15006_v22 = vadd.f32 %v3504_v3, %v14690_v41 }
 0xa87   : > { %v3785_v9 = vpop.xlane.xlu0 %3784  ;;  %v3506_v23 = vpop.f32.mrf.mxu0 }
 0xa88   : > { %v15010_v28 = vadd.f32 %v3506_v23, %v14694_v57  ;;  %v3810_v8 = vsub.f32 %v14878_v59, %v3785_v9  ;;  %v3811_v23 = vsub.f32 %v14884_v43, %v3787_v15  ;;  %v3842_v15 = vmul.f32 1.442695, %v3815_v10 }
 0xa89   : > { %v15012_v40 = vpop.f32.mrf.mxu0 }
 0xa8a   : > { %18610 = vst [vmem:[#allocation63_spill] sm:$0xff] %v15012_v40  ;;  %v3832_v9 = vmul.f32 1.442695, %v3810_v8 }
 0xa8b   : > { %v3781_v0 = vpop.xlane.xlu0 %3780  ;;  %v3512_v32 = vpop.f32.mrf.mxu0 }
 0xa8c   : > { %v3808_v41 = vsub.f32 %v14881_v4, %v3781_v0  ;;  %v15018_v3 = vadd.f32 %v3512_v32, %v14704_v56  ;;  %v3834_v4 = vmul.f32 1.442695, %v3811_v23 }
 0xa8d   : > { %v3514_v20 = vpop.f32.mrf.mxu0 }
 0xa8e   : > { %v3828_v29 = vmul.f32 1.442695, %v3808_v41  ;;  %v15021_v57 = vadd.f32 %v3514_v20, %v14708_v14  ;;  %v3817_v14 = vsub.f32 %v14911_v63, %v3799_v17 }
 0xa8f   : > { %v3793_v40 = vpop.xlane.xlu0 %3792  ;;  %v3516_v62 = vpop.f32.mrf.mxu0 }
 0xa90   : > { %12865 = vpow2.f32 %v3828_v29  ;;  %v15026_v59 = vadd.f32 %v3516_v62, %v14713_v34  ;;  %v3819_v34 = vsub.f32 %v14906_v39, %v3803_v16  ;;  %v3846_v32 = vmul.f32 1.442695, %v3817_v14 }
 0xa91   : > { %v15028_v56 = vpop.f32.mrf.mxu0  ;;  %12867 = vpow2.f32 %v3838_v37  ;;  %v3814_v63 = vsub.f32 %v14890_v36, %v3793_v40  ;;  %v15043_v29 = vpop.eup %12863 }
 0xa92   : > { %18611 = vst [vmem:[#allocation64_spill] sm:$0xff] %v15028_v56  ;;  %12869 = vpow2.f32 %v3832_v9 }
 0xa93   : > { %v3789_v0 = vpop.xlane.xlu0 %3788  ;;  %v3522_v43 = vpop.f32.mrf.mxu0  ;;  %12871 = vpow2.f32 %v3834_v4 }
 0xa94   : > { %v3812_v58 = vsub.f32 %v14893_v6, %v3789_v0  ;;  %v15033_v48 = vadd.f32 %v3522_v43, %v14723_v55  ;;  %12873 = vpow2.f32 %v3842_v15  ;;  %v3850_v6 = vmul.f32 1.442695, %v3819_v34  ;;  %v3929_v0 = vpop.permute.xlu1 %3928 }
 0xa95   : > { %v3524_v61 = vpop.f32.mrf.mxu0  ;;  %12875 = vpow2.f32 %v3846_v32  ;;  %v18612_v32 = vld [vmem:[#allocation16_spill] sm:$0xff] }
 0xa96   : > { %v15036_v35 = vadd.f32 %v3524_v61, %v14729_v45  ;;  %v3836_v17 = vmul.f32 1.442695, %v3812_v58  ;;  %v3840_v45 = vmul.f32 1.442695, %v3814_v63  ;;  %v18614_v63 = vld [vmem:[#allocation34_spill] sm:$0xff] }
 0xa97   : > { %v3801_v8 = vpop.xlane.xlu0 %3800  ;;  %v3526_v41 = vpop.f32.mrf.mxu0 }
 0xa98   : > { %v15041_v20 = vadd.f32 %v3526_v41, %v14733_v46  ;;  %12877 = vpow2.f32 %v3836_v17  ;;  %v3818_v46 = vsub.f32 %v14901_v25, %v3801_v8  ;;  %v18613_v8 = vld [vmem:[#allocation36_spill] sm:$0xff]  ;;  %v1261_v17 = vadd.f32 %v18614_v63, %v18612_v32 }
 0xa99   : > { %12879 = vpow2.f32 %v3850_v6  ;;  %v1265_v41 = vadd.f32 %v18613_v8, %v18612_v32 }
 0xa9a   : > { %12881 = vpow2.f32 %v3840_v45  ;;  %v3848_v10 = vmul.f32 1.442695, %v3818_v46 }
 0xa9b   : > { %v3797_v55 = vpop.xlane.xlu0 %3796  ;;  %v15085_v6 = vpack.c.bf16 %v1265_v41, %v1261_v17 }
 0xa9c   : > { %v3816_v23 = vsub.f32 %v14904_v52, %v3797_v55  ;;  %v18616_v55 = vld [vmem:[#allocation66_spill] sm:$0xff] }
 0xa9d   : > { %v15046_v39 = vpop.eup %12865  ;;  %18615 = vst [vmem:[#allocation49_spill] sm:$0xff] %v15085_v6  ;;  %v1275_v45 = vadd.f32 %v18616_v55, %v18612_v32 }
 0xa9e   : > { %3860 = vadd.xlane.f32.xlu0 %v15046_v39  ;;  %3862 = vadd.xlane.f32.xlu1 %v15043_v29  ;;  %v15050_v40 = vpop.eup %12867  ;;  %v3844_v16 = vmul.f32 1.442695, %v3816_v23  ;;  %v18617_v23 = vld [vmem:[#allocation38_spill] sm:$0xff] }
 0xa9f   : > { %v3935_v36 = vpop.permute.xlu0 %3934  ;;  %v15053_v37 = vpop.eup %12869 }
 0xaa0   : > { %11858 = vmatprep.subr.bf16.mxu0 %v3935_v36  ;;  %v15057_v62 = vpop.eup %12871  ;;  %12883 = vpow2.f32 %v3844_v16 }
 0xaa1   : > { %11859 = vmatpush3.bf16.msra.mxu0 %v3935_v36  ;;  %v15059_v9 = vpop.eup %12873  ;;  %12885 = vpow2.f32 %v3848_v10  ;;  %v1271_v36 = vadd.f32 %v18617_v23, %v18612_v32 }
 0xaa2   : > { %3864 = vadd.xlane.f32.xlu0 %v15053_v37  ;;  %3870 = vadd.xlane.f32.xlu1 %v15050_v40  ;;  %v15063_v4 = vpop.eup %12875 }
 0xaa3   : > { %v3933_v52 = vpop.permute.xlu0 %3932  ;;  %v15093_v46 = vpack.c.bf16 %v1275_v45, %v1271_v36 }
 0xaa4   : > { %11860 = vmatprep.subr.bf16.mxu0 %v3933_v52 }
 0xaa5   : > { %11861 = vmatpush3.bf16.msra.mxu0 %v3933_v52  ;;  %v15065_v14 = vpop.eup %12877  ;;  %18618 = vst [vmem:[#allocation78_spill] sm:$0xff] %v15093_v46 }
 0xaa6   : > { %3866 = vadd.xlane.f32.xlu0 %v15057_v62  ;;  %3874 = vadd.xlane.f32.xlu1 %v15059_v9  ;;  %v15069_v43 = vpop.eup %12879 }
 0xaa7   : > { %v3931_v25 = vpop.permute.xlu0 %3930  ;;  %v15071_v15 = vpop.eup %12881 }
 0xaa8   : > { %11862 = vmatprep.subr.bf16.mxu0 %v3931_v25 }
 0xaa9   : > { %11863 = vmatpush3.bf16.msra.mxu0 %v3931_v25 }
 0xaaa   : > { %3868 = vadd.xlane.f32.xlu0 %v15065_v14  ;;  %3878 = vadd.xlane.f32.xlu1 %v15063_v4 }
 0xaab   : > { %11864 = vmatprep.subr.bf16.mxu0 %v3929_v0  ;;  %v3927_v58 = vpop.permute.xlu0 %3926 }
 0xaad   : > { %11865 = vmatpush3.bf16.msra.mxu0 %v3929_v0  ;;  %v15075_v61 = vpop.eup %12883 }
 0xaae   : > { %3872 = vadd.xlane.f32.xlu0 %v15071_v15  ;;  %3882 = vadd.xlane.f32.xlu1 %v15069_v43  ;;  %v15078_v34 = vpop.eup %12885 }
 0xaaf   : > { %11866 = vmatprep.subr.bf16.mxu0 %v3927_v58 }
 0xab1   : > { %11867 = vmatpush3.bf16.msra.mxu0 %v3927_v58 }
 0xab2   : > { %3876 = vadd.xlane.f32.xlu0 %v15075_v61 }
 0xab6   : > { %3880 = vadd.xlane.f32.xlu0 %v15078_v34 }
 0xabf   : > { %5013 = vrot.lane.b32.xlu1 %v15085_v6, %s13420_s21 }
 0xacc   : > { %5015 = vrot.lane.b32.xlu0 %v15093_v46, %s13420_s21 }
 0xae6   : > { %v3857_v16 = vpop.xlane.xlu1 %3856 }
 0xaea   : > { %v3853_v52 = vpop.xlane.xlu1 %3852 }
 0xaee   : > { %v3859_v10 = vpop.xlane.xlu1 %3858 }
 0xaef   : > { %12887 = vrcp.f32 %v3859_v10  ;;  %v18621_v10 = vld [vmem:[#allocation27_spill] sm:$0xff] }
 0xaf0   : > { %12889 = vrcp.f32 %v3853_v52 }
 0xaf1   : > { %12891 = vrcp.f32 %v3857_v16  ;;  %v4356_v16 = vsel %vm1481_vm0, %v15093_v46, 0 }
 0xaf2   : > { %v3855_v25 = vpop.xlane.xlu1 %3854 }
 0xaf3   : > { %12893 = vrcp.f32 %v3855_v25  ;;  %v4344_v25 = vsel %vm1481_vm0, %v18621_v10, 0 }
 0xaf6   : > { %v3925_v0 = vpop.permute.xlu1 %3924 }
 0xaf7   : > { %11868 = vmatprep.subr.bf16.mxu0 %v3925_v0 }
 0xaf8   : > { %11869 = vmatpush3.bf16.msra.mxu0 %v3925_v0 }
 0xaf9   : > { %12174 = vmatprep.subr.msk.bf16.mxu0 %vm1481_vm0, %v15093_v46 }
 0xafc   : > { %v12888_v58 = vpop.eup %12887 }
 0xafd   : > { %v12890_v32 = vpop.eup %12889  ;;  %v3903_v63 = vmul.f32 %v12888_v58, %v14959_v12  ;;  %v4353_v12 = vsel %vm1481_vm0, %v15085_v6, 0 }
 0xafe   : > { %v12892_v8 = vpop.eup %12891  ;;  %v3900_v17 = vmul.f32 %v12890_v32, %v14956_v42  ;;  %v18619_v42 = vld [vmem:[#allocation33_spill] sm:$0xff]  ;;  %v18622_v32 = vld [vmem:[#allocation24_spill] sm:$0xff] }
 0xaff   : > { %v3902_v45 = vmul.f32 %v12892_v8, %v14953_v5  ;;  %v4350_v5 = vsel %vm1481_vm0, %v18619_v42, 0 }
 0xb00   : > { %v12894_v41 = vpop.eup %12893 }
 0xb01   : > { %v3901_v55 = vmul.f32 %v12894_v41, %v14962_v44  ;;  %v3917_v36 = vpack.c.bf16 %v3903_v63, %v3902_v45  ;;  %v18620_v44 = vld [vmem:[#allocation30_spill] sm:$0xff]  ;;  %v4341_v63 = vsel %vm1481_vm0, %v18622_v32, 0  ;;  %v18623_v45 = vld [vmem:[#allocation21_spill] sm:$0xff] }
 0xb02   : > { %v4347_v52 = vsel %vm1481_vm0, %v18620_v44, 0 }
 0xb03   : > { %v3916_v23 = vpack.c.bf16 %v3901_v55, %v3900_v17 }
 0xb05   : > { %11870 = vmatprep.mubr.bf16.mxu0 %v3916_v23 }
 0xb06   : > { %11871 = vmatmul.mubr.bf16.vlgmr.msra.gmra.mxu0 %v3917_v36 }
 0xb07   : > { %11887 = vmatpush3.bf16.xpose.msra.mxu0 %v4356_v16 }
 0xb08   : > { %12175 = vmatprep.subr.msk.bf16.mxu0 %vm1481_vm0, %v15085_v6 }
 0xb0f   : > { %11889 = vmatpush3.bf16.xpose.msra.mxu0 %v4353_v12 }
 0xb10   : > { %12176 = vmatprep.subr.msk.bf16.mxu0 %vm1481_vm0, %v18619_v42 }
 0xb17   : > { %11891 = vmatpush3.bf16.xpose.msra.mxu0 %v4350_v5  ;;  %v4338_v5 = vsel %vm1481_vm0, %v18623_v45, 0 }
 0xb18   : > { %12177 = vmatprep.subr.msk.bf16.mxu0 %vm1481_vm0, %v18620_v44 }
 0xb1f   : > { %11893 = vmatpush3.bf16.xpose.msra.mxu0 %v4347_v52 }
 0xb20   : > { %12178 = vmatprep.subr.msk.bf16.mxu0 %vm1481_vm0, %v18621_v10 }
 0xb27   : > { %11895 = vmatpush3.bf16.xpose.msra.mxu0 %v4344_v25  ;;  %v3861_v0 = vpop.xlane.xlu0 %3860  ;;  %v3863_v58 = vpop.xlane.xlu1 %3862 }
 0xb28   : > { %12895 = vrcp.f32 %v3861_v0  ;;  %12179 = vmatprep.subr.msk.bf16.mxu0 %vm1481_vm0, %v18622_v32 }
 0xb29   : > { %12897 = vrcp.f32 %v3863_v58  ;;  %v18624_v58 = vld [vmem:[#allocation18_spill] sm:$0xff] }
 0xb2b   : > { %v3865_v8 = vpop.xlane.xlu0 %3864  ;;  %v3871_v41 = vpop.xlane.xlu1 %3870 }
 0xb2c   : > { %12899 = vrcp.f32 %v3865_v8 }
 0xb2f   : > { %11897 = vmatpush3.bf16.xpose.msra.mxu0 %v4341_v63  ;;  %v3867_v17 = vpop.xlane.xlu0 %3866  ;;  %v3875_v55 = vpop.xlane.xlu1 %3874 }
 0xb30   : > { %12901 = vrcp.f32 %v3867_v17  ;;  %12180 = vmatprep.subr.msk.bf16.mxu0 %vm1481_vm0, %v18623_v45 }
 0xb31   : > { %12903 = vrcp.f32 %v3871_v41 }
 0xb33   : > { %v3869_v23 = vpop.xlane.xlu0 %3868  ;;  %v3879_v16 = vpop.xlane.xlu1 %3878 }
 0xb34   : > { %12905 = vrcp.f32 %v3869_v23 }
 0xb35   : > { %v12896_v36 = vpop.eup %12895  ;;  %12907 = vrcp.f32 %v3875_v55 }
 0xb36   : > { %v12898_v12 = vpop.eup %12897  ;;  %v3904_v52 = vmul.f32 %v12896_v36, %v15046_v39  ;;  %v4335_v39 = vsel %vm1481_vm0, %v18624_v58, 0 }
 0xb37   : > { %11899 = vmatpush3.bf16.xpose.msra.mxu0 %v4338_v5  ;;  %v3873_v25 = vpop.xlane.xlu0 %3872  ;;  %v3905_v0 = vmul.f32 %v12898_v12, %v15043_v29  ;;  %v3883_v63 = vpop.xlane.xlu1 %3882 }
 0xb38   : > { %12909 = vrcp.f32 %v3873_v25  ;;  %12181 = vmatprep.subr.msk.bf16.mxu0 %vm1481_vm0, %v18624_v58 }
 0xb39   : > { %v3918_v8 = vpack.c.bf16 %v3905_v0, %v3904_v52  ;;  %12911 = vrcp.f32 %v3879_v16  ;;  %v12900_v41 = vpop.eup %12899 }
 0xb3a   : > { %v3906_v23 = vmul.f32 %v12900_v41, %v15053_v37 }
 0xb3b   : > { %11874 = vmatprep.mubr.bf16.mxu0 %v3918_v8  ;;  %v3877_v17 = vpop.xlane.xlu0 %3876 }
 0xb3c   : > { %12913 = vrcp.f32 %v3877_v17 }
 0xb3d   : > { %v12902_v55 = vpop.eup %12901  ;;  %12915 = vrcp.f32 %v3883_v63 }
 0xb3e   : > { %v3907_v29 = vmul.f32 %v12902_v55, %v15057_v62  ;;  %v12904_v36 = vpop.eup %12903 }
 0xb3f   : > { %11901 = vmatpush3.bf16.xpose.msra.mxu0 %v4335_v39  ;;  %v3881_v12 = vpop.xlane.xlu0 %3880  ;;  %v3909_v25 = vmul.f32 %v12904_v36, %v15050_v40  ;;  %v18625_v39 = vld [vmem:[#allocation76_spill] sm:$0xff] }
 0xb40   : > { %12917 = vrcp.f32 %v3881_v12  ;;  %v3919_v5 = vpack.c.bf16 %v3907_v29, %v3906_v23  ;;  %v548_v23 = vrot.slane %v14834_v27, %v18625_v39  ;;  %v18628_v27 = vld [vmem:[#allocation22_spill] sm:$0xff] }
 0xb41   : > { %v12906_v16 = vpop.eup %12905 }
 0xb42   : > { %11875 = vmatmul.mubr.bf16.gmra.mxu0 %v3919_v5  ;;  %v3908_v52 = vmul.f32 %v12906_v16, %v15065_v14  ;;  %v12908_v0 = vpop.eup %12907  ;;  %v18626_v5 = vld [vmem:[#allocation19_spill] sm:$0xff] }
 0xb43   : > { %v3911_v37 = vmul.f32 %v12908_v0, %v15059_v9  ;;  %v1088_v16 = vadd.f32 %v18626_v5, %v548_v23  ;;  %v18635_v5 = vld [vmem:[#allocation32_spill] sm:$0xff] }
 0xb44   : > { %v3920_v8 = vpack.c.bf16 %v3909_v25, %v3908_v52  ;;  %v18627_v52 = vld [vmem:[#allocation20_spill] sm:$0xff] }
 0xb45   : > { %v12910_v63 = vpop.eup %12909 }
 0xb46   : > { %11878 = vmatprep.mubr.bf16.mxu0 %v3920_v8  ;;  %v3910_v17 = vmul.f32 %v12910_v63, %v15071_v15  ;;  %v12912_v62 = vpop.eup %12911  ;;  %v1092_v15 = vadd.f32 %v18627_v52, %v548_v23 }
 0xb47   : > { %v3913_v14 = vmul.f32 %v12912_v62, %v15063_v4  ;;  %v1098_v4 = vadd.f32 %v18628_v27, %v548_v23  ;;  %v18631_v62 = vld [vmem:[#allocation26_spill] sm:$0xff] }
 0xb48   : > { %v3921_v41 = vpack.c.bf16 %v3911_v37, %v3910_v17  ;;  %v15149_v8 = vpack.c.bf16 %v1092_v15, %v1088_v16  ;;  %v18630_v17 = vld [vmem:[#allocation25_spill] sm:$0xff]  ;;  %v1132_v16 = vadd.f32 %v18635_v5, %v548_v23 }
 0xb49   : > { %v12914_v55 = vpop.eup %12913  ;;  %v1108_v37 = vadd.f32 %v18630_v17, %v548_v23 }
 0xb4a   : > { %11879 = vmatmul.mubr.bf16.gmra.mxu0 %v3921_v41  ;;  %v3912_v29 = vmul.f32 %v12914_v55, %v15075_v61  ;;  %v12916_v40 = vpop.eup %12915  ;;  %v18629_v61 = vld [vmem:[#allocation23_spill] sm:$0xff]  ;;  %v1112_v41 = vadd.f32 %v18631_v62, %v548_v23 }
 0xb4b   : > { %v3915_v25 = vmul.f32 %v12916_v40, %v15069_v43  ;;  %v1102_v63 = vadd.f32 %v18629_v61, %v548_v23  ;;  %v18632_v43 = vld [vmem:[#allocation28_spill] sm:$0xff] }
 0xb4c   : > { %v3922_v36 = vpack.c.bf16 %v3913_v14, %v3912_v29  ;;  %v1118_v29 = vadd.f32 %v18632_v43, %v548_v23  ;;  %v18633_v14 = vld [vmem:[#allocation29_spill] sm:$0xff] }
 0xb4d   : > { %v12918_v12 = vpop.eup %12917  ;;  %v15157_v55 = vpack.c.bf16 %v1102_v63, %v1098_v4  ;;  %v1122_v40 = vadd.f32 %v18633_v14, %v548_v23  ;;  %v18638_v4 = vld [vmem:[#allocation39_spill] sm:$0xff]  ;;  %v18639_v63 = vld [vmem:[#allocation40_spill] sm:$0xff] }
 0xb4e   : > { %11882 = vmatprep.mubr.bf16.mxu0 %v3922_v36  ;;  %v3914_v9 = vmul.f32 %v12918_v12, %v15078_v34  ;;  %v15159_v34 = vpack.c.bf16 %v1112_v41, %v1108_v37  ;;  %v18634_v36 = vld [vmem:[#allocation31_spill] sm:$0xff]  ;;  %v1148_v61 = vadd.f32 %v18638_v4, %v548_v23  ;;  %v1152_v17 = vadd.f32 %v18639_v63, %v548_v23  ;;  %v18640_v41 = vld [vmem:[#allocation42_spill] sm:$0xff] }
 0xb4f   : > { %v1128_v12 = vadd.f32 %v18634_v36, %v548_v23  ;;  %v15169_v52 = vpack.c.bf16 %v1122_v40, %v1118_v29  ;;  %v1158_v43 = vadd.f32 %v18640_v41, %v548_v23  ;;  %v18641_v29 = vld [vmem:[#allocation43_spill] sm:$0xff]  ;;  %v15196_v36 = vpop.f32.mrf.mxu0 }
 0xb50   : > { %v3923_v0 = vpack.c.bf16 %v3915_v25, %v3914_v9  ;;  %v18636_v9 = vld [vmem:[#allocation35_spill] sm:$0xff]  ;;  %v15183_v62 = vpack.c.bf16 %v1152_v17, %v1148_v61  ;;  %v1162_v14 = vadd.f32 %v18641_v29, %v548_v23  ;;  %18642 = vst [vmem:[#allocation79_spill] sm:$0xff] %v15196_v36  ;;  %v18645_v61 = vld [vmem:[#allocation56_spill] sm:$0xff]  ;;  %v18646_v17 = vld [vmem:[#allocation57_spill] sm:$0xff] }
 0xb51   : > { %v15171_v15 = vpack.c.bf16 %v1132_v16, %v1128_v12  ;;  %v1138_v25 = vadd.f32 %v18636_v9, %v548_v23  ;;  %v18643_v9 = vld [vmem:[#allocation58_spill] sm:$0xff]  ;;  %v1364_v63 = vadd.f32 %v18645_v61, %v14839_v2  ;;  %v1368_v41 = vadd.f32 %v18646_v17, %v14839_v2 }
 0xb52   : > { %11883 = vmatmul.mubr.bf16.gmra.mxu0 %v3923_v0  ;;  %v18637_v0 = vld [vmem:[#allocation37_spill] sm:$0xff]  ;;  %v15191_v40 = vpack.c.bf16 %v1162_v14, %v1158_v43  ;;  %v18648_v29 = vld [vmem:[#allocation54_spill] sm:$0xff] }
 0xb53   : > { %11902 = vmatprep.mubr.msk.bf16.mxu0 %vm1481_vm0, %v15149_v8  ;;  %v1142_v27 = vadd.f32 %v18637_v0, %v548_v23  ;;  %v18644_v0 = vld [vmem:[#allocation59_spill] sm:$0xff]  ;;  %v1354_v14 = vadd.f32 %v18648_v29, %v14839_v2 }
 0xb55   : > { %v15181_v37 = vpack.c.bf16 %v1142_v27, %v1138_v25  ;;  %v1374_v25 = vadd.f32 %v18643_v9, %v14839_v2  ;;  %v1378_v27 = vadd.f32 %v18644_v0, %v14839_v2  ;;  %v15216_v0 = vpack.c.bf16 %v1368_v41, %v1364_v63  ;;  %v18655_v63 = vld [vmem:[#allocation51_spill] sm:$0xff] }
 0xb56   : > { %v1338_v41 = vadd.f32 %v18655_v63, %v14839_v2 }
 0xb57   : > { %v15206_v43 = vpack.c.bf16 %v1378_v27, %v1374_v25  ;;  %18650 = vst [vmem:[#allocation46_spill] sm:$0xff] %v15216_v0  ;;  %v18651_v27 = vld [vmem:[#allocation52_spill] sm:$0xff] }
 0xb59   : > { %18647 = vst [vmem:[#allocation81_spill] sm:$0xff] %v15206_v43 }
 0xb5a   : > { %11903 = vmatmul.mubr.msk.bf16.vlgmr.msra.gmra.mxu0 %vm1481_vm0, %v15157_v55 }
 0xb5b   : > { %11906 = vmatprep.mubr.msk.bf16.mxu0 %vm1481_vm0, %v15159_v34 }
 0xb62   : > { %11907 = vmatmul.mubr.msk.bf16.gmra.mxu0 %vm1481_vm0, %v15169_v52 }
 0xb63   : > { %11910 = vmatprep.mubr.msk.bf16.mxu0 %vm1481_vm0, %v15171_v15 }
 0xb6a   : > { %11911 = vmatmul.mubr.msk.bf16.gmra.mxu0 %vm1481_vm0, %v15181_v37 }
 0xb6b   : > { %11914 = vmatprep.mubr.msk.bf16.mxu0 %vm1481_vm0, %v15183_v62 }
 0xb72   : > { %11915 = vmatmul.mubr.msk.bf16.gmra.mxu0 %vm1481_vm0, %v15191_v40 }
 0xb73   : > { %4824 = vmatprep.mubr.bf16.mxu0 %v18592_v50 }
 0xbc6   : > { %v11872_v12 = vpop.f32.mrf.mxu0 }
 0xbc8   : > { %v3982_v5 = vpop.f32.mrf.mxu0 }
 0xbca   : > { %v11873_v16 = vpop.f32.mrf.mxu0 }
 0xbcb   : > { %v4078_v25 = vpack.c.bf16 %v11873_v16, %v11872_v12  ;;  %v18654_v12 = vld [vmem:[#allocation50_spill] sm:$0xff] }
 0xbcc   : > { %v3985_v4 = vpop.f32.mrf.mxu0  ;;  %v1334_v16 = vadd.f32 %v18654_v12, %v14839_v2 }
 0xbcd   : > { %v4077_v23 = vpack.c.bf16 %v3985_v4, %v3982_v5  ;;  %v18649_v5 = vld [vmem:[#allocation55_spill] sm:$0xff]  ;;  %v1344_v4 = vadd.f32 %v18651_v27, %v14839_v2 }
 0xbce   : > { %v1358_v9 = vadd.f32 %v18649_v5, %v14839_v2  ;;  %v15242_v27 = vpack.c.bf16 %v1338_v41, %v1334_v16  ;;  %v15258_v16 = vpop.permute.xlu0 %5015 }
 0xbcf   : > { %11023 = vmatmul.mubr.msk.bf16.vlgmr.msra.gmra.mxu1 %vm1481_vm0, %v4077_v23  ;;  %v18652_v23 = vld [vmem:[#allocation53_spill] sm:$0xff]  ;;  %18664 = vst [vmem:[#allocation38_spill] sm:$0xff] %v15258_v16 }
 0xbd0   : > { %11919 = vmatpush3.bf16.msra.mxu1 %v14847_v26  ;;  %4175 = vmatprep.mubr.bf16.mxu1 %v18592_v50  ;;  %v1348_v61 = vadd.f32 %v18652_v23, %v14839_v2  ;;  %v15224_v17 = vpack.c.bf16 %v1358_v9, %v1354_v14  ;;  %v18657_v14 = vld [vmem:[#allocation47_spill] sm:$0xff]  ;;  %v18658_v9 = vld [vmem:[#allocation48_spill] sm:$0xff]  ;;  %18659 = vst [vmem:[#allocation36_spill] sm:$0xff] %v15242_v27 }
 0xbd1   : > { %11920 = vmatprep.subr.bf16.mxu1 %v15206_v43  ;;  %v1324_v5 = vadd.f32 %v18657_v14, %v14839_v2  ;;  %v18660_v23 = vld [vmem:[#allocation44_spill] sm:$0xff] }
 0xbd2   : > { %18653 = vst [vmem:[#allocation86_spill] sm:$0xff] %v15224_v17  ;;  %v15234_v29 = vpack.c.bf16 %v1348_v61, %v1344_v4  ;;  %v1314_v4 = vadd.f32 %v18660_v23, %v14839_v2  ;;  %v18661_v61 = vld [vmem:[#allocation45_spill] sm:$0xff] }
 0xbd3   : > { %v1318_v12 = vadd.f32 %v18661_v61, %v14839_v2 }
 0xbd4   : > { %11921 = vmatpush3.bf16.msra.mxu1 %v15206_v43  ;;  %18656 = vst [vmem:[#allocation16_spill] sm:$0xff] %v15234_v29 }
 0xbd5   : > { %11922 = vmatprep.subr.bf16.mxu1 %v15216_v0  ;;  %v15254_v14 = vpack.c.bf16 %v1318_v12, %v1314_v4 }
 0xbd7   : > { %11024 = vmatmul.mubr.msk.bf16.gmra.mxu1 %vm1481_vm0, %v4078_v25  ;;  %v1328_v25 = vadd.f32 %v18658_v9, %v14839_v2  ;;  %18663 = vst [vmem:[#allocation66_spill] sm:$0xff] %v15254_v14 }
 0xbd8   : > { %11923 = vmatpush3.bf16.msra.mxu1 %v15216_v0  ;;  %4185 = vmatprep.mubr.bf16.mxu1 %v18592_v50 }
 0xbd9   : > { %11924 = vmatprep.subr.bf16.mxu1 %v15224_v17  ;;  %v15250_v63 = vpack.c.bf16 %v1328_v25, %v1324_v5 }
 0xbdb   : > { %18662 = vst [vmem:[#allocation34_spill] sm:$0xff] %v15250_v63 }
 0xbdc   : > { %11925 = vmatpush3.bf16.msra.mxu1 %v15224_v17 }
 0xbdd   : > { %11926 = vmatprep.subr.bf16.mxu1 %v15234_v29 }
 0xbe0   : > { %11927 = vmatpush3.bf16.msra.mxu1 %v15234_v29 }
 0xbe1   : > { %11928 = vmatprep.subr.bf16.mxu1 %v15242_v27 }
 0xbe4   : > { %11929 = vmatpush3.bf16.msra.mxu1 %v15242_v27 }
 0xbe5   : > { %11930 = vmatprep.subr.bf16.mxu1 %v15250_v63 }
 0xbe8   : > { %11931 = vmatpush3.bf16.msra.mxu1 %v15250_v63 }
 0xbe9   : > { %11932 = vmatprep.subr.bf16.mxu1 %v15254_v14 }
 0xbec   : > { %11933 = vmatpush3.bf16.msra.mxu1 %v15254_v14 }
 0xbed   : > { %12182 = vmatprep.subr.msk.bf16.mxu1 %vm1481_vm0, %v15258_v16 }
 0xc02   : > { %v11876_v2 = vpop.f32.mrf.mxu0 }
 0xc04   : > { %v3998_v41 = vpop.f32.mrf.mxu0 }
 0xc06   : > { %v11877_v5 = vpop.f32.mrf.mxu0 }
 0xc07   : > { %v4080_v39 = vpack.c.bf16 %v11877_v5, %v11876_v2 }
 0xc08   : > { %v4001_v9 = vpop.f32.mrf.mxu0 }
 0xc09   : > { %v4079_v25 = vpack.c.bf16 %v4001_v9, %v3998_v41 }
 0xc0a   : > { %v11880_v23 = vpop.f32.mrf.mxu0 }
 0xc0b   : > { %11025 = vmatmul.mubr.msk.bf16.gmra.mxu1 %vm1481_vm0, %v4079_v25 }
 0xc0c   : > { %v4014_v4 = vpop.f32.mrf.mxu0  ;;  %4195 = vmatprep.mubr.bf16.mxu1 %v18592_v50 }
 0xc0e   : > { %v11881_v61 = vpop.f32.mrf.mxu0 }
 0xc10   : > { %v4017_v12 = vpop.f32.mrf.mxu0 }
 0xc11   : > { %v4081_v46 = vpack.c.bf16 %v4017_v12, %v4014_v4 }
 0xc12   : > { %v11884_v36 = vpop.f32.mrf.mxu0 }
 0xc13   : > { %11026 = vmatmul.mubr.msk.bf16.gmra.mxu1 %vm1481_vm0, %v4080_v39  ;;  %v4082_v39 = vpack.c.bf16 %v11881_v61, %v11880_v23 }
 0xc14   : > { %v4030_v56 = vpop.f32.mrf.mxu0  ;;  %4205 = vmatprep.mubr.bf16.mxu1 %v18592_v50 }
 0xc16   : > { %v11885_v53 = vpop.f32.mrf.mxu0 }
 0xc18   : > { %v4033_v13 = vpop.f32.mrf.mxu0 }
 0xc19   : > { %v4083_v23 = vpack.c.bf16 %v4033_v13, %v4030_v56  ;;  %v4084_v13 = vpack.c.bf16 %v11885_v53, %v11884_v36 }
 0xc1a   : > { %v11904_v6 = vpop.f32.mrf.mxu0 }
 0xc1b   : > { %11027 = vmatmul.mubr.msk.bf16.gmra.mxu1 %vm1481_vm0, %v4081_v46  ;;  %4459 = vmax.xlane.f32.xlu0 %v11904_v6 }
 0xc1c   : > { %v15268_v41 = vpop.f32.mrf.mxu0  ;;  %4215 = vmatprep.mubr.bf16.mxu1 %v18592_v50 }
 0xc1e   : > { %v11905_v9 = vpop.f32.mrf.mxu0 }
 0xc1f   : > { %4455 = vmax.xlane.f32.xlu0 %v15268_v41  ;;  %4461 = vmax.xlane.f32.xlu1 %v11905_v9 }
 0xc20   : > { %v15272_v2 = vpop.f32.mrf.mxu0 }
 0xc22   : > { %v15274_v5 = vpop.f32.mrf.mxu0 }
 0xc23   : > { %11028 = vmatmul.mubr.msk.bf16.gmra.mxu1 %vm1481_vm0, %v4082_v39  ;;  %4457 = vmax.xlane.f32.xlu1 %v15272_v2 }
 0xc24   : > { %4467 = vmax.xlane.f32.xlu0 %v15274_v5  ;;  %v15279_v46 = vpop.f32.mrf.mxu0  ;;  %4225 = vmatprep.mubr.bf16.mxu1 %v18592_v50 }
 0xc26   : > { %v15282_v25 = vpop.f32.mrf.mxu0 }
 0xc27   : > { %4469 = vmax.xlane.f32.xlu1 %v15282_v25 }
 0xc28   : > { %4463 = vmax.xlane.f32.xlu0 %v15279_v46  ;;  %v15286_v4 = vpop.f32.mrf.mxu0 }
 0xc2a   : > { %v15288_v61 = vpop.f32.mrf.mxu0 }
 0xc2b   : > { %4465 = vmax.xlane.f32.xlu1 %v15286_v4  ;;  %11029 = vmatmul.mubr.msk.bf16.gmra.mxu1 %vm1481_vm0, %v4083_v23 }
 0xc2c   : > { %4475 = vmax.xlane.f32.xlu0 %v15288_v61  ;;  %v15293_v12 = vpop.f32.mrf.mxu0  ;;  %4235 = vmatprep.mubr.bf16.mxu1 %v18592_v50 }
 0xc2e   : > { %v15296_v39 = vpop.f32.mrf.mxu0 }
 0xc2f   : > { %4477 = vmax.xlane.f32.xlu1 %v15296_v39 }
 0xc30   : > { %4471 = vmax.xlane.f32.xlu0 %v15293_v12  ;;  %v15300_v63 = vpop.f32.mrf.mxu0 }
 0xc32   : > { %v15302_v56 = vpop.f32.mrf.mxu0 }
 0xc33   : > { %4473 = vmax.xlane.f32.xlu1 %v15300_v63  ;;  %11030 = vmatmul.mubr.msk.bf16.gmra.mxu1 %vm1481_vm0, %v4084_v13 }
 0xc34   : > { %4483 = vmax.xlane.f32.xlu0 %v15302_v56  ;;  %v15307_v23 = vpop.f32.mrf.mxu0 }
 0xc36   : > { %v15314_v50 = vpop.f32.mrf.mxu0 }
 0xc38   : > { %4479 = vmax.xlane.f32.xlu0 %v15307_v23  ;;  %v15317_v53 = vpop.f32.mrf.mxu0 }
 0xc44   : > { %5009 = vrot.lane.b32.xlu1 %v18620_v44, %s13420_s21 }
 0xc4e   : > { %5011 = vrot.lane.b32.xlu0 %v18619_v42, %s13420_s21 }
 0xc68   : > { %4485 = vmax.xlane.f32.xlu1 %v15314_v50 }
 0xc6c   : > { %4481 = vmax.xlane.f32.xlu1 %v15317_v53 }
 0xc8f   : > { %v4167_v36 = vpop.f32.mrf.mxu1 }
 0xc90   : > { %v15321_v13 = vadd.f32 %v4167_v36, %v14929_v11 }
 0xc91   : > { %v4169_v16 = vpop.f32.mrf.mxu1 }
 0xc92   : > { %18665 = vst [vmem:[#allocation21_spill] sm:$0xff] %v15321_v13  ;;  %v15324_v29 = vadd.f32 %v4169_v16, %v14934_v24  ;;  %v15340_v24 = vpop.permute.xlu1 %5013 }
 0xc93   : > { %v4171_v44 = vpop.f32.mrf.mxu1 }
 0xc94   : > { %18666 = vst [vmem:[#allocation18_spill] sm:$0xff] %v15324_v29  ;;  %v15327_v14 = vadd.f32 %v4171_v44, %v14937_v30 }
 0xc95   : > { %v15329_v42 = vpop.f32.mrf.mxu1 }
 0xc96   : > { %18667 = vst [vmem:[#allocation19_spill] sm:$0xff] %v15327_v14  ;;  %18668 = vst [vmem:[#allocation20_spill] sm:$0xff] %v15329_v42 }
 0xc97   : > { %v4177_v17 = vpop.f32.mrf.mxu1 }
 0xc98   : > { %v15332_v27 = vadd.f32 %v4177_v17, %v14942_v31 }
 0xc99   : > { %v4179_v0 = vpop.f32.mrf.mxu1 }
 0xc9a   : > { %18669 = vst [vmem:[#allocation22_spill] sm:$0xff] %v15332_v27  ;;  %v15335_v43 = vadd.f32 %v4179_v0, %v14945_v21 }
 0xc9b   : > { %v4181_v11 = vpop.f32.mrf.mxu1 }
 0xc9c   : > { %v15338_v36 = vadd.f32 %v4181_v11, %v14948_v19 }
 0xca4   : > { %v4460_v16 = vpop.xlane.xlu0 %4459 }
 0xca5   : > { %v4489_v29 = vsub.f32 %v11904_v6, %v4460_v16 }
 0xca7   : > { %v4507_v30 = vmul.f32 1.442695, %v4489_v29 }
 0xca8   : > { %v4456_v44 = vpop.xlane.xlu0 %4455  ;;  %v4462_v14 = vpop.xlane.xlu1 %4461 }
 0xca9   : > { %12919 = vpow2.f32 %v4507_v30  ;;  %v4487_v42 = vsub.f32 %v15268_v41, %v4456_v44  ;;  %v4490_v31 = vsub.f32 %v11905_v9, %v4462_v14 }
 0xcab   : > { %v4503_v17 = vmul.f32 1.442695, %v4487_v42  ;;  %v4509_v27 = vmul.f32 1.442695, %v4490_v31 }
 0xcac   : > { %v4458_v13 = vpop.xlane.xlu1 %4457 }
 0xcad   : > { %12921 = vpow2.f32 %v4503_v17  ;;  %v4488_v21 = vsub.f32 %v15272_v2, %v4458_v13  ;;  %v4468_v14 = vpop.xlane.xlu0 %4467 }
 0xcae   : > { %12923 = vpow2.f32 %v4509_v27  ;;  %v15356_v27 = vpop.f32.mrf.mxu1 }
 0xcaf   : > { %v4505_v19 = vmul.f32 1.442695, %v4488_v21  ;;  %18670 = vst [vmem:[#allocation23_spill] sm:$0xff] %v15356_v27 }
 0xcb0   : > { %v4470_v21 = vpop.xlane.xlu1 %4469 }
 0xcb1   : > { %12925 = vpow2.f32 %v4505_v19  ;;  %v4464_v41 = vpop.xlane.xlu0 %4463 }
 0xcb4   : > { %v4466_v27 = vpop.xlane.xlu1 %4465 }
 0xcb5   : > { %v4476_v44 = vpop.xlane.xlu0 %4475 }
 0xcb6   : > { %v15344_v0 = vpop.eup %12919 }
 0xcb7   : > { %4539 = vadd.xlane.f32.xlu0 %v15344_v0 }
 0xcba   : > { %v15347_v6 = vpop.eup %12921 }
 0xcbb   : > { %v15349_v29 = vpop.eup %12923  ;;  %4535 = vadd.xlane.f32.xlu0 %v15347_v6 }
 0xcbc   : > { %4541 = vadd.xlane.f32.xlu1 %v15349_v29 }
 0xcbe   : > { %v15353_v42 = vpop.eup %12925 }
 0xcc0   : > { %4537 = vadd.xlane.f32.xlu1 %v15353_v42 }
 0xccb   : > { %v4187_v9 = vpop.f32.mrf.mxu1 }
 0xccc   : > { %v15359_v2 = vadd.f32 %v4187_v9, %v14968_v33 }
 0xccd   : > { %v4189_v13 = vpop.f32.mrf.mxu1 }
 0xcce   : > { %v15362_v11 = vadd.f32 %v4189_v13, %v14971_v49 }
 0xccf   : > { %v4191_v16 = vpop.f32.mrf.mxu1 }
 0xcd0   : > { %v15365_v30 = vadd.f32 %v4191_v16, %v14974_v54  ;;  %v4472_v54 = vpop.xlane.xlu0 %4471 }
 0xcd1   : > { %5005 = vrot.lane.b32.xlu1 %v18622_v32, %s13420_s21  ;;  %v15369_v31 = vpop.f32.mrf.mxu1  ;;  %5007 = vrot.lane.b32.xlu0 %v18621_v10, %s13420_s21 }
 0xcd2   : > { %18671 = vst [vmem:[#allocation25_spill] sm:$0xff] %v15365_v30  ;;  %18672 = vst [vmem:[#allocation26_spill] sm:$0xff] %v15369_v31  ;;  %v4493_v31 = vsub.f32 %v15274_v5, %v4468_v14  ;;  %v4478_v5 = vpop.xlane.xlu1 %4477 }
 0xcd3   : > { %v4197_v17 = vpop.f32.mrf.mxu1 }
 0xcd4   : > { %v15374_v33 = vadd.f32 %v4197_v17, %v14979_v47  ;;  %v4484_v47 = vpop.xlane.xlu0 %4483 }
 0xcd5   : > { %v4199_v49 = vpop.f32.mrf.mxu1 }
 0xcd6   : > { %18673 = vst [vmem:[#allocation28_spill] sm:$0xff] %v15374_v33  ;;  %v15377_v19 = vadd.f32 %v4199_v49, %v14982_v1  ;;  %v4515_v33 = vmul.f32 1.442695, %v4493_v31  ;;  %v4492_v1 = vsub.f32 %v15286_v4, %v4466_v27  ;;  %v4494_v31 = vsub.f32 %v15282_v25, %v4470_v21 }
 0xcd7   : > { %v4201_v9 = vpop.f32.mrf.mxu1 }
 0xcd8   : > { %v15380_v13 = vadd.f32 %v4201_v9, %v14985_v7  ;;  %v4491_v7 = vsub.f32 %v15279_v46, %v4464_v41  ;;  %12927 = vpow2.f32 %v4515_v33  ;;  %v4480_v4 = vpop.xlane.xlu0 %4479  ;;  %v4517_v33 = vmul.f32 1.442695, %v4494_v31 }
 0xcd9   : > { %v15382_v16 = vpop.f32.mrf.mxu1 }
 0xcda   : > { %18674 = vst [vmem:[#allocation29_spill] sm:$0xff] %v15382_v16 }
 0xcdb   : > { %v4207_v32 = vpop.f32.mrf.mxu1 }
 0xcdc   : > { %v15386_v30 = vadd.f32 %v4207_v32, %v14992_v38  ;;  %v4513_v38 = vmul.f32 1.442695, %v4492_v1  ;;  %v4501_v32 = vsub.f32 %v15302_v56, %v4484_v47  ;;  %v4497_v56 = vsub.f32 %v15288_v61, %v4476_v44  ;;  %v4474_v47 = vpop.xlane.xlu1 %4473 }
 0xcdd   : > { %v4209_v17 = vpop.f32.mrf.mxu1 }
 0xcde   : > { %18675 = vst [vmem:[#allocation31_spill] sm:$0xff] %v15386_v30  ;;  %v15390_v49 = vadd.f32 %v4209_v17, %v14995_v51  ;;  %v4511_v30 = vmul.f32 1.442695, %v4491_v7  ;;  %12929 = vpow2.f32 %v4513_v38  ;;  %v4531_v41 = vmul.f32 1.442695, %v4501_v32 }
 0xcdf   : > { %v4211_v9 = vpop.f32.mrf.mxu1  ;;  %v4523_v7 = vmul.f32 1.442695, %v4497_v56  ;;  %v4498_v32 = vsub.f32 %v15296_v39, %v4478_v5 }
 0xce0   : > { %v15394_v16 = vadd.f32 %v4211_v9, %v14998_v18  ;;  %v4499_v18 = vsub.f32 %v15307_v23, %v4480_v4  ;;  %12931 = vpow2.f32 %v4511_v30  ;;  %v4495_v23 = vsub.f32 %v15293_v12, %v4472_v54  ;;  %v15417_v30 = vpop.permute.xlu1 %5009 }
 0xce1   : > { %v15396_v14 = vpop.f32.mrf.mxu1  ;;  %12933 = vpow2.f32 %v4531_v41 }
 0xce2   : > { %18676 = vst [vmem:[#allocation32_spill] sm:$0xff] %v15396_v14  ;;  %12935 = vpow2.f32 %v4517_v33  ;;  %v4519_v38 = vmul.f32 1.442695, %v4495_v23 }
 0xce3   : > { %v4217_v27 = vpop.f32.mrf.mxu1 }
 0xce4   : > { %v15401_v51 = vadd.f32 %v4217_v27, %v15003_v60  ;;  %v4527_v60 = vmul.f32 1.442695, %v4499_v18 }
 0xce5   : > { %v4219_v46 = vpop.f32.mrf.mxu1 }
 0xce6   : > { %v15405_v17 = vadd.f32 %v4219_v46, %v15006_v22  ;;  %12937 = vpow2.f32 %v4527_v60  ;;  %v4496_v46 = vsub.f32 %v15300_v63, %v4474_v47 }
 0xce7   : > { %v4221_v1 = vpop.f32.mrf.mxu1  ;;  %12939 = vpow2.f32 %v4523_v7 }
 0xce8   : > { %v15409_v25 = vadd.f32 %v4221_v1, %v15010_v28  ;;  %v15422_v28 = vpop.eup %12927  ;;  %12941 = vpow2.f32 %v4519_v38  ;;  %v4521_v63 = vmul.f32 1.442695, %v4496_v46  ;;  %v18680_v46 = vld [vmem:[#allocation46_spill] sm:$0xff] }
 0xce9   : > { %v15411_v21 = vpop.f32.mrf.mxu1 }
 0xcea   : > { %18677 = vst [vmem:[#allocation35_spill] sm:$0xff] %v15411_v21 }
 0xceb   : > { %v4227_v9 = vpop.f32.mrf.mxu1  ;;  %v15432_v27 = vpop.eup %12929 }
 0xcec   : > { %v15415_v22 = vadd.f32 %v4227_v9, %v15018_v3 }
 0xced   : > { %v4229_v61 = vpop.f32.mrf.mxu1  ;;  %v15435_v18 = vpop.eup %12931 }
 0xcee   : > { %v15420_v44 = vadd.f32 %v4229_v61, %v15021_v57  ;;  %v4525_v57 = vmul.f32 1.442695, %v4498_v32  ;;  %v15445_v56 = vpop.eup %12933  ;;  %v12447_v32 = vld [vmem:[#allocation6 + $0x90] ss:$8 sps:$4 sm:$0xff]  }
 0xcef   : > { %v4231_v31 = vpop.f32.mrf.mxu1  ;;  %v15448_v60 = vpop.eup %12935 }
 0xcf0   : > { %v15426_v12 = vadd.f32 %v4231_v31, %v15026_v59  ;;  %4547 = vadd.xlane.f32.xlu0 %v15422_v28  ;;  %v12449_v31 = vld [vmem:[#allocation6 + $0x94] ss:$8 sps:$4 sm:$0xff]  }
 0xcf1   : > { %v15429_v3 = vpop.f32.mrf.mxu1  ;;  %v4486_v54 = vpop.xlane.xlu1 %4485  ;;  %4804 = vmatprep.subr.bf16.mxu0 %v12449_v31 }
 0xcf2   : > { %18678 = vst [vmem:[#allocation37_spill] sm:$0xff] %v15429_v3  ;;  %v4502_v4 = vsub.f32 %v15314_v50, %v4486_v54  ;;  %4805 = vmatpush1.bf16.msra.mxu0 %v12447_v32  ;;  %v12452_v54 = vld [vmem:[#allocation6 + $0x84] ss:$8 sps:$4 sm:$0xff]  }
 0xcf3   : > { %v4237_v41 = vpop.f32.mrf.mxu1  ;;  %v15455_v7 = vpop.eup %12937  ;;  %4806 = vmatprep.subr.bf16.mxu0 %v12452_v54 }
 0xcf4   : > { %v4533_v39 = vmul.f32 1.442695, %v4502_v4  ;;  %v15438_v59 = vadd.f32 %v4237_v41, %v15033_v48  ;;  %4545 = vadd.xlane.f32.xlu0 %v15432_v27  ;;  %v15457_v23 = vpop.eup %12939  ;;  %v12450_v4 = vld [vmem:[#allocation6 + $0x80] ss:$8 sps:$4 sm:$0xff]  }
 0xcf5   : > { %4543 = vadd.xlane.f32.xlu1 %v15435_v18  ;;  %v4239_v5 = vpop.f32.mrf.mxu1  ;;  %v4482_v33 = vpop.xlane.xlu1 %4481  ;;  %v18681_v41 = vld [vmem:[#allocation36_spill] sm:$0xff] }
 0xcf6   : > { %12943 = vpow2.f32 %v4533_v39  ;;  %v15443_v50 = vadd.f32 %v4239_v5, %v15036_v35  ;;  %v4500_v47 = vsub.f32 %v15317_v53, %v4482_v33  ;;  %v15461_v53 = vpop.eup %12941  ;;  %4807 = vmatpush1.bf16.msra.mxu0 %v12450_v4  ;;  %v18682_v39 = vld [vmem:[#allocation86_spill] sm:$0xff]  ;;  %v18684_v33 = vld [vmem:[#allocation16_spill] sm:$0xff] }
 0xcf7   : > { %12945 = vpow2.f32 %v4525_v57  ;;  %v4241_v1 = vpop.f32.mrf.mxu1  ;;  %v18679_v57 = vld [vmem:[#allocation81_spill] sm:$0xff]  ;;  %v18683_v5 = vld [vmem:[#allocation66_spill] sm:$0xff] }
 0xcf8   : > { %v15451_v48 = vadd.f32 %v4241_v1, %v15041_v20  ;;  %4563 = vadd.xlane.f32.xlu0 %v15445_v56  ;;  %12947 = vpow2.f32 %v4521_v63  ;;  %v4529_v35 = vmul.f32 1.442695, %v4500_v47  ;;  %v5012_v63 = vpop.permute.xlu0 %5011 }
 0xcf9   : > { %4549 = vadd.xlane.f32.xlu1 %v15448_v60 }
 0xcfa   : > { %12949 = vpow2.f32 %v4529_v35 }
 0xcfc   : > { %4559 = vadd.xlane.f32.xlu0 %v15455_v7 }
 0xcfd   : > { %4555 = vadd.xlane.f32.xlu1 %v15457_v23 }
 0xd01   : > { %4551 = vadd.xlane.f32.xlu1 %v15461_v53 }
 0xd03   : > { %v15464_v20 = vpop.eup %12943 }
 0xd04   : > { %v15466_v9 = vpop.eup %12945  ;;  %4565 = vadd.xlane.f32.xlu0 %v15464_v20 }
 0xd05   : > { %4557 = vadd.xlane.f32.xlu1 %v15466_v9  ;;  %v15470_v61 = vpop.eup %12947 }
 0xd07   : > { %v15473_v38 = vpop.eup %12949 }
 0xd09   : > { %4553 = vadd.xlane.f32.xlu1 %v15470_v61 }
 0xd0d   : > { %4561 = vadd.xlane.f32.xlu1 %v15473_v38 }
 0xd1a   : > { %5003 = vrot.lane.b32.xlu0 %v18623_v45, %s13420_s21 }
 0xd1e   : > { %5001 = vrot.lane.b32.xlu1 %v18624_v58, %s13420_s21  ;;  %4977 = vrot.lane.b32.xlu0 %v15149_v8, %s13420_s21 }
 0xd22   : > { %4979 = vrot.lane.b32.xlu1 %v15157_v55, %s13420_s21  ;;  %4981 = vrot.lane.b32.xlu0 %v15159_v34, %s13420_s21 }
 0xd26   : > { %4983 = vrot.lane.b32.xlu1 %v15169_v52, %s13420_s21  ;;  %4985 = vrot.lane.b32.xlu0 %v15171_v15, %s13420_s21 }
 0xd2a   : > { %4987 = vrot.lane.b32.xlu1 %v15181_v37, %s13420_s21  ;;  %4989 = vrot.lane.b32.xlu0 %v15183_v62, %s13420_s21 }
 0xd2e   : > { %4991 = vrot.lane.b32.xlu1 %v15191_v40, %s13420_s21  ;;  %5336 = vrot.lane.b32.xlu0 %v14847_v26, %s13420_s21 }
 0xd32   : > { %5334 = vrot.lane.b32.xlu1 %v18679_v57, %s13420_s21  ;;  %5332 = vrot.lane.b32.xlu0 %v18680_v46, %s13420_s21 }
 0xd36   : > { %5326 = vrot.lane.b32.xlu1 %v18681_v41, %s13420_s21  ;;  %5330 = vrot.lane.b32.xlu0 %v18682_v39, %s13420_s21 }
 0xd3a   : > { %5322 = vrot.lane.b32.xlu1 %v18683_v5, %s13420_s21  ;;  %5328 = vrot.lane.b32.xlu0 %v18684_v33, %s13420_s21 }
 0xd40   : > { %v4540_v47 = vpop.xlane.xlu0 %4539 }
 0xd44   : > { %v4536_v1 = vpop.xlane.xlu0 %4535 }
 0xd45   : > { %v4542_v35 = vpop.xlane.xlu1 %4541 }
 0xd46   : > { %12951 = vrcp.f32 %v4542_v35 }
 0xd47   : > { %12953 = vrcp.f32 %v4536_v1  ;;  %v18685_v1 = vld [vmem:[#allocation38_spill] sm:$0xff] }
 0xd48   : > { %12955 = vrcp.f32 %v4540_v47  ;;  %v5063_v47 = vsel %vm1481_vm0, %v18685_v1, 0 }
 0xd49   : > { %v4538_v32 = vpop.xlane.xlu1 %4537 }
 0xd4a   : > { %12957 = vrcp.f32 %v4538_v32 }
 0xd53   : > { %v12952_v31 = vpop.eup %12951 }
 0xd54   : > { %v12954_v54 = vpop.eup %12953  ;;  %v4586_v21 = vmul.f32 %v12952_v31, %v15349_v29  ;;  %v5060_v29 = vsel %vm1481_vm0, %v15340_v24, 0 }
 0xd55   : > { %v12956_v4 = vpop.eup %12955  ;;  %v4583_v14 = vmul.f32 %v12954_v54, %v15347_v6  ;;  %v5057_v6 = vsel %vm1481_vm0, %v5012_v63, 0 }
 0xd56   : > { %v4585_v33 = vmul.f32 %v12956_v4, %v15344_v0  ;;  %v5008_v0 = vpop.permute.xlu0 %5007 }
 0xd57   : > { %v12958_v3 = vpop.eup %12957 }
 0xd58   : > { %v4584_v39 = vmul.f32 %v12958_v3, %v15353_v42  ;;  %v4600_v5 = vpack.c.bf16 %v4586_v21, %v4585_v33  ;;  %v5054_v42 = vsel %vm1481_vm0, %v15417_v30, 0  ;;  %v5006_v21 = vpop.permute.xlu1 %5005 }
 0xd5a   : > { %v4599_v46 = vpack.c.bf16 %v4584_v39, %v4583_v14 }
 0xd5c   : > { %11934 = vmatprep.mubr.bf16.mxu1 %v4599_v46 }
 0xd5d   : > { %11935 = vmatmul.mubr.bf16.vlgmr.msra.gmra.mxu1 %v4600_v5 }
 0xd5e   : > { %11951 = vmatpush3.bf16.xpose.msra.mxu1 %v5063_v47 }
 0xd5f   : > { %12183 = vmatprep.subr.msk.bf16.mxu1 %vm1481_vm0, %v15340_v24  ;;  %v5051_v24 = vsel %vm1481_vm0, %v5008_v0, 0 }
 0xd66   : > { %11953 = vmatpush3.bf16.xpose.msra.mxu1 %v5060_v29 }
 0xd67   : > { %12184 = vmatprep.subr.msk.bf16.mxu1 %vm1481_vm0, %v5012_v63 }
 0xd6e   : > { %11955 = vmatpush3.bf16.xpose.msra.mxu1 %v5057_v6 }
 0xd6f   : > { %12185 = vmatprep.subr.msk.bf16.mxu1 %vm1481_vm0, %v15417_v30  ;;  %v5048_v30 = vsel %vm1481_vm0, %v5006_v21, 0 }
 0xd76   : > { %11957 = vmatpush3.bf16.xpose.msra.mxu1 %v5054_v42 }
 0xd77   : > { %12186 = vmatprep.subr.msk.bf16.mxu1 %vm1481_vm0, %v5008_v0 }
 0xd79   : > { %v4548_v14 = vpop.xlane.xlu0 %4547 }
 0xd7d   : > { %v4546_v3 = vpop.xlane.xlu0 %4545 }
 0xd7e   : > { %11959 = vmatpush3.bf16.xpose.msra.mxu1 %v5051_v24  ;;  %12959 = vrcp.f32 %v4546_v3  ;;  %v4544_v46 = vpop.xlane.xlu1 %4543 }
 0xd7f   : > { %12187 = vmatprep.subr.msk.bf16.mxu1 %vm1481_vm0, %v5006_v21  ;;  %12961 = vrcp.f32 %v4544_v46 }
 0xd80   : > { %12963 = vrcp.f32 %v4548_v14 }
 0xd81   : > { %v4564_v5 = vpop.xlane.xlu0 %4563 }
 0xd82   : > { %v4550_v39 = vpop.xlane.xlu1 %4549 }
 0xd83   : > { %12965 = vrcp.f32 %v4550_v39 }
 0xd85   : > { %v4560_v63 = vpop.xlane.xlu0 %4559 }
 0xd86   : > { %11961 = vmatpush3.bf16.xpose.msra.mxu1 %v5048_v30  ;;  %v4556_v33 = vpop.xlane.xlu1 %4555 }
 0xd8a   : > { %v4552_v35 = vpop.xlane.xlu1 %4551 }
 0xd8b   : > { %v12960_v32 = vpop.eup %12959 }
 0xd8c   : > { %v12962_v31 = vpop.eup %12961  ;;  %v4588_v54 = vmul.f32 %v12960_v32, %v15432_v27 }
 0xd8d   : > { %v4566_v4 = vpop.xlane.xlu0 %4565  ;;  %v4587_v1 = vmul.f32 %v12962_v31, %v15435_v18  ;;  %v12964_v47 = vpop.eup %12963 }
 0xd8e   : > { %v4558_v29 = vpop.xlane.xlu1 %4557  ;;  %v4589_v14 = vmul.f32 %v12964_v47, %v15422_v28 }
 0xd8f   : > { %v4601_v6 = vpack.c.bf16 %v4588_v54, %v4587_v1  ;;  %12967 = vrcp.f32 %v4558_v29 }
 0xd90   : > { %v12966_v0 = vpop.eup %12965  ;;  %12969 = vrcp.f32 %v4552_v35 }
 0xd91   : > { %11938 = vmatprep.mubr.bf16.mxu1 %v4601_v6  ;;  %v5004_v42 = vpop.permute.xlu0 %5003  ;;  %v4590_v21 = vmul.f32 %v12966_v0, %v15448_v60  ;;  %12971 = vrcp.f32 %v4556_v33 }
 0xd92   : > { %v4554_v24 = vpop.xlane.xlu1 %4553  ;;  %12188 = vmatprep.subr.msk.bf16.mxu1 %vm1481_vm0, %v5004_v42  ;;  %v5045_v27 = vsel %vm1481_vm0, %v5004_v42, 0 }
 0xd93   : > { %12973 = vrcp.f32 %v4554_v24  ;;  %11963 = vmatpush3.bf16.xpose.msra.mxu1 %v5045_v27  ;;  %v4602_v18 = vpack.c.bf16 %v4590_v21, %v4589_v14 }
 0xd94   : > { %12975 = vrcp.f32 %v4560_v63 }
 0xd95   : > { %11939 = vmatmul.mubr.bf16.gmra.mxu1 %v4602_v18  ;;  %v4978_v3 = vpop.permute.xlu0 %4977 }
 0xd96   : > { %v4562_v46 = vpop.xlane.xlu1 %4561 }
 0xd97   : > { %12977 = vrcp.f32 %v4562_v46 }
 0xd98   : > { %12979 = vrcp.f32 %v4566_v4 }
 0xd99   : > { %v4982_v39 = vpop.permute.xlu0 %4981  ;;  %12981 = vrcp.f32 %v4564_v5 }
 0xd9a   : > { %v5002_v28 = vpop.permute.xlu1 %5001 }
 0xd9b   : > { %12189 = vmatprep.subr.msk.bf16.mxu1 %vm1481_vm0, %v5002_v28  ;;  %v5042_v60 = vsel %vm1481_vm0, %v5002_v28, 0 }
 0xd9c   : > { %11965 = vmatpush3.bf16.xpose.msra.mxu1 %v5042_v60  ;;  %v12968_v30 = vpop.eup %12967 }
 0xd9d   : > { %v4986_v33 = vpop.permute.xlu0 %4985  ;;  %v12970_v35 = vpop.eup %12969  ;;  %v4594_v63 = vmul.f32 %v12968_v30, %v15466_v9 }
 0xd9e   : > { %v12972_v32 = vpop.eup %12971  ;;  %v4591_v1 = vmul.f32 %v12970_v35, %v15461_v53  ;;  %v4980_v18 = vpop.permute.xlu1 %4979 }
 0xd9f   : > { %v4593_v5 = vmul.f32 %v12972_v32, %v15457_v23 }
 0xda0   : > { %v12974_v31 = vpop.eup %12973 }
 0xda1   : > { %v4990_v54 = vpop.permute.xlu0 %4989  ;;  %v4592_v4 = vmul.f32 %v12974_v31, %v15470_v61  ;;  %v12976_v47 = vpop.eup %12975  ;;  %v4604_v0 = vpack.c.bf16 %v4594_v63, %v4593_v5 }
 0xda2   : > { %v4595_v21 = vmul.f32 %v12976_v47, %v15455_v7  ;;  %v4984_v7 = vpop.permute.xlu1 %4983 }
 0xda3   : > { %v4603_v29 = vpack.c.bf16 %v4592_v4, %v4591_v1 }
 0xda4   : > { %v12978_v6 = vpop.eup %12977 }
 0xda5   : > { %v12980_v42 = vpop.eup %12979  ;;  %11942 = vmatprep.mubr.bf16.mxu1 %v4603_v29  ;;  %v5337_v14 = vpop.permute.xlu0 %5336  ;;  %v4596_v24 = vmul.f32 %v12978_v6, %v15473_v38 }
 0xda6   : > { %11943 = vmatmul.mubr.bf16.gmra.mxu1 %v4604_v0  ;;  %11982 = vmatprep.subr.bf16.mxu0 %v5337_v14  ;;  %v12982_v9 = vpop.eup %12981  ;;  %v4598_v53 = vmul.f32 %v12980_v42, %v15464_v20  ;;  %v4988_v38 = vpop.permute.xlu1 %4987  ;;  %v18686_v20 = vmov 0  }
 0xda7   : > { %v4605_v27 = vpack.c.bf16 %v4596_v24, %v4595_v21  ;;  %v4597_v61 = vmul.f32 %v12982_v9, %v15445_v56 }
 0xda9   : > { %11946 = vmatprep.mubr.bf16.mxu1 %v4605_v27  ;;  %v4606_v23 = vpack.c.bf16 %v4598_v53, %v4597_v61 }
 0xdaa   : > { %v4992_v56 = vpop.permute.xlu1 %4991 }
 0xdae   : > { %11947 = vmatmul.mubr.bf16.gmra.mxu1 %v4606_v23  ;;  %v5335_v35 = vpop.permute.xlu1 %5334 }
 0xdaf   : > { %11966 = vmatprep.mubr.msk.bf16.mxu1 %vm1481_vm0, %v4978_v3  ;;  %v15555_v3 = vpop.f32.mrf.mxu1 }
 0xdb0   : > { %18687 = vst [vmem:[#allocation39_spill] sm:$0xff] %v15555_v3 }
 0xdb6   : > { %11967 = vmatmul.mubr.msk.bf16.vlgmr.msra.gmra.mxu1 %vm1481_vm0, %v4980_v18 }
 0xdb7   : > { %11970 = vmatprep.mubr.msk.bf16.mxu1 %vm1481_vm0, %v4982_v39 }
 0xdbe   : > { %11971 = vmatmul.mubr.msk.bf16.gmra.mxu1 %vm1481_vm0, %v4984_v7 }
 0xdbf   : > { %11974 = vmatprep.mubr.msk.bf16.mxu1 %vm1481_vm0, %v4986_v33  ;;  %v5333_v33 = vpop.permute.xlu0 %5332 }
 0xdc3   : > { %v5331_v31 = vpop.permute.xlu0 %5330 }
 0xdc6   : > { %11975 = vmatmul.mubr.msk.bf16.gmra.mxu1 %vm1481_vm0, %v4988_v38 }
 0xdc7   : > { %11978 = vmatprep.mubr.msk.bf16.mxu1 %vm1481_vm0, %v4990_v54  ;;  %v5329_v63 = vpop.permute.xlu0 %5328  ;;  %v5327_v54 = vpop.permute.xlu1 %5326 }
 0xdce   : > { %11979 = vmatmul.mubr.msk.bf16.gmra.mxu1 %vm1481_vm0, %v4992_v56 }
 0xdcf   : > { %5563 = vmatprep.mubr.bf16.mxu1 %v18686_v20 }
 0xe1d   : > { %v11936_v46 = vpop.f32.mrf.mxu1 }
 0xe1f   : > { %v4641_v28 = vpop.f32.mrf.mxu1 }
 0xe21   : > { %v11937_v39 = vpop.f32.mrf.mxu1 }
 0xe22   : > { %v4737_v32 = vpack.c.bf16 %v11937_v39, %v11936_v46 }
 0xe23   : > { %v4644_v60 = vpop.f32.mrf.mxu1 }
 0xe24   : > { %v4736_v30 = vpack.c.bf16 %v4644_v60, %v4641_v28 }
 0xe26   : > { %11043 = vmatmul.mubr.msk.bf16.vlgmr.msra.gmra.mxu0 %vm1481_vm0, %v4736_v30 }
 0xe27   : > { %11983 = vmatpush3.bf16.msra.mxu0 %v5337_v14  ;;  %4834 = vmatprep.mubr.bf16.mxu0 %v18686_v20 }
 0xe28   : > { %11984 = vmatprep.subr.bf16.mxu0 %v5335_v35 }
 0xe2b   : > { %11985 = vmatpush3.bf16.msra.mxu0 %v5335_v35 }
 0xe2c   : > { %11986 = vmatprep.subr.bf16.mxu0 %v5333_v33 }
 0xe2e   : > { %11044 = vmatmul.mubr.msk.bf16.gmra.mxu0 %vm1481_vm0, %v4737_v32 }
 0xe2f   : > { %11987 = vmatpush3.bf16.msra.mxu0 %v5333_v33  ;;  %4844 = vmatprep.mubr.bf16.mxu0 %v18686_v20 }
 0xe30   : > { %11988 = vmatprep.subr.bf16.mxu0 %v5331_v31 }
 0xe33   : > { %11989 = vmatpush3.bf16.msra.mxu0 %v5331_v31 }
 0xe34   : > { %11990 = vmatprep.subr.bf16.mxu0 %v5329_v63 }
 0xe37   : > { %11991 = vmatpush3.bf16.msra.mxu0 %v5329_v63 }
 0xe38   : > { %11992 = vmatprep.subr.bf16.mxu0 %v5327_v54 }
 0xe3b   : > { %11993 = vmatpush3.bf16.msra.mxu0 %v5327_v54  ;;  %v18688_v54 = vld [vmem:[#allocation34_spill] sm:$0xff] }
 0xe55   : > { %v11940_v1 = vpop.f32.mrf.mxu1 }
 0xe57   : > { %v4657_v4 = vpop.f32.mrf.mxu1 }
 0xe59   : > { %v11941_v47 = vpop.f32.mrf.mxu1 }
 0xe5a   : > { %v4739_v6 = vpack.c.bf16 %v11941_v47, %v11940_v1  ;;  %v18689_v1 = vld [vmem:[#allocation49_spill] sm:$0xff] }
 0xe5b   : > { %v4660_v5 = vpop.f32.mrf.mxu1 }
 0xe5c   : > { %v4738_v29 = vpack.c.bf16 %v4660_v5, %v4657_v4  ;;  %v18690_v4 = vld [vmem:[#allocation30_spill] sm:$0xff] }
 0xe5e   : > { %11045 = vmatmul.mubr.msk.bf16.gmra.mxu0 %vm1481_vm0, %v4738_v29 }
 0xe5f   : > { %4854 = vmatprep.mubr.bf16.mxu0 %v18686_v20 }
 0xe66   : > { %v11944_v0 = vpop.f32.mrf.mxu1  ;;  %11046 = vmatmul.mubr.msk.bf16.gmra.mxu0 %vm1481_vm0, %v4739_v6 }
 0xe67   : > { %4864 = vmatprep.mubr.bf16.mxu0 %v18686_v20 }
 0xe68   : > { %v4673_v42 = vpop.f32.mrf.mxu1 }
 0xe6a   : > { %v11945_v14 = vpop.f32.mrf.mxu1 }
 0xe6b   : > { %v4741_v23 = vpack.c.bf16 %v11945_v14, %v11944_v0  ;;  %v18691_v0 = vld [vmem:[#allocation78_spill] sm:$0xff] }
 0xe6c   : > { %v4676_v21 = vpop.f32.mrf.mxu1 }
 0xe6d   : > { %v4740_v24 = vpack.c.bf16 %v4676_v21, %v4673_v42  ;;  %v18692_v42 = vld [vmem:[#allocation33_spill] sm:$0xff] }
 0xe6e   : > { %v11948_v9 = vpop.f32.mrf.mxu1  ;;  %v18693_v21 = vld [vmem:[#allocation21_spill] sm:$0xff] }
 0xe6f   : > { %11047 = vmatmul.mubr.msk.bf16.gmra.mxu0 %vm1481_vm0, %v4740_v24 }
 0xe70   : > { %v4689_v27 = vpop.f32.mrf.mxu1  ;;  %4874 = vmatprep.mubr.bf16.mxu0 %v18686_v20 }
 0xe72   : > { %v11949_v53 = vpop.f32.mrf.mxu1 }
 0xe73   : > { %v4743_v33 = vpack.c.bf16 %v11949_v53, %v11948_v9 }
 0xe74   : > { %v4692_v61 = vpop.f32.mrf.mxu1 }
 0xe75   : > { %v4742_v46 = vpack.c.bf16 %v4692_v61, %v4689_v27  ;;  %v18695_v27 = vld [vmem:[#allocation18_spill] sm:$0xff] }
 0xe76   : > { %v11968_v18 = vpop.f32.mrf.mxu1 }
 0xe77   : > { %11048 = vmatmul.mubr.msk.bf16.gmra.mxu0 %vm1481_vm0, %v4741_v23  ;;  %5166 = vmax.xlane.f32.xlu0 %v11968_v18  ;;  %v18697_v23 = vld [vmem:[#allocation19_spill] sm:$0xff] }
 0xe78   : > { %v15568_v7 = vpop.f32.mrf.mxu1  ;;  %4884 = vmatprep.mubr.bf16.mxu0 %v18686_v20 }
 0xe7a   : > { %v15571_v38 = vpop.f32.mrf.mxu1 }
 0xe7b   : > { %5162 = vmax.xlane.f32.xlu0 %v15568_v7 }
 0xe7c   : > { %v15574_v56 = vpop.f32.mrf.mxu1 }
 0xe7d   : > { %5164 = vmax.xlane.f32.xlu1 %v15574_v56 }
 0xe7e   : > { %v15577_v28 = vpop.f32.mrf.mxu1 }
 0xe7f   : > { %11049 = vmatmul.mubr.msk.bf16.gmra.mxu0 %vm1481_vm0, %v4742_v46  ;;  %5168 = vmax.xlane.f32.xlu0 %v15571_v38 }
 0xe80   : > { %v15581_v39 = vpop.f32.mrf.mxu1  ;;  %4894 = vmatprep.mubr.bf16.mxu0 %v18686_v20 }
 0xe82   : > { %v15584_v60 = vpop.f32.mrf.mxu1 }
 0xe83   : > { %5176 = vmax.xlane.f32.xlu1 %v15584_v60 }
 0xe84   : > { %v15587_v30 = vpop.f32.mrf.mxu1 }
 0xe86   : > { %v15589_v35 = vpop.f32.mrf.mxu1 }
 0xe87   : > { %11050 = vmatmul.mubr.msk.bf16.gmra.mxu0 %vm1481_vm0, %v4743_v33  ;;  %5172 = vmax.xlane.f32.xlu1 %v15587_v30 }
 0xe88   : > { %v15593_v32 = vpop.f32.mrf.mxu1 }
 0xe8a   : > { %v15595_v31 = vpop.f32.mrf.mxu1 }
 0xe8b   : > { %5184 = vmax.xlane.f32.xlu1 %v15595_v31 }
 0xe8c   : > { %v15598_v63 = vpop.f32.mrf.mxu1 }
 0xe8e   : > { %v15610_v47 = vpop.f32.mrf.mxu1 }
 0xe8f   : > { %5180 = vmax.xlane.f32.xlu1 %v15598_v63 }
 0xe90   : > { %v15613_v5 = vpop.f32.mrf.mxu1 }
 0xe92   : > { %v15616_v29 = vpop.f32.mrf.mxu1 }
 0xe94   : > { %v15620_v6 = vpop.f32.mrf.mxu1 }
 0xe95   : > { %5324 = vrot.lane.b32.xlu0 %v18688_v54, %s13420_s21 }
 0xea0   : > { %5736 = vrot.lane.b32.xlu1 %v18689_v1, %s13422_s7 }
 0xea4   : > { %5732 = vrot.lane.b32.xlu1 %v18690_v4, %s13422_s7 }
 0xeb4   : > { %5174 = vmax.xlane.f32.xlu0 %v15577_v28 }
 0xeb8   : > { %5170 = vmax.xlane.f32.xlu0 %v15581_v39 }
 0xebc   : > { %5182 = vmax.xlane.f32.xlu0 %v15589_v35 }
 0xec0   : > { %5178 = vmax.xlane.f32.xlu0 %v15593_v32 }
 0xec4   : > { %5190 = vmax.xlane.f32.xlu0 %v15610_v47 }
 0xec8   : > { %5186 = vmax.xlane.f32.xlu0 %v15613_v5  ;;  %5192 = vmax.xlane.f32.xlu1 %v15616_v29 }
 0xecc   : > { %5188 = vmax.xlane.f32.xlu1 %v15620_v6 }
 0xede   : > { %5738 = vrot.lane.b32.xlu0 %v18691_v0, %s13422_s7  ;;  %v18700_v0 = vld [vmem:[#allocation22_spill] sm:$0xff] }
 0xee2   : > { %5734 = vrot.lane.b32.xlu0 %v18692_v42, %s13422_s7 }
 0xee6   : > { %v4826_v14 = vpop.f32.mrf.mxu0  ;;  %5730 = vrot.lane.b32.xlu0 %v18621_v10, %s13422_s7 }
 0xee7   : > { %v15630_v24 = vadd.f32 %v4826_v14, %v18693_v21 }
 0xee8   : > { %v4828_v9 = vpop.f32.mrf.mxu0 }
 0xee9   : > { %18694 = vst [vmem:[#allocation40_spill] sm:$0xff] %v15630_v24  ;;  %v15633_v53 = vadd.f32 %v4828_v9, %v18695_v27 }
 0xeea   : > { %v4830_v61 = vpop.f32.mrf.mxu0 }
 0xeeb   : > { %18696 = vst [vmem:[#allocation42_spill] sm:$0xff] %v15633_v53  ;;  %v15636_v46 = vadd.f32 %v4830_v61, %v18697_v23  ;;  %v5323_v53 = vpop.permute.xlu1 %5322 }
 0xeec   : > { %v15638_v33 = vpop.f32.mrf.mxu0 }
 0xeed   : > { %18698 = vst [vmem:[#allocation43_spill] sm:$0xff] %v15636_v46  ;;  %18699 = vst [vmem:[#allocation58_spill] sm:$0xff] %v15638_v33 }
 0xeee   : > { %v4836_v3 = vpop.f32.mrf.mxu0 }
 0xeef   : > { %v15641_v42 = vadd.f32 %v4836_v3, %v18700_v0 }
 0xef0   : > { %v4838_v4 = vpop.f32.mrf.mxu0 }
 0xef1   : > { %v15644_v10 = vadd.f32 %v4838_v4, %v15335_v43 }
 0xef2   : > { %v4840_v14 = vpop.f32.mrf.mxu0 }
 0xef3   : > { %18701 = vst [vmem:[#allocation59_spill] sm:$0xff] %v15644_v10  ;;  %v15647_v21 = vadd.f32 %v4840_v14, %v15338_v36 }
 0xf00   : > { %v5167_v9 = vpop.xlane.xlu0 %5166 }
 0xf01   : > { %v5196_v27 = vsub.f32 %v11968_v18, %v5167_v9  ;;  %v18703_v9 = vld [vmem:[#allocation25_spill] sm:$0xff] }
 0xf03   : > { %v5214_v24 = vmul.f32 1.442695, %v5196_v27 }
 0xf04   : > { %v5163_v61 = vpop.xlane.xlu0 %5162 }
 0xf05   : > { %12983 = vpow2.f32 %v5214_v24  ;;  %v5194_v23 = vsub.f32 %v15568_v7, %v5163_v61 }
 0xf06   : > { %v5165_v33 = vpop.xlane.xlu1 %5164 }
 0xf07   : > { %v5210_v46 = vmul.f32 1.442695, %v5194_v23  ;;  %v5195_v0 = vsub.f32 %v15574_v56, %v5165_v33 }
 0xf08   : > { %v5169_v3 = vpop.xlane.xlu0 %5168 }
 0xf09   : > { %12985 = vpow2.f32 %v5210_v46  ;;  %v5197_v43 = vsub.f32 %v15571_v38, %v5169_v3  ;;  %v5212_v36 = vmul.f32 1.442695, %v5195_v0  ;;  %v15661_v38 = vpop.f32.mrf.mxu0  ;;  %v18705_v3 = vld [vmem:[#allocation28_spill] sm:$0xff] }
 0xf0a   : > { %18702 = vst [vmem:[#allocation56_spill] sm:$0xff] %v15661_v38 }
 0xf0b   : > { %v5216_v4 = vmul.f32 1.442695, %v5197_v43 }
 0xf0c   : > { %v5325_v10 = vpop.permute.xlu0 %5324 }
 0xf0d   : > { %12987 = vpow2.f32 %v5216_v4  ;;  %11994 = vmatprep.subr.bf16.mxu0 %v5325_v10 }
 0xf0e   : > { %11995 = vmatpush3.bf16.msra.mxu0 %v5325_v10  ;;  %12989 = vpow2.f32 %v5212_v36 }
 0xf0f   : > { %11996 = vmatprep.subr.bf16.mxu0 %v5323_v53 }
 0xf12   : > { %v15652_v18 = vpop.eup %12983  ;;  %11997 = vmatpush3.bf16.msra.mxu0 %v5323_v53 }
 0xf13   : > { %5246 = vadd.xlane.f32.xlu1 %v15652_v18 }
 0xf16   : > { %v15655_v7 = vpop.eup %12985 }
 0xf17   : > { %5242 = vadd.xlane.f32.xlu1 %v15655_v7 }
 0xf1a   : > { %v15658_v56 = vpop.eup %12987 }
 0xf1b   : > { %5248 = vadd.xlane.f32.xlu1 %v15658_v56  ;;  %v15663_v24 = vpop.eup %12989 }
 0xf1e   : > { %v4846_v10 = vpop.f32.mrf.mxu0 }
 0xf1f   : > { %v15666_v46 = vadd.f32 %v4846_v10, %v15359_v2  ;;  %5244 = vadd.xlane.f32.xlu1 %v15663_v24  ;;  %v5177_v10 = vpop.xlane.xlu1 %5176 }
 0xf20   : > { %v4848_v53 = vpop.f32.mrf.mxu0 }
 0xf21   : > { %v15670_v33 = vadd.f32 %v4848_v53, %v15362_v11 }
 0xf22   : > { %v4850_v14 = vpop.f32.mrf.mxu0 }
 0xf23   : > { %v15673_v27 = vadd.f32 %v4850_v14, %v18703_v9  ;;  %v18707_v14 = vld [vmem:[#allocation31_spill] sm:$0xff] }
 0xf24   : > { %v15675_v61 = vpop.f32.mrf.mxu0 }
 0xf25   : > { %18704 = vst [vmem:[#allocation57_spill] sm:$0xff] %v15675_v61  ;;  %v18709_v61 = vld [vmem:[#allocation24_spill] sm:$0xff] }
 0xf26   : > { %v4856_v23 = vpop.f32.mrf.mxu0 }
 0xf27   : > { %v15678_v0 = vadd.f32 %v4856_v23, %v18705_v3 }
 0xf28   : > { %v4858_v43 = vpop.f32.mrf.mxu0 }
 0xf29   : > { %v15681_v2 = vadd.f32 %v4858_v43, %v15377_v19  ;;  %v5173_v43 = vpop.xlane.xlu1 %5172 }
 0xf2a   : > { %v4860_v4 = vpop.f32.mrf.mxu0 }
 0xf2b   : > { %v15684_v36 = vadd.f32 %v4860_v4, %v15380_v13 }
 0xf2c   : > { %v15686_v11 = vpop.f32.mrf.mxu0 }
 0xf2d   : > { %18706 = vst [vmem:[#allocation54_spill] sm:$0xff] %v15686_v11 }
 0xf2f   : > { %v4866_v53 = vpop.f32.mrf.mxu0 }
 0xf30   : > { %v15689_v9 = vadd.f32 %v4866_v53, %v18707_v14  ;;  %5728 = vrot.lane.b32.xlu1 %v18709_v61, %s13422_s7  ;;  %v5185_v14 = vpop.xlane.xlu1 %5184 }
 0xf31   : > { %v4868_v23 = vpop.f32.mrf.mxu0 }
 0xf32   : > { %18708 = vst [vmem:[#allocation55_spill] sm:$0xff] %v15689_v9  ;;  %v15694_v3 = vadd.f32 %v4868_v23, %v15390_v49  ;;  %v5199_v23 = vsub.f32 %v15587_v30, %v5173_v43 }
 0xf33   : > { %v4870_v19 = vpop.f32.mrf.mxu0 }
 0xf34   : > { %18710 = vst [vmem:[#allocation52_spill] sm:$0xff] %v15694_v3  ;;  %v15697_v38 = vadd.f32 %v4870_v19, %v15394_v16 }
 0xf35   : > { %v15699_v13 = vpop.f32.mrf.mxu0 }
 0xf36   : > { %18711 = vst [vmem:[#allocation53_spill] sm:$0xff] %v15697_v38  ;;  %18712 = vst [vmem:[#allocation50_spill] sm:$0xff] %v15699_v13  ;;  %v5181_v38 = vpop.xlane.xlu1 %5180 }
 0xf37   : > { %v4876_v4 = vpop.f32.mrf.mxu0 }
 0xf38   : > { %v15702_v11 = vadd.f32 %v4876_v4, %v15401_v51 }
 0xf39   : > { %v4878_v53 = vpop.f32.mrf.mxu0 }
 0xf3a   : > { %18713 = vst [vmem:[#allocation51_spill] sm:$0xff] %v15702_v11  ;;  %v15705_v9 = vadd.f32 %v4878_v53, %v15405_v17  ;;  %v5201_v17 = vsub.f32 %v15584_v60, %v5177_v10  ;;  %v5220_v53 = vmul.f32 1.442695, %v5199_v23  ;;  %v15728_v10 = vpop.permute.xlu1 %5736 }
 0xf3b   : > { %v4880_v61 = vpop.f32.mrf.mxu0 }
 0xf3c   : > { %18714 = vst [vmem:[#allocation47_spill] sm:$0xff] %v15705_v9  ;;  %v15708_v49 = vadd.f32 %v4880_v61, %v15409_v25 }
 0xf3d   : > { %v15711_v3 = vpop.f32.mrf.mxu0  ;;  %v5175_v16 = vpop.xlane.xlu0 %5174 }
 0xf3e   : > { %18715 = vst [vmem:[#allocation48_spill] sm:$0xff] %v15711_v3  ;;  %v5200_v19 = vsub.f32 %v15577_v28, %v5175_v16  ;;  %v5224_v16 = vmul.f32 1.442695, %v5201_v17 }
 0xf3f   : > { %v4886_v13 = vpop.f32.mrf.mxu0 }
 0xf40   : > { %v5222_v51 = vmul.f32 1.442695, %v5200_v19  ;;  %v15715_v4 = vadd.f32 %v4886_v13, %v15415_v22 }
 0xf41   : > { %v4888_v9 = vpop.f32.mrf.mxu0  ;;  %v5171_v11 = vpop.xlane.xlu0 %5170 }
 0xf42   : > { %12991 = vpow2.f32 %v5222_v51  ;;  %v15719_v25 = vadd.f32 %v4888_v9, %v15420_v44  ;;  %v5198_v30 = vsub.f32 %v15581_v39, %v5171_v11  ;;  %v5205_v39 = vsub.f32 %v15595_v31, %v5185_v14 }
 0xf43   : > { %v4890_v61 = vpop.f32.mrf.mxu0  ;;  %12993 = vpow2.f32 %v5220_v53 }
 0xf44   : > { %v5218_v43 = vmul.f32 1.442695, %v5198_v30  ;;  %v15723_v28 = vadd.f32 %v4890_v61, %v15426_v12  ;;  %v5232_v30 = vmul.f32 1.442695, %v5205_v39  ;;  %v15742_v61 = vpop.permute.xlu1 %5732 }
 0xf45   : > { %v15725_v22 = vpop.f32.mrf.mxu0  ;;  %v5183_v13 = vpop.xlane.xlu0 %5182 }
 0xf46   : > { %18716 = vst [vmem:[#allocation44_spill] sm:$0xff] %v15725_v22  ;;  %12995 = vpow2.f32 %v5218_v43  ;;  %v5204_v60 = vsub.f32 %v15589_v35, %v5183_v13 }
 0xf47   : > { %v4896_v23 = vpop.f32.mrf.mxu0  ;;  %12997 = vpow2.f32 %v5224_v16 }
 0xf48   : > { %v5230_v44 = vmul.f32 1.442695, %v5204_v60  ;;  %v15731_v9 = vadd.f32 %v4896_v23, %v15438_v59  ;;  %v5203_v59 = vsub.f32 %v15598_v63, %v5181_v38 }
 0xf49   : > { %v4898_v12 = vpop.f32.mrf.mxu0  ;;  %v5179_v11 = vpop.xlane.xlu0 %5178 }
 0xf4a   : > { %12999 = vpow2.f32 %v5230_v44  ;;  %v15735_v19 = vadd.f32 %v4898_v12, %v15443_v50  ;;  %v5202_v51 = vsub.f32 %v15593_v32, %v5179_v11  ;;  %v5228_v32 = vmul.f32 1.442695, %v5203_v59 }
 0xf4b   : > { %v4900_v17 = vpop.f32.mrf.mxu0 }
 0xf4c   : > { %v5226_v35 = vmul.f32 1.442695, %v5202_v51  ;;  %v15739_v53 = vadd.f32 %v4900_v17, %v15451_v48 }
 0xf4d   : > { %v5191_v43 = vpop.xlane.xlu0 %5190 }
 0xf4e   : > { %13001 = vpow2.f32 %v5226_v35  ;;  %v5208_v31 = vsub.f32 %v15610_v47, %v5191_v43 }
 0xf4f   : > { %v15745_v14 = vpop.eup %12991  ;;  %13003 = vpow2.f32 %v5232_v30 }
 0xf50   : > { %v5238_v50 = vmul.f32 1.442695, %v5208_v31  ;;  %5254 = vadd.xlane.f32.xlu0 %v15745_v14  ;;  %v15748_v48 = vpop.eup %12993  ;;  %v12455_v31 = vld [vmem:[#allocation6 + $0xb4] ss:$8 sps:$4 sm:$0xff]  }
 0xf51   : > { %v5187_v16 = vpop.xlane.xlu0 %5186  ;;  %v5193_v13 = vpop.xlane.xlu1 %5192  ;;  %5543 = vmatprep.subr.bf16.mxu1 %v12455_v31 }
 0xf52   : > { %13005 = vpow2.f32 %v5238_v50  ;;  %v5206_v63 = vsub.f32 %v15613_v5, %v5187_v16  ;;  %v5209_v38 = vsub.f32 %v15616_v29, %v5193_v13  ;;  %v12453_v50 = vld [vmem:[#allocation6 + $0xb0] ss:$8 sps:$4 sm:$0xff]   ;;  %v12456_v16 = vld [vmem:[#allocation6 + $0xa0] ss:$8 sps:$4 sm:$0xff]  }
 0xf53   : > { %v15752_v60 = vpop.eup %12995  ;;  %13007 = vpow2.f32 %v5228_v32  ;;  %v12458_v32 = vld [vmem:[#allocation6 + $0xa4] ss:$8 sps:$4 sm:$0xff]   ;;  %5544 = vmatpush1.bf16.msra.mxu1 %v12453_v50  ;;  %v18717_v13 = vld [vmem:[#allocation66_spill] sm:$0xff] }
 0xf54   : > { %v5234_v23 = vmul.f32 1.442695, %v5206_v63  ;;  %5250 = vadd.xlane.f32.xlu0 %v15752_v60  ;;  %5252 = vadd.xlane.f32.xlu1 %v15748_v48  ;;  %v5240_v47 = vmul.f32 1.442695, %v5209_v38  ;;  %v15758_v12 = vpop.eup %12997  ;;  %v18718_v63 = vld [vmem:[#allocation46_spill] sm:$0xff] }
 0xf55   : > { %v15756_v44 = vpop.permute.xlu0 %5738  ;;  %v5189_v39 = vpop.xlane.xlu1 %5188  ;;  %5545 = vmatprep.subr.bf16.mxu1 %v12458_v32  ;;  %v18719_v38 = vld [vmem:[#allocation86_spill] sm:$0xff] }
 0xf56   : > { %13009 = vpow2.f32 %v5234_v23  ;;  %v5207_v11 = vsub.f32 %v15620_v6, %v5189_v39  ;;  %12190 = vmatprep.subr.msk.bf16.mxu0 %vm1481_vm0, %v15756_v44 }
 0xf57   : > { %v15763_v5 = vpop.eup %12999  ;;  %13011 = vpow2.f32 %v5240_v47  ;;  %5546 = vmatpush1.bf16.msra.mxu1 %v12456_v16  ;;  %v18720_v47 = vld [vmem:[#allocation16_spill] sm:$0xff] }
 0xf58   : > { %v5236_v29 = vmul.f32 1.442695, %v5207_v11  ;;  %5256 = vadd.xlane.f32.xlu0 %v15758_v12  ;;  %5262 = vadd.xlane.f32.xlu1 %v15763_v5 }
 0xf5a   : > { %13013 = vpow2.f32 %v5236_v29 }
 0xf5b   : > { %v15767_v51 = vpop.eup %13001 }
 0xf5c   : > { %5258 = vadd.xlane.f32.xlu1 %v15767_v51  ;;  %v15770_v17 = vpop.eup %13003 }
 0xf5f   : > { %v15772_v35 = vpop.eup %13005 }
 0xf60   : > { %5270 = vadd.xlane.f32.xlu0 %v15772_v35  ;;  %5264 = vadd.xlane.f32.xlu1 %v15770_v17  ;;  %v15776_v6 = vpop.eup %13007 }
 0xf63   : > { %v15778_v30 = vpop.eup %13009 }
 0xf64   : > { %5266 = vadd.xlane.f32.xlu0 %v15778_v30  ;;  %5260 = vadd.xlane.f32.xlu1 %v15776_v6  ;;  %v15782_v59 = vpop.eup %13011 }
 0xf67   : > { %v15784_v43 = vpop.eup %13013 }
 0xf68   : > { %5272 = vadd.xlane.f32.xlu0 %v15782_v59  ;;  %5268 = vadd.xlane.f32.xlu1 %v15784_v43 }
 0xf79   : > { %5724 = vrot.lane.b32.xlu1 %v18624_v58, %s13422_s7 }
 0xf7d   : > { %5710 = vrot.lane.b32.xlu1 %v15157_v55, %s13422_s7 }
 0xf7e   : > { %5726 = vrot.lane.b32.xlu0 %v18623_v45, %s13422_s7 }
 0xf81   : > { %5714 = vrot.lane.b32.xlu1 %v15169_v52, %s13422_s7 }
 0xf82   : > { %5708 = vrot.lane.b32.xlu0 %v15149_v8, %s13422_s7 }
 0xf85   : > { %5718 = vrot.lane.b32.xlu1 %v15181_v37, %s13422_s7 }
 0xf86   : > { %5712 = vrot.lane.b32.xlu0 %v15159_v34, %s13422_s7 }
 0xf89   : > { %5722 = vrot.lane.b32.xlu1 %v15191_v40, %s13422_s7 }
 0xf8a   : > { %5716 = vrot.lane.b32.xlu0 %v15171_v15, %s13422_s7 }
 0xf8d   : > { %6049 = vrot.lane.b32.xlu1 %v18679_v57, %s13422_s7 }
 0xf8e   : > { %5720 = vrot.lane.b32.xlu0 %v15183_v62, %s13422_s7 }
 0xf91   : > { %6041 = vrot.lane.b32.xlu1 %v18681_v41, %s13422_s7 }
 0xf92   : > { %6051 = vrot.lane.b32.xlu0 %v14847_v26, %s13422_s7 }
 0xf95   : > { %6037 = vrot.lane.b32.xlu1 %v18717_v13, %s13422_s7 }
 0xf96   : > { %6047 = vrot.lane.b32.xlu0 %v18718_v63, %s13422_s7 }
 0xf9a   : > { %6045 = vrot.lane.b32.xlu0 %v18719_v38, %s13422_s7 }
 0xf9c   : > { %v5247_v23 = vpop.xlane.xlu1 %5246 }
 0xf9e   : > { %6043 = vrot.lane.b32.xlu0 %v18720_v47, %s13422_s7 }
 0xfa0   : > { %v5243_v39 = vpop.xlane.xlu1 %5242 }
 0xfa4   : > { %v5249_v11 = vpop.xlane.xlu1 %5248 }
 0xfa5   : > { %13015 = vrcp.f32 %v5249_v11 }
 0xfa6   : > { %13017 = vrcp.f32 %v5243_v39  ;;  %v5735_v39 = vpop.permute.xlu0 %5734 }
 0xfa7   : > { %13019 = vrcp.f32 %v5247_v23  ;;  %v5786_v23 = vsel %vm1481_vm0, %v15756_v44, 0 }
 0xfa8   : > { %v5245_v29 = vpop.xlane.xlu1 %5244 }
 0xfa9   : > { %13021 = vrcp.f32 %v5245_v29 }
 0xfb2   : > { %v13016_v31 = vpop.eup %13015 }
 0xfb3   : > { %v13018_v50 = vpop.eup %13017  ;;  %v5293_v22 = vmul.f32 %v13016_v31, %v15658_v56  ;;  %v5783_v56 = vsel %vm1481_vm0, %v15728_v10, 0 }
 0xfb4   : > { %v13020_v32 = vpop.eup %13019  ;;  %v5290_v3 = vmul.f32 %v13018_v50, %v15655_v7  ;;  %v5731_v7 = vpop.permute.xlu0 %5730 }
 0xfb5   : > { %v5292_v41 = vmul.f32 %v13020_v32, %v15652_v18  ;;  %v5780_v18 = vsel %vm1481_vm0, %v5735_v39, 0 }
 0xfb6   : > { %v13022_v16 = vpop.eup %13021 }
 0xfb7   : > { %v5291_v13 = vmul.f32 %v13022_v16, %v15663_v24  ;;  %v5307_v38 = vpack.c.bf16 %v5293_v22, %v5292_v41  ;;  %v5777_v41 = vsel %vm1481_vm0, %v15742_v61, 0  ;;  %v5729_v24 = vpop.permute.xlu1 %5728  ;;  %v5774_v22 = vsel %vm1481_vm0, %v5731_v7, 0 }
 0xfb9   : > { %v5306_v47 = vpack.c.bf16 %v5291_v13, %v5290_v3 }
 0xfbb   : > { %11998 = vmatprep.mubr.bf16.mxu0 %v5306_v47 }
 0xfbc   : > { %11999 = vmatmul.mubr.bf16.vlgmr.msra.gmra.mxu0 %v5307_v38 }
 0xfbd   : > { %12015 = vmatpush3.bf16.xpose.msra.mxu0 %v5786_v23 }
 0xfbe   : > { %12191 = vmatprep.subr.msk.bf16.mxu0 %vm1481_vm0, %v15728_v10 }
 0xfc5   : > { %12017 = vmatpush3.bf16.xpose.msra.mxu0 %v5783_v56 }
 0xfc6   : > { %12192 = vmatprep.subr.msk.bf16.mxu0 %vm1481_vm0, %v5735_v39 }
 0xfcd   : > { %12019 = vmatpush3.bf16.xpose.msra.mxu0 %v5780_v18 }
 0xfce   : > { %12193 = vmatprep.subr.msk.bf16.mxu0 %vm1481_vm0, %v15742_v61  ;;  %v5771_v61 = vsel %vm1481_vm0, %v5729_v24, 0 }
 0xfd5   : > { %12021 = vmatpush3.bf16.xpose.msra.mxu0 %v5777_v41 }
 0xfd6   : > { %12194 = vmatprep.subr.msk.bf16.mxu0 %vm1481_vm0, %v5731_v7 }
 0xfd9   : > { %v5255_v3 = vpop.xlane.xlu0 %5254 }
 0xfdd   : > { %12023 = vmatpush3.bf16.xpose.msra.mxu0 %v5774_v22  ;;  %v5251_v10 = vpop.xlane.xlu0 %5250  ;;  %v5253_v44 = vpop.xlane.xlu1 %5252 }
 0xfde   : > { %13023 = vrcp.f32 %v5251_v10  ;;  %12195 = vmatprep.subr.msk.bf16.mxu0 %vm1481_vm0, %v5729_v24 }
 0xfdf   : > { %13025 = vrcp.f32 %v5253_v44 }
 0xfe0   : > { %13027 = vrcp.f32 %v5255_v3 }
 0xfe1   : > { %v5257_v13 = vpop.xlane.xlu0 %5256  ;;  %v5263_v38 = vpop.xlane.xlu1 %5262 }
 0xfe2   : > { %13029 = vrcp.f32 %v5257_v13 }
 0xfe5   : > { %12025 = vmatpush3.bf16.xpose.msra.mxu0 %v5771_v61  ;;  %v5259_v47 = vpop.xlane.xlu1 %5258 }
 0xfe9   : > { %v5271_v11 = vpop.xlane.xlu0 %5270  ;;  %v5265_v29 = vpop.xlane.xlu1 %5264 }
 0xfea   : > { %13031 = vrcp.f32 %v5265_v29 }
 0xfeb   : > { %v13024_v31 = vpop.eup %13023  ;;  %13033 = vrcp.f32 %v5259_v47 }
 0xfec   : > { %v13026_v50 = vpop.eup %13025  ;;  %v5294_v32 = vmul.f32 %v13024_v31, %v15752_v60  ;;  %13035 = vrcp.f32 %v5263_v38 }
 0xfed   : > { %v13028_v16 = vpop.eup %13027  ;;  %v5267_v23 = vpop.xlane.xlu0 %5266  ;;  %v5295_v39 = vmul.f32 %v13026_v50, %v15748_v48 }
 0xfee   : > { %v5261_v56 = vpop.xlane.xlu1 %5260  ;;  %v5296_v7 = vmul.f32 %v13028_v16, %v15745_v14 }
 0xfef   : > { %v13030_v18 = vpop.eup %13029  ;;  %13037 = vrcp.f32 %v5261_v56  ;;  %v5308_v41 = vpack.c.bf16 %v5295_v39, %v5294_v32 }
 0xff0   : > { %v5297_v24 = vmul.f32 %v13030_v18, %v15758_v12  ;;  %13039 = vrcp.f32 %v5267_v23 }
 0xff1   : > { %12002 = vmatprep.mubr.bf16.mxu0 %v5308_v41  ;;  %v5273_v3 = vpop.xlane.xlu0 %5272 }
 0xff2   : > { %v5269_v22 = vpop.xlane.xlu1 %5268  ;;  %v5309_v10 = vpack.c.bf16 %v5297_v24, %v5296_v7 }
 0xff3   : > { %13041 = vrcp.f32 %v5269_v22 }
 0xff4   : > { %13043 = vrcp.f32 %v5273_v3  ;;  %12003 = vmatmul.mubr.bf16.gmra.mxu0 %v5309_v10 }
 0xff5   : > { %v5727_v60 = vpop.permute.xlu0 %5726  ;;  %13045 = vrcp.f32 %v5271_v11 }
 0xff6   : > { %12196 = vmatprep.subr.msk.bf16.mxu0 %vm1481_vm0, %v5727_v60  ;;  %v5768_v48 = vsel %vm1481_vm0, %v5727_v60, 0  ;;  %v5725_v44 = vpop.permute.xlu1 %5724 }
 0xff7   : > { %12027 = vmatpush3.bf16.xpose.msra.mxu0 %v5768_v48  ;;  %v13032_v14 = vpop.eup %13031  ;;  %v5765_v32 = vsel %vm1481_vm0, %v5725_v44, 0 }
 0xff8   : > { %12197 = vmatprep.subr.msk.bf16.mxu0 %vm1481_vm0, %v5725_v44  ;;  %v13034_v13 = vpop.eup %13033  ;;  %v5301_v47 = vmul.f32 %v13032_v14, %v15770_v17 }
 0xff9   : > { %v5709_v12 = vpop.permute.xlu0 %5708  ;;  %v13036_v38 = vpop.eup %13035  ;;  %v5298_v31 = vmul.f32 %v13034_v13, %v15767_v51 }
 0xffa   : > { %v5300_v16 = vmul.f32 %v13036_v38, %v15763_v5  ;;  %v5711_v60 = vpop.permute.xlu1 %5710 }
 0xffc   : > { %v13038_v61 = vpop.eup %13037  ;;  %v5311_v39 = vpack.c.bf16 %v5301_v47, %v5300_v16 }
 0xffd   : > { %v5713_v29 = vpop.permute.xlu0 %5712  ;;  %v5299_v11 = vmul.f32 %v13038_v61, %v15776_v6  ;;  %v13040_v50 = vpop.eup %13039 }
 0xffe   : > { %v5302_v7 = vmul.f32 %v13040_v50, %v15778_v30  ;;  %v5715_v30 = vpop.permute.xlu1 %5714 }
 0xfff   : > { %12029 = vmatpush3.bf16.xpose.msra.mxu0 %v5765_v32  ;;  %v5310_v23 = vpack.c.bf16 %v5299_v11, %v5298_v31 }
0x1000   : > { %v13042_v56 = vpop.eup %13041 }
0x1001   : > { %v13044_v18 = vpop.eup %13043  ;;  %12006 = vmatprep.mubr.bf16.mxu0 %v5310_v23  ;;  %v5717_v41 = vpop.permute.xlu0 %5716  ;;  %v5303_v17 = vmul.f32 %v13042_v56, %v15784_v43 }
0x1002   : > { %12007 = vmatmul.mubr.bf16.gmra.mxu0 %v5311_v39  ;;  %v13046_v51 = vpop.eup %13045  ;;  %v5305_v6 = vmul.f32 %v13044_v18, %v15782_v59  ;;  %v5719_v59 = vpop.permute.xlu1 %5718 }
0x1003   : > { %v5312_v24 = vpack.c.bf16 %v5303_v17, %v5302_v7  ;;  %v5304_v5 = vmul.f32 %v13046_v51, %v15772_v35  ;;  %v15867_v43 = vpop.f32.mrf.mxu0 }
0x1004   : > { %18721 = vst [vmem:[#allocation45_spill] sm:$0xff] %v15867_v43 }
0x1005   : > { %12010 = vmatprep.mubr.bf16.mxu0 %v5312_v24  ;;  %v5721_v3 = vpop.permute.xlu0 %5720  ;;  %v5313_v22 = vpack.c.bf16 %v5305_v6, %v5304_v5 }
0x1006   : > { %v5723_v35 = vpop.permute.xlu1 %5722 }
0x1009   : > { %v6052_v10 = vpop.permute.xlu0 %6051 }
0x100a   : > { %12011 = vmatmul.mubr.bf16.gmra.mxu0 %v5313_v22  ;;  %12046 = vmatprep.subr.bf16.mxu1 %v6052_v10  ;;  %v6050_v38 = vpop.permute.xlu1 %6049 }
0x100b   : > { %12030 = vmatprep.mubr.msk.bf16.mxu0 %vm1481_vm0, %v5709_v12 }
0x100d   : > { %v6048_v61 = vpop.permute.xlu0 %6047 }
0x100e   : > { %v6042_v11 = vpop.permute.xlu1 %6041 }
0x1012   : > { %12031 = vmatmul.mubr.msk.bf16.vlgmr.msra.gmra.mxu0 %vm1481_vm0, %v5711_v60 }
0x1013   : > { %12034 = vmatprep.mubr.msk.bf16.mxu0 %vm1481_vm0, %v5713_v29  ;;  %v6046_v29 = vpop.permute.xlu0 %6045 }
0x1017   : > { %v6044_v31 = vpop.permute.xlu0 %6043 }
0x101a   : > { %12035 = vmatmul.mubr.msk.bf16.gmra.mxu0 %vm1481_vm0, %v5715_v30 }
0x101b   : > { %12038 = vmatprep.mubr.msk.bf16.mxu0 %vm1481_vm0, %v5717_v41 }
0x1022   : > { %12039 = vmatmul.mubr.msk.bf16.gmra.mxu0 %vm1481_vm0, %v5719_v59 }
0x1023   : > { %12042 = vmatprep.mubr.msk.bf16.mxu0 %vm1481_vm0, %v5721_v3 }
0x102a   : > { %12043 = vmatmul.mubr.msk.bf16.gmra.mxu0 %vm1481_vm0, %v5723_v35 }
0x102b   : > { %6278 = vmatprep.mubr.bf16.mxu0 %v18686_v20 }
0x107c   : > { %v12000_v48 = vpop.f32.mrf.mxu0 }
0x107e   : > { %v5380_v44 = vpop.f32.mrf.mxu0 }
0x1080   : > { %v12001_v14 = vpop.f32.mrf.mxu0 }
0x1081   : > { %v5476_v47 = vpack.c.bf16 %v12001_v14, %v12000_v48 }
0x1082   : > { %v5383_v12 = vpop.f32.mrf.mxu0 }
0x1083   : > { %v5475_v13 = vpack.c.bf16 %v5383_v12, %v5380_v44 }
0x1085   : > { %11063 = vmatmul.mubr.msk.bf16.vlgmr.msra.gmra.mxu1 %vm1481_vm0, %v5475_v13 }
0x1086   : > { %12047 = vmatpush3.bf16.msra.mxu1 %v6052_v10  ;;  %5573 = vmatprep.mubr.bf16.mxu1 %v18686_v20 }
0x1087   : > { %12048 = vmatprep.subr.bf16.mxu1 %v6050_v38 }
0x108a   : > { %12049 = vmatpush3.bf16.msra.mxu1 %v6050_v38 }
0x108b   : > { %12050 = vmatprep.subr.bf16.mxu1 %v6048_v61 }
0x108d   : > { %11064 = vmatmul.mubr.msk.bf16.gmra.mxu1 %vm1481_vm0, %v5476_v47 }
0x108e   : > { %12051 = vmatpush3.bf16.msra.mxu1 %v6048_v61  ;;  %5583 = vmatprep.mubr.bf16.mxu1 %v18686_v20 }
0x108f   : > { %12052 = vmatprep.subr.bf16.mxu1 %v6046_v29 }
0x1092   : > { %12053 = vmatpush3.bf16.msra.mxu1 %v6046_v29 }
0x1093   : > { %12054 = vmatprep.subr.bf16.mxu1 %v6044_v31 }
0x1096   : > { %12055 = vmatpush3.bf16.msra.mxu1 %v6044_v31  ;;  %v18722_v31 = vld [vmem:[#allocation30_spill] sm:$0xff] }
0x1097   : > { %12056 = vmatprep.subr.bf16.mxu1 %v6042_v11 }
0x109a   : > { %12057 = vmatpush3.bf16.msra.mxu1 %v6042_v11 }
0x10b4   : > { %v12004_v50 = vpop.f32.mrf.mxu0 }
0x10b6   : > { %v5396_v32 = vpop.f32.mrf.mxu0 }
0x10b8   : > { %v12005_v16 = vpop.f32.mrf.mxu0 }
0x10b9   : > { %v5478_v18 = vpack.c.bf16 %v12005_v16, %v12004_v50  ;;  %v18723_v16 = vld [vmem:[#allocation78_spill] sm:$0xff] }
0x10ba   : > { %v5399_v23 = vpop.f32.mrf.mxu0 }
0x10bb   : > { %v5477_v56 = vpack.c.bf16 %v5399_v23, %v5396_v32  ;;  %v18724_v23 = vld [vmem:[#allocation33_spill] sm:$0xff] }
0x10bd   : > { %11065 = vmatmul.mubr.msk.bf16.gmra.mxu1 %vm1481_vm0, %v5477_v56  ;;  %v18725_v56 = vld [vmem:[#allocation27_spill] sm:$0xff] }
0x10be   : > { %5593 = vmatprep.mubr.bf16.mxu1 %v18686_v20 }
0x10c2   : > { %v12008_v39 = vpop.f32.mrf.mxu0 }
0x10c4   : > { %v5412_v41 = vpop.f32.mrf.mxu0 }
0x10c5   : > { %11066 = vmatmul.mubr.msk.bf16.gmra.mxu1 %vm1481_vm0, %v5478_v18  ;;  %v18726_v18 = vld [vmem:[#allocation40_spill] sm:$0xff] }
0x10c6   : > { %v12009_v7 = vpop.f32.mrf.mxu0  ;;  %5603 = vmatprep.mubr.bf16.mxu1 %v18686_v20 }
0x10c7   : > { %v5480_v10 = vpack.c.bf16 %v12009_v7, %v12008_v39 }
0x10c8   : > { %v5415_v17 = vpop.f32.mrf.mxu0 }
0x10c9   : > { %v5479_v24 = vpack.c.bf16 %v5415_v17, %v5412_v41  ;;  %v18727_v17 = vld [vmem:[#allocation42_spill] sm:$0xff] }
0x10ca   : > { %v12012_v51 = vpop.f32.mrf.mxu0 }
0x10cc   : > { %v5428_v6 = vpop.f32.mrf.mxu0 }
0x10cd   : > { %11067 = vmatmul.mubr.msk.bf16.gmra.mxu1 %vm1481_vm0, %v5479_v24 }
0x10ce   : > { %v12013_v3 = vpop.f32.mrf.mxu0  ;;  %5613 = vmatprep.mubr.bf16.mxu1 %v18686_v20 }
0x10cf   : > { %v5482_v38 = vpack.c.bf16 %v12013_v3, %v12012_v51 }
0x10d0   : > { %v5431_v5 = vpop.f32.mrf.mxu0 }
0x10d1   : > { %v5481_v48 = vpack.c.bf16 %v5431_v5, %v5428_v6  ;;  %v18728_v6 = vld [vmem:[#allocation43_spill] sm:$0xff] }
0x10d2   : > { %v12032_v22 = vpop.f32.mrf.mxu0 }
0x10d3   : > { %5889 = vmax.xlane.f32.xlu0 %v12032_v22 }
0x10d4   : > { %v15879_v60 = vpop.f32.mrf.mxu0 }
0x10d5   : > { %11068 = vmatmul.mubr.msk.bf16.gmra.mxu1 %vm1481_vm0, %v5480_v10 }
0x10d6   : > { %v15882_v30 = vpop.f32.mrf.mxu0  ;;  %5623 = vmatprep.mubr.bf16.mxu1 %v18686_v20 }
0x10d7   : > { %5885 = vmax.xlane.f32.xlu0 %v15879_v60 }
0x10d8   : > { %v15886_v59 = vpop.f32.mrf.mxu0 }
0x10d9   : > { %5887 = vmax.xlane.f32.xlu1 %v15886_v59 }
0x10da   : > { %v15889_v35 = vpop.f32.mrf.mxu0 }
0x10db   : > { %5891 = vmax.xlane.f32.xlu0 %v15882_v30 }
0x10dc   : > { %v15892_v44 = vpop.f32.mrf.mxu0 }
0x10dd   : > { %11069 = vmatmul.mubr.msk.bf16.gmra.mxu1 %vm1481_vm0, %v5481_v48 }
0x10de   : > { %v15895_v14 = vpop.f32.mrf.mxu0  ;;  %5633 = vmatprep.mubr.bf16.mxu1 %v18686_v20 }
0x10df   : > { %5899 = vmax.xlane.f32.xlu1 %v15895_v14 }
0x10e0   : > { %v15899_v12 = vpop.f32.mrf.mxu0 }
0x10e2   : > { %v15901_v13 = vpop.f32.mrf.mxu0 }
0x10e3   : > { %5895 = vmax.xlane.f32.xlu1 %v15899_v12 }
0x10e4   : > { %v15904_v61 = vpop.f32.mrf.mxu0 }
0x10e5   : > { %11070 = vmatmul.mubr.msk.bf16.gmra.mxu1 %vm1481_vm0, %v5482_v38 }
0x10e6   : > { %v15907_v47 = vpop.f32.mrf.mxu0 }
0x10e7   : > { %5907 = vmax.xlane.f32.xlu1 %v15907_v47 }
0x10e8   : > { %v15910_v29 = vpop.f32.mrf.mxu0 }
0x10ea   : > { %v15922_v11 = vpop.f32.mrf.mxu0 }
0x10eb   : > { %5903 = vmax.xlane.f32.xlu1 %v15910_v29 }
0x10ec   : > { %v15925_v50 = vpop.f32.mrf.mxu0 }
0x10ee   : > { %v15928_v32 = vpop.f32.mrf.mxu0 }
0x10f1   : > { %6039 = vrot.lane.b32.xlu0 %v18688_v54, %s13422_s7 }
0x10fc   : > { %6451 = vrot.lane.b32.xlu1 %v18689_v1, %s13423_s13  ;;  %v15932_v1 = vpop.f32.mrf.mxu0 }
0x1100   : > { %6447 = vrot.lane.b32.xlu1 %v18722_v31, %s13423_s13  ;;  %v18730_v31 = vld [vmem:[#allocation59_spill] sm:$0xff] }
0x1110   : > { %5897 = vmax.xlane.f32.xlu0 %v15889_v35 }
0x1114   : > { %5893 = vmax.xlane.f32.xlu0 %v15892_v44 }
0x1118   : > { %5905 = vmax.xlane.f32.xlu0 %v15901_v13 }
0x111c   : > { %5901 = vmax.xlane.f32.xlu0 %v15904_v61 }
0x1120   : > { %5913 = vmax.xlane.f32.xlu0 %v15922_v11 }
0x1124   : > { %5909 = vmax.xlane.f32.xlu0 %v15925_v50  ;;  %5915 = vmax.xlane.f32.xlu1 %v15928_v32 }
0x1128   : > { %5911 = vmax.xlane.f32.xlu1 %v15932_v1 }
0x113a   : > { %6453 = vrot.lane.b32.xlu0 %v18723_v16, %s13423_s13 }
0x113e   : > { %6449 = vrot.lane.b32.xlu0 %v18724_v23, %s13423_s13 }
0x1142   : > { %6445 = vrot.lane.b32.xlu0 %v18725_v56, %s13423_s13 }
0x1145   : > { %v5565_v39 = vpop.f32.mrf.mxu1 }
0x1146   : > { %v15942_v41 = vadd.f32 %v5565_v39, %v18726_v18 }
0x1147   : > { %v5567_v7 = vpop.f32.mrf.mxu1 }
0x1148   : > { %v15945_v51 = vadd.f32 %v5567_v7, %v18727_v17  ;;  %v6038_v7 = vpop.permute.xlu1 %6037 }
0x1149   : > { %v5569_v24 = vpop.f32.mrf.mxu1 }
0x114a   : > { %v15948_v3 = vadd.f32 %v5569_v24, %v18728_v6 }
0x114b   : > { %v15950_v5 = vpop.f32.mrf.mxu1 }
0x114c   : > { %18729 = vst [vmem:[#allocation81_spill] sm:$0xff] %v15950_v5 }
0x114d   : > { %v5575_v10 = vpop.f32.mrf.mxu1 }
0x114e   : > { %v15953_v48 = vadd.f32 %v5575_v10, %v15641_v42 }
0x114f   : > { %v5577_v38 = vpop.f32.mrf.mxu1 }
0x1150   : > { %v15956_v16 = vadd.f32 %v5577_v38, %v18730_v31 }
0x1151   : > { %v5579_v23 = vpop.f32.mrf.mxu1 }
0x1152   : > { %v15959_v56 = vadd.f32 %v5579_v23, %v15647_v21 }
0x115c   : > { %v5890_v39 = vpop.xlane.xlu0 %5889 }
0x115d   : > { %v5919_v18 = vsub.f32 %v12032_v22, %v5890_v39 }
0x115f   : > { %v5937_v17 = vmul.f32 1.442695, %v5919_v18 }
0x1160   : > { %v5886_v24 = vpop.xlane.xlu0 %5885 }
0x1161   : > { %13047 = vpow2.f32 %v5937_v17  ;;  %v5917_v6 = vsub.f32 %v15879_v60, %v5886_v24 }
0x1162   : > { %v5888_v43 = vpop.xlane.xlu1 %5887 }
0x1163   : > { %v5933_v5 = vmul.f32 1.442695, %v5917_v6  ;;  %v5918_v10 = vsub.f32 %v15886_v59, %v5888_v43  ;;  %v15975_v59 = vpop.f32.mrf.mxu1 }
0x1164   : > { %v5892_v42 = vpop.xlane.xlu0 %5891  ;;  %18731 = vst [vmem:[#allocation38_spill] sm:$0xff] %v15975_v59 }
0x1165   : > { %13049 = vpow2.f32 %v5933_v5  ;;  %v5920_v38 = vsub.f32 %v15882_v30, %v5892_v42  ;;  %v5935_v21 = vmul.f32 1.442695, %v5918_v10 }
0x1167   : > { %v5939_v31 = vmul.f32 1.442695, %v5920_v38 }
0x1168   : > { %v6040_v54 = vpop.permute.xlu0 %6039  ;;  %v5900_v38 = vpop.xlane.xlu1 %5899 }
0x1169   : > { %13051 = vpow2.f32 %v5939_v31  ;;  %12058 = vmatprep.subr.bf16.mxu1 %v6040_v54 }
0x116a   : > { %12059 = vmatpush3.bf16.msra.mxu1 %v6040_v54  ;;  %13053 = vpow2.f32 %v5935_v21 }
0x116b   : > { %12060 = vmatprep.subr.bf16.mxu1 %v6038_v7 }
0x116e   : > { %v15964_v22 = vpop.eup %13047  ;;  %12061 = vmatpush3.bf16.msra.mxu1 %v6038_v7 }
0x116f   : > { %5969 = vadd.xlane.f32.xlu1 %v15964_v22 }
0x1172   : > { %v15967_v60 = vpop.eup %13049 }
0x1173   : > { %5965 = vadd.xlane.f32.xlu1 %v15967_v60 }
0x1176   : > { %v15970_v43 = vpop.eup %13051 }
0x1177   : > { %5971 = vadd.xlane.f32.xlu1 %v15970_v43  ;;  %v15973_v30 = vpop.eup %13053 }
0x117b   : > { %5967 = vadd.xlane.f32.xlu1 %v15973_v30 }
0x117d   : > { %v5585_v54 = vpop.f32.mrf.mxu1 }
0x117e   : > { %v15979_v5 = vadd.f32 %v5585_v54, %v15666_v46  ;;  %v18738_v54 = vld [vmem:[#allocation55_spill] sm:$0xff] }
0x117f   : > { %v5587_v23 = vpop.f32.mrf.mxu1 }
0x1180   : > { %v15982_v39 = vadd.f32 %v5587_v23, %v15670_v33 }
0x1181   : > { %v5589_v18 = vpop.f32.mrf.mxu1 }
0x1182   : > { %v15985_v7 = vadd.f32 %v5589_v18, %v15673_v27  ;;  %v18737_v27 = vld [vmem:[#allocation24_spill] sm:$0xff]  ;;  %v5896_v18 = vpop.xlane.xlu1 %5895 }
0x1183   : > { %v15987_v17 = vpop.f32.mrf.mxu1 }
0x1184   : > { %18732 = vst [vmem:[#allocation49_spill] sm:$0xff] %v15987_v17 }
0x1185   : > { %v5595_v24 = vpop.f32.mrf.mxu1 }
0x1186   : > { %v15990_v6 = vadd.f32 %v5595_v24, %v15678_v0  ;;  %v18740_v24 = vld [vmem:[#allocation52_spill] sm:$0xff] }
0x1187   : > { %v5597_v42 = vpop.f32.mrf.mxu1 }
0x1188   : > { %18733 = vst [vmem:[#allocation21_spill] sm:$0xff] %v15990_v6  ;;  %v15993_v10 = vadd.f32 %v5597_v42, %v15681_v2  ;;  %v18742_v42 = vld [vmem:[#allocation53_spill] sm:$0xff]  ;;  %v18747_v6 = vld [vmem:[#allocation47_spill] sm:$0xff] }
0x1189   : > { %v5599_v46 = vpop.f32.mrf.mxu1 }
0x118a   : > { %18734 = vst [vmem:[#allocation18_spill] sm:$0xff] %v15993_v10  ;;  %v15996_v31 = vadd.f32 %v5599_v46, %v15684_v36 }
0x118b   : > { %v15998_v33 = vpop.f32.mrf.mxu1 }
0x118c   : > { %18735 = vst [vmem:[#allocation19_spill] sm:$0xff] %v15996_v31  ;;  %18736 = vst [vmem:[#allocation22_spill] sm:$0xff] %v15998_v33  ;;  %6443 = vrot.lane.b32.xlu1 %v18737_v27, %s13423_s13  ;;  %v5908_v33 = vpop.xlane.xlu1 %5907  ;;  %v18745_v31 = vld [vmem:[#allocation51_spill] sm:$0xff] }
0x118d   : > { %v5605_v21 = vpop.f32.mrf.mxu1 }
0x118e   : > { %v16003_v23 = vadd.f32 %v5605_v21, %v18738_v54  ;;  %v5922_v54 = vsub.f32 %v15899_v12, %v5896_v18 }
0x118f   : > { %v5607_v0 = vpop.f32.mrf.mxu1 }
0x1190   : > { %18739 = vst [vmem:[#allocation25_spill] sm:$0xff] %v16003_v23  ;;  %v16006_v17 = vadd.f32 %v5607_v0, %v18740_v24 }
0x1191   : > { %v5609_v2 = vpop.f32.mrf.mxu1 }
0x1192   : > { %18741 = vst [vmem:[#allocation28_spill] sm:$0xff] %v16006_v17  ;;  %v16009_v59 = vadd.f32 %v5609_v2, %v18742_v42 }
0x1193   : > { %v16011_v36 = vpop.f32.mrf.mxu1 }
0x1194   : > { %18743 = vst [vmem:[#allocation31_spill] sm:$0xff] %v16009_v59  ;;  %18744 = vst [vmem:[#allocation46_spill] sm:$0xff] %v16011_v36  ;;  %v5904_v36 = vpop.xlane.xlu1 %5903 }
0x1195   : > { %v5615_v46 = vpop.f32.mrf.mxu1 }
0x1196   : > { %v16014_v10 = vadd.f32 %v5615_v46, %v18745_v31  ;;  %v5924_v31 = vsub.f32 %v15895_v14, %v5900_v38  ;;  %v5943_v46 = vmul.f32 1.442695, %v5922_v54 }
0x1197   : > { %v5617_v27 = vpop.f32.mrf.mxu1 }
0x1198   : > { %18746 = vst [vmem:[#allocation30_spill] sm:$0xff] %v16014_v10  ;;  %v16017_v21 = vadd.f32 %v5617_v27, %v18747_v6 }
0x1199   : > { %v5898_v23 = vpop.xlane.xlu0 %5897  ;;  %v5619_v0 = vpop.f32.mrf.mxu1 }
0x119a   : > { %v5923_v24 = vsub.f32 %v15889_v35, %v5898_v23  ;;  %v16022_v2 = vadd.f32 %v5619_v0, %v15708_v49  ;;  %v5947_v23 = vmul.f32 1.442695, %v5924_v31 }
0x119b   : > { %v16024_v42 = vpop.f32.mrf.mxu1 }
0x119c   : > { %v5945_v59 = vmul.f32 1.442695, %v5923_v24  ;;  %v16034_v24 = vpop.permute.xlu1 %6451 }
0x119d   : > { %v5894_v10 = vpop.xlane.xlu0 %5893  ;;  %v5625_v17 = vpop.f32.mrf.mxu1 }
0x119e   : > { %13055 = vpow2.f32 %v5945_v59  ;;  %v5921_v6 = vsub.f32 %v15892_v44, %v5894_v10  ;;  %v16029_v12 = vadd.f32 %v5625_v17, %v15715_v4  ;;  %v5928_v17 = vsub.f32 %v15907_v47, %v5908_v33 }
0x119f   : > { %v5627_v18 = vpop.f32.mrf.mxu1  ;;  %13057 = vpow2.f32 %v5943_v46 }
0x11a0   : > { %v5941_v35 = vmul.f32 1.442695, %v5921_v6  ;;  %v16032_v49 = vadd.f32 %v5627_v18, %v15719_v25  ;;  %v16047_v46 = vpop.permute.xlu1 %6447  ;;  %v5955_v6 = vmul.f32 1.442695, %v5928_v17  ;;  %v5926_v18 = vsub.f32 %v15910_v29, %v5904_v36 }
0x11a1   : > { %v5906_v27 = vpop.xlane.xlu0 %5905  ;;  %v5629_v0 = vpop.f32.mrf.mxu1 }
0x11a2   : > { %13059 = vpow2.f32 %v5941_v35  ;;  %v5927_v14 = vsub.f32 %v15901_v13, %v5906_v27  ;;  %v16038_v59 = vadd.f32 %v5629_v0, %v15723_v28  ;;  %v5951_v27 = vmul.f32 1.442695, %v5926_v18 }
0x11a3   : > { %v16040_v44 = vpop.f32.mrf.mxu1  ;;  %13061 = vpow2.f32 %v5947_v23 }
0x11a4   : > { %18748 = vst [vmem:[#allocation78_spill] sm:$0xff] %v16040_v44  ;;  %v5953_v4 = vmul.f32 1.442695, %v5927_v14 }
0x11a5   : > { %v5902_v25 = vpop.xlane.xlu0 %5901  ;;  %v5635_v10 = vpop.f32.mrf.mxu1 }
0x11a6   : > { %13063 = vpow2.f32 %v5953_v4  ;;  %v5925_v38 = vsub.f32 %v15904_v61, %v5902_v25  ;;  %v16045_v54 = vadd.f32 %v5635_v10, %v15731_v9 }
0x11a7   : > { %v5637_v31 = vpop.f32.mrf.mxu1 }
0x11a8   : > { %v5949_v13 = vmul.f32 1.442695, %v5925_v38  ;;  %v16050_v28 = vadd.f32 %v5637_v31, %v15735_v19 }
0x11a9   : > { %v5914_v35 = vpop.xlane.xlu0 %5913  ;;  %v5639_v47 = vpop.f32.mrf.mxu1 }
0x11aa   : > { %13065 = vpow2.f32 %v5949_v13  ;;  %v5931_v33 = vsub.f32 %v15922_v11, %v5914_v35  ;;  %v16055_v61 = vadd.f32 %v5639_v47, %v15739_v53 }
0x11ab   : > { %v16057_v9 = vpop.eup %13055  ;;  %13067 = vpow2.f32 %v5955_v6 }
0x11ac   : > { %v5961_v23 = vmul.f32 1.442695, %v5931_v33  ;;  %5977 = vadd.xlane.f32.xlu0 %v16057_v9  ;;  %v16060_v14 = vpop.eup %13057  ;;  %v12461_v33 = vld [vmem:[#allocation6 + $0xd4] ss:$8 sps:$4 sm:$0xff]  }
0x11ad   : > { %v5910_v19 = vpop.xlane.xlu0 %5909  ;;  %v5916_v0 = vpop.xlane.xlu1 %5915  ;;  %6258 = vmatprep.subr.bf16.mxu0 %v12461_v33 }
0x11ae   : > { %13069 = vpow2.f32 %v5961_v23  ;;  %v5929_v29 = vsub.f32 %v15925_v50, %v5910_v19  ;;  %v5932_v36 = vsub.f32 %v15928_v32, %v5916_v0  ;;  %v12459_v23 = vld [vmem:[#allocation6 + $0xd0] ss:$8 sps:$4 sm:$0xff]  }
0x11af   : > { %v16064_v11 = vpop.eup %13059  ;;  %13071 = vpow2.f32 %v5951_v27  ;;  %v12464_v27 = vld [vmem:[#allocation6 + $0xc4] ss:$8 sps:$4 sm:$0xff]   ;;  %6259 = vmatpush1.bf16.msra.mxu0 %v12459_v23 }
0x11b0   : > { %v5957_v53 = vmul.f32 1.442695, %v5929_v29  ;;  %5973 = vadd.xlane.f32.xlu0 %v16064_v11  ;;  %5975 = vadd.xlane.f32.xlu1 %v16060_v14  ;;  %v5963_v4 = vmul.f32 1.442695, %v5932_v36  ;;  %v16070_v10 = vpop.eup %13061 }
0x11b1   : > { %v16068_v17 = vpop.permute.xlu0 %6453  ;;  %v5912_v25 = vpop.xlane.xlu1 %5911  ;;  %6260 = vmatprep.subr.bf16.mxu0 %v12464_v27 }
0x11b2   : > { %13073 = vpow2.f32 %v5957_v53  ;;  %v5930_v38 = vsub.f32 %v15932_v1, %v5912_v25  ;;  %12198 = vmatprep.subr.msk.bf16.mxu1 %vm1481_vm0, %v16068_v17  ;;  %v6501_v36 = vsel %vm1481_vm0, %v16068_v17, 0 }
0x11b3   : > { %v16075_v50 = vpop.eup %13063  ;;  %13075 = vpow2.f32 %v5963_v4 }
0x11b4   : > { %v5959_v32 = vmul.f32 1.442695, %v5930_v38  ;;  %5979 = vadd.xlane.f32.xlu0 %v16070_v10  ;;  %5985 = vadd.xlane.f32.xlu1 %v16075_v50 }
0x11b5   : > { %v6450_v53 = vpop.permute.xlu0 %6449 }
0x11b6   : > { %13077 = vpow2.f32 %v5959_v32 }
0x11b7   : > { %v16079_v31 = vpop.eup %13065 }
0x11b8   : > { %5981 = vadd.xlane.f32.xlu1 %v16079_v31  ;;  %v16082_v13 = vpop.eup %13067 }
0x11bb   : > { %v16084_v6 = vpop.eup %13069 }
0x11bc   : > { %5993 = vadd.xlane.f32.xlu0 %v16084_v6  ;;  %5987 = vadd.xlane.f32.xlu1 %v16082_v13  ;;  %v16088_v1 = vpop.eup %13071 }
0x11bf   : > { %v16090_v18 = vpop.eup %13073 }
0x11c0   : > { %5989 = vadd.xlane.f32.xlu0 %v16090_v18  ;;  %5983 = vadd.xlane.f32.xlu1 %v16088_v1  ;;  %v16094_v35 = vpop.eup %13075 }
0x11c3   : > { %v16096_v47 = vpop.eup %13077 }
0x11c4   : > { %5995 = vadd.xlane.f32.xlu0 %v16094_v35  ;;  %5991 = vadd.xlane.f32.xlu1 %v16096_v47 }
0x11d5   : > { %6439 = vrot.lane.b32.xlu1 %v18624_v58, %s13423_s13  ;;  %v12462_v58 = vld [vmem:[#allocation6 + $0xc0] ss:$8 sps:$4 sm:$0xff]  }
0x11d6   : > { %6261 = vmatpush1.bf16.msra.mxu0 %v12462_v58 }
0x11d9   : > { %6425 = vrot.lane.b32.xlu1 %v15157_v55, %s13423_s13 }
0x11da   : > { %6441 = vrot.lane.b32.xlu0 %v18623_v45, %s13423_s13  ;;  %v18749_v45 = vld [vmem:[#allocation86_spill] sm:$0xff] }
0x11dd   : > { %6429 = vrot.lane.b32.xlu1 %v15169_v52, %s13423_s13 }
0x11de   : > { %6423 = vrot.lane.b32.xlu0 %v15149_v8, %s13423_s13 }
0x11e1   : > { %6433 = vrot.lane.b32.xlu1 %v15181_v37, %s13423_s13 }
0x11e2   : > { %6427 = vrot.lane.b32.xlu0 %v15159_v34, %s13423_s13 }
0x11e5   : > { %6437 = vrot.lane.b32.xlu1 %v15191_v40, %s13423_s13 }
0x11e6   : > { %6431 = vrot.lane.b32.xlu0 %v15171_v15, %s13423_s13 }
0x11e9   : > { %6764 = vrot.lane.b32.xlu1 %v18679_v57, %s13423_s13 }
0x11ea   : > { %6435 = vrot.lane.b32.xlu0 %v15183_v62, %s13423_s13 }
0x11ee   : > { %6766 = vrot.lane.b32.xlu0 %v14847_v26, %s13423_s13 }
0x11f2   : > { %6762 = vrot.lane.b32.xlu0 %v18718_v63, %s13423_s13 }
0x11f6   : > { %6760 = vrot.lane.b32.xlu0 %v18749_v45, %s13423_s13 }
0x11f8   : > { %v5970_v8 = vpop.xlane.xlu1 %5969 }
0x11fc   : > { %v5966_v55 = vpop.xlane.xlu1 %5965 }
0x1200   : > { %v5972_v34 = vpop.xlane.xlu1 %5971 }
0x1201   : > { %13079 = vrcp.f32 %v5972_v34 }
0x1202   : > { %13081 = vrcp.f32 %v5966_v55 }
0x1203   : > { %13083 = vrcp.f32 %v5970_v8 }
0x1204   : > { %v5968_v52 = vpop.xlane.xlu1 %5967 }
0x1205   : > { %13085 = vrcp.f32 %v5968_v52 }
0x1208   : > { %v6444_v4 = vpop.permute.xlu1 %6443 }
0x120e   : > { %v13080_v15 = vpop.eup %13079 }
0x120f   : > { %v13082_v37 = vpop.eup %13081  ;;  %v6016_v26 = vmul.f32 %v13080_v15, %v15970_v43  ;;  %v6498_v43 = vsel %vm1481_vm0, %v16034_v24, 0 }
0x1210   : > { %v13084_v62 = vpop.eup %13083  ;;  %v6013_v57 = vmul.f32 %v13082_v37, %v15967_v60  ;;  %v6492_v60 = vsel %vm1481_vm0, %v16047_v46, 0 }
0x1211   : > { %v6015_v19 = vmul.f32 %v13084_v62, %v15964_v22  ;;  %v6495_v22 = vsel %vm1481_vm0, %v6450_v53, 0 }
0x1212   : > { %v13086_v40 = vpop.eup %13085 }
0x1213   : > { %v6014_v63 = vmul.f32 %v13086_v40, %v15973_v30  ;;  %v6030_v29 = vpack.c.bf16 %v6016_v26, %v6015_v19  ;;  %v6446_v30 = vpop.permute.xlu0 %6445 }
0x1215   : > { %v6029_v0 = vpack.c.bf16 %v6014_v63, %v6013_v57 }
0x1217   : > { %12062 = vmatprep.mubr.bf16.mxu1 %v6029_v0 }
0x1218   : > { %12063 = vmatmul.mubr.bf16.vlgmr.msra.gmra.mxu1 %v6030_v29 }
0x1219   : > { %12079 = vmatpush3.bf16.xpose.msra.mxu1 %v6501_v36 }
0x121a   : > { %12199 = vmatprep.subr.msk.bf16.mxu1 %vm1481_vm0, %v16034_v24  ;;  %v6489_v24 = vsel %vm1481_vm0, %v6446_v30, 0 }
0x1221   : > { %12081 = vmatpush3.bf16.xpose.msra.mxu1 %v6498_v43 }
0x1222   : > { %12200 = vmatprep.subr.msk.bf16.mxu1 %vm1481_vm0, %v6450_v53 }
0x1229   : > { %12083 = vmatpush3.bf16.xpose.msra.mxu1 %v6495_v22 }
0x122a   : > { %12201 = vmatprep.subr.msk.bf16.mxu1 %vm1481_vm0, %v16047_v46  ;;  %v6486_v46 = vsel %vm1481_vm0, %v6444_v4, 0 }
0x1231   : > { %12085 = vmatpush3.bf16.xpose.msra.mxu1 %v6492_v60 }
0x1232   : > { %12202 = vmatprep.subr.msk.bf16.mxu1 %vm1481_vm0, %v6446_v30 }
0x1235   : > { %v5978_v17 = vpop.xlane.xlu0 %5977 }
0x1239   : > { %12087 = vmatpush3.bf16.xpose.msra.mxu1 %v6489_v24  ;;  %v5974_v25 = vpop.xlane.xlu0 %5973  ;;  %v5976_v38 = vpop.xlane.xlu1 %5975 }
0x123a   : > { %13087 = vrcp.f32 %v5974_v25  ;;  %12203 = vmatprep.subr.msk.bf16.mxu1 %vm1481_vm0, %v6444_v4 }
0x123b   : > { %13089 = vrcp.f32 %v5976_v38 }
0x123c   : > { %13091 = vrcp.f32 %v5978_v17 }
0x123d   : > { %v5980_v32 = vpop.xlane.xlu0 %5979  ;;  %v5986_v33 = vpop.xlane.xlu1 %5985 }
0x123e   : > { %13093 = vrcp.f32 %v5980_v32 }
0x1241   : > { %12089 = vmatpush3.bf16.xpose.msra.mxu1 %v6486_v46  ;;  %v5982_v23 = vpop.xlane.xlu1 %5981 }
0x1245   : > { %v5994_v27 = vpop.xlane.xlu0 %5993  ;;  %v5988_v58 = vpop.xlane.xlu1 %5987 }
0x1246   : > { %13095 = vrcp.f32 %v5988_v58 }
0x1247   : > { %v13088_v45 = vpop.eup %13087  ;;  %13097 = vrcp.f32 %v5982_v23 }
0x1248   : > { %v13090_v8 = vpop.eup %13089  ;;  %v6017_v55 = vmul.f32 %v13088_v45, %v16064_v11  ;;  %13099 = vrcp.f32 %v5986_v33 }
0x1249   : > { %v13092_v34 = vpop.eup %13091  ;;  %v5990_v52 = vpop.xlane.xlu0 %5989  ;;  %v6018_v37 = vmul.f32 %v13090_v8, %v16060_v14 }
0x124a   : > { %v5984_v15 = vpop.xlane.xlu1 %5983  ;;  %v6019_v26 = vmul.f32 %v13092_v34, %v16057_v9 }
0x124b   : > { %v13094_v62 = vpop.eup %13093  ;;  %13101 = vrcp.f32 %v5984_v15  ;;  %v6031_v40 = vpack.c.bf16 %v6018_v37, %v6017_v55 }
0x124c   : > { %v6020_v57 = vmul.f32 %v13094_v62, %v16070_v10  ;;  %13103 = vrcp.f32 %v5990_v52 }
0x124d   : > { %12066 = vmatprep.mubr.bf16.mxu1 %v6031_v40  ;;  %v5996_v63 = vpop.xlane.xlu0 %5995 }
0x124e   : > { %v5992_v19 = vpop.xlane.xlu1 %5991  ;;  %v6032_v0 = vpack.c.bf16 %v6020_v57, %v6019_v26 }
0x124f   : > { %13105 = vrcp.f32 %v5992_v19 }
0x1250   : > { %13107 = vrcp.f32 %v5996_v63  ;;  %12067 = vmatmul.mubr.bf16.gmra.mxu1 %v6032_v0 }
0x1251   : > { %v6442_v11 = vpop.permute.xlu0 %6441  ;;  %13109 = vrcp.f32 %v5994_v27 }
0x1252   : > { %12204 = vmatprep.subr.msk.bf16.mxu1 %vm1481_vm0, %v6442_v11  ;;  %v6483_v14 = vsel %vm1481_vm0, %v6442_v11, 0  ;;  %v6440_v29 = vpop.permute.xlu1 %6439 }
0x1253   : > { %12091 = vmatpush3.bf16.xpose.msra.mxu1 %v6483_v14  ;;  %v13096_v9 = vpop.eup %13095  ;;  %v6480_v24 = vsel %vm1481_vm0, %v6440_v29, 0 }
0x1254   : > { %12205 = vmatprep.subr.msk.bf16.mxu1 %vm1481_vm0, %v6440_v29  ;;  %v13098_v36 = vpop.eup %13097  ;;  %v6024_v22 = vmul.f32 %v13096_v9, %v16082_v13 }
0x1255   : > { %v6424_v10 = vpop.permute.xlu0 %6423  ;;  %v13100_v43 = vpop.eup %13099  ;;  %v6021_v30 = vmul.f32 %v13098_v36, %v16079_v31 }
0x1256   : > { %v6023_v25 = vmul.f32 %v13100_v43, %v16075_v50  ;;  %v6426_v34 = vpop.permute.xlu1 %6425 }
0x1258   : > { %v13102_v53 = vpop.eup %13101  ;;  %v6034_v33 = vpack.c.bf16 %v6024_v22, %v6023_v25 }
0x1259   : > { %v6428_v60 = vpop.permute.xlu0 %6427  ;;  %v6022_v4 = vmul.f32 %v13102_v53, %v16088_v1  ;;  %v13104_v17 = vpop.eup %13103 }
0x125a   : > { %v6025_v27 = vmul.f32 %v13104_v17, %v16090_v18  ;;  %v6430_v18 = vpop.permute.xlu1 %6429 }
0x125b   : > { %12093 = vmatpush3.bf16.xpose.msra.mxu1 %v6480_v24  ;;  %v6033_v38 = vpack.c.bf16 %v6022_v4, %v6021_v30 }
0x125c   : > { %v13106_v32 = vpop.eup %13105 }
0x125d   : > { %v13108_v46 = vpop.eup %13107  ;;  %12070 = vmatprep.mubr.bf16.mxu1 %v6033_v38  ;;  %v6432_v23 = vpop.permute.xlu0 %6431  ;;  %v6026_v13 = vmul.f32 %v13106_v32, %v16096_v47 }
0x125e   : > { %12071 = vmatmul.mubr.bf16.gmra.mxu1 %v6034_v33  ;;  %v13110_v31 = vpop.eup %13109  ;;  %v6028_v1 = vmul.f32 %v13108_v46, %v16094_v35  ;;  %v6434_v35 = vpop.permute.xlu1 %6433 }
0x125f   : > { %v6035_v58 = vpack.c.bf16 %v6026_v13, %v6025_v27  ;;  %v6027_v50 = vmul.f32 %v13110_v31, %v16084_v6  ;;  %v16173_v47 = vpop.f32.mrf.mxu1 }
0x1260   : > { %18750 = vst [vmem:[#allocation33_spill] sm:$0xff] %v16173_v47 }
0x1261   : > { %12074 = vmatprep.mubr.bf16.mxu1 %v6035_v58  ;;  %v6436_v45 = vpop.permute.xlu0 %6435  ;;  %v6036_v8 = vpack.c.bf16 %v6028_v1, %v6027_v50 }
0x1262   : > { %v6438_v6 = vpop.permute.xlu1 %6437 }
0x1265   : > { %v6767_v55 = vpop.permute.xlu0 %6766 }
0x1266   : > { %12075 = vmatmul.mubr.bf16.gmra.mxu1 %v6036_v8  ;;  %12110 = vmatprep.subr.bf16.mxu0 %v6767_v55  ;;  %v6765_v26 = vpop.permute.xlu1 %6764 }
0x1267   : > { %12094 = vmatprep.mubr.msk.bf16.mxu1 %vm1481_vm0, %v6424_v10 }
0x1269   : > { %v6763_v57 = vpop.permute.xlu0 %6762 }
0x126d   : > { %v6761_v19 = vpop.permute.xlu0 %6760 }
0x126e   : > { %12095 = vmatmul.mubr.msk.bf16.vlgmr.msra.gmra.mxu1 %vm1481_vm0, %v6426_v34 }
0x126f   : > { %12098 = vmatprep.mubr.msk.bf16.mxu1 %vm1481_vm0, %v6428_v60 }
0x1276   : > { %12099 = vmatmul.mubr.msk.bf16.gmra.mxu1 %vm1481_vm0, %v6430_v18 }
0x1277   : > { %12102 = vmatprep.mubr.msk.bf16.mxu1 %vm1481_vm0, %v6432_v23 }
0x127e   : > { %12103 = vmatmul.mubr.msk.bf16.gmra.mxu1 %vm1481_vm0, %v6434_v35  ;;  %v18751_v35 = vld [vmem:[#allocation36_spill] sm:$0xff] }
0x127f   : > { %12106 = vmatprep.mubr.msk.bf16.mxu1 %vm1481_vm0, %v6436_v45 }
0x1286   : > { %12107 = vmatmul.mubr.msk.bf16.gmra.mxu1 %vm1481_vm0, %v6438_v6  ;;  %v18752_v6 = vld [vmem:[#allocation16_spill] sm:$0xff] }
0x1287   : > { %6993 = vmatprep.mubr.bf16.mxu1 %v18686_v20 }
0x12d8   : > { %v12064_v52 = vpop.f32.mrf.mxu1 }
0x12da   : > { %v6095_v15 = vpop.f32.mrf.mxu1 }
0x12dc   : > { %v12065_v37 = vpop.f32.mrf.mxu1 }
0x12dd   : > { %v6191_v63 = vpack.c.bf16 %v12065_v37, %v12064_v52 }
0x12de   : > { %v6098_v62 = vpop.f32.mrf.mxu1 }
0x12df   : > { %v6190_v40 = vpack.c.bf16 %v6098_v62, %v6095_v15 }
0x12e1   : > { %11083 = vmatmul.mubr.msk.bf16.vlgmr.msra.gmra.mxu0 %vm1481_vm0, %v6190_v40 }
0x12e2   : > { %12111 = vmatpush3.bf16.msra.mxu0 %v6767_v55  ;;  %6288 = vmatprep.mubr.bf16.mxu0 %v18686_v20 }
0x12e3   : > { %12112 = vmatprep.subr.bf16.mxu0 %v6765_v26 }
0x12e6   : > { %12113 = vmatpush3.bf16.msra.mxu0 %v6765_v26 }
0x12e7   : > { %12114 = vmatprep.subr.bf16.mxu0 %v6763_v57 }
0x12e9   : > { %11084 = vmatmul.mubr.msk.bf16.gmra.mxu0 %vm1481_vm0, %v6191_v63 }
0x12ea   : > { %12115 = vmatpush3.bf16.msra.mxu0 %v6763_v57  ;;  %6298 = vmatprep.mubr.bf16.mxu0 %v18686_v20 }
0x12eb   : > { %12116 = vmatprep.subr.bf16.mxu0 %v6761_v19 }
0x12ee   : > { %12117 = vmatpush3.bf16.msra.mxu0 %v6761_v19 }
0x1310   : > { %v12068_v0 = vpop.f32.mrf.mxu1 }
0x1312   : > { %v6111_v11 = vpop.f32.mrf.mxu1 }
0x1314   : > { %v12069_v14 = vpop.f32.mrf.mxu1 }
0x1315   : > { %v6193_v36 = vpack.c.bf16 %v12069_v14, %v12068_v0 }
0x1316   : > { %v6114_v29 = vpop.f32.mrf.mxu1 }
0x1317   : > { %v6192_v9 = vpack.c.bf16 %v6114_v29, %v6111_v11 }
0x1319   : > { %11085 = vmatmul.mubr.msk.bf16.gmra.mxu0 %vm1481_vm0, %v6192_v9 }
0x131a   : > { %6308 = vmatprep.mubr.bf16.mxu0 %v18686_v20 }
0x131e   : > { %v12072_v10 = vpop.f32.mrf.mxu1 }
0x1320   : > { %v6127_v43 = vpop.f32.mrf.mxu1 }
0x1321   : > { %11086 = vmatmul.mubr.msk.bf16.gmra.mxu0 %vm1481_vm0, %v6193_v36 }
0x1322   : > { %v12073_v53 = vpop.f32.mrf.mxu1  ;;  %6318 = vmatprep.mubr.bf16.mxu0 %v18686_v20 }
0x1323   : > { %v6195_v38 = vpack.c.bf16 %v12073_v53, %v12072_v10 }
0x1324   : > { %v6130_v22 = vpop.f32.mrf.mxu1 }
0x1325   : > { %v6194_v30 = vpack.c.bf16 %v6130_v22, %v6127_v43 }
0x1326   : > { %v12076_v60 = vpop.f32.mrf.mxu1 }
0x1328   : > { %v6143_v4 = vpop.f32.mrf.mxu1 }
0x1329   : > { %11087 = vmatmul.mubr.msk.bf16.gmra.mxu0 %vm1481_vm0, %v6194_v30 }
0x132a   : > { %v12077_v17 = vpop.f32.mrf.mxu1  ;;  %6328 = vmatprep.mubr.bf16.mxu0 %v18686_v20 }
0x132b   : > { %v6197_v45 = vpack.c.bf16 %v12077_v17, %v12076_v60 }
0x132c   : > { %v6146_v24 = vpop.f32.mrf.mxu1 }
0x132d   : > { %v6196_v27 = vpack.c.bf16 %v6146_v24, %v6143_v4 }
0x132e   : > { %v12096_v25 = vpop.f32.mrf.mxu1 }
0x132f   : > { %6604 = vmax.xlane.f32.xlu0 %v12096_v25 }
0x1330   : > { %v6537_v32 = vpop.f32.mrf.mxu1 }
0x1331   : > { %11088 = vmatmul.mubr.msk.bf16.gmra.mxu0 %vm1481_vm0, %v6195_v38 }
0x1332   : > { %v12097_v33 = vpop.f32.mrf.mxu1  ;;  %6338 = vmatprep.mubr.bf16.mxu0 %v18686_v20 }
0x1333   : > { %6600 = vmax.xlane.f32.xlu0 %v6537_v32 }
0x1334   : > { %v6540_v46 = vpop.f32.mrf.mxu1 }
0x1335   : > { %6602 = vmax.xlane.f32.xlu1 %v6540_v46 }
0x1336   : > { %v16187_v23 = vpop.f32.mrf.mxu1 }
0x1337   : > { %6606 = vmax.xlane.f32.xlu0 %v12097_v33 }
0x1338   : > { %v16189_v13 = vpop.f32.mrf.mxu1 }
0x1339   : > { %11089 = vmatmul.mubr.msk.bf16.gmra.mxu0 %vm1481_vm0, %v6196_v27 }
0x133a   : > { %v12101_v31 = vpop.f32.mrf.mxu1  ;;  %6348 = vmatprep.mubr.bf16.mxu0 %v18686_v20 }
0x133b   : > { %6612 = vmax.xlane.f32.xlu0 %v16187_v23  ;;  %6614 = vmax.xlane.f32.xlu1 %v12101_v31 }
0x133c   : > { %v16194_v58 = vpop.f32.mrf.mxu1 }
0x133e   : > { %v16196_v1 = vpop.f32.mrf.mxu1 }
0x133f   : > { %6608 = vmax.xlane.f32.xlu0 %v16189_v13  ;;  %6610 = vmax.xlane.f32.xlu1 %v16194_v58 }
0x1340   : > { %v16200_v50 = vpop.f32.mrf.mxu1 }
0x1341   : > { %11090 = vmatmul.mubr.msk.bf16.gmra.mxu0 %vm1481_vm0, %v6197_v45 }
0x1342   : > { %v16203_v8 = vpop.f32.mrf.mxu1 }
0x1343   : > { %6620 = vmax.xlane.f32.xlu0 %v16196_v1  ;;  %6622 = vmax.xlane.f32.xlu1 %v16203_v8 }
0x1344   : > { %v16207_v55 = vpop.f32.mrf.mxu1 }
0x1346   : > { %v16211_v34 = vpop.f32.mrf.mxu1 }
0x1347   : > { %6616 = vmax.xlane.f32.xlu0 %v16200_v50  ;;  %6618 = vmax.xlane.f32.xlu1 %v16207_v55 }
0x1348   : > { %v16214_v18 = vpop.f32.mrf.mxu1 }
0x134a   : > { %v16221_v52 = vpop.f32.mrf.mxu1 }
0x134b   : > { %6628 = vmax.xlane.f32.xlu0 %v16211_v34 }
0x134c   : > { %v16224_v15 = vpop.f32.mrf.mxu1 }
0x134f   : > { %6624 = vmax.xlane.f32.xlu0 %v16214_v18 }
0x1358   : > { %6756 = vrot.lane.b32.xlu1 %v18751_v35, %s13423_s13 }
0x1365   : > { %6758 = vrot.lane.b32.xlu0 %v18752_v6, %s13423_s13 }
0x137c   : > { %6630 = vmax.xlane.f32.xlu1 %v16221_v52 }
0x1380   : > { %6626 = vmax.xlane.f32.xlu1 %v16224_v15 }
0x13a1   : > { %v6280_v37 = vpop.f32.mrf.mxu0 }
0x13a2   : > { %v16228_v62 = vadd.f32 %v6280_v37, %v15942_v41 }
0x13a3   : > { %v6282_v40 = vpop.f32.mrf.mxu0 }
0x13a4   : > { %v16231_v26 = vadd.f32 %v6282_v40, %v15945_v51 }
0x13a5   : > { %v6284_v57 = vpop.f32.mrf.mxu0 }
0x13a6   : > { %v16234_v63 = vadd.f32 %v6284_v57, %v15948_v3 }
0x13a7   : > { %v16236_v19 = vpop.f32.mrf.mxu0 }
0x13a9   : > { %v6290_v0 = vpop.f32.mrf.mxu0 }
0x13aa   : > { %v16239_v11 = vadd.f32 %v6290_v0, %v15953_v48 }
0x13ab   : > { %v6292_v14 = vpop.f32.mrf.mxu0 }
0x13ac   : > { %v16242_v29 = vadd.f32 %v6292_v14, %v15956_v16 }
0x13ad   : > { %v6294_v41 = vpop.f32.mrf.mxu0 }
0x13ae   : > { %v16245_v9 = vadd.f32 %v6294_v41, %v15959_v56 }
0x13af   : > { %v16269_v41 = vpop.f32.mrf.mxu0 }
0x13b8   : > { %v6605_v51 = vpop.xlane.xlu0 %6604 }
0x13b9   : > { %v6634_v10 = vsub.f32 %v12096_v25, %v6605_v51 }
0x13bb   : > { %v6652_v36 = vmul.f32 1.442695, %v6634_v10 }
0x13bc   : > { %v6601_v43 = vpop.xlane.xlu0 %6600 }
0x13bd   : > { %13111 = vpow2.f32 %v6652_v36  ;;  %v6632_v3 = vsub.f32 %v6537_v32, %v6601_v43 }
0x13be   : > { %v6603_v53 = vpop.xlane.xlu1 %6602 }
0x13bf   : > { %v6648_v22 = vmul.f32 1.442695, %v6632_v3  ;;  %v6633_v60 = vsub.f32 %v6540_v46, %v6603_v53 }
0x13c0   : > { %v6607_v30 = vpop.xlane.xlu0 %6606 }
0x13c1   : > { %13113 = vpow2.f32 %v6648_v22  ;;  %v6635_v48 = vsub.f32 %v12097_v33, %v6607_v30  ;;  %v6650_v17 = vmul.f32 1.442695, %v6633_v60 }
0x13c3   : > { %v6654_v4 = vmul.f32 1.442695, %v6635_v48 }
0x13c4   : > { %v6613_v16 = vpop.xlane.xlu0 %6612  ;;  %v6615_v24 = vpop.xlane.xlu1 %6614 }
0x13c5   : > { %13115 = vpow2.f32 %v6654_v4  ;;  %v6638_v56 = vsub.f32 %v16187_v23, %v6613_v16  ;;  %v6639_v38 = vsub.f32 %v12101_v31, %v6615_v24 }
0x13c6   : > { %13117 = vpow2.f32 %v6650_v17 }
0x13c7   : > { %v6660_v27 = vmul.f32 1.442695, %v6638_v56  ;;  %v6662_v25 = vmul.f32 1.442695, %v6639_v38  ;;  %v18753_v56 = vld [vmem:[#allocation21_spill] sm:$0xff] }
0x13c8   : > { %v6609_v45 = vpop.xlane.xlu0 %6608  ;;  %v6611_v35 = vpop.xlane.xlu1 %6610 }
0x13c9   : > { %13119 = vpow2.f32 %v6660_v27  ;;  %v6636_v32 = vsub.f32 %v16189_v13, %v6609_v45  ;;  %v6637_v46 = vsub.f32 %v16194_v58, %v6611_v35  ;;  %v18754_v27 = vld [vmem:[#allocation18_spill] sm:$0xff]  ;;  %v18755_v35 = vld [vmem:[#allocation19_spill] sm:$0xff] }
0x13ca   : > { %v16250_v6 = vpop.eup %13111  ;;  %13121 = vpow2.f32 %v6662_v25 }
0x13cb   : > { %v6656_v33 = vmul.f32 1.442695, %v6636_v32  ;;  %6684 = vadd.xlane.f32.xlu1 %v16250_v6  ;;  %v6658_v23 = vmul.f32 1.442695, %v6637_v46 }
0x13cc   : > { %v16253_v37 = vpop.xlane.xlu0 %6620  ;;  %v16260_v13 = vpop.xlane.xlu1 %6622 }
0x13cd   : > { %13123 = vpow2.f32 %v6656_v33  ;;  %v18756_v33 = vld [vmem:[#allocation25_spill] sm:$0xff] }
0x13ce   : > { %v16255_v31 = vpop.eup %13113  ;;  %13125 = vpow2.f32 %v6658_v23 }
0x13cf   : > { %6680 = vadd.xlane.f32.xlu1 %v16255_v31 }
0x13d0   : > { %v6617_v40 = vpop.xlane.xlu0 %6616  ;;  %v6619_v51 = vpop.xlane.xlu1 %6618 }
0x13d2   : > { %v16258_v57 = vpop.eup %13115 }
0x13d3   : > { %6686 = vadd.xlane.f32.xlu1 %v16258_v57  ;;  %v16265_v0 = vpop.eup %13117 }
0x13d4   : > { %v16263_v58 = vpop.xlane.xlu0 %6628  ;;  %v6757_v17 = vpop.permute.xlu1 %6756 }
0x13d6   : > { %v16267_v14 = vpop.eup %13119 }
0x13d7   : > { %6692 = vadd.xlane.f32.xlu0 %v16267_v14  ;;  %6682 = vadd.xlane.f32.xlu1 %v16265_v0  ;;  %v16275_v36 = vpop.eup %13121 }
0x13d8   : > { %v16273_v10 = vpop.xlane.xlu0 %6624 }
0x13d9   : > { %v6300_v43 = vpop.f32.mrf.mxu0 }
0x13da   : > { %v16277_v3 = vpop.eup %13123  ;;  %v16280_v53 = vadd.f32 %v6300_v43, %v15979_v5 }
0x13db   : > { %6688 = vadd.xlane.f32.xlu1 %v16277_v3  ;;  %6694 = vadd.xlane.f32.xlu0 %v16275_v36  ;;  %v6302_v22 = vpop.f32.mrf.mxu0  ;;  %v16287_v4 = vpop.eup %13125 }
0x13dc   : > { %v16285_v60 = vadd.f32 %v6302_v22, %v15982_v39  ;;  %v6759_v30 = vpop.permute.xlu0 %6758  ;;  %v18757_v22 = vld [vmem:[#allocation28_spill] sm:$0xff] }
0x13dd   : > { %12118 = vmatprep.subr.bf16.mxu0 %v6759_v30  ;;  %v6304_v48 = vpop.f32.mrf.mxu0 }
0x13de   : > { %v16290_v16 = vadd.f32 %v6304_v48, %v15985_v7  ;;  %12119 = vmatpush3.bf16.msra.mxu0 %v6759_v30  ;;  %v18758_v48 = vld [vmem:[#allocation66_spill] sm:$0xff] }
0x13df   : > { %6690 = vadd.xlane.f32.xlu0 %v16287_v4  ;;  %12120 = vmatprep.subr.bf16.mxu0 %v6757_v17  ;;  %v16293_v5 = vpop.f32.mrf.mxu0 }
0x13e1   : > { %v6310_v24 = vpop.f32.mrf.mxu0 }
0x13e2   : > { %v16296_v38 = vadd.f32 %v6310_v24, %v18753_v56  ;;  %12121 = vmatpush3.bf16.msra.mxu0 %v6757_v17  ;;  %v18759_v24 = vld [vmem:[#allocation31_spill] sm:$0xff] }
0x13e3   : > { %v6312_v39 = vpop.f32.mrf.mxu0 }
0x13e4   : > { %v16299_v25 = vadd.f32 %v6312_v39, %v18754_v27 }
0x13e5   : > { %v6314_v45 = vpop.f32.mrf.mxu0 }
0x13e6   : > { %v16302_v32 = vadd.f32 %v6314_v45, %v18755_v35  ;;  %v18760_v45 = vld [vmem:[#allocation30_spill] sm:$0xff] }
0x13e7   : > { %v16304_v7 = vpop.f32.mrf.mxu0 }
0x13e9   : > { %v6320_v46 = vpop.f32.mrf.mxu0 }
0x13ea   : > { %v16307_v23 = vadd.f32 %v6320_v46, %v18756_v33  ;;  %v18761_v33 = vld [vmem:[#allocation34_spill] sm:$0xff] }
0x13eb   : > { %v6322_v43 = vpop.f32.mrf.mxu0 }
0x13ec   : > { %v16310_v30 = vadd.f32 %v6322_v43, %v18757_v22  ;;  %6752 = vrot.lane.b32.xlu1 %v18758_v48, %s13423_s13 }
0x13ed   : > { %v6324_v17 = vpop.f32.mrf.mxu0 }
0x13ee   : > { %v16315_v56 = vadd.f32 %v6324_v17, %v18759_v24  ;;  %v6640_v24 = vsub.f32 %v16200_v50, %v6617_v40 }
0x13ef   : > { %v16317_v39 = vpop.f32.mrf.mxu0 }
0x13f1   : > { %v6330_v27 = vpop.f32.mrf.mxu0 }
0x13f2   : > { %v16320_v35 = vadd.f32 %v6330_v27, %v18760_v45 }
0x13f3   : > { %v6332_v47 = vpop.f32.mrf.mxu0 }
0x13f4   : > { %v16323_v46 = vadd.f32 %v6332_v47, %v16017_v21  ;;  %v6643_v21 = vsub.f32 %v16203_v8, %v16260_v13 }
0x13f5   : > { %6754 = vrot.lane.b32.xlu0 %v18761_v33, %s13423_s13  ;;  %v6334_v43 = vpop.f32.mrf.mxu0  ;;  %v6664_v33 = vmul.f32 1.442695, %v6640_v24 }
0x13f6   : > { %v16328_v22 = vadd.f32 %v6334_v43, %v16022_v2  ;;  %v6641_v2 = vsub.f32 %v16207_v55, %v6619_v51  ;;  %v6670_v50 = vmul.f32 1.442695, %v6643_v21 }
0x13f7   : > { %v16330_v48 = vpop.f32.mrf.mxu0  ;;  %13127 = vpow2.f32 %v6664_v33 }
0x13f8   : > { %18762 = vst [vmem:[#allocation27_spill] sm:$0xff] %v16328_v22  ;;  %13129 = vpow2.f32 %v6670_v50 }
0x13f9   : > { %v6340_v17 = vpop.f32.mrf.mxu0 }
0x13fa   : > { %v16334_v44 = vadd.f32 %v6340_v17, %v16029_v12  ;;  %v6642_v12 = vsub.f32 %v16196_v1, %v16253_v37  ;;  %v6646_v1 = vsub.f32 %v16211_v34, %v16263_v58 }
0x13fb   : > { %v6342_v27 = vpop.f32.mrf.mxu0 }
0x13fc   : > { %v16337_v45 = vadd.f32 %v6342_v27, %v16032_v49  ;;  %v6666_v49 = vmul.f32 1.442695, %v6641_v2  ;;  %v6668_v24 = vmul.f32 1.442695, %v6642_v12  ;;  %v6676_v33 = vmul.f32 1.442695, %v6646_v1 }
0x13fd   : > { %v6344_v47 = vpop.f32.mrf.mxu0 }
0x13fe   : > { %v16343_v43 = vadd.f32 %v6344_v47, %v16038_v59  ;;  %v6644_v59 = vsub.f32 %v16214_v18, %v16273_v10  ;;  %13131 = vpow2.f32 %v6666_v49 }
0x13ff   : > { %v16345_v22 = vpop.f32.mrf.mxu0  ;;  %13133 = vpow2.f32 %v6668_v24 }
0x1401   : > { %v6350_v40 = vpop.f32.mrf.mxu0 }
0x1402   : > { %v16350_v17 = vadd.f32 %v6350_v40, %v16045_v54  ;;  %v6672_v54 = vmul.f32 1.442695, %v6644_v59 }
0x1403   : > { %v6352_v8 = vpop.f32.mrf.mxu0 }
0x1404   : > { %v16353_v13 = vadd.f32 %v6352_v8, %v16050_v28  ;;  %13135 = vpow2.f32 %v6672_v54  ;;  %v16364_v10 = vpop.eup %13127 }
0x1405   : > { %v6631_v55 = vpop.xlane.xlu1 %6630  ;;  %v6354_v51 = vpop.f32.mrf.mxu0 }
0x1406   : > { %v16358_v27 = vadd.f32 %v6354_v51, %v16055_v61  ;;  %v6647_v28 = vsub.f32 %v16221_v52, %v6631_v55  ;;  %v16367_v61 = vpop.eup %13129 }
0x1408   : > { %v6678_v18 = vmul.f32 1.442695, %v6647_v28 }
0x1409   : > { %v6627_v37 = vpop.xlane.xlu1 %6626 }
0x140a   : > { %v6645_v21 = vsub.f32 %v16224_v15, %v6627_v37 }
0x140b   : > { %v16369_v34 = vpop.eup %13131 }
0x140c   : > { %v6674_v47 = vmul.f32 1.442695, %v6645_v21  ;;  %v16373_v52 = vpop.eup %13133 }
0x140e   : > { %13137 = vpow2.f32 %v6674_v47 }
0x140f   : > { %13139 = vpow2.f32 %v6676_v33 }
0x1410   : > { %6696 = vadd.xlane.f32.xlu1 %v16364_v10  ;;  %13141 = vpow2.f32 %v6678_v18 }
0x1411   : > { %v16376_v15 = vpop.eup %13135 }
0x1414   : > { %6702 = vadd.xlane.f32.xlu1 %v16367_v61  ;;  %6698 = vadd.xlane.f32.xlu0 %v16369_v34 }
0x1418   : > { %6700 = vadd.xlane.f32.xlu0 %v16373_v52 }
0x141b   : > { %v16378_v58 = vpop.eup %13137 }
0x141c   : > { %6704 = vadd.xlane.f32.xlu0 %v16376_v15  ;;  %6706 = vadd.xlane.f32.xlu1 %v16378_v58  ;;  %v16382_v2 = vpop.eup %13139 }
0x141d   : > { %v16384_v50 = vpop.eup %13141 }
0x1420   : > { %6708 = vadd.xlane.f32.xlu0 %v16382_v2  ;;  %6710 = vadd.xlane.f32.xlu1 %v16384_v50 }
0x1454   : > { %v6685_v40 = vpop.xlane.xlu1 %6684 }
0x1458   : > { %v6681_v12 = vpop.xlane.xlu1 %6680 }
0x145c   : > { %v6687_v49 = vpop.xlane.xlu1 %6686 }
0x145d   : > { %13143 = vrcp.f32 %v6687_v49 }
0x145e   : > { %13145 = vrcp.f32 %v6681_v12 }
0x145f   : > { %13147 = vrcp.f32 %v6685_v40 }
0x1460   : > { %v6693_v8 = vpop.xlane.xlu0 %6692  ;;  %v6683_v59 = vpop.xlane.xlu1 %6682 }
0x1461   : > { %13149 = vrcp.f32 %v6683_v59 }
0x1464   : > { %v6695_v55 = vpop.xlane.xlu0 %6694  ;;  %v6689_v51 = vpop.xlane.xlu1 %6688 }
0x1465   : > { %13151 = vrcp.f32 %v6695_v55 }
0x1466   : > { %13153 = vrcp.f32 %v6689_v51 }
0x1467   : > { %13155 = vrcp.f32 %v6693_v8 }
0x1468   : > { %v6691_v24 = vpop.xlane.xlu0 %6690  ;;  %v6753_v21 = vpop.permute.xlu1 %6752 }
0x1469   : > { %13157 = vrcp.f32 %v6691_v24 }
0x146a   : > { %v13144_v1 = vpop.eup %13143 }
0x146b   : > { %v13146_v37 = vpop.eup %13145  ;;  %v6731_v33 = vmul.f32 %v13144_v1, %v16258_v57 }
0x146c   : > { %v6755_v54 = vpop.permute.xlu0 %6754  ;;  %v13148_v28 = vpop.eup %13147  ;;  %v6728_v18 = vmul.f32 %v13146_v37, %v16255_v31 }
0x146d   : > { %12122 = vmatprep.subr.bf16.mxu0 %v6755_v54  ;;  %v6730_v12 = vmul.f32 %v13148_v28, %v16250_v6 }
0x146e   : > { %12123 = vmatpush3.bf16.msra.mxu0 %v6755_v54  ;;  %v13150_v47 = vpop.eup %13149 }
0x146f   : > { %12124 = vmatprep.subr.bf16.mxu0 %v6753_v21  ;;  %v6729_v40 = vmul.f32 %v13150_v47, %v16265_v0  ;;  %v6745_v59 = vpack.c.bf16 %v6731_v33, %v6730_v12 }
0x1471   : > { %v6744_v49 = vpack.c.bf16 %v6729_v40, %v6728_v18 }
0x1472   : > { %12125 = vmatpush3.bf16.msra.mxu0 %v6753_v21  ;;  %v13152_v8 = vpop.eup %13151 }
0x1473   : > { %v13154_v55 = vpop.eup %13153  ;;  %12126 = vmatprep.mubr.bf16.mxu0 %v6744_v49  ;;  %v6735_v1 = vmul.f32 %v13152_v8, %v16275_v36 }
0x1474   : > { %v13156_v51 = vpop.eup %13155  ;;  %v6732_v54 = vmul.f32 %v13154_v55, %v16277_v3 }
0x1475   : > { %12127 = vmatmul.mubr.bf16.vlgmr.msra.gmra.mxu0 %v6745_v59  ;;  %v6734_v0 = vmul.f32 %v13156_v51, %v16267_v14 }
0x1476   : > { %v13158_v24 = vpop.eup %13157 }
0x1477   : > { %v6733_v57 = vmul.f32 %v13158_v24, %v16287_v4  ;;  %v6747_v6 = vpack.c.bf16 %v6735_v1, %v6734_v0  ;;  %v12465_v0 = vld [vmem:[#allocation6 + $0xf0] ss:$8 sps:$4 sm:$0xff]  }
0x1479   : > { %v6746_v31 = vpack.c.bf16 %v6733_v57, %v6732_v54 }
0x147b   : > { %12130 = vmatprep.mubr.bf16.mxu0 %v6746_v31 }
0x147d   : > { %12131 = vmatmul.mubr.bf16.gmra.mxu0 %v6747_v6 }
0x1499   : > { %v6697_v37 = vpop.xlane.xlu1 %6696 }
0x149a   : > { %13159 = vrcp.f32 %v6697_v37 }
0x149d   : > { %v6699_v28 = vpop.xlane.xlu0 %6698  ;;  %v6703_v21 = vpop.xlane.xlu1 %6702 }
0x149e   : > { %13161 = vrcp.f32 %v6699_v28 }
0x149f   : > { %13163 = vrcp.f32 %v6703_v21  ;;  %v12468_v21 = vld [vmem:[#allocation6 + $0xe0] ss:$8 sps:$4 sm:$0xff]  }
0x14a1   : > { %v6701_v47 = vpop.xlane.xlu0 %6700 }
0x14a2   : > { %13165 = vrcp.f32 %v6701_v47 }
0x14a5   : > { %v6705_v33 = vpop.xlane.xlu0 %6704  ;;  %v6707_v3 = vpop.xlane.xlu1 %6706 }
0x14a6   : > { %13167 = vrcp.f32 %v6705_v33 }
0x14a7   : > { %13169 = vrcp.f32 %v6707_v3  ;;  %v13160_v4 = vpop.eup %13159 }
0x14a8   : > { %v6736_v40 = vmul.f32 %v13160_v4, %v16364_v10  ;;  %v12467_v10 = vld [vmem:[#allocation6 + $0xf4] ss:$8 sps:$4 sm:$0xff]  }
0x14a9   : > { %v6709_v36 = vpop.xlane.xlu0 %6708  ;;  %v6711_v18 = vpop.xlane.xlu1 %6710  ;;  %6973 = vmatprep.subr.bf16.mxu1 %v12467_v10 }
0x14aa   : > { %13171 = vrcp.f32 %v6709_v36  ;;  %6974 = vmatpush1.bf16.msra.mxu1 %v12465_v0 }
0x14ab   : > { %v13162_v14 = vpop.eup %13161  ;;  %13173 = vrcp.f32 %v6711_v18 }
0x14ac   : > { %v6737_v12 = vmul.f32 %v13162_v14, %v16369_v34  ;;  %v13164_v49 = vpop.eup %13163 }
0x14ad   : > { %v6739_v51 = vmul.f32 %v13164_v49, %v16367_v61 }
0x14ae   : > { %v6748_v8 = vpack.c.bf16 %v6737_v12, %v6736_v40 }
0x14af   : > { %v13166_v59 = vpop.eup %13165 }
0x14b0   : > { %12134 = vmatprep.mubr.bf16.mxu0 %v6748_v8  ;;  %v6738_v55 = vmul.f32 %v13166_v59, %v16373_v52  ;;  %v12470_v52 = vld [vmem:[#allocation6 + $0xe4] ss:$8 sps:$4 sm:$0xff]  }
0x14b1   : > { %6975 = vmatprep.subr.bf16.mxu1 %v12470_v52 }
0x14b2   : > { %v6749_v24 = vpack.c.bf16 %v6739_v51, %v6738_v55  ;;  %6976 = vmatpush1.bf16.msra.mxu1 %v12468_v21  ;;  %v18766_v21 = vld [vmem:[#allocation60_spill] sm:$0xff] }
0x14b3   : > { %v13168_v54 = vpop.eup %13167 }
0x14b4   : > { %v13170_v57 = vpop.eup %13169  ;;  %12135 = vmatmul.mubr.bf16.gmra.mxu0 %v6749_v24  ;;  %v6740_v1 = vmul.f32 %v13168_v54, %v16376_v15  ;;  %v16404_v15 = vpop.f32.mrf.mxu0 }
0x14b5   : > { %v6741_v31 = vmul.f32 %v13170_v57, %v16378_v58 }
0x14b7   : > { %v13172_v6 = vpop.eup %13171  ;;  %v6750_v34 = vpack.c.bf16 %v6741_v31, %v6740_v1 }
0x14b8   : > { %v13174_v37 = vpop.eup %13173  ;;  %v6742_v28 = vmul.f32 %v13172_v6, %v16382_v2 }
0x14b9   : > { %12138 = vmatprep.mubr.bf16.mxu0 %v6750_v34  ;;  %v6743_v61 = vmul.f32 %v13174_v37, %v16384_v50  ;;  %v18763_v34 = vld [vmem:[#allocation77_spill] sm:$0xff]  ;;  %v18764_v37 = vld [vmem:[#allocation68_spill] sm:$0xff] }
0x14bb   : > { %v6751_v47 = vpack.c.bf16 %v6743_v61, %v6742_v28  ;;  %v2080_v28 = vadd.f32 %v18764_v37, %v18763_v34  ;;  %v18765_v61 = vld [vmem:[#allocation80_spill] sm:$0xff] }
0x14bd   : > { %12139 = vmatmul.mubr.bf16.gmra.mxu0 %v6751_v47  ;;  %v2819_v52 = vadd.f32 %v18765_v61, %v2080_v28  ;;  %v18774_v28 = vld [vmem:[#allocation70_spill] sm:$0xff] }
0x14be   : > { %v2088_v61 = vadd.f32 %v18774_v28, %v18763_v34  ;;  %v13246_v28 = vld [vmem:[%s13635_s11 + $0x30] sm:$0xff] }
0x14bf   : > { %v3534_v47 = vadd.f32 %v18766_v21, %v2819_v52 }
0x1535   : > { %v12128_v58 = vpop.f32.mrf.mxu0 }
0x1537   : > { %v6810_v33 = vpop.f32.mrf.mxu0 }
0x1539   : > { %v12129_v3 = vpop.f32.mrf.mxu0 }
0x153a   : > { %v6906_v50 = vpack.c.bf16 %v12129_v3, %v12128_v58  ;;  %v18767_v58 = vld [vmem:[#allocation20_spill] sm:$0xff]  ;;  %v18768_v3 = vld [vmem:[#allocation69_spill] sm:$0xff] }
0x153b   : > { %v6813_v4 = vpop.f32.mrf.mxu0 }
0x153c   : > { %v6905_v36 = vpack.c.bf16 %v6813_v4, %v6810_v33  ;;  %v4249_v33 = vadd.f32 %v18767_v58, %v3534_v47  ;;  %v2084_v4 = vadd.f32 %v18768_v3, %v18763_v34  ;;  %v13242_v47 = vld [vmem:[%s13635_s11 + $0x10] sm:$0xff] }
0x153d   : > { %v12132_v18 = vpop.f32.mrf.mxu0 }
0x153e   : > { %11103 = vmatmul.mubr.msk.bf16.vlgmr.msra.gmra.mxu1 %vm1481_vm0, %v6905_v36 }
0x153f   : > { %7003 = vmatprep.mubr.bf16.mxu1 %v18686_v20  ;;  %v6826_v2 = vpop.f32.mrf.mxu0 }
0x1541   : > { %v12133_v14 = vpop.f32.mrf.mxu0 }
0x1542   : > { %v6908_v49 = vpack.c.bf16 %v12133_v14, %v12132_v18  ;;  %v18769_v18 = vld [vmem:[#allocation58_spill] sm:$0xff] }
0x1543   : > { %v6829_v40 = vpop.f32.mrf.mxu0 }
0x1544   : > { %v6907_v12 = vpack.c.bf16 %v6829_v40, %v6826_v2 }
0x1546   : > { %11104 = vmatmul.mubr.msk.bf16.gmra.mxu1 %vm1481_vm0, %v6906_v50  ;;  %v18770_v50 = vld [vmem:[#allocation82_spill] sm:$0xff] }
0x1547   : > { %7013 = vmatprep.mubr.bf16.mxu1 %v18686_v20  ;;  %v2823_v14 = vadd.f32 %v18770_v50, %v2084_v4  ;;  %v18776_v4 = vld [vmem:[#allocation83_spill] sm:$0xff] }
0x154e   : > { %11105 = vmatmul.mubr.msk.bf16.gmra.mxu1 %vm1481_vm0, %v6907_v12  ;;  %v18771_v12 = vld [vmem:[#allocation81_spill] sm:$0xff] }
0x154f   : > { %7023 = vmatprep.mubr.bf16.mxu1 %v18686_v20 }
0x1556   : > { %11106 = vmatmul.mubr.msk.bf16.gmra.mxu1 %vm1481_vm0, %v6908_v49 }
0x1557   : > { %7033 = vmatprep.mubr.bf16.mxu1 %v18686_v20 }
0x1574   : > { %v12136_v8 = vpop.f32.mrf.mxu0 }
0x1576   : > { %v6842_v59 = vpop.f32.mrf.mxu0 }
0x1578   : > { %v12137_v55 = vpop.f32.mrf.mxu0 }
0x1579   : > { %v6910_v1 = vpack.c.bf16 %v12137_v55, %v12136_v8 }
0x157a   : > { %v6845_v51 = vpop.f32.mrf.mxu0 }
0x157b   : > { %v6909_v24 = vpack.c.bf16 %v6845_v51, %v6842_v59  ;;  %v18772_v59 = vld [vmem:[#allocation67_spill] sm:$0xff] }
0x157c   : > { %v3538_v55 = vadd.f32 %v18772_v59, %v2823_v14  ;;  %v13244_v59 = vld [vmem:[%s13635_s11 + $0x20] sm:$0xff] }
0x157d   : > { %v12140_v54 = vpop.f32.mrf.mxu0  ;;  %11107 = vmatmul.mubr.msk.bf16.gmra.mxu1 %vm1481_vm0, %v6909_v24 }
0x157e   : > { %7043 = vmatprep.mubr.bf16.mxu1 %v18686_v20 }
0x157f   : > { %v6858_v57 = vpop.f32.mrf.mxu0 }
0x1581   : > { %v12141_v31 = vpop.f32.mrf.mxu0 }
0x1582   : > { %v6912_v6 = vpack.c.bf16 %v12141_v31, %v12140_v54  ;;  %v13240_v54 = vld [vmem:[%s13635_s11] sm:$0xff] }
0x1583   : > { %v6861_v0 = vpop.f32.mrf.mxu0 }
0x1584   : > { %v6911_v10 = vpack.c.bf16 %v6861_v0, %v6858_v57 }
0x1585   : > { %11108 = vmatmul.mubr.msk.bf16.gmra.mxu1 %vm1481_vm0, %v6910_v1  ;;  %v13241_v1 = vld [vmem:[%s13635_s11 + $0x8] sm:$0xff] }
0x1586   : > { %7053 = vmatprep.mubr.bf16.mxu1 %v18686_v20 }
0x158d   : > { %11109 = vmatmul.mubr.msk.bf16.gmra.mxu1 %vm1481_vm0, %v6911_v10  ;;  %v18773_v10 = vld [vmem:[#allocation23_spill] sm:$0xff] }
0x158e   : > { %7063 = vmatprep.mubr.bf16.mxu1 %v18686_v20  ;;  %v4908_v20 = vadd.f32 %v18769_v18, %v4249_v33  ;;  %v13243_v33 = vld [vmem:[%s13635_s11 + $0x18] sm:$0xff] }
0x1590   : > { %v5647_v49 = vadd.f32 %v18771_v12, %v4908_v20  ;;  %v18777_v20 = vld [vmem:[#allocation38_spill] sm:$0xff] }
0x1592   : > { %v6362_v24 = vadd.f32 %v16236_v19, %v5647_v49  ;;  %v18775_v19 = vld [vmem:[#allocation56_spill] sm:$0xff] }
0x1595   : > { %11110 = vmatmul.mubr.msk.bf16.gmra.mxu1 %vm1481_vm0, %v6912_v6  ;;  %v4253_v6 = vadd.f32 %v18773_v10, %v3538_v55  ;;  %v13245_v55 = vld [vmem:[%s13635_s11 + $0x28] sm:$0xff]  ;;  %v18780_v10 = vld [vmem:[#allocation71_spill] sm:$0xff] }
0x1597   : > { %v4912_v21 = vadd.f32 %v18775_v19, %v4253_v6 }
0x15fe   : > { %v6995_v36 = vpop.f32.mrf.mxu1 }
0x15ff   : > { %v7074_v2 = vadd.f32 %v6995_v36, %v16228_v62  ;;  %v2827_v36 = vadd.f32 %v18776_v4, %v2088_v61 }
0x1600   : > { %v6997_v40 = vpop.f32.mrf.mxu1 }
0x1601   : > { %v7075_v8 = vadd.f32 %v6997_v40, %v16231_v26  ;;  %v16436_v57 = vadd.f32 %v13240_v54, %v7074_v2  ;;  %v5651_v2 = vadd.f32 %v18777_v20, %v4912_v21  ;;  %v18778_v40 = vld [vmem:[#allocation61_spill] sm:$0xff]  ;;  %v18779_v54 = vld [vmem:[#allocation26_spill] sm:$0xff]  ;;  %v18782_v21 = vld [vmem:[#allocation84_spill] sm:$0xff] }
0x1602   : > { %v6999_v51 = vpop.f32.mrf.mxu1  ;;  %v3542_v12 = vadd.f32 %v18778_v40, %v2827_v36  ;;  %v18784_v20 = vld [vmem:[#allocation65_spill] sm:$0xff]  ;;  %v13248_v40 = vld [vmem:[%s13635_s11 + $0x40] sm:$0xff] }
0x1603   : > { %v16439_v31 = vadd.f32 %v13241_v1, %v7075_v8  ;;  %v7076_v62 = vadd.f32 %v6999_v51, %v16234_v63  ;;  %v6366_v8 = vadd.f32 %v16269_v41, %v5651_v2  ;;  %v2092_v41 = vadd.f32 %v18780_v10, %v18763_v34  ;;  %v13251_v10 = vld [vmem:[%s13635_s11 + $0x58] sm:$0xff] }
0x1604   : > { %v7001_v0 = vpop.f32.mrf.mxu1  ;;  %v4257_v1 = vadd.f32 %v18779_v54, %v3542_v12  ;;  %v13249_v12 = vld [vmem:[%s13635_s11 + $0x48] sm:$0xff] }
0x1605   : > { %v7077_v37 = vadd.f32 %v7001_v0, %v6362_v24  ;;  %v7202_v26 = vadd.f32 %v16439_v31, %v16436_v57  ;;  %v16449_v58 = vadd.f32 %v13242_v47, %v7076_v62  ;;  %v2831_v47 = vadd.f32 %v18782_v21, %v2092_v41 }
0x1606   : > { %v7005_v52 = vpop.f32.mrf.mxu1 }
0x1607   : > { %v16452_v63 = vadd.f32 %v13243_v33, %v7077_v37  ;;  %v7078_v3 = vadd.f32 %v7005_v52, %v16239_v11  ;;  %7203 = vadd.xlane.f32.xlu0 %v7202_v26  ;;  %v18781_v37 = vld [vmem:[#allocation57_spill] sm:$0xff]  ;;  %v3546_v2 = vadd.f32 %v18784_v20, %v2831_v47  ;;  %v13252_v47 = vld [vmem:[%s13635_s11 + $0x60] sm:$0xff] }
0x1608   : > { %v7007_v18 = vpop.f32.mrf.mxu1  ;;  %v4916_v26 = vadd.f32 %v18781_v37, %v4257_v1  ;;  %v18786_v1 = vld [vmem:[#allocation54_spill] sm:$0xff] }
0x1609   : > { %v7079_v50 = vadd.f32 %v7007_v18, %v16242_v29  ;;  %v7205_v14 = vadd.f32 %v16452_v63, %v16449_v58  ;;  %v16463_v11 = vadd.f32 %v13244_v59, %v7078_v3  ;;  %v18783_v3 = vld [vmem:[#allocation49_spill] sm:$0xff]  ;;  %v18787_v37 = vld [vmem:[#allocation22_spill] sm:$0xff] }
0x160a   : > { %v7009_v49 = vpop.f32.mrf.mxu1  ;;  %v5655_v4 = vadd.f32 %v18783_v3, %v4916_v26  ;;  %v18785_v59 = vld [vmem:[#allocation29_spill] sm:$0xff] }
0x160b   : > { %v16466_v51 = vadd.f32 %v13245_v55, %v7079_v50  ;;  %v7080_v24 = vadd.f32 %v7009_v49, %v16245_v9  ;;  %7206 = vadd.xlane.f32.xlu1 %v7205_v14  ;;  %v13247_v9 = vld [vmem:[%s13635_s11 + $0x38] sm:$0xff]  ;;  %v4261_v55 = vadd.f32 %v18785_v59, %v3546_v2  ;;  %v13253_v3 = vld [vmem:[%s13635_s11 + $0x68] sm:$0xff]  ;;  %v13254_v20 = vld [vmem:[%s13635_s11 + $0x70] sm:$0xff] }
0x160c   : > { %v7011_v29 = vpop.f32.mrf.mxu1  ;;  %v6370_v14 = vadd.f32 %v16293_v5, %v5655_v4 }
0x160d   : > { %v7081_v62 = vadd.f32 %v7011_v29, %v6366_v8  ;;  %v7208_v0 = vadd.f32 %v16466_v51, %v16463_v11  ;;  %v16476_v61 = vadd.f32 %v13246_v28, %v7080_v24  ;;  %v4920_v5 = vadd.f32 %v18786_v1, %v4261_v55  ;;  %v18791_v55 = vld [vmem:[#allocation32_spill] sm:$0xff] }
0x160e   : > { %v7015_v6 = vpop.f32.mrf.mxu1 }
0x160f   : > { %v16479_v52 = vadd.f32 %v13247_v9, %v7081_v62  ;;  %v7082_v19 = vadd.f32 %v7015_v6, %v16280_v53  ;;  %7209 = vadd.xlane.f32.xlu0 %v7208_v0  ;;  %v13250_v62 = vld [vmem:[%s13635_s11 + $0x50] sm:$0xff]  ;;  %v5659_v26 = vadd.f32 %v18787_v37, %v4920_v5 }
0x1610   : > { %v7017_v33 = vpop.f32.mrf.mxu1  ;;  %v18793_v5 = vld [vmem:[#allocation50_spill] sm:$0xff] }
0x1611   : > { %v7083_v36 = vadd.f32 %v7017_v33, %v16285_v60  ;;  %v7211_v18 = vadd.f32 %v16479_v52, %v16476_v61  ;;  %v16490_v53 = vadd.f32 %v13248_v40, %v7082_v19  ;;  %v6374_v21 = vadd.f32 %v16304_v7, %v5659_v26  ;;  %v18788_v40 = vld [vmem:[#allocation72_spill] sm:$0xff]  ;;  %v18795_v26 = vld [vmem:[#allocation46_spill] sm:$0xff] }
0x1612   : > { %v7019_v50 = vpop.f32.mrf.mxu1 }
0x1613   : > { %v16493_v49 = vadd.f32 %v13249_v12, %v7083_v36  ;;  %v7084_v8 = vadd.f32 %v7019_v50, %v16290_v16  ;;  %7212 = vadd.xlane.f32.xlu1 %v7211_v18  ;;  %v13255_v50 = vld [vmem:[%s13635_s11 + $0x78] sm:$0xff]  ;;  %v18789_v12 = vld [vmem:[#allocation85_spill] sm:$0xff] }
0x1614   : > { %v7021_v60 = vpop.f32.mrf.mxu1 }
0x1615   : > { %v7085_v24 = vadd.f32 %v7021_v60, %v6370_v14  ;;  %v7214_v29 = vadd.f32 %v16493_v49, %v16490_v53  ;;  %v16501_v0 = vadd.f32 %v13250_v62, %v7084_v8  ;;  %v18790_v60 = vld [vmem:[#allocation62_spill] sm:$0xff] }
0x1616   : > { %v7025_v54 = vpop.f32.mrf.mxu1 }
0x1617   : > { %v16504_v41 = vadd.f32 %v13251_v10, %v7085_v24  ;;  %v7086_v16 = vadd.f32 %v7025_v54, %v16296_v38  ;;  %7215 = vadd.xlane.f32.xlu0 %v7214_v29  ;;  %v18792_v29 = vld [vmem:[#allocation73_spill] sm:$0xff] }
0x1618   : > { %v7027_v6 = vpop.f32.mrf.mxu1  ;;  %v2100_v54 = vadd.f32 %v18792_v29, %v18763_v34 }
0x1619   : > { %v7087_v28 = vadd.f32 %v7027_v6, %v16299_v25  ;;  %v7217_v9 = vadd.f32 %v16504_v41, %v16501_v0  ;;  %v16513_v33 = vadd.f32 %v13252_v47, %v7086_v16  ;;  %v18794_v16 = vld [vmem:[#allocation87_spill] sm:$0xff] }
0x161a   : > { %v7029_v19 = vpop.f32.mrf.mxu1  ;;  %v2839_v6 = vadd.f32 %v18794_v16, %v2100_v54  ;;  %v18800_v54 = vld [vmem:[#allocation88_spill] sm:$0xff] }
0x161b   : > { %v16516_v4 = vadd.f32 %v13253_v3, %v7087_v28  ;;  %v7088_v38 = vadd.f32 %v7029_v19, %v16302_v32  ;;  %7218 = vadd.xlane.f32.xlu1 %v7217_v9  ;;  %v2096_v32 = vadd.f32 %v18788_v40, %v18763_v34  ;;  %v18796_v19 = vld [vmem:[#allocation63_spill] sm:$0xff] }
0x161c   : > { %v7031_v36 = vpop.f32.mrf.mxu1 }
0x161d   : > { %v7089_v18 = vadd.f32 %v7031_v36, %v6374_v21  ;;  %v7220_v25 = vadd.f32 %v16516_v4, %v16513_v33  ;;  %v16522_v2 = vadd.f32 %v13254_v20, %v7088_v38  ;;  %v2835_v8 = vadd.f32 %v18789_v12, %v2096_v32  ;;  %v13256_v38 = vld [vmem:[%s13635_s11 + $0x80] sm:$0xff]  ;;  %v18798_v32 = vld [vmem:[#allocation74_spill] sm:$0xff] }
0x161e   : > { %v3554_v21 = vadd.f32 %v18796_v19, %v2839_v6  ;;  %v2104_v12 = vadd.f32 %v18798_v32, %v18763_v34  ;;  %v18801_v6 = vld [vmem:[#allocation64_spill] sm:$0xff] }
0x161f   : > { %v16525_v14 = vadd.f32 %v13255_v50, %v7089_v18  ;;  %7221 = vadd.xlane.f32.xlu0 %v7220_v25  ;;  %v3550_v59 = vadd.f32 %v18790_v60, %v2835_v8  ;;  %v13257_v18 = vld [vmem:[%s13635_s11 + $0x88] sm:$0xff]  ;;  %v18797_v50 = vld [vmem:[#allocation35_spill] sm:$0xff] }
0x1620   : > { %v13261_v19 = vld [vmem:[%s13635_s11 + $0xa8] sm:$0xff] }
0x1621   : > { %v7223_v7 = vadd.f32 %v16525_v14, %v16522_v2  ;;  %v4265_v24 = vadd.f32 %v18791_v55, %v3550_v59  ;;  %v13258_v59 = vld [vmem:[%s13635_s11 + $0x90] sm:$0xff] }
0x1623   : > { %7224 = vadd.xlane.f32.xlu1 %v7223_v7  ;;  %v4924_v62 = vadd.f32 %v18793_v5, %v4265_v24  ;;  %v4269_v7 = vadd.f32 %v18797_v50, %v3554_v21  ;;  %v13259_v24 = vld [vmem:[%s13635_s11 + $0x98] sm:$0xff] }
0x1625   : > { %v5663_v28 = vadd.f32 %v18795_v26, %v4924_v62 }
0x1627   : > { %v6378_v3 = vadd.f32 %v16317_v39, %v5663_v28  ;;  %v18799_v39 = vld [vmem:[#allocation48_spill] sm:$0xff] }
0x1628   : > { %v4928_v60 = vadd.f32 %v18799_v39, %v4269_v7  ;;  %v18805_v7 = vld [vmem:[#allocation44_spill] sm:$0xff] }
0x162a   : > { %v5667_v62 = vadd.f32 %v16024_v42, %v4928_v60  ;;  %v18806_v60 = vld [vmem:[#allocation41_spill] sm:$0xff] }
0x162c   : > { %v6382_v28 = vadd.f32 %v16330_v48, %v5667_v62 }
0x163d   : > { %v7035_v1 = vpop.f32.mrf.mxu1 }
0x163e   : > { %v7090_v10 = vadd.f32 %v7035_v1, %v16307_v23  ;;  %v2843_v1 = vadd.f32 %v18800_v54, %v2104_v12  ;;  %v13263_v12 = vld [vmem:[%s13635_s11 + $0xb8] sm:$0xff] }
0x163f   : > { %v7037_v37 = vpop.f32.mrf.mxu1 }
0x1640   : > { %v7091_v9 = vadd.f32 %v7037_v37, %v16310_v30  ;;  %v16544_v36 = vadd.f32 %v13256_v38, %v7090_v10  ;;  %v3558_v37 = vadd.f32 %v18801_v6, %v2843_v1  ;;  %v13264_v6 = vld [vmem:[%s13635_s11 + $0xc0] sm:$0xff] }
0x1641   : > { %v7039_v47 = vpop.f32.mrf.mxu1 }
0x1642   : > { %v16547_v25 = vadd.f32 %v13257_v18, %v7091_v9  ;;  %v7092_v23 = vadd.f32 %v7039_v47, %v16315_v56  ;;  %v13260_v9 = vld [vmem:[%s13635_s11 + $0xa0] sm:$0xff] }
0x1643   : > { %v7041_v20 = vpop.f32.mrf.mxu1  ;;  %v18802_v47 = vld [vmem:[#allocation27_spill] sm:$0xff] }
0x1644   : > { %v7093_v40 = vadd.f32 %v7041_v20, %v6378_v3  ;;  %v7226_v30 = vadd.f32 %v16547_v25, %v16544_v36  ;;  %v16557_v55 = vadd.f32 %v13258_v59, %v7092_v23  ;;  %v18803_v3 = vld [vmem:[#allocation37_spill] sm:$0xff]  ;;  %v18804_v20 = vld [vmem:[#allocation75_spill] sm:$0xff] }
0x1645   : > { %v7045_v8 = vpop.f32.mrf.mxu1  ;;  %v4273_v38 = vadd.f32 %v18803_v3, %v3558_v37  ;;  %v2108_v48 = vadd.f32 %v18804_v20, %v18763_v34  ;;  %v13265_v37 = vld [vmem:[%s13635_s11 + $0xc8] sm:$0xff] }
0x1646   : > { %v16560_v56 = vadd.f32 %v13259_v24, %v7093_v40  ;;  %v7094_v29 = vadd.f32 %v7045_v8, %v16320_v35  ;;  %7227 = vadd.xlane.f32.xlu0 %v7226_v30  ;;  %v13262_v30 = vld [vmem:[%s13635_s11 + $0xb0] sm:$0xff] }
0x1647   : > { %v7047_v5 = vpop.f32.mrf.mxu1  ;;  %v4932_v40 = vadd.f32 %v18805_v7, %v4273_v38  ;;  %v2847_v59 = vadd.f32 %v18806_v60, %v2108_v48  ;;  %v18810_v3 = vld [vmem:[#allocation45_spill] sm:$0xff]  ;;  %v13268_v60 = vld [vmem:[%s13635_s11 + $0xe0] sm:$0xff] }
0x1648   : > { %v7095_v10 = vadd.f32 %v7047_v5, %v16323_v46  ;;  %v7229_v16 = vadd.f32 %v16560_v56, %v16557_v55  ;;  %v16571_v35 = vadd.f32 %v13260_v9, %v7094_v29  ;;  %v18807_v29 = vld [vmem:[#allocation78_spill] sm:$0xff]  ;;  %v18808_v5 = vld [vmem:[#allocation79_spill] sm:$0xff] }
0x1649   : > { %v7049_v26 = vpop.f32.mrf.mxu1  ;;  %v5671_v54 = vadd.f32 %v18807_v29, %v4932_v40  ;;  %v3562_v62 = vadd.f32 %v18808_v5, %v2847_v59  ;;  %v18809_v9 = vld [vmem:[#allocation39_spill] sm:$0xff]  ;;  %v13266_v38 = vld [vmem:[%s13635_s11 + $0xd0] sm:$0xff] }
0x164a   : > { %v16574_v21 = vadd.f32 %v13261_v19, %v7095_v10  ;;  %v7096_v42 = vadd.f32 %v7049_v26, %v18802_v47  ;;  %7230 = vadd.xlane.f32.xlu1 %v7229_v16 }
0x164b   : > { %v7051_v46 = vpop.f32.mrf.mxu1  ;;  %v6386_v16 = vadd.f32 %v16345_v22, %v5671_v54  ;;  %v4277_v19 = vadd.f32 %v18809_v9, %v3562_v62  ;;  %v13271_v62 = vld [vmem:[%s13635_s11 + $0xf8] sm:$0xff]  ;;  %v7609_v9 = vld [vmem:[%s18415_s3 + $0x180] sm:$0xff] }
0x164c   : > { %v7097_v18 = vadd.f32 %v7051_v46, %v6382_v28  ;;  %v7232_v23 = vadd.f32 %v16574_v21, %v16571_v35  ;;  %v16584_v32 = vadd.f32 %v13262_v30, %v7096_v42 }
0x164d   : > { %v7055_v50 = vpop.f32.mrf.mxu1  ;;  %v4936_v22 = vadd.f32 %v18810_v3, %v4277_v19  ;;  %v7613_v19 = vld [vmem:[%s18415_s3 + $0x1a0] sm:$0xff]  ;;  %v7610_v3 = vld [vmem:[%s18415_s3 + $0x188] sm:$0xff] }
0x164e   : > { %v16587_v8 = vadd.f32 %v13263_v12, %v7097_v18  ;;  %v7098_v39 = vadd.f32 %v7055_v50, %v16334_v44  ;;  %7233 = vadd.xlane.f32.xlu0 %v7232_v23  ;;  %v13267_v23 = vld [vmem:[%s13635_s11 + $0xd8] sm:$0xff]  ;;  %v18811_v50 = vld [vmem:[#allocation33_spill] sm:$0xff] }
0x164f   : > { %v7057_v24 = vpop.f32.mrf.mxu1  ;;  %v5675_v7 = vadd.f32 %v18811_v50, %v4936_v22  ;;  %v7614_v22 = vld [vmem:[%s18415_s3 + $0x1a8] sm:$0xff] }
0x1650   : > { %v7099_v34 = vadd.f32 %v7057_v24, %v16337_v45  ;;  %v7235_v1 = vadd.f32 %v16587_v8, %v16584_v32  ;;  %v16598_v44 = vadd.f32 %v13264_v6, %v7098_v39  ;;  %v13269_v24 = vld [vmem:[%s13635_s11 + $0xe8] sm:$0xff] }
0x1651   : > { %v7059_v10 = vpop.f32.mrf.mxu1  ;;  %v6390_v39 = vadd.f32 %v16404_v15, %v5675_v7  ;;  %v7618_v6 = vld [vmem:[%s18415_s3 + $0x1c8] sm:$0xff]  ;;  %v11159_v7 = vcombine.low %v7609_v9, %v7613_v19 }
0x1652   : > { %v16601_v26 = vadd.f32 %v13265_v37, %v7099_v34  ;;  %v7100_v28 = vadd.f32 %v7059_v10, %v16343_v43  ;;  %7236 = vadd.xlane.f32.xlu1 %v7235_v1  ;;  %v13270_v1 = vld [vmem:[%s13635_s11 + $0xf0] sm:$0xff]  ;;  %v7606_v50 = vld [vmem:[%s18415_s3 + $0x168] sm:$0xff] }
0x1653   : > { %v7061_v45 = vpop.f32.mrf.mxu1 }
0x1654   : > { %v7101_v47 = vadd.f32 %v7061_v45, %v6386_v16  ;;  %v7238_v42 = vadd.f32 %v16601_v26, %v16598_v44  ;;  %v16609_v18 = vadd.f32 %v13266_v38, %v7100_v28  ;;  %v7621_v16 = vld [vmem:[%s18415_s3 + $0x1e0] sm:$0xff]  ;;  %v7622_v45 = vld [vmem:[%s18415_s3 + $0x1e8] sm:$0xff] }
0x1655   : > { %v7065_v46 = vpop.f32.mrf.mxu1  ;;  %v7601_v38 = vld [vmem:[%s18415_s3 + $0x140] sm:$0xff] }
0x1656   : > { %v16612_v20 = vadd.f32 %v13267_v23, %v7101_v47  ;;  %v7102_v43 = vadd.f32 %v7065_v46, %v16350_v17  ;;  %7239 = vadd.xlane.f32.xlu0 %v7238_v42  ;;  %v11169_v47 = vcombine.low %v7618_v6, %v7622_v45  ;;  %v11170_v42 = vcombine.high %v7618_v6, %v7622_v45 }
0x1657   : > { %v7067_v48 = vpop.f32.mrf.mxu1  ;;  %v11160_v46 = vcombine.high %v7609_v9, %v7613_v19  ;;  %v11162_v23 = vcombine.high %v7610_v3, %v7614_v22  ;;  %v7577_v9 = vld [vmem:[%s18415_s3 + $0x80] sm:$0xff] }
0x1658   : > { %v7103_v40 = vadd.f32 %v7067_v48, %v16353_v13  ;;  %v7241_v30 = vadd.f32 %v16612_v20, %v16609_v18  ;;  %v16621_v59 = vadd.f32 %v13268_v60, %v7102_v43  ;;  %v7605_v43 = vld [vmem:[%s18415_s3 + $0x160] sm:$0xff]  ;;  %v7602_v48 = vld [vmem:[%s18415_s3 + $0x148] sm:$0xff]  ;;  %8483 = vmatprep.subr.bf16.mxu1 %v11170_v42 }
0x1659   : > { %v7069_v12 = vpop.f32.mrf.mxu1  ;;  %8484 = vmatpush1.bf16.msra.mxu1 %v11169_v47  ;;  %v7597_v60 = vld [vmem:[%s18415_s3 + $0x120] sm:$0xff]  ;;  %v7578_v47 = vld [vmem:[%s18415_s3 + $0x88] sm:$0xff] }
0x165a   : > { %v16624_v29 = vadd.f32 %v13269_v24, %v7103_v40  ;;  %v7104_v17 = vadd.f32 %v7069_v12, %v16358_v27  ;;  %7242 = vadd.xlane.f32.xlu1 %v7241_v30  ;;  %v7617_v27 = vld [vmem:[%s18415_s3 + $0x1c0] sm:$0xff]  ;;  %v11161_v40 = vcombine.low %v7610_v3, %v7614_v22  ;;  %v11152_v30 = vcombine.high %v7601_v38, %v7605_v43  ;;  %v7594_v24 = vld [vmem:[%s18415_s3 + $0x108] sm:$0xff] }
0x165b   : > { %v7071_v54 = vpop.f32.mrf.mxu1  ;;  %v11167_v37 = vcombine.low %v7617_v27, %v7621_v16  ;;  %v11168_v28 = vcombine.high %v7617_v27, %v7621_v16  ;;  %8485 = vmatprep.subr.bf16.mxu1 %v11162_v23  ;;  %v11154_v12 = vcombine.high %v7602_v48, %v7606_v50  ;;  %v7586_v27 = vld [vmem:[%s18415_s3 + $0xc8] sm:$0xff]  ;;  %v7581_v19 = vld [vmem:[%s18415_s3 + $0xa0] sm:$0xff] }
0x165c   : > { %v7105_v34 = vadd.f32 %v7071_v54, %v6390_v39  ;;  %v7244_v13 = vadd.f32 %v16624_v29, %v16621_v59  ;;  %v16630_v5 = vadd.f32 %v13270_v1, %v7104_v17  ;;  %v7593_v39 = vld [vmem:[%s18415_s3 + $0x100] sm:$0xff]  ;;  %v7598_v17 = vld [vmem:[%s18415_s3 + $0x128] sm:$0xff]  ;;  %v11151_v54 = vcombine.low %v7601_v38, %v7605_v43 }
0x165d   : > { %8370 = vmatprep.subr.bf16.mxu0 %v11168_v28  ;;  %8486 = vmatpush1.bf16.msra.mxu1 %v11161_v40  ;;  %v11146_v1 = vcombine.high %v7594_v24, %v7598_v17  ;;  %v7590_v16 = vld [vmem:[%s18415_s3 + $0xe8] sm:$0xff]  ;;  %v11143_v6 = vcombine.low %v7593_v39, %v7597_v60  ;;  %v11128_v22 = vcombine.high %v7577_v9, %v7581_v19  ;;  %v7569_v23 = vld [vmem:[%s18415_s3 + $0x40] sm:$0xff] }
0x165e   : > { %v16633_v10 = vadd.f32 %v13271_v62, %v7105_v34  ;;  %7245 = vadd.xlane.f32.xlu0 %v7244_v13  ;;  %8371 = vmatpush1.bf16.msra.mxu0 %v11167_v37  ;;  %v11153_v34 = vcombine.low %v7602_v48, %v7606_v50  ;;  %v11144_v13 = vcombine.high %v7593_v39, %v7597_v60  ;;  %v7585_v62 = vld [vmem:[%s18415_s3 + $0xc0] sm:$0xff]  ;;  %v7582_v42 = vld [vmem:[%s18415_s3 + $0xa8] sm:$0xff] }
0x165f   : > { %8372 = vmatprep.subr.bf16.mxu0 %v11160_v46  ;;  %8487 = vmatprep.subr.bf16.mxu1 %v11154_v12  ;;  %v11145_v37 = vcombine.low %v7594_v24, %v7598_v17  ;;  %v11138_v45 = vcombine.high %v7586_v27, %v7590_v16  ;;  %v11137_v3 = vcombine.low %v7586_v27, %v7590_v16  ;;  %v7573_v43 = vld [vmem:[%s18415_s3 + $0x60] sm:$0xff]  ;;  %v7570_v48 = vld [vmem:[%s18415_s3 + $0x48] sm:$0xff] }
0x1660   : > { %v7247_v15 = vadd.f32 %v16633_v10, %v16630_v5  ;;  %v11130_v38 = vcombine.high %v7578_v47, %v7582_v42  ;;  %v7574_v50 = vld [vmem:[%s18415_s3 + $0x68] sm:$0xff]  ;;  %v11129_v40 = vcombine.low %v7578_v47, %v7582_v42  ;;  %v7561_v39 = vld [vmem:[%s18415_s3] sm:$0xff] }
0x1661   : > { %8488 = vmatpush1.bf16.msra.mxu1 %v11153_v34  ;;  %v11122_v12 = vcombine.high %v7570_v48, %v7574_v50  ;;  %v7565_v60 = vld [vmem:[%s18415_s3 + $0x20] sm:$0xff]  ;;  %v7562_v24 = vld [vmem:[%s18415_s3 + $0x8] sm:$0xff]  ;;  %v11121_v34 = vcombine.low %v7570_v48, %v7574_v50 }
0x1662   : > { %7248 = vadd.xlane.f32.xlu1 %v7247_v15  ;;  %8373 = vmatpush1.bf16.msra.mxu0 %v11159_v7  ;;  %v7589_v15 = vld [vmem:[%s18415_s3 + $0xe0] sm:$0xff]  ;;  %v11127_v7 = vcombine.low %v7577_v9, %v7581_v19  ;;  %v7566_v17 = vld [vmem:[%s18415_s3 + $0x28] sm:$0xff] }
0x1663   : > { %8374 = vmatprep.subr.bf16.mxu0 %v11152_v30  ;;  %v11136_v28 = vcombine.high %v7585_v62, %v7589_v15  ;;  %8489 = vmatprep.subr.bf16.mxu1 %v11146_v1  ;;  %v11135_v46 = vcombine.low %v7585_v62, %v7589_v15  ;;  %v11120_v30 = vcombine.high %v7569_v23, %v7573_v43  ;;  %v7681_v62 = vld [vmem:[%s18415_s3 + $0x3c0] sm:$0xff]  ;;  %v7682_v27 = vld [vmem:[%s18415_s3 + $0x3c8] sm:$0xff] }
0x1664   : > { %v11114_v1 = vcombine.high %v7562_v24, %v7566_v17  ;;  %v7685_v15 = vld [vmem:[%s18415_s3 + $0x3e0] sm:$0xff]  ;;  %v7686_v16 = vld [vmem:[%s18415_s3 + $0x3e8] sm:$0xff] }
0x1665   : > { %8490 = vmatpush1.bf16.msra.mxu1 %v11145_v37  ;;  %v11111_v37 = vcombine.low %v7561_v39, %v7565_v60  ;;  %v11232_v9 = vcombine.high %v7681_v62, %v7685_v15  ;;  %v11234_v19 = vcombine.high %v7682_v27, %v7686_v16 }
0x1666   : > { %8375 = vmatpush1.bf16.msra.mxu0 %v11151_v54  ;;  %8491 = vmatprep.subr.bf16.mxu1 %v11138_v45  ;;  %v11119_v54 = vcombine.low %v7569_v23, %v7573_v43  ;;  %v11113_v45 = vcombine.low %v7562_v24, %v7566_v17  ;;  %v11233_v43 = vcombine.low %v7682_v27, %v7686_v16 }
0x1667   : > { %8376 = vmatprep.subr.bf16.mxu0 %v11144_v13  ;;  %v11112_v13 = vcombine.high %v7561_v39, %v7565_v60 }
0x1669   : > { %8492 = vmatpush1.bf16.msra.mxu1 %v11137_v3  ;;  %v11231_v3 = vcombine.low %v7681_v62, %v7685_v15 }
0x166a   : > { %8377 = vmatpush1.bf16.msra.mxu0 %v11143_v6  ;;  %8493 = vmatprep.subr.bf16.mxu1 %v11130_v38 }
0x166b   : > { %8378 = vmatprep.subr.bf16.mxu0 %v11136_v28 }
0x166d   : > { %8494 = vmatpush1.bf16.msra.mxu1 %v11129_v40 }
0x166e   : > { %8379 = vmatpush1.bf16.msra.mxu0 %v11135_v46  ;;  %8495 = vmatprep.subr.bf16.mxu1 %v11122_v12 }
0x166f   : > { %8380 = vmatprep.subr.bf16.mxu0 %v11128_v22 }
0x1671   : > { %8496 = vmatpush1.bf16.msra.mxu1 %v11121_v34 }
0x1672   : > { %8381 = vmatpush1.bf16.msra.mxu0 %v11127_v7  ;;  %8497 = vmatprep.subr.bf16.mxu1 %v11114_v1 }
0x1673   : > { %8382 = vmatprep.subr.bf16.mxu0 %v11120_v30 }
0x1675   : > { %8498 = vmatpush1.bf16.msra.mxu1 %v11113_v45 }
0x1676   : > { %8383 = vmatpush1.bf16.msra.mxu0 %v11119_v54  ;;  %8499 = vmatprep.subr.bf16.mxu1 %v11234_v19 }
0x1677   : > { %8384 = vmatprep.subr.bf16.mxu0 %v11112_v13 }
0x1679   : > { %8500 = vmatpush2.bf16.msra.mxu1 %v11233_v43 }
0x167a   : > { %8385 = vmatpush1.bf16.msra.mxu0 %v11111_v37  ;;  %v7674_v37 = vld [vmem:[%s18415_s3 + $0x388] sm:$0xff] }
0x167b   : > { %8386 = vmatprep.subr.bf16.mxu0 %v11232_v9  ;;  %v7678_v9 = vld [vmem:[%s18415_s3 + $0x3a8] sm:$0xff] }
0x167e   : > { %8387 = vmatpush2.bf16.msra.mxu0 %v11231_v3  ;;  %v11226_v3 = vcombine.high %v7674_v37, %v7678_v9 }
0x1680   : > { %8501 = vmatprep.subr.bf16.mxu1 %v11226_v3 }
0x1690   : > { %v7204_v6 = vpop.xlane.xlu0 %7203 }
0x1691   : > { %v7251_v28 = vmul.f32 0.00390625, %v7204_v6  ;;  %v7677_v6 = vld [vmem:[%s18415_s3 + $0x3a0] sm:$0xff] }
0x1693   : > { %v16746_v47 = vsub.f32 %v16436_v57, %v7251_v28  ;;  %v16749_v42 = vsub.f32 %v16439_v31, %v7251_v28 }
0x1694   : > { %v7207_v46 = vpop.xlane.xlu1 %7206 }
0x1695   : > { %v7299_v22 = vmul.f32 %v16746_v47, %v16746_v47  ;;  %v7300_v38 = vmul.f32 %v16749_v42, %v16749_v42  ;;  %v7252_v23 = vmul.f32 0.00390625, %v7207_v46  ;;  %v11225_v46 = vcombine.low %v7674_v37, %v7678_v9 }
0x1697   : > { %v16756_v57 = vsub.f32 %v16449_v58, %v7252_v23  ;;  %v16759_v31 = vsub.f32 %v16452_v63, %v7252_v23  ;;  %v7331_v48 = vadd.f32 %v7300_v38, %v7299_v22  ;;  %8502 = vmatpush2.bf16.msra.mxu1 %v11225_v46  ;;  %v7653_v46 = vld [vmem:[%s18415_s3 + $0x2e0] sm:$0xff] }
0x1698   : > { %v7210_v50 = vpop.xlane.xlu0 %7209 }
0x1699   : > { %v7301_v7 = vmul.f32 %v16756_v57, %v16756_v57  ;;  %v7302_v40 = vmul.f32 %v16759_v31, %v16759_v31  ;;  %v7253_v30 = vmul.f32 0.00390625, %v7210_v50  ;;  %7332 = vadd.xlane.f32.xlu0 %v7331_v48  ;;  %v7665_v48 = vld [vmem:[%s18415_s3 + $0x340] sm:$0xff] }
0x169a   : > { %v7669_v50 = vld [vmem:[%s18415_s3 + $0x360] sm:$0xff] }
0x169b   : > { %v16766_v12 = vsub.f32 %v16463_v11, %v7253_v30  ;;  %v16769_v58 = vsub.f32 %v16466_v51, %v7253_v30  ;;  %v7334_v63 = vadd.f32 %v7302_v40, %v7301_v7  ;;  %v11216_v30 = vcombine.high %v7665_v48, %v7669_v50 }
0x169c   : > { %v7213_v39 = vpop.xlane.xlu1 %7212 }
0x169d   : > { %v7303_v60 = vmul.f32 %v16766_v12, %v16766_v12  ;;  %v7304_v24 = vmul.f32 %v16769_v58, %v16769_v58  ;;  %v7254_v17 = vmul.f32 0.00390625, %v7213_v39  ;;  %7335 = vadd.xlane.f32.xlu1 %v7334_v63  ;;  %v7670_v63 = vld [vmem:[%s18415_s3 + $0x368] sm:$0xff]  ;;  %v11215_v39 = vcombine.low %v7665_v48, %v7669_v50 }
0x169f   : > { %v16776_v54 = vsub.f32 %v16476_v61, %v7254_v17  ;;  %v16779_v34 = vsub.f32 %v16479_v52, %v7254_v17  ;;  %v7337_v11 = vadd.f32 %v7304_v24, %v7303_v60  ;;  %v7673_v52 = vld [vmem:[%s18415_s3 + $0x380] sm:$0xff] }
0x16a0   : > { %v7216_v13 = vpop.xlane.xlu0 %7215  ;;  %v11224_v45 = vcombine.high %v7673_v52, %v7677_v6  ;;  %v11223_v19 = vcombine.low %v7673_v52, %v7677_v6  ;;  %v7662_v6 = vld [vmem:[%s18415_s3 + $0x328] sm:$0xff] }
0x16a1   : > { %v7305_v51 = vmul.f32 %v16776_v54, %v16776_v54  ;;  %v7306_v1 = vmul.f32 %v16779_v34, %v16779_v34  ;;  %v7255_v62 = vmul.f32 0.00390625, %v7216_v13  ;;  %7338 = vadd.xlane.f32.xlu0 %v7337_v11 }
0x16a2   : > { %8388 = vmatprep.subr.bf16.mxu0 %v11224_v45 }
0x16a3   : > { %v16786_v15 = vsub.f32 %v16490_v53, %v7255_v62  ;;  %v16789_v27 = vsub.f32 %v16493_v49, %v7255_v62  ;;  %v7340_v61 = vadd.f32 %v7306_v1, %v7305_v51  ;;  %8389 = vmatpush2.bf16.msra.mxu0 %v11223_v19  ;;  %v7657_v1 = vld [vmem:[%s18415_s3 + $0x300] sm:$0xff] }
0x16a4   : > { %v7219_v16 = vpop.xlane.xlu1 %7218  ;;  %8390 = vmatprep.subr.bf16.mxu0 %v11216_v30  ;;  %v7661_v62 = vld [vmem:[%s18415_s3 + $0x320] sm:$0xff]  ;;  %v7642_v30 = vld [vmem:[%s18415_s3 + $0x288] sm:$0xff] }
0x16a5   : > { %v7307_v53 = vmul.f32 %v16786_v15, %v16786_v15  ;;  %v7308_v49 = vmul.f32 %v16789_v27, %v16789_v27  ;;  %v7256_v28 = vmul.f32 0.00390625, %v7219_v16  ;;  %7341 = vadd.xlane.f32.xlu1 %v7340_v61  ;;  %v11208_v52 = vcombine.high %v7657_v1, %v7661_v62  ;;  %v7649_v19 = vld [vmem:[%s18415_s3 + $0x2c0] sm:$0xff] }
0x16a6   : > { %v11207_v37 = vcombine.low %v7657_v1, %v7661_v62  ;;  %v11199_v48 = vcombine.low %v7649_v19, %v7653_v46  ;;  %v7637_v1 = vld [vmem:[%s18415_s3 + $0x260] sm:$0xff]  ;;  %v7634_v62 = vld [vmem:[%s18415_s3 + $0x248] sm:$0xff] }
0x16a7   : > { %v16808_v22 = vsub.f32 %v16501_v0, %v7256_v28  ;;  %v16811_v38 = vsub.f32 %v16504_v41, %v7256_v28  ;;  %v7343_v23 = vadd.f32 %v7308_v49, %v7307_v53  ;;  %v7666_v0 = vld [vmem:[%s18415_s3 + $0x348] sm:$0xff]  ;;  %8391 = vmatpush2.bf16.msra.mxu0 %v11215_v39 }
0x16a8   : > { %v7222_v43 = vpop.xlane.xlu0 %7221  ;;  %v11217_v60 = vcombine.low %v7666_v0, %v7670_v63  ;;  %v11218_v24 = vcombine.high %v7666_v0, %v7670_v63  ;;  %8392 = vmatprep.subr.bf16.mxu0 %v11208_v52  ;;  %v7646_v39 = vld [vmem:[%s18415_s3 + $0x2a8] sm:$0xff] }
0x16a9   : > { %v7309_v41 = vmul.f32 %v16808_v22, %v16808_v22  ;;  %v7310_v7 = vmul.f32 %v16811_v38, %v16811_v38  ;;  %v7257_v40 = vmul.f32 0.00390625, %v7222_v43  ;;  %7344 = vadd.xlane.f32.xlu0 %v7343_v23  ;;  %v11200_v23 = vcombine.high %v7649_v19, %v7653_v46  ;;  %v7654_v43 = vld [vmem:[%s18415_s3 + $0x2e8] sm:$0xff] }
0x16aa   : > { %8503 = vmatprep.subr.bf16.mxu1 %v11218_v24  ;;  %v11193_v24 = vcombine.low %v7642_v30, %v7646_v39 }
0x16ab   : > { %v16830_v17 = vsub.f32 %v16513_v33, %v7257_v40  ;;  %v16833_v11 = vsub.f32 %v16516_v4, %v7257_v40  ;;  %v7346_v13 = vadd.f32 %v7310_v7, %v7309_v41  ;;  %v7658_v33 = vld [vmem:[%s18415_s3 + $0x308] sm:$0xff]  ;;  %8504 = vmatpush2.bf16.msra.mxu1 %v11217_v60  ;;  %8393 = vmatpush2.bf16.msra.mxu0 %v11207_v37  ;;  %v7641_v7 = vld [vmem:[%s18415_s3 + $0x280] sm:$0xff] }
0x16ac   : > { %v7225_v51 = vpop.xlane.xlu1 %7224  ;;  %v11209_v53 = vcombine.low %v7658_v33, %v7662_v6  ;;  %v11210_v49 = vcombine.high %v7658_v33, %v7662_v6  ;;  %8394 = vmatprep.subr.bf16.mxu0 %v11200_v23  ;;  %v7645_v40 = vld [vmem:[%s18415_s3 + $0x2a0] sm:$0xff] }
0x16ad   : > { %v7311_v4 = vmul.f32 %v16830_v17, %v16830_v17  ;;  %v7312_v61 = vmul.f32 %v16833_v11, %v16833_v11  ;;  %v7258_v16 = vmul.f32 0.00390625, %v7225_v51  ;;  %7347 = vadd.xlane.f32.xlu1 %v7346_v13  ;;  %v11192_v63 = vcombine.high %v7641_v7, %v7645_v40  ;;  %v7633_v51 = vld [vmem:[%s18415_s3 + $0x240] sm:$0xff] }
0x16ae   : > { %8505 = vmatprep.subr.bf16.mxu1 %v11210_v49  ;;  %v11191_v60 = vcombine.low %v7641_v7, %v7645_v40  ;;  %v11194_v13 = vcombine.high %v7642_v30, %v7646_v39  ;;  %v11184_v33 = vcombine.high %v7633_v51, %v7637_v1  ;;  %v7625_v6 = vld [vmem:[%s18415_s3 + $0x200] sm:$0xff] }
0x16af   : > { %v16852_v28 = vsub.f32 %v16522_v2, %v7258_v16  ;;  %v16855_v45 = vsub.f32 %v16525_v14, %v7258_v16  ;;  %v7349_v9 = vadd.f32 %v7312_v61, %v7311_v4  ;;  %v7650_v2 = vld [vmem:[%s18415_s3 + $0x2c8] sm:$0xff]  ;;  %8506 = vmatpush2.bf16.msra.mxu1 %v11209_v53  ;;  %8395 = vmatpush2.bf16.msra.mxu0 %v11199_v48  ;;  %v7629_v37 = vld [vmem:[%s18415_s3 + $0x220] sm:$0xff] }
0x16b0   : > { %v11201_v50 = vcombine.low %v7650_v2, %v7654_v43  ;;  %v11202_v0 = vcombine.high %v7650_v2, %v7654_v43  ;;  %8396 = vmatprep.subr.bf16.mxu0 %v11192_v63  ;;  %v7638_v4 = vld [vmem:[%s18415_s3 + $0x268] sm:$0xff]  ;;  %v11183_v61 = vcombine.low %v7633_v51, %v7637_v1  ;;  %v11176_v49 = vcombine.high %v7625_v6, %v7629_v37  ;;  %v16948_v51 = vld [vmem:[%s18415_s3 + $0x1d8] sm:$0xff] }
0x16b1   : > { %v7313_v14 = vmul.f32 %v16852_v28, %v16852_v28  ;;  %v7314_v3 = vmul.f32 %v16855_v45, %v16855_v45  ;;  %7350 = vadd.xlane.f32.xlu0 %v7349_v9  ;;  %v11185_v16 = vcombine.low %v7634_v62, %v7638_v4  ;;  %v11186_v52 = vcombine.high %v7634_v62, %v7638_v4  ;;  %v7626_v53 = vld [vmem:[%s18415_s3 + $0x208] sm:$0xff]  ;;  %v16957_v62 = vld [vmem:[%s18415_s3 + $0x1f8] sm:$0xff] }
0x16b2   : > { %8507 = vmatprep.subr.bf16.mxu1 %v11202_v0  ;;  %v7630_v9 = vld [vmem:[%s18415_s3 + $0x228] sm:$0xff]  ;;  %v11175_v19 = vcombine.low %v7625_v6, %v7629_v37 }
0x16b3   : > { %v7352_v41 = vadd.f32 %v7314_v3, %v7313_v14  ;;  %8508 = vmatpush2.bf16.msra.mxu1 %v11201_v50  ;;  %8397 = vmatpush2.bf16.msra.mxu0 %v11191_v60  ;;  %v11177_v46 = vcombine.low %v7626_v53, %v7630_v9  ;;  %v11178_v2 = vcombine.high %v7626_v53, %v7630_v9 }
0x16b4   : > { %8509 = vmatprep.subr.bf16.mxu1 %v11194_v13  ;;  %8398 = vmatprep.subr.bf16.mxu0 %v11184_v33  ;;  %v16943_v13 = vld [vmem:[%s18415_s3 + $0x1f0] sm:$0xff] }
0x16b5   : > { %7353 = vadd.xlane.f32.xlu1 %v7352_v41 }
0x16b7   : > { %8510 = vmatpush2.bf16.msra.mxu1 %v11193_v24  ;;  %8399 = vmatpush2.bf16.msra.mxu0 %v11183_v61 }
0x16b8   : > { %8511 = vmatprep.subr.bf16.mxu1 %v11186_v52  ;;  %8400 = vmatprep.subr.bf16.mxu0 %v11176_v49  ;;  %v11174_v52 = vcombine.high %v16948_v51, %v16957_v62 }
0x16bb   : > { %8512 = vmatpush2.bf16.msra.mxu1 %v11185_v16  ;;  %8401 = vmatpush2.bf16.msra.mxu0 %v11175_v19  ;;  %v11173_v16 = vcombine.low %v16948_v51, %v16957_v62 }
0x16bc   : > { %8513 = vmatprep.subr.bf16.mxu1 %v11178_v2 }
0x16bf   : > { %8514 = vmatpush2.bf16.msra.mxu1 %v11177_v46 }
0x16c0   : > { %8709 = vmatprep.subr.bf16.mxu1 %v11174_v52 }
0x16cf   : > { %v7228_v14 = vpop.xlane.xlu0 %7227 }
0x16d0   : > { %v7259_v3 = vmul.f32 0.00390625, %v7228_v14 }
0x16d2   : > { %v16910_v23 = vsub.f32 %v16544_v36, %v7259_v3  ;;  %v16913_v43 = vsub.f32 %v16547_v25, %v7259_v3 }
0x16d3   : > { %v7231_v48 = vpop.xlane.xlu1 %7230 }
0x16d4   : > { %v7315_v50 = vmul.f32 %v16910_v23, %v16910_v23  ;;  %v7316_v0 = vmul.f32 %v16913_v43, %v16913_v43  ;;  %v7260_v41 = vmul.f32 0.00390625, %v7231_v48 }
0x16d6   : > { %v16920_v7 = vsub.f32 %v16557_v55, %v7260_v41  ;;  %v16923_v40 = vsub.f32 %v16560_v56, %v7260_v41  ;;  %v7355_v30 = vadd.f32 %v7316_v0, %v7315_v50  ;;  %v16938_v56 = vld [vmem:[%s18415_s3 + $0x1d0] sm:$0xff] }
0x16d7   : > { %v7234_v36 = vpop.xlane.xlu0 %7233  ;;  %v11172_v1 = vcombine.high %v16938_v56, %v16943_v13 }
0x16d8   : > { %v7317_v25 = vmul.f32 %v16920_v7, %v16920_v7  ;;  %v7318_v63 = vmul.f32 %v16923_v40, %v16923_v40  ;;  %v7261_v39 = vmul.f32 0.00390625, %v7234_v36  ;;  %7356 = vadd.xlane.f32.xlu0 %v7355_v30 }
0x16d9   : > { %8596 = vmatprep.subr.bf16.mxu0 %v11172_v1 }
0x16da   : > { %v16930_v60 = vsub.f32 %v16571_v35, %v7261_v39  ;;  %v16933_v24 = vsub.f32 %v16574_v21, %v7261_v39  ;;  %v7358_v55 = vadd.f32 %v7318_v63, %v7317_v25  ;;  %v11171_v21 = vcombine.low %v16938_v56, %v16943_v13  ;;  %v7604_v56 = vld [vmem:[%s18415_s3 + $0x158] sm:$0xff] }
0x16db   : > { %v7237_v35 = vpop.xlane.xlu1 %7236  ;;  %v7608_v13 = vld [vmem:[%s18415_s3 + $0x178] sm:$0xff] }
0x16dc   : > { %v7319_v33 = vmul.f32 %v16930_v60, %v16930_v60  ;;  %v7320_v4 = vmul.f32 %v16933_v24, %v16933_v24  ;;  %v7262_v61 = vmul.f32 0.00390625, %v7237_v35  ;;  %7359 = vadd.xlane.f32.xlu1 %v7358_v55 }
0x16de   : > { %v16968_v6 = vsub.f32 %v16584_v32, %v7262_v61  ;;  %v16971_v37 = vsub.f32 %v16587_v8, %v7262_v61  ;;  %v7361_v53 = vadd.f32 %v7320_v4, %v7319_v33 }
0x16df   : > { %v7240_v49 = vpop.xlane.xlu0 %7239 }
0x16e0   : > { %v7321_v9 = vmul.f32 %v16968_v6, %v16968_v6  ;;  %v7322_v19 = vmul.f32 %v16971_v37, %v16971_v37  ;;  %v7263_v46 = vmul.f32 0.00390625, %v7240_v49  ;;  %7362 = vadd.xlane.f32.xlu0 %v7361_v53 }
0x16e2   : > { %v16978_v2 = vsub.f32 %v16598_v44, %v7263_v46  ;;  %v16981_v32 = vsub.f32 %v16601_v26, %v7263_v46  ;;  %v7364_v14 = vadd.f32 %v7322_v19, %v7321_v9 }
0x16e3   : > { %v7243_v8 = vpop.xlane.xlu1 %7242 }
0x16e4   : > { %v7323_v3 = vmul.f32 %v16978_v2, %v16978_v2  ;;  %v7324_v48 = vmul.f32 %v16981_v32, %v16981_v32  ;;  %v7264_v50 = vmul.f32 0.00390625, %v7243_v8  ;;  %7365 = vadd.xlane.f32.xlu1 %v7364_v14 }
0x16e6   : > { %v16988_v0 = vsub.f32 %v16609_v18, %v7264_v50  ;;  %v16991_v41 = vsub.f32 %v16612_v20, %v7264_v50  ;;  %v7367_v44 = vadd.f32 %v7324_v48, %v7323_v3  ;;  %v440_v50 = vld [vmem:[#allocation9 + $0x12] sm:$0x3] }
0x16e7   : > { %v7246_v30 = vpop.xlane.xlu0 %7245 }
0x16e8   : > { %v7325_v26 = vmul.f32 %v16988_v0, %v16988_v0  ;;  %v7326_v36 = vmul.f32 %v16991_v41, %v16991_v41  ;;  %v7265_v25 = vmul.f32 0.00390625, %v7246_v30  ;;  %7368 = vadd.xlane.f32.xlu0 %v7367_v44 }
0x16ea   : > { %v16998_v63 = vsub.f32 %v16621_v59, %v7265_v25  ;;  %v17001_v39 = vsub.f32 %v16624_v29, %v7265_v25  ;;  %v7370_v18 = vadd.f32 %v7326_v36, %v7325_v26  ;;  %v18812_v25 = vld [vmem:[#allocation17_spill] sm:$0xff] }
0x16eb   : > { %v7249_v55 = vpop.xlane.xlu1 %7248 }
0x16ec   : > { %v7327_v20 = vmul.f32 %v16998_v63, %v16998_v63  ;;  %v7328_v35 = vmul.f32 %v17001_v39, %v17001_v39  ;;  %v7266_v1 = vmul.f32 0.00390625, %v7249_v55  ;;  %7371 = vadd.xlane.f32.xlu1 %v7370_v18  ;;  %v17018_v18 = vrot.slane %v440_v50, %v18812_v25  ;;  %v18813_v55 = vld [vmem:[#allocation76_spill] sm:$0xff] }
0x16ee   : > { %v17008_v33 = vsub.f32 %v16630_v5, %v7266_v1  ;;  %v17011_v4 = vsub.f32 %v16633_v10, %v7266_v1  ;;  %v7373_v59 = vadd.f32 %v7328_v35, %v7327_v20  ;;  %v17021_v20 = vrot.slane %v440_v50, %v18813_v55 }
0x16f0   : > { %v7329_v29 = vmul.f32 %v17008_v33, %v17008_v33  ;;  %v7330_v61 = vmul.f32 %v17011_v4, %v17011_v4  ;;  %7374 = vadd.xlane.f32.xlu0 %v7373_v59  ;;  %v441_v59 = vld [vmem:[#allocation9 + $0x14] sm:$0x3] }
0x16f2   : > { %v7376_v52 = vadd.f32 %v7330_v61, %v7329_v29 }
0x16f4   : > { %7377 = vadd.xlane.f32.xlu1 %v7376_v52 }
0x1722   : > { %v7333_v53 = vpop.xlane.xlu0 %7332 }
0x1723   : > { %v7379_v49 = vmul.f32 0.00390625, %v7333_v53 }
0x1725   : > { %v7395_v9 = vadd.f32 1e-05, %v7379_v49 }
0x1726   : > { %v7336_v19 = vpop.xlane.xlu1 %7335 }
0x1727   : > { %13175 = vrsqrt.f32 %v7395_v9  ;;  %v7380_v5 = vmul.f32 0.00390625, %v7336_v19  ;;  %v17028_v19 = vrot.slane %v441_v59, %v18812_v25 }
0x1729   : > { %v7396_v46 = vadd.f32 1e-05, %v7380_v5  ;;  %v17031_v5 = vrot.slane %v441_v59, %v18813_v55  ;;  %v7616_v59 = vld [vmem:[%s18415_s3 + $0x1b8] sm:$0xff] }
0x172a   : > { %v7339_v14 = vpop.xlane.xlu0 %7338 }
0x172b   : > { %13177 = vrsqrt.f32 %v7396_v46  ;;  %v7381_v10 = vmul.f32 0.00390625, %v7339_v14 }
0x172d   : > { %v7397_v8 = vadd.f32 1e-05, %v7381_v10 }
0x172e   : > { %v7342_v3 = vpop.xlane.xlu1 %7341 }
0x172f   : > { %13179 = vrsqrt.f32 %v7397_v8  ;;  %v7382_v48 = vmul.f32 0.00390625, %v7342_v3 }
0x1731   : > { %v7398_v44 = vadd.f32 1e-05, %v7382_v48 }
0x1732   : > { %v7345_v30 = vpop.xlane.xlu0 %7344 }
0x1733   : > { %13181 = vrsqrt.f32 %v7398_v44  ;;  %v7383_v26 = vmul.f32 0.00390625, %v7345_v30 }
0x1734   : > { %v13176_v36 = vpop.eup %13175 }
0x1735   : > { %v7427_v35 = vmul.f32 %v13176_v36, %v16746_v47  ;;  %v7399_v1 = vadd.f32 1e-05, %v7383_v26  ;;  %v7428_v29 = vmul.f32 %v13176_v36, %v16749_v42 }
0x1736   : > { %v7348_v61 = vpop.xlane.xlu1 %7347 }
0x1737   : > { %13183 = vrsqrt.f32 %v7399_v1  ;;  %v7384_v52 = vmul.f32 0.00390625, %v7348_v61  ;;  %v7470_v49 = vmul.f32 %v17018_v18, %v7427_v35  ;;  %v7471_v9 = vmul.f32 %v17021_v20, %v7428_v29  ;;  %v7615_v35 = vld [vmem:[%s18415_s3 + $0x1b0] sm:$0xff]  ;;  %v7612_v1 = vld [vmem:[%s18415_s3 + $0x198] sm:$0xff] }
0x1738   : > { %v13178_v53 = vpop.eup %13177 }
0x1739   : > { %v7429_v47 = vmul.f32 %v13178_v53, %v16756_v57  ;;  %v7400_v46 = vadd.f32 1e-05, %v7384_v52  ;;  %v7430_v14 = vmul.f32 %v13178_v53, %v16759_v31  ;;  %v17038_v50 = vadd.f32 %v17031_v5, %v7471_v9  ;;  %v7611_v57 = vld [vmem:[%s18415_s3 + $0x190] sm:$0xff] }
0x173a   : > { %v7351_v42 = vpop.xlane.xlu0 %7350  ;;  %v17041_v44 = vadd.f32 %v17028_v19, %v7470_v49 }
0x173b   : > { %v7472_v10 = vmul.f32 %v17018_v18, %v7429_v47  ;;  %13185 = vrsqrt.f32 %v7400_v46  ;;  %v7385_v8 = vmul.f32 0.00390625, %v7351_v42  ;;  %v7473_v3 = vmul.f32 %v17021_v20, %v7430_v14 }
0x173c   : > { %v13180_v48 = vpop.eup %13179  ;;  %v11164_v46 = vcombine.high %v7611_v57, %v7615_v35  ;;  %v11166_v14 = vcombine.high %v7612_v1, %v7616_v59 }
0x173d   : > { %v7401_v30 = vadd.f32 1e-05, %v7385_v8  ;;  %v17047_v31 = vadd.f32 %v17031_v5, %v7473_v3  ;;  %v17050_v26 = vadd.f32 %v17028_v19, %v7472_v10  ;;  %v7432_v36 = vmul.f32 %v13180_v48, %v16769_v58  ;;  %v7603_v8 = vld [vmem:[%s18415_s3 + $0x150] sm:$0xff] }
0x173e   : > { %v7354_v29 = vpop.xlane.xlu1 %7353  ;;  %v7431_v61 = vmul.f32 %v13180_v48, %v16766_v12  ;;  %v7607_v3 = vld [vmem:[%s18415_s3 + $0x170] sm:$0xff]  ;;  %v11163_v48 = vcombine.low %v7611_v57, %v7615_v35 }
0x173f   : > { %13187 = vrsqrt.f32 %v7401_v30  ;;  %v7386_v52 = vmul.f32 0.00390625, %v7354_v29  ;;  %v17065_v58 = vpack.c.bf16 %v17047_v31, %v17038_v50  ;;  %v17069_v53 = vpack.c.bf16 %v17050_v26, %v17041_v44 }
0x1740   : > { %v13182_v49 = vpop.eup %13181  ;;  %v7475_v9 = vmul.f32 %v17021_v20, %v7432_v36  ;;  %v7474_v47 = vmul.f32 %v17018_v18, %v7431_v61  ;;  %v11156_v35 = vcombine.high %v7603_v8, %v7607_v3  ;;  %v11155_v61 = vcombine.low %v7603_v8, %v7607_v3 }
0x1741   : > { %v7402_v42 = vadd.f32 1e-05, %v7386_v52  ;;  %8402 = vmatprep.mubr.bf16.mxu0 %v17065_v58  ;;  %8515 = vmatprep.mubr.bf16.mxu1 %v17065_v58  ;;  %v7434_v12 = vmul.f32 %v13182_v49, %v16779_v34  ;;  %v7433_v10 = vmul.f32 %v13182_v49, %v16776_v54  ;;  %v11165_v54 = vcombine.low %v7612_v1, %v7616_v59  ;;  %v7595_v1 = vld [vmem:[%s18415_s3 + $0x110] sm:$0xff]  ;;  %v7596_v52 = vld [vmem:[%s18415_s3 + $0x118] sm:$0xff] }
0x1742   : > { %8403 = vmatmul.mubr.bf16.vlgmr.msra.gmra.mxu0 %v17069_v53  ;;  %8516 = vmatmul.mubr.bf16.vlgmr.msra.gmra.mxu1 %v17069_v53  ;;  %v17094_v29 = vadd.f32 %v17031_v5, %v7475_v9  ;;  %v17097_v57 = vadd.f32 %v17028_v19, %v7474_v47  ;;  %v7599_v59 = vld [vmem:[%s18415_s3 + $0x130] sm:$0xff]  ;;  %v7600_v49 = vld [vmem:[%s18415_s3 + $0x138] sm:$0xff]  ;;  %v11157_v9 = vcombine.low %v7604_v56, %v7608_v13 }
0x1743   : > { %13189 = vrsqrt.f32 %v7402_v42  ;;  %v7477_v30 = vmul.f32 %v17021_v20, %v7434_v12  ;;  %v7476_v34 = vmul.f32 %v17018_v18, %v7433_v10  ;;  %8597 = vmatpush1.bf16.msra.mxu0 %v11171_v21  ;;  %8710 = vmatpush1.bf16.msra.mxu1 %v11173_v16  ;;  %v11158_v47 = vcombine.high %v7604_v56, %v7608_v13 }
0x1744   : > { %v13184_v36 = vpop.eup %13183  ;;  %8598 = vmatprep.subr.bf16.mxu0 %v11164_v46  ;;  %8711 = vmatprep.subr.bf16.mxu1 %v11166_v14  ;;  %v11148_v12 = vcombine.high %v7595_v1, %v7599_v59  ;;  %v11150_v3 = vcombine.high %v7596_v52, %v7600_v49 }
0x1745   : > { %v17106_v51 = vadd.f32 %v17031_v5, %v7477_v30  ;;  %v17109_v21 = vadd.f32 %v17028_v19, %v7476_v34  ;;  %v7436_v62 = vmul.f32 %v13184_v36, %v16789_v27  ;;  %v7435_v16 = vmul.f32 %v13184_v36, %v16786_v15  ;;  %v7591_v30 = vld [vmem:[%s18415_s3 + $0xf0] sm:$0xff] }
0x1746   : > { %v11147_v34 = vcombine.low %v7595_v1, %v7599_v59  ;;  %v7579_v1 = vld [vmem:[%s18415_s3 + $0x90] sm:$0xff] }
0x1747   : > { %v17127_v15 = vpack.c.bf16 %v17106_v51, %v17094_v29  ;;  %v17131_v27 = vpack.c.bf16 %v17109_v21, %v17097_v57  ;;  %8599 = vmatpush1.bf16.msra.mxu0 %v11163_v48  ;;  %v7479_v14 = vmul.f32 %v17021_v20, %v7436_v62  ;;  %v7478_v42 = vmul.f32 %v17018_v18, %v7435_v16  ;;  %v7587_v48 = vld [vmem:[%s18415_s3 + $0xd0] sm:$0xff]  ;;  %v7588_v62 = vld [vmem:[%s18415_s3 + $0xd8] sm:$0xff] }
0x1748   : > { %v13186_v46 = vpop.eup %13185  ;;  %8712 = vmatpush1.bf16.msra.mxu1 %v11165_v54  ;;  %8600 = vmatprep.subr.bf16.mxu0 %v11156_v35  ;;  %v11140_v13 = vcombine.high %v7587_v48, %v7591_v30  ;;  %v7592_v16 = vld [vmem:[%s18415_s3 + $0xf8] sm:$0xff] }
0x1749   : > { %8412 = vmatprep.mubr.bf16.mxu0 %v17127_v15  ;;  %8525 = vmatprep.mubr.bf16.mxu1 %v17127_v15  ;;  %v7438_v10 = vmul.f32 %v13186_v46, %v16811_v38  ;;  %v7437_v8 = vmul.f32 %v13186_v46, %v16808_v22  ;;  %v11149_v22 = vcombine.low %v7596_v52, %v7600_v49  ;;  %v7584_v46 = vld [vmem:[%s18415_s3 + $0xb8] sm:$0xff] }
0x174a   : > { %8413 = vmatmul.mubr.bf16.gmra.mxu0 %v17131_v27  ;;  %8526 = vmatmul.mubr.bf16.gmra.mxu1 %v17131_v27  ;;  %v17150_v35 = vadd.f32 %v17031_v5, %v7479_v14  ;;  %v17153_v56 = vadd.f32 %v17028_v19, %v7478_v42  ;;  %v11139_v14 = vcombine.low %v7587_v48, %v7591_v30 }
0x174b   : > { %v7481_v54 = vmul.f32 %v17021_v20, %v7438_v10  ;;  %v7480_v38 = vmul.f32 %v17018_v18, %v7437_v8  ;;  %8713 = vmatprep.subr.bf16.mxu1 %v11158_v47  ;;  %8601 = vmatpush1.bf16.msra.mxu0 %v11155_v61  ;;  %v7580_v47 = vld [vmem:[%s18415_s3 + $0x98] sm:$0xff] }
0x174c   : > { %v13188_v36 = vpop.eup %13187  ;;  %18814 = vst [vmem:[#allocation40_spill] sm:$0xff] %v17150_v35  ;;  %8714 = vmatpush1.bf16.msra.mxu1 %v11157_v9  ;;  %8602 = vmatprep.subr.bf16.mxu0 %v11148_v12  ;;  %v7583_v9 = vld [vmem:[%s18415_s3 + $0xb0] sm:$0xff]  ;;  %v11142_v12 = vcombine.high %v7588_v62, %v7592_v16 }
0x174d   : > { %v17165_v59 = vadd.f32 %v17031_v5, %v7481_v54  ;;  %v17168_v61 = vadd.f32 %v17028_v19, %v7480_v38  ;;  %v7440_v52 = vmul.f32 %v13188_v36, %v16833_v11  ;;  %v7439_v49 = vmul.f32 %v13188_v36, %v16830_v17  ;;  %8715 = vmatprep.subr.bf16.mxu1 %v11150_v3 }
0x174e   : > { %v11141_v11 = vcombine.low %v7588_v62, %v7592_v16  ;;  %v11132_v3 = vcombine.high %v7579_v1, %v7583_v9  ;;  %v11134_v54 = vcombine.high %v7580_v47, %v7584_v46  ;;  %v7572_v16 = vld [vmem:[%s18415_s3 + $0x58] sm:$0xff] }
0x174f   : > { %18815 = vst [vmem:[#allocation42_spill] sm:$0xff] %v17165_v59  ;;  %18816 = vst [vmem:[#allocation43_spill] sm:$0xff] %v17168_v61  ;;  %v17183_v42 = vpack.c.bf16 %v17165_v59, %v17150_v35  ;;  %v17187_v17 = vpack.c.bf16 %v17168_v61, %v17153_v56  ;;  %8603 = vmatpush1.bf16.msra.mxu0 %v11147_v34  ;;  %v7483_v8 = vmul.f32 %v17021_v20, %v7440_v52  ;;  %v7571_v34 = vld [vmem:[%s18415_s3 + $0x50] sm:$0xff]  ;;  %v7576_v52 = vld [vmem:[%s18415_s3 + $0x78] sm:$0xff] }
0x1750   : > { %v13190_v10 = vpop.eup %13189  ;;  %8716 = vmatpush1.bf16.msra.mxu1 %v11149_v22  ;;  %8604 = vmatprep.subr.bf16.mxu0 %v11140_v13  ;;  %v7482_v38 = vmul.f32 %v17018_v18, %v7439_v49  ;;  %v7575_v22 = vld [vmem:[%s18415_s3 + $0x70] sm:$0xff]  ;;  %v11133_v13 = vcombine.low %v7580_v47, %v7584_v46 }
0x1751   : > { %8422 = vmatprep.mubr.bf16.mxu0 %v17183_v42  ;;  %8535 = vmatprep.mubr.bf16.mxu1 %v17183_v42  ;;  %v7442_v48 = vmul.f32 %v13190_v10, %v16855_v45  ;;  %v7441_v30 = vmul.f32 %v13190_v10, %v16852_v28  ;;  %v11131_v28 = vcombine.low %v7579_v1, %v7583_v9  ;;  %v7563_v47 = vld [vmem:[%s18415_s3 + $0x10] sm:$0xff] }
0x1752   : > { %8423 = vmatmul.mubr.bf16.gmra.mxu0 %v17187_v17  ;;  %8536 = vmatmul.mubr.bf16.gmra.mxu1 %v17187_v17  ;;  %v11124_v62 = vcombine.high %v7571_v34, %v7575_v22  ;;  %v17212_v49 = vadd.f32 %v17031_v5, %v7483_v8  ;;  %v17218_v1 = vadd.f32 %v17028_v19, %v7482_v38  ;;  %v7567_v46 = vld [vmem:[%s18415_s3 + $0x30] sm:$0xff] }
0x1753   : > { %v7485_v36 = vmul.f32 %v17021_v20, %v7442_v48  ;;  %v7484_v45 = vmul.f32 %v17018_v18, %v7441_v30  ;;  %8717 = vmatprep.subr.bf16.mxu1 %v11142_v12  ;;  %8605 = vmatpush1.bf16.msra.mxu0 %v11139_v14  ;;  %v7564_v14 = vld [vmem:[%s18415_s3 + $0x18] sm:$0xff]  ;;  %v11125_v48 = vcombine.low %v7572_v16, %v7576_v52  ;;  %v7627_v59 = vld [vmem:[%s18415_s3 + $0x210] sm:$0xff] }
0x1754   : > { %8718 = vmatpush1.bf16.msra.mxu1 %v11141_v11  ;;  %8606 = vmatprep.subr.bf16.mxu0 %v11132_v3  ;;  %18817 = vst [vmem:[#allocation59_spill] sm:$0xff] %v17212_v49  ;;  %18819 = vst [vmem:[#allocation55_spill] sm:$0xff] %v17218_v1  ;;  %v7568_v11 = vld [vmem:[%s18415_s3 + $0x38] sm:$0xff]  ;;  %v11123_v3 = vcombine.low %v7571_v34, %v7575_v22  ;;  %v11116_v30 = vcombine.high %v7563_v47, %v7567_v46 }
0x1755   : > { %v17215_v10 = vadd.f32 %v17031_v5, %v7485_v36  ;;  %v17221_v9 = vadd.f32 %v17028_v19, %v7484_v45  ;;  %8719 = vmatprep.subr.bf16.mxu1 %v11134_v54  ;;  %v11126_v54 = vcombine.high %v7572_v16, %v7576_v52  ;;  %v11118_v38 = vcombine.high %v7564_v14, %v7568_v11  ;;  %v7683_v36 = vld [vmem:[%s18415_s3 + $0x3d0] sm:$0xff]  ;;  %v7684_v34 = vld [vmem:[%s18415_s3 + $0x3d8] sm:$0xff] }
0x1756   : > { %v7687_v45 = vld [vmem:[%s18415_s3 + $0x3f0] sm:$0xff]  ;;  %v7688_v22 = vld [vmem:[%s18415_s3 + $0x3f8] sm:$0xff] }
0x1757   : > { %18818 = vst [vmem:[#allocation24_spill] sm:$0xff] %v17215_v10  ;;  %18820 = vst [vmem:[#allocation52_spill] sm:$0xff] %v17221_v9  ;;  %v17237_v12 = vpack.c.bf16 %v17215_v10, %v17212_v49  ;;  %v17241_v8 = vpack.c.bf16 %v17221_v9, %v17218_v1  ;;  %8607 = vmatpush1.bf16.msra.mxu0 %v11131_v28  ;;  %v11115_v28 = vcombine.low %v7563_v47, %v7567_v46  ;;  %v7675_v52 = vld [vmem:[%s18415_s3 + $0x390] sm:$0xff]  ;;  %v7680_v47 = vld [vmem:[%s18415_s3 + $0x3b8] sm:$0xff] }
0x1758   : > { %8720 = vmatpush1.bf16.msra.mxu1 %v11133_v13  ;;  %8608 = vmatprep.subr.bf16.mxu0 %v11124_v62  ;;  %v11117_v13 = vcombine.low %v7564_v14, %v7568_v11  ;;  %v11236_v62 = vcombine.high %v7683_v36, %v7687_v45  ;;  %v11238_v16 = vcombine.high %v7684_v34, %v7688_v22  ;;  %v7679_v10 = vld [vmem:[%s18415_s3 + $0x3b0] sm:$0xff] }
0x1759   : > { %8432 = vmatprep.mubr.bf16.mxu0 %v17237_v12  ;;  %8545 = vmatprep.mubr.bf16.mxu1 %v17237_v12  ;;  %v11235_v46 = vcombine.low %v7683_v36, %v7687_v45  ;;  %v11237_v14 = vcombine.low %v7684_v34, %v7688_v22  ;;  %v11228_v11 = vcombine.high %v7675_v52, %v7679_v10  ;;  %v7668_v36 = vld [vmem:[%s18415_s3 + $0x358] sm:$0xff]  ;;  %v7663_v49 = vld [vmem:[%s18415_s3 + $0x330] sm:$0xff] }
0x175a   : > { %8433 = vmatmul.mubr.bf16.gmra.mxu0 %v17241_v8  ;;  %8546 = vmatmul.mubr.bf16.gmra.mxu1 %v17241_v8  ;;  %v7672_v45 = vld [vmem:[%s18415_s3 + $0x378] sm:$0xff]  ;;  %v11227_v34 = vcombine.low %v7675_v52, %v7679_v10 }
0x175b   : > { %8721 = vmatprep.subr.bf16.mxu1 %v11126_v54  ;;  %8609 = vmatpush1.bf16.msra.mxu0 %v11123_v3  ;;  %v7676_v54 = vld [vmem:[%s18415_s3 + $0x398] sm:$0xff] }
0x175c   : > { %8722 = vmatpush1.bf16.msra.mxu1 %v11125_v48  ;;  %8610 = vmatprep.subr.bf16.mxu0 %v11116_v30  ;;  %v11230_v48 = vcombine.high %v7676_v54, %v7680_v47  ;;  %v7667_v30 = vld [vmem:[%s18415_s3 + $0x350] sm:$0xff]  ;;  %v7660_v10 = vld [vmem:[%s18415_s3 + $0x318] sm:$0xff] }
0x175d   : > { %8723 = vmatprep.subr.bf16.mxu1 %v11118_v38  ;;  %v7671_v38 = vld [vmem:[%s18415_s3 + $0x370] sm:$0xff] }
0x175e   : > { %v11219_v52 = vcombine.low %v7667_v30, %v7671_v38 }
0x175f   : > { %8611 = vmatpush1.bf16.msra.mxu0 %v11115_v28  ;;  %v11229_v28 = vcombine.low %v7676_v54, %v7680_v47  ;;  %v11221_v47 = vcombine.low %v7668_v36, %v7672_v45 }
0x1760   : > { %8724 = vmatpush1.bf16.msra.mxu1 %v11117_v13  ;;  %8612 = vmatprep.subr.bf16.mxu0 %v11236_v62  ;;  %v11220_v13 = vcombine.high %v7667_v30, %v7671_v38  ;;  %v7656_v30 = vld [vmem:[%s18415_s3 + $0x2f8] sm:$0xff] }
0x1761   : > { %v7357_v3 = vpop.xlane.xlu0 %7356  ;;  %8725 = vmatprep.subr.bf16.mxu1 %v11238_v16  ;;  %v11222_v16 = vcombine.high %v7668_v36, %v7672_v45 }
0x1762   : > { %v7387_v9 = vmul.f32 0.00390625, %v7357_v3  ;;  %v7659_v3 = vld [vmem:[%s18415_s3 + $0x310] sm:$0xff] }
0x1763   : > { %8613 = vmatpush2.bf16.msra.mxu0 %v11235_v46  ;;  %v11212_v46 = vcombine.high %v7659_v3, %v7663_v49  ;;  %v11211_v38 = vcombine.low %v7659_v3, %v7663_v49  ;;  %v7644_v49 = vld [vmem:[%s18415_s3 + $0x298] sm:$0xff] }
0x1764   : > { %v7403_v22 = vadd.f32 1e-05, %v7387_v9  ;;  %8726 = vmatpush2.bf16.msra.mxu1 %v11237_v14  ;;  %8614 = vmatprep.subr.bf16.mxu0 %v11228_v11  ;;  %v7664_v9 = vld [vmem:[%s18415_s3 + $0x338] sm:$0xff] }
0x1765   : > { %v7360_v62 = vpop.xlane.xlu1 %7359  ;;  %8727 = vmatprep.subr.bf16.mxu1 %v11230_v48  ;;  %v11214_v11 = vcombine.high %v7660_v10, %v7664_v9  ;;  %v7651_v48 = vld [vmem:[%s18415_s3 + $0x2d0] sm:$0xff]  ;;  %v11213_v45 = vcombine.low %v7660_v10, %v7664_v9  ;;  %v7648_v3 = vld [vmem:[%s18415_s3 + $0x2b8] sm:$0xff] }
0x1766   : > { %13191 = vrsqrt.f32 %v7403_v22  ;;  %v7388_v1 = vmul.f32 0.00390625, %v7360_v62  ;;  %v7655_v22 = vld [vmem:[%s18415_s3 + $0x2f0] sm:$0xff] }
0x1767   : > { %8615 = vmatpush2.bf16.msra.mxu0 %v11227_v34  ;;  %v11204_v34 = vcombine.high %v7651_v48, %v7655_v22  ;;  %v11203_v10 = vcombine.low %v7651_v48, %v7655_v22  ;;  %v7636_v48 = vld [vmem:[%s18415_s3 + $0x258] sm:$0xff] }
0x1768   : > { %v7404_v54 = vadd.f32 1e-05, %v7388_v1  ;;  %8728 = vmatpush2.bf16.msra.mxu1 %v11229_v28  ;;  %8616 = vmatprep.subr.bf16.mxu0 %v11220_v13  ;;  %v7652_v1 = vld [vmem:[%s18415_s3 + $0x2d8] sm:$0xff] }
0x1769   : > { %v7363_v14 = vpop.xlane.xlu0 %7362  ;;  %8729 = vmatprep.subr.bf16.mxu1 %v11222_v16  ;;  %v11206_v13 = vcombine.high %v7652_v1, %v7656_v30  ;;  %v7643_v16 = vld [vmem:[%s18415_s3 + $0x290] sm:$0xff]  ;;  %v7640_v22 = vld [vmem:[%s18415_s3 + $0x278] sm:$0xff] }
0x176a   : > { %13193 = vrsqrt.f32 %v7404_v54  ;;  %v7389_v62 = vmul.f32 0.00390625, %v7363_v14  ;;  %v7647_v54 = vld [vmem:[%s18415_s3 + $0x2b0] sm:$0xff] }
0x176b   : > { %8617 = vmatpush2.bf16.msra.mxu0 %v11219_v52  ;;  %v11205_v52 = vcombine.low %v7652_v1, %v7656_v30  ;;  %v11195_v30 = vcombine.low %v7643_v16, %v7647_v54 }
0x176c   : > { %v7405_v36 = vadd.f32 1e-05, %v7389_v62  ;;  %8730 = vmatpush2.bf16.msra.mxu1 %v11221_v47  ;;  %8618 = vmatprep.subr.bf16.mxu0 %v11212_v46  ;;  %v11196_v47 = vcombine.high %v7643_v16, %v7647_v54  ;;  %v7635_v62 = vld [vmem:[%s18415_s3 + $0x250] sm:$0xff] }
0x176d   : > { %v7366_v28 = vpop.xlane.xlu1 %7365  ;;  %8731 = vmatprep.subr.bf16.mxu1 %v11214_v11  ;;  %v11198_v11 = vcombine.high %v7644_v49, %v7648_v3  ;;  %v7631_v16 = vld [vmem:[%s18415_s3 + $0x230] sm:$0xff] }
0x176e   : > { %13195 = vrsqrt.f32 %v7405_v36  ;;  %v7390_v14 = vmul.f32 0.00390625, %v7366_v28  ;;  %v7639_v36 = vld [vmem:[%s18415_s3 + $0x270] sm:$0xff] }
0x176f   : > { %8619 = vmatpush2.bf16.msra.mxu0 %v11211_v38  ;;  %v11197_v38 = vcombine.low %v7644_v49, %v7648_v3 }
0x1770   : > { %v7406_v9 = vadd.f32 1e-05, %v7390_v14  ;;  %8732 = vmatpush2.bf16.msra.mxu1 %v11213_v45  ;;  %8620 = vmatprep.subr.bf16.mxu0 %v11204_v34  ;;  %v11188_v14 = vcombine.high %v7635_v62, %v7639_v36 }
0x1771   : > { %v7369_v46 = vpop.xlane.xlu0 %7368  ;;  %8733 = vmatprep.subr.bf16.mxu1 %v11206_v13 }
0x1772   : > { %13197 = vrsqrt.f32 %v7406_v9  ;;  %v7391_v28 = vmul.f32 0.00390625, %v7369_v46  ;;  %v11190_v46 = vcombine.high %v7636_v48, %v7640_v22 }
0x1773   : > { %v13192_v1 = vpop.eup %13191  ;;  %8621 = vmatpush2.bf16.msra.mxu0 %v11203_v10 }
0x1774   : > { %v7407_v45 = vadd.f32 1e-05, %v7391_v28  ;;  %v7444_v34 = vmul.f32 %v13192_v1, %v16913_v43  ;;  %v7443_v13 = vmul.f32 %v13192_v1, %v16910_v23  ;;  %8734 = vmatpush2.bf16.msra.mxu1 %v11205_v52  ;;  %8622 = vmatprep.subr.bf16.mxu0 %v11196_v47  ;;  %v7628_v23 = vld [vmem:[%s18415_s3 + $0x218] sm:$0xff]  ;;  %v11187_v52 = vcombine.low %v7635_v62, %v7639_v36 }
0x1775   : > { %v7372_v9 = vpop.xlane.xlu1 %7371  ;;  %8735 = vmatprep.subr.bf16.mxu1 %v11198_v11  ;;  %v7632_v43 = vld [vmem:[%s18415_s3 + $0x238] sm:$0xff]  ;;  %v11189_v47 = vcombine.low %v7636_v48, %v7640_v22 }
0x1776   : > { %13199 = vrsqrt.f32 %v7407_v45  ;;  %v7392_v54 = vmul.f32 0.00390625, %v7372_v9  ;;  %v7487_v3 = vmul.f32 %v17021_v20, %v7444_v34  ;;  %v7486_v10 = vmul.f32 %v17018_v18, %v7443_v13 }
0x1777   : > { %v13194_v49 = vpop.eup %13193  ;;  %8623 = vmatpush2.bf16.msra.mxu0 %v11195_v30  ;;  %v11180_v45 = vcombine.high %v7627_v59, %v7631_v16  ;;  %v11182_v61 = vcombine.high %v7628_v23, %v7632_v43 }
0x1778   : > { %v7408_v11 = vadd.f32 1e-05, %v7392_v54  ;;  %v7446_v28 = vmul.f32 %v13194_v49, %v16923_v40  ;;  %v7445_v1 = vmul.f32 %v13194_v49, %v16920_v7  ;;  %8736 = vmatpush2.bf16.msra.mxu1 %v11197_v38  ;;  %8624 = vmatprep.subr.bf16.mxu0 %v11188_v14  ;;  %v17352_v62 = vadd.f32 %v17031_v5, %v7487_v3 }
0x1779   : > { %v7375_v9 = vpop.xlane.xlu0 %7374  ;;  %8737 = vmatprep.subr.bf16.mxu1 %v11190_v46  ;;  %v17355_v40 = vadd.f32 %v17028_v19, %v7486_v10  ;;  %v11179_v7 = vcombine.low %v7627_v59, %v7631_v16  ;;  %v11181_v54 = vcombine.low %v7628_v23, %v7632_v43  ;;  %v12473_v16 = vld [vmem:[#allocation8 + $0x74] ss:$8 sps:$4 sm:$0xff]  }
0x177a   : > { %13201 = vrsqrt.f32 %v7408_v11  ;;  %v7393_v35 = vmul.f32 0.00390625, %v7375_v9  ;;  %v7489_v34 = vmul.f32 %v17021_v20, %v7446_v28  ;;  %v7488_v13 = vmul.f32 %v17018_v18, %v7445_v1  ;;  %18821 = vst [vmem:[#allocation53_spill] sm:$0xff] %v17352_v62 }
0x177b   : > { %v13196_v30 = vpop.eup %13195  ;;  %18822 = vst [vmem:[#allocation51_spill] sm:$0xff] %v17355_v40  ;;  %8625 = vmatpush2.bf16.msra.mxu0 %v11187_v52 }
0x177c   : > { %v7409_v36 = vadd.f32 1e-05, %v7393_v35  ;;  %v17358_v48 = vadd.f32 %v17031_v5, %v7489_v34  ;;  %v17361_v22 = vadd.f32 %v17028_v19, %v7488_v13  ;;  %v7448_v38 = vmul.f32 %v13196_v30, %v16933_v24  ;;  %8738 = vmatpush2.bf16.msra.mxu1 %v11189_v47  ;;  %8626 = vmatprep.subr.bf16.mxu0 %v11180_v45 }
0x177d   : > { %v7378_v14 = vpop.xlane.xlu1 %7377  ;;  %v7447_v46 = vmul.f32 %v13196_v30, %v16930_v60  ;;  %8739 = vmatprep.subr.bf16.mxu1 %v11182_v61  ;;  %v12476_v60 = vld [vmem:[#allocation8 + $0x174] ss:$8 sps:$4 sm:$0xff]  }
0x177e   : > { %18823 = vst [vmem:[#allocation47_spill] sm:$0xff] %v17358_v48  ;;  %18824 = vst [vmem:[#allocation86_spill] sm:$0xff] %v17361_v22  ;;  %13203 = vrsqrt.f32 %v7409_v36  ;;  %v7394_v49 = vmul.f32 0.00390625, %v7378_v14  ;;  %v17367_v35 = vpack.c.bf16 %v17358_v48, %v17352_v62  ;;  %v17371_v59 = vpack.c.bf16 %v17361_v22, %v17355_v40  ;;  %v439_v40 = vld [vmem:[#allocation9 + $0x10] sm:$0x3] }
0x177f   : > { %v13198_v3 = vpop.eup %13197  ;;  %v7491_v24 = vmul.f32 %v17021_v20, %v7448_v38  ;;  %v7490_v10 = vmul.f32 %v17018_v18, %v7447_v46  ;;  %8627 = vmatpush2.bf16.msra.mxu0 %v11179_v7 }
0x1780   : > { %v7410_v23 = vadd.f32 1e-05, %v7394_v49  ;;  %8442 = vmatprep.mubr.bf16.mxu0 %v17367_v35  ;;  %8555 = vmatprep.mubr.bf16.mxu1 %v17367_v35  ;;  %v7450_v61 = vmul.f32 %v13198_v3, %v16971_v37  ;;  %v7449_v43 = vmul.f32 %v13198_v3, %v16968_v6 }
0x1781   : > { %8443 = vmatmul.mubr.bf16.gmra.mxu0 %v17371_v59  ;;  %8556 = vmatmul.mubr.bf16.gmra.mxu1 %v17371_v59  ;;  %v17384_v28 = vadd.f32 %v17031_v5, %v7491_v24  ;;  %v17387_v1 = vadd.f32 %v17028_v19, %v7490_v10 }
0x1782   : > { %13205 = vrsqrt.f32 %v7410_v23  ;;  %v7493_v52 = vmul.f32 %v17021_v20, %v7450_v61  ;;  %v7492_v47 = vmul.f32 %v17018_v18, %v7449_v43  ;;  %8740 = vmatpush2.bf16.msra.mxu1 %v11181_v54  ;;  %9793 = vmatprep.subr.bf16.mxu0 %v12473_v16 }
0x1783   : > { %v13200_v11 = vpop.eup %13199  ;;  %18825 = vst [vmem:[#allocation36_spill] sm:$0xff] %v17384_v28  ;;  %18826 = vst [vmem:[#allocation16_spill] sm:$0xff] %v17387_v1  ;;  %9906 = vmatprep.subr.bf16.mxu1 %v12476_v60 }
0x1784   : > { %v17390_v6 = vadd.f32 %v17031_v5, %v7493_v52  ;;  %v17393_v37 = vadd.f32 %v17028_v19, %v7492_v47  ;;  %v7452_v45 = vmul.f32 %v13200_v11, %v16981_v32  ;;  %v7451_v9 = vmul.f32 %v13200_v11, %v16978_v2 }
0x1786   : > { %18827 = vst [vmem:[#allocation21_spill] sm:$0xff] %v17390_v6  ;;  %18828 = vst [vmem:[#allocation18_spill] sm:$0xff] %v17393_v37  ;;  %v17399_v34 = vpack.c.bf16 %v17390_v6, %v17384_v28  ;;  %v17403_v13 = vpack.c.bf16 %v17393_v37, %v17387_v1  ;;  %v7495_v7 = vmul.f32 %v17021_v20, %v7452_v45 }
0x1787   : > { %v13202_v30 = vpop.eup %13201  ;;  %v7494_v36 = vmul.f32 %v17018_v18, %v7451_v9  ;;  %v12482_v9 = vld [vmem:[#allocation8 + $0x164] ss:$8 sps:$4 sm:$0xff]  }
0x1788   : > { %8452 = vmatprep.mubr.bf16.mxu0 %v17399_v34  ;;  %8565 = vmatprep.mubr.bf16.mxu1 %v17399_v34  ;;  %v7454_v32 = vmul.f32 %v13202_v30, %v16991_v41  ;;  %v7453_v2 = vmul.f32 %v13202_v30, %v16988_v0  ;;  %v17416_v54 = vadd.f32 %v17031_v5, %v7495_v7  ;;  %v12477_v30 = vld [vmem:[#allocation8 + $0x60] ss:$8 sps:$4 sm:$0xff]  }
0x1789   : > { %8453 = vmatmul.mubr.bf16.gmra.mxu0 %v17403_v13  ;;  %8566 = vmatmul.mubr.bf16.gmra.mxu1 %v17403_v13  ;;  %v17419_v49 = vadd.f32 %v17028_v19, %v7494_v36  ;;  %v12480_v7 = vld [vmem:[#allocation8 + $0x160] ss:$8 sps:$4 sm:$0xff]   ;;  %v12485_v36 = vld [vmem:[#allocation8 + $0x54] ss:$8 sps:$4 sm:$0xff]  }
0x178a   : > { %v7497_v38 = vmul.f32 %v17021_v20, %v7454_v32  ;;  %v7496_v14 = vmul.f32 %v17018_v18, %v7453_v2  ;;  %18829 = vst [vmem:[#allocation19_spill] sm:$0xff] %v17416_v54  ;;  %v12483_v32 = vld [vmem:[#allocation8 + $0x50] ss:$8 sps:$4 sm:$0xff]  }
0x178b   : > { %v13204_v46 = vpop.eup %13203  ;;  %18830 = vst [vmem:[#allocation25_spill] sm:$0xff] %v17419_v49  ;;  %v12486_v2 = vld [vmem:[#allocation8 + $0x150] ss:$8 sps:$4 sm:$0xff]  }
0x178c   : > { %v17422_v16 = vadd.f32 %v17031_v5, %v7497_v38  ;;  %v17425_v0 = vadd.f32 %v17028_v19, %v7496_v14  ;;  %v7456_v41 = vmul.f32 %v13204_v46, %v17001_v39  ;;  %v7455_v3 = vmul.f32 %v13204_v46, %v16998_v63  ;;  %v12491_v38 = vld [vmem:[#allocation8 + $0x44] ss:$8 sps:$4 sm:$0xff]   ;;  %v12492_v14 = vld [vmem:[#allocation8 + $0x140] ss:$8 sps:$4 sm:$0xff]   ;;  %v12497_v46 = vld [vmem:[#allocation8 + $0x34] ss:$8 sps:$4 sm:$0xff]  }
0x178e   : > { %18831 = vst [vmem:[#allocation28_spill] sm:$0xff] %v17422_v16  ;;  %18832 = vst [vmem:[#allocation66_spill] sm:$0xff] %v17425_v0  ;;  %v17431_v24 = vpack.c.bf16 %v17422_v16, %v17416_v54  ;;  %v17435_v10 = vpack.c.bf16 %v17425_v0, %v17419_v49  ;;  %v7499_v23 = vmul.f32 %v17021_v20, %v7456_v41  ;;  %v12500_v41 = vld [vmem:[#allocation8 + $0x134] ss:$8 sps:$4 sm:$0xff]  }
0x178f   : > { %v13206_v60 = vpop.eup %13205  ;;  %v7498_v63 = vmul.f32 %v17018_v18, %v7455_v3  ;;  %v12495_v3 = vld [vmem:[#allocation8 + $0x30] ss:$8 sps:$4 sm:$0xff]  }
0x1790   : > { %8462 = vmatprep.mubr.bf16.mxu0 %v17431_v24  ;;  %8575 = vmatprep.mubr.bf16.mxu1 %v17431_v24  ;;  %v7458_v61 = vmul.f32 %v13206_v60, %v17011_v4  ;;  %v7457_v39 = vmul.f32 %v13206_v60, %v17008_v33  ;;  %v17448_v47 = vadd.f32 %v17031_v5, %v7499_v23  ;;  %v12498_v60 = vld [vmem:[#allocation8 + $0x130] ss:$8 sps:$4 sm:$0xff]   ;;  %v12503_v23 = vld [vmem:[#allocation8 + $0x24] ss:$8 sps:$4 sm:$0xff]  }
0x1791   : > { %8463 = vmatmul.mubr.bf16.gmra.mxu0 %v17435_v10  ;;  %8576 = vmatmul.mubr.bf16.gmra.mxu1 %v17435_v10  ;;  %v17454_v4 = vadd.f32 %v17028_v19, %v7498_v63  ;;  %v12512_v63 = vld [vmem:[#allocation8 + $0x114] ss:$8 sps:$4 sm:$0xff]  }
0x1792   : > { %v7501_v43 = vmul.f32 %v17021_v20, %v7458_v61  ;;  %v7500_v52 = vmul.f32 %v17018_v18, %v7457_v39  ;;  %18833 = vst [vmem:[#allocation31_spill] sm:$0xff] %v17448_v47  ;;  %v12471_v18 = vld [vmem:[#allocation8 + $0x70] ss:$8 sps:$4 sm:$0xff]   ;;  %v12504_v61 = vld [vmem:[#allocation8 + $0x120] ss:$8 sps:$4 sm:$0xff]  }
0x1793   : > { %18835 = vst [vmem:[#allocation34_spill] sm:$0xff] %v17454_v4  ;;  %v12509_v39 = vld [vmem:[#allocation8 + $0x14] ss:$8 sps:$4 sm:$0xff]  }
0x1794   : > { %v17451_v11 = vadd.f32 %v17031_v5, %v7501_v43  ;;  %v17457_v33 = vadd.f32 %v17028_v19, %v7500_v52  ;;  %v12474_v19 = vld [vmem:[#allocation8 + $0x170] ss:$8 sps:$4 sm:$0xff]   ;;  %v12479_v5 = vld [vmem:[#allocation8 + $0x64] ss:$8 sps:$4 sm:$0xff]  }
0x1795   : > { %v12507_v43 = vld [vmem:[#allocation8 + $0x10] ss:$8 sps:$4 sm:$0xff]  }
0x1796   : > { %18834 = vst [vmem:[#allocation30_spill] sm:$0xff] %v17451_v11  ;;  %18836 = vst [vmem:[#allocation77_spill] sm:$0xff] %v17457_v33  ;;  %v17461_v45 = vpack.c.bf16 %v17451_v11, %v17448_v47  ;;  %v17465_v20 = vpack.c.bf16 %v17457_v33, %v17454_v4  ;;  %v12510_v52 = vld [vmem:[#allocation8 + $0x110] ss:$8 sps:$4 sm:$0xff]  }
0x1798   : > { %8472 = vmatprep.mubr.bf16.mxu0 %v17461_v45  ;;  %8585 = vmatprep.mubr.bf16.mxu1 %v17461_v45 }
0x1799   : > { %8473 = vmatmul.mubr.bf16.gmra.mxu0 %v17465_v20  ;;  %8586 = vmatmul.mubr.bf16.gmra.mxu1 %v17465_v20 }
0x179a   : > { %8628 = vmatprep.mubr.bf16.mxu0 %v17065_v58  ;;  %8741 = vmatprep.mubr.bf16.mxu1 %v17065_v58  ;;  %v12488_v58 = vld [vmem:[#allocation8 + $0x154] ss:$8 sps:$4 sm:$0xff]  }
0x17a1   : > { %8629 = vmatmul.mubr.bf16.vlgmr.msra.gmra.mxu0 %v17069_v53  ;;  %8742 = vmatmul.mubr.bf16.vlgmr.msra.gmra.mxu1 %v17069_v53  ;;  %v12494_v53 = vld [vmem:[#allocation8 + $0x144] ss:$8 sps:$4 sm:$0xff]  }
0x17a2   : > { %8638 = vmatprep.mubr.bf16.mxu0 %v17127_v15  ;;  %8751 = vmatprep.mubr.bf16.mxu1 %v17127_v15  ;;  %v12489_v15 = vld [vmem:[#allocation8 + $0x40] ss:$8 sps:$4 sm:$0xff]  }
0x17a3   : > { %9794 = vmatpush1.bf16.msra.mxu0 %v12471_v18  ;;  %9907 = vmatpush1.bf16.msra.mxu1 %v12474_v19  ;;  %v12515_v18 = vld [vmem:[#allocation8 + $0x4] ss:$8 sps:$4 sm:$0xff]   ;;  %v12516_v19 = vld [vmem:[#allocation8 + $0x100] ss:$8 sps:$4 sm:$0xff]  }
0x17a4   : > { %9795 = vmatprep.subr.bf16.mxu0 %v12479_v5  ;;  %9908 = vmatprep.subr.bf16.mxu1 %v12482_v9  ;;  %v12521_v5 = vld [vmem:[#allocation8 + $0xf4] ss:$8 sps:$4 sm:$0xff]  }
0x17a5   : > { %v12524_v9 = vld [vmem:[#allocation8 + $0x1f4] ss:$8 sps:$4 sm:$0xff]  }
0x17a7   : > { %9796 = vmatpush1.bf16.msra.mxu0 %v12477_v30  ;;  %9909 = vmatpush1.bf16.msra.mxu1 %v12480_v7  ;;  %v12519_v30 = vld [vmem:[#allocation8 + $0xf0] ss:$8 sps:$4 sm:$0xff]  }
0x17a8   : > { %9797 = vmatprep.subr.bf16.mxu0 %v12485_v36  ;;  %9910 = vmatprep.subr.bf16.mxu1 %v12488_v58  ;;  %v12522_v7 = vld [vmem:[#allocation8 + $0x1f0] ss:$8 sps:$4 sm:$0xff]   ;;  %v12527_v36 = vld [vmem:[#allocation8 + $0xe4] ss:$8 sps:$4 sm:$0xff]   ;;  %v12528_v58 = vld [vmem:[#allocation8 + $0x1e0] ss:$8 sps:$4 sm:$0xff]  }
0x17a9   : > { %8639 = vmatmul.mubr.bf16.gmra.mxu0 %v17131_v27  ;;  %8752 = vmatmul.mubr.bf16.gmra.mxu1 %v17131_v27  ;;  %v12506_v27 = vld [vmem:[#allocation8 + $0x124] ss:$8 sps:$4 sm:$0xff]  }
0x17aa   : > { %8648 = vmatprep.mubr.bf16.mxu0 %v17183_v42  ;;  %8761 = vmatprep.mubr.bf16.mxu1 %v17183_v42  ;;  %v12501_v42 = vld [vmem:[#allocation8 + $0x20] ss:$8 sps:$4 sm:$0xff]  }
0x17ab   : > { %9798 = vmatpush1.bf16.msra.mxu0 %v12483_v32  ;;  %9911 = vmatpush1.bf16.msra.mxu1 %v12486_v2  ;;  %v12533_v32 = vld [vmem:[#allocation8 + $0xd4] ss:$8 sps:$4 sm:$0xff]  }
0x17ac   : > { %9799 = vmatprep.subr.bf16.mxu0 %v12491_v38  ;;  %9912 = vmatprep.subr.bf16.mxu1 %v12494_v53  ;;  %v12536_v2 = vld [vmem:[#allocation8 + $0x1d4] ss:$8 sps:$4 sm:$0xff]   ;;  %v12531_v38 = vld [vmem:[#allocation8 + $0xd0] ss:$8 sps:$4 sm:$0xff]  }
0x17ad   : > { %v12534_v53 = vld [vmem:[#allocation8 + $0x1d0] ss:$8 sps:$4 sm:$0xff]  }
0x17af   : > { %9800 = vmatpush1.bf16.msra.mxu0 %v12489_v15  ;;  %9913 = vmatpush1.bf16.msra.mxu1 %v12492_v14  ;;  %v12539_v15 = vld [vmem:[#allocation8 + $0xc4] ss:$8 sps:$4 sm:$0xff]   ;;  %v12540_v14 = vld [vmem:[#allocation8 + $0x1c0] ss:$8 sps:$4 sm:$0xff]  }
0x17b0   : > { %9801 = vmatprep.subr.bf16.mxu0 %v12497_v46  ;;  %9914 = vmatprep.subr.bf16.mxu1 %v12500_v41  ;;  %v12545_v46 = vld [vmem:[#allocation8 + $0xb4] ss:$8 sps:$4 sm:$0xff]  }
0x17b1   : > { %8649 = vmatmul.mubr.bf16.gmra.mxu0 %v17187_v17  ;;  %8762 = vmatmul.mubr.bf16.gmra.mxu1 %v17187_v17  ;;  %v12518_v17 = vld [vmem:[#allocation8 + $0x104] ss:$8 sps:$4 sm:$0xff]   ;;  %v12548_v41 = vld [vmem:[#allocation8 + $0x1b4] ss:$8 sps:$4 sm:$0xff]  }
0x17b2   : > { %8658 = vmatprep.mubr.bf16.mxu0 %v17237_v12  ;;  %8771 = vmatprep.mubr.bf16.mxu1 %v17237_v12  ;;  %v12513_v12 = vld [vmem:[#allocation8] ss:$8 sps:$4 sm:$0xff]  }
0x17b3   : > { %9802 = vmatpush1.bf16.msra.mxu0 %v12495_v3  ;;  %9915 = vmatpush1.bf16.msra.mxu1 %v12498_v60  ;;  %v12543_v3 = vld [vmem:[#allocation8 + $0xb0] ss:$8 sps:$4 sm:$0xff]  }
0x17b4   : > { %9803 = vmatprep.subr.bf16.mxu0 %v12503_v23  ;;  %9916 = vmatprep.subr.bf16.mxu1 %v12506_v27  ;;  %v12546_v60 = vld [vmem:[#allocation8 + $0x1b0] ss:$8 sps:$4 sm:$0xff]   ;;  %v12551_v23 = vld [vmem:[#allocation8 + $0xa4] ss:$8 sps:$4 sm:$0xff]   ;;  %v12552_v27 = vld [vmem:[#allocation8 + $0x1a0] ss:$8 sps:$4 sm:$0xff]  }
0x17b7   : > { %9804 = vmatpush1.bf16.msra.mxu0 %v12501_v42  ;;  %9917 = vmatpush1.bf16.msra.mxu1 %v12504_v61  ;;  %v12557_v42 = vld [vmem:[#allocation8 + $0x94] ss:$8 sps:$4 sm:$0xff]  }
0x17b8   : > { %9805 = vmatprep.subr.bf16.mxu0 %v12509_v39  ;;  %9918 = vmatprep.subr.bf16.mxu1 %v12512_v63  ;;  %v12560_v61 = vld [vmem:[#allocation8 + $0x194] ss:$8 sps:$4 sm:$0xff]   ;;  %v12555_v39 = vld [vmem:[#allocation8 + $0x90] ss:$8 sps:$4 sm:$0xff]  }
0x17b9   : > { %8659 = vmatmul.mubr.bf16.gmra.mxu0 %v17241_v8  ;;  %8772 = vmatmul.mubr.bf16.gmra.mxu1 %v17241_v8  ;;  %v12530_v8 = vld [vmem:[#allocation8 + $0x1e4] ss:$8 sps:$4 sm:$0xff]   ;;  %v12558_v63 = vld [vmem:[#allocation8 + $0x190] ss:$8 sps:$4 sm:$0xff]  }
0x17ba   : > { %8668 = vmatprep.mubr.bf16.mxu0 %v17367_v35  ;;  %8781 = vmatprep.mubr.bf16.mxu1 %v17367_v35  ;;  %v12525_v35 = vld [vmem:[#allocation8 + $0xe0] ss:$8 sps:$4 sm:$0xff]  }
0x17bb   : > { %9806 = vmatpush1.bf16.msra.mxu0 %v12507_v43  ;;  %9919 = vmatpush1.bf16.msra.mxu1 %v12510_v52  ;;  %v12563_v43 = vld [vmem:[#allocation8 + $0x84] ss:$8 sps:$4 sm:$0xff]   ;;  %v12564_v52 = vld [vmem:[#allocation8 + $0x180] ss:$8 sps:$4 sm:$0xff]  }
0x17bc   : > { %9807 = vmatprep.subr.bf16.mxu0 %v12515_v18  ;;  %9920 = vmatprep.subr.bf16.mxu1 %v12518_v17  ;;  %v12569_v18 = vld [vmem:[#allocation8 + $0x274] ss:$8 sps:$4 sm:$0xff]  }
0x17bd   : > { %v12572_v17 = vld [vmem:[#allocation8 + $0x374] ss:$8 sps:$4 sm:$0xff]  }
0x17bf   : > { %9808 = vmatpush1.bf16.msra.mxu0 %v12513_v12  ;;  %9921 = vmatpush1.bf16.msra.mxu1 %v12516_v19  ;;  %v17503_v12 = vld [vmem:[#allocation9 + $0x8] sm:$0xff] }
0x17c0   : > { %9809 = vmatprep.subr.bf16.mxu0 %v12521_v5  ;;  %9922 = vmatprep.subr.bf16.mxu1 %v12524_v9  ;;  %v17507_v9 = vrot.slane %v17503_v12, %v18813_v55 }
0x17c1   : > { %8669 = vmatmul.mubr.bf16.gmra.mxu0 %v17371_v59  ;;  %8782 = vmatmul.mubr.bf16.gmra.mxu1 %v17371_v59  ;;  %v12542_v59 = vld [vmem:[#allocation8 + $0x1c4] ss:$8 sps:$4 sm:$0xff]  }
0x17c2   : > { %8678 = vmatprep.mubr.bf16.mxu0 %v17399_v34  ;;  %8791 = vmatprep.mubr.bf16.mxu1 %v17399_v34  ;;  %v12537_v34 = vld [vmem:[#allocation8 + $0xc0] ss:$8 sps:$4 sm:$0xff]  }
0x17c3   : > { %9810 = vmatpush2.bf16.msra.mxu0 %v12519_v30  ;;  %9923 = vmatpush2.bf16.msra.mxu1 %v12522_v7 }
0x17c4   : > { %9811 = vmatprep.subr.bf16.mxu0 %v12527_v36  ;;  %9924 = vmatprep.subr.bf16.mxu1 %v12530_v8  ;;  %v17516_v36 = vrot.slane %v17503_v12, %v18812_v25 }
0x17c7   : > { %9812 = vmatpush2.bf16.msra.mxu0 %v12525_v35  ;;  %9925 = vmatpush2.bf16.msra.mxu1 %v12528_v58 }
0x17c8   : > { %9813 = vmatprep.subr.bf16.mxu0 %v12533_v32  ;;  %9926 = vmatprep.subr.bf16.mxu1 %v12536_v2 }
0x17c9   : > { %8679 = vmatmul.mubr.bf16.gmra.mxu0 %v17403_v13  ;;  %8792 = vmatmul.mubr.bf16.gmra.mxu1 %v17403_v13  ;;  %v12554_v13 = vld [vmem:[#allocation8 + $0x1a4] ss:$8 sps:$4 sm:$0xff]  }
0x17ca   : > { %8688 = vmatprep.mubr.bf16.mxu0 %v17431_v24  ;;  %8801 = vmatprep.mubr.bf16.mxu1 %v17431_v24  ;;  %v12549_v24 = vld [vmem:[#allocation8 + $0xa0] ss:$8 sps:$4 sm:$0xff]  }
0x17cb   : > { %9814 = vmatpush2.bf16.msra.mxu0 %v12531_v38  ;;  %9927 = vmatpush2.bf16.msra.mxu1 %v12534_v53 }
0x17cc   : > { %9815 = vmatprep.subr.bf16.mxu0 %v12539_v15  ;;  %9928 = vmatprep.subr.bf16.mxu1 %v12542_v59 }
0x17cf   : > { %9816 = vmatpush2.bf16.msra.mxu0 %v12537_v34  ;;  %9929 = vmatpush2.bf16.msra.mxu1 %v12540_v14 }
0x17d0   : > { %9817 = vmatprep.subr.bf16.mxu0 %v12545_v46  ;;  %9930 = vmatprep.subr.bf16.mxu1 %v12548_v41 }
0x17d1   : > { %8689 = vmatmul.mubr.bf16.gmra.mxu0 %v17435_v10  ;;  %8802 = vmatmul.mubr.bf16.gmra.mxu1 %v17435_v10  ;;  %v12566_v10 = vld [vmem:[#allocation8 + $0x184] ss:$8 sps:$4 sm:$0xff]  }
0x17d2   : > { %8698 = vmatprep.mubr.bf16.mxu0 %v17461_v45  ;;  %8811 = vmatprep.mubr.bf16.mxu1 %v17461_v45  ;;  %v12561_v45 = vld [vmem:[#allocation8 + $0x80] ss:$8 sps:$4 sm:$0xff]  }
0x17d3   : > { %9818 = vmatpush2.bf16.msra.mxu0 %v12543_v3  ;;  %9931 = vmatpush2.bf16.msra.mxu1 %v12546_v60 }
0x17d4   : > { %9819 = vmatprep.subr.bf16.mxu0 %v12551_v23  ;;  %9932 = vmatprep.subr.bf16.mxu1 %v12554_v13 }
0x17d7   : > { %9820 = vmatpush2.bf16.msra.mxu0 %v12549_v24  ;;  %9933 = vmatpush2.bf16.msra.mxu1 %v12552_v27 }
0x17d8   : > { %9821 = vmatprep.subr.bf16.mxu0 %v12557_v42  ;;  %9934 = vmatprep.subr.bf16.mxu1 %v12560_v61 }
0x17d9   : > { %8699 = vmatmul.mubr.bf16.gmra.mxu0 %v17465_v20  ;;  %8812 = vmatmul.mubr.bf16.gmra.mxu1 %v17465_v20  ;;  %v18837_v20 = vld [vmem:[#allocation15_spill] sm:$0xff] }
0x17da   : > { %v18838_v30 = vsub.s32 3, %v18837_v20  ;;  %v18839_v8 = vsub.s32 2, %v18837_v20 }
0x17db   : > { %9822 = vmatpush2.bf16.msra.mxu0 %v12555_v39  ;;  %9935 = vmatpush2.bf16.msra.mxu1 %v12558_v63 }
0x17dc   : > { %9823 = vmatprep.subr.bf16.mxu0 %v12563_v43  ;;  %9936 = vmatprep.subr.bf16.mxu1 %v12566_v10  ;;  %v17512_v7 = vrot.slane %v17503_v12, %v18838_v30  ;;  %v17521_v35 = vrot.slane %v17503_v12, %v18839_v8  ;;  %v12570_v30 = vld [vmem:[#allocation8 + $0x370] ss:$8 sps:$4 sm:$0xff]  }
0x17df   : > { %9824 = vmatpush2.bf16.msra.mxu0 %v12561_v45  ;;  %9937 = vmatpush2.bf16.msra.mxu1 %v12564_v52 }
0x17e0   : > { %10019 = vmatprep.subr.bf16.mxu0 %v12569_v18  ;;  %10132 = vmatprep.subr.bf16.mxu1 %v12572_v17 }
0x1802   : > { %v8404_v19 = vpop.f32.mrf.mxu0  ;;  %v8517_v5 = vpop.f32.mrf.mxu1 }
0x1803   : > { %v8405_v14 = vadd.f32 %v8404_v19, %v17516_v36  ;;  %v8518_v46 = vadd.f32 %v8517_v5, %v17521_v35  ;;  %v12567_v5 = vld [vmem:[#allocation8 + $0x270] ss:$8 sps:$4 sm:$0xff]  }
0x1804   : > { %v8406_v58 = vpop.f32.mrf.mxu0  ;;  %v8519_v32 = vpop.f32.mrf.mxu1 }
0x1805   : > { %v8407_v53 = vadd.f32 %v8406_v58, %v17507_v9  ;;  %v8520_v15 = vadd.f32 %v8519_v32, %v17512_v7  ;;  %v8822_v10 = vmax.f32 %v8405_v14, 0.0  ;;  %v8824_v45 = vmax.f32 %v8518_v46, 0.0 }
0x1806   : > { %v8408_v2 = vpop.f32.mrf.mxu0  ;;  %v8521_v38 = vpop.f32.mrf.mxu1 }
0x1807   : > { %v8409_v59 = vadd.f32 %v8408_v2, %v17516_v36  ;;  %v8522_v34 = vadd.f32 %v8521_v38, %v17521_v35  ;;  %v8823_v61 = vmax.f32 %v8407_v53, 0.0  ;;  %v8825_v39 = vmax.f32 %v8520_v15, 0.0 }
0x1808   : > { %v8410_v41 = vpop.f32.mrf.mxu0  ;;  %v8523_v3 = vpop.f32.mrf.mxu1 }
0x1809   : > { %v8411_v60 = vadd.f32 %v8410_v41, %v17507_v9  ;;  %v8524_v23 = vadd.f32 %v8523_v3, %v17512_v7  ;;  %v8830_v13 = vmax.f32 %v8409_v59, 0.0  ;;  %v8832_v24 = vmax.f32 %v8522_v34, 0.0  ;;  %v12575_v59 = vld [vmem:[#allocation8 + $0x264] ss:$8 sps:$4 sm:$0xff]  }
0x180a   : > { %v8414_v27 = vpop.f32.mrf.mxu0  ;;  %v8527_v42 = vpop.f32.mrf.mxu1  ;;  %v12578_v34 = vld [vmem:[#allocation8 + $0x364] ss:$8 sps:$4 sm:$0xff]  }
0x180b   : > { %v8831_v63 = vmax.f32 %v8411_v60, 0.0  ;;  %v8833_v43 = vmax.f32 %v8524_v23, 0.0  ;;  %v8950_v8 = vpack.c.bf16 %v8830_v13, %v8822_v10  ;;  %v8952_v58 = vpack.c.bf16 %v8832_v24, %v8824_v45  ;;  %v12573_v24 = vld [vmem:[#allocation8 + $0x260] ss:$8 sps:$4 sm:$0xff]  }
0x180c   : > { %v8416_v52 = vpop.f32.mrf.mxu0  ;;  %v8529_v18 = vpop.f32.mrf.mxu1  ;;  %v8415_v46 = vadd.f32 %v8414_v27, %v17516_v36  ;;  %v8528_v41 = vadd.f32 %v8527_v42, %v17521_v35  ;;  %v12576_v10 = vld [vmem:[#allocation8 + $0x360] ss:$8 sps:$4 sm:$0xff]   ;;  %v12581_v27 = vld [vmem:[#allocation8 + $0x254] ss:$8 sps:$4 sm:$0xff]  }
0x180d   : > { %v8951_v17 = vpack.c.bf16 %v8831_v63, %v8823_v61  ;;  %v8953_v19 = vpack.c.bf16 %v8833_v43, %v8825_v39  ;;  %v8417_v32 = vadd.f32 %v8416_v52, %v17507_v9  ;;  %v8530_v53 = vadd.f32 %v8529_v18, %v17512_v7 }
0x180e   : > { %v8418_v2 = vpop.f32.mrf.mxu0  ;;  %v8531_v38 = vpop.f32.mrf.mxu1 }
0x180f   : > { %v8419_v15 = vadd.f32 %v8418_v2, %v17516_v36  ;;  %v8532_v14 = vadd.f32 %v8531_v38, %v17521_v35  ;;  %9825 = vmatprep.mubr.bf16.mxu0 %v8951_v17  ;;  %9938 = vmatprep.mubr.bf16.mxu1 %v8953_v19  ;;  %v8839_v42 = vmax.f32 %v8417_v32, 0.0  ;;  %v8841_v45 = vmax.f32 %v8530_v53, 0.0  ;;  %v12584_v38 = vld [vmem:[#allocation8 + $0x354] ss:$8 sps:$4 sm:$0xff]   ;;  %v12582_v32 = vld [vmem:[#allocation8 + $0x350] ss:$8 sps:$4 sm:$0xff]  }
0x1810   : > { %v8420_v3 = vpop.f32.mrf.mxu0  ;;  %v8533_v60 = vpop.f32.mrf.mxu1  ;;  %9826 = vmatmul.mubr.bf16.vlgmr.msra.gmra.mxu0 %v8950_v8  ;;  %9939 = vmatmul.mubr.bf16.vlgmr.msra.gmra.mxu1 %v8952_v58  ;;  %v8838_v17 = vmax.f32 %v8415_v46, 0.0  ;;  %v8840_v19 = vmax.f32 %v8528_v41, 0.0  ;;  %v12587_v53 = vld [vmem:[#allocation8 + $0x244] ss:$8 sps:$4 sm:$0xff]  }
0x1811   : > { %v8421_v23 = vadd.f32 %v8420_v3, %v17507_v9  ;;  %v8534_v13 = vadd.f32 %v8533_v60, %v17512_v7  ;;  %10020 = vmatpush1.bf16.msra.mxu0 %v12567_v5  ;;  %10133 = vmatpush1.bf16.msra.mxu1 %v12570_v30  ;;  %v8846_v61 = vmax.f32 %v8419_v15, 0.0  ;;  %v8848_v39 = vmax.f32 %v8532_v14, 0.0  ;;  %v12579_v30 = vld [vmem:[#allocation8 + $0x250] ss:$8 sps:$4 sm:$0xff]  }
0x1812   : > { %v8424_v63 = vpop.f32.mrf.mxu0  ;;  %v8537_v43 = vpop.f32.mrf.mxu1  ;;  %10021 = vmatprep.subr.bf16.mxu0 %v12575_v59  ;;  %10134 = vmatprep.subr.bf16.mxu1 %v12578_v34 }
0x1813   : > { %v8847_v52 = vmax.f32 %v8421_v23, 0.0  ;;  %v8849_v18 = vmax.f32 %v8534_v13, 0.0  ;;  %v8958_v15 = vpack.c.bf16 %v8846_v61, %v8838_v17  ;;  %v8960_v14 = vpack.c.bf16 %v8848_v39, %v8840_v19  ;;  %v12590_v23 = vld [vmem:[#allocation8 + $0x344] ss:$8 sps:$4 sm:$0xff]   ;;  %v12593_v19 = vld [vmem:[#allocation8 + $0x234] ss:$8 sps:$4 sm:$0xff]  }
0x1814   : > { %v8426_v8 = vpop.f32.mrf.mxu0  ;;  %v8539_v58 = vpop.f32.mrf.mxu1  ;;  %v8425_v13 = vadd.f32 %v8424_v63, %v17516_v36  ;;  %v12588_v63 = vld [vmem:[#allocation8 + $0x340] ss:$8 sps:$4 sm:$0xff]  }
0x1815   : > { %v8959_v2 = vpack.c.bf16 %v8847_v52, %v8839_v42  ;;  %v8961_v5 = vpack.c.bf16 %v8849_v18, %v8841_v45  ;;  %10022 = vmatpush1.bf16.msra.mxu0 %v12573_v24  ;;  %v8427_v59 = vadd.f32 %v8426_v8, %v17507_v9  ;;  %10135 = vmatpush1.bf16.msra.mxu1 %v12576_v10  ;;  %v12585_v42 = vld [vmem:[#allocation8 + $0x240] ss:$8 sps:$4 sm:$0xff]  }
0x1816   : > { %v8428_v3 = vpop.f32.mrf.mxu0  ;;  %v8541_v34 = vpop.f32.mrf.mxu1  ;;  %10023 = vmatprep.subr.bf16.mxu0 %v12581_v27  ;;  %v8540_v46 = vadd.f32 %v8539_v58, %v17512_v7  ;;  %v8538_v24 = vadd.f32 %v8537_v43, %v17521_v35  ;;  %10136 = vmatprep.subr.bf16.mxu1 %v12584_v38 }
0x1817   : > { %v8429_v41 = vadd.f32 %v8428_v3, %v17516_v36  ;;  %v8542_v60 = vadd.f32 %v8541_v34, %v17521_v35  ;;  %9835 = vmatprep.mubr.bf16.mxu0 %v8959_v2  ;;  %9948 = vmatprep.mubr.bf16.mxu1 %v8961_v5  ;;  %v8855_v43 = vmax.f32 %v8427_v59, 0.0  ;;  %v8854_v5 = vmax.f32 %v8425_v13, 0.0  ;;  %v12591_v34 = vld [vmem:[#allocation8 + $0x230] ss:$8 sps:$4 sm:$0xff]  }
0x1818   : > { %v8430_v61 = vpop.f32.mrf.mxu0  ;;  %v8543_v39 = vpop.f32.mrf.mxu1  ;;  %9836 = vmatmul.mubr.bf16.gmra.mxu0 %v8958_v15  ;;  %9949 = vmatmul.mubr.bf16.gmra.mxu1 %v8960_v14  ;;  %v8857_v8 = vmax.f32 %v8540_v46, 0.0  ;;  %v8856_v15 = vmax.f32 %v8538_v24, 0.0  ;;  %v12594_v59 = vld [vmem:[#allocation8 + $0x330] ss:$8 sps:$4 sm:$0xff]   ;;  %v12599_v46 = vld [vmem:[#allocation8 + $0x224] ss:$8 sps:$4 sm:$0xff]  }
0x1819   : > { %v8431_v10 = vadd.f32 %v8430_v61, %v17507_v9  ;;  %v8544_v27 = vadd.f32 %v8543_v39, %v17512_v7  ;;  %10024 = vmatpush1.bf16.msra.mxu0 %v12579_v30  ;;  %v8862_v45 = vmax.f32 %v8429_v41, 0.0  ;;  %v8864_v52 = vmax.f32 %v8542_v60, 0.0  ;;  %10137 = vmatpush1.bf16.msra.mxu1 %v12582_v32  ;;  %v12596_v41 = vld [vmem:[#allocation8 + $0x334] ss:$8 sps:$4 sm:$0xff]  }
0x181a   : > { %v8434_v18 = vpop.f32.mrf.mxu0  ;;  %v8547_v17 = vpop.f32.mrf.mxu1  ;;  %10025 = vmatprep.subr.bf16.mxu0 %v12587_v53  ;;  %10138 = vmatprep.subr.bf16.mxu1 %v12590_v23 }
0x181b   : > { %v8863_v58 = vmax.f32 %v8431_v10, 0.0  ;;  %v8865_v2 = vmax.f32 %v8544_v27, 0.0  ;;  %v8966_v60 = vpack.c.bf16 %v8862_v45, %v8854_v5  ;;  %v8968_v61 = vpack.c.bf16 %v8864_v52, %v8856_v15  ;;  %v12602_v10 = vld [vmem:[#allocation8 + $0x324] ss:$8 sps:$4 sm:$0xff]   ;;  %v12605_v5 = vld [vmem:[#allocation8 + $0x214] ss:$8 sps:$4 sm:$0xff]  }
0x181c   : > { %v8436_v14 = vpop.f32.mrf.mxu0  ;;  %v8549_v3 = vpop.f32.mrf.mxu1  ;;  %v8435_v27 = vadd.f32 %v8434_v18, %v17516_v36 }
0x181d   : > { %v8967_v38 = vpack.c.bf16 %v8863_v58, %v8855_v43  ;;  %v8969_v30 = vpack.c.bf16 %v8865_v2, %v8857_v8  ;;  %10026 = vmatpush1.bf16.msra.mxu0 %v12585_v42  ;;  %v8437_v32 = vadd.f32 %v8436_v14, %v17507_v9  ;;  %10139 = vmatpush1.bf16.msra.mxu1 %v12588_v63  ;;  %v12597_v43 = vld [vmem:[#allocation8 + $0x220] ss:$8 sps:$4 sm:$0xff]  }
0x181e   : > { %v8438_v53 = vpop.f32.mrf.mxu0  ;;  %v8551_v39 = vpop.f32.mrf.mxu1  ;;  %10027 = vmatprep.subr.bf16.mxu0 %v12593_v19  ;;  %v8550_v23 = vadd.f32 %v8549_v3, %v17512_v7  ;;  %v8548_v42 = vadd.f32 %v8547_v17, %v17521_v35  ;;  %10140 = vmatprep.subr.bf16.mxu1 %v12596_v41  ;;  %v12600_v2 = vld [vmem:[#allocation8 + $0x320] ss:$8 sps:$4 sm:$0xff]   ;;  %v8870_v3 = vmax.f32 %v8435_v27, 0.0  ;;  %v12608_v41 = vld [vmem:[#allocation8 + $0x314] ss:$8 sps:$4 sm:$0xff]  }
0x181f   : > { %v8439_v13 = vadd.f32 %v8438_v53, %v17516_v36  ;;  %v8552_v24 = vadd.f32 %v8551_v39, %v17521_v35  ;;  %9845 = vmatprep.mubr.bf16.mxu0 %v8967_v38  ;;  %9958 = vmatprep.mubr.bf16.mxu1 %v8969_v30  ;;  %v8871_v18 = vmax.f32 %v8437_v32, 0.0  ;;  %v12606_v39 = vld [vmem:[#allocation8 + $0x310] ss:$8 sps:$4 sm:$0xff]   ;;  %v12614_v32 = vld [vmem:[#allocation8 + $0x304] ss:$8 sps:$4 sm:$0xff]  }
0x1820   : > { %v8440_v45 = vpop.f32.mrf.mxu0  ;;  %v8553_v52 = vpop.f32.mrf.mxu1  ;;  %9846 = vmatmul.mubr.bf16.gmra.mxu0 %v8966_v60  ;;  %9959 = vmatmul.mubr.bf16.gmra.mxu1 %v8968_v61  ;;  %v8873_v15 = vmax.f32 %v8550_v23, 0.0  ;;  %v8872_v38 = vmax.f32 %v8548_v42, 0.0  ;;  %v12603_v61 = vld [vmem:[#allocation8 + $0x210] ss:$8 sps:$4 sm:$0xff]   ;;  %v12612_v23 = vld [vmem:[#allocation8 + $0x300] ss:$8 sps:$4 sm:$0xff]  }
0x1821   : > { %v8441_v63 = vadd.f32 %v8440_v45, %v17507_v9  ;;  %v8554_v19 = vadd.f32 %v8553_v52, %v17512_v7  ;;  %10028 = vmatpush1.bf16.msra.mxu0 %v12591_v34  ;;  %v8878_v8 = vmax.f32 %v8439_v13, 0.0  ;;  %v8880_v58 = vmax.f32 %v8552_v24, 0.0  ;;  %10141 = vmatpush1.bf16.msra.mxu1 %v12594_v59  ;;  %v12611_v59 = vld [vmem:[#allocation8 + $0x204] ss:$8 sps:$4 sm:$0xff]   ;;  %v12617_v13 = vld [vmem:[#allocation8 + $0x2f4] ss:$8 sps:$4 sm:$0xff]  }
0x1822   : > { %10029 = vmatprep.subr.bf16.mxu0 %v12599_v46  ;;  %10142 = vmatprep.subr.bf16.mxu1 %v12602_v10  ;;  %v12609_v46 = vld [vmem:[#allocation8 + $0x200] ss:$8 sps:$4 sm:$0xff]   ;;  %v12620_v24 = vld [vmem:[#allocation8 + $0x3f4] ss:$8 sps:$4 sm:$0xff]   ;;  %v12615_v10 = vld [vmem:[#allocation8 + $0x2f0] ss:$8 sps:$4 sm:$0xff]  }
0x1823   : > { %v8879_v17 = vmax.f32 %v8441_v63, 0.0  ;;  %v8881_v14 = vmax.f32 %v8554_v19, 0.0  ;;  %v8974_v34 = vpack.c.bf16 %v8878_v8, %v8870_v3  ;;  %v8976_v53 = vpack.c.bf16 %v8880_v58, %v8872_v38  ;;  %v12618_v27 = vld [vmem:[#allocation8 + $0x3f0] ss:$8 sps:$4 sm:$0xff]   ;;  %v12623_v42 = vld [vmem:[#allocation8 + $0x2e4] ss:$8 sps:$4 sm:$0xff]  }
0x1824   : > { %v12626_v45 = vld [vmem:[#allocation8 + $0x3e4] ss:$8 sps:$4 sm:$0xff]   ;;  %v12621_v52 = vld [vmem:[#allocation8 + $0x2e0] ss:$8 sps:$4 sm:$0xff]   ;;  %v12629_v19 = vld [vmem:[#allocation8 + $0x2d4] ss:$8 sps:$4 sm:$0xff]  }
0x1825   : > { %v8975_v30 = vpack.c.bf16 %v8879_v17, %v8871_v18  ;;  %v8977_v60 = vpack.c.bf16 %v8881_v14, %v8873_v15  ;;  %10030 = vmatpush1.bf16.msra.mxu0 %v12597_v43  ;;  %10143 = vmatpush1.bf16.msra.mxu1 %v12600_v2  ;;  %v12624_v63 = vld [vmem:[#allocation8 + $0x3e0] ss:$8 sps:$4 sm:$0xff]   ;;  %v12632_v43 = vld [vmem:[#allocation8 + $0x3d4] ss:$8 sps:$4 sm:$0xff]   ;;  %v12627_v8 = vld [vmem:[#allocation8 + $0x2d0] ss:$8 sps:$4 sm:$0xff]  }
0x1826   : > { %10031 = vmatprep.subr.bf16.mxu0 %v12605_v5  ;;  %10144 = vmatprep.subr.bf16.mxu1 %v12608_v41  ;;  %v12630_v58 = vld [vmem:[#allocation8 + $0x3d0] ss:$8 sps:$4 sm:$0xff]   ;;  %v12635_v2 = vld [vmem:[#allocation8 + $0x2c4] ss:$8 sps:$4 sm:$0xff]   ;;  %v12633_v18 = vld [vmem:[#allocation8 + $0x2c0] ss:$8 sps:$4 sm:$0xff]  }
0x1827   : > { %9855 = vmatprep.mubr.bf16.mxu0 %v8975_v30  ;;  %9968 = vmatprep.mubr.bf16.mxu1 %v8977_v60  ;;  %v12638_v5 = vld [vmem:[#allocation8 + $0x3c4] ss:$8 sps:$4 sm:$0xff]   ;;  %v12636_v15 = vld [vmem:[#allocation8 + $0x3c0] ss:$8 sps:$4 sm:$0xff]   ;;  %v12641_v17 = vld [vmem:[#allocation8 + $0x2b4] ss:$8 sps:$4 sm:$0xff]  }
0x1828   : > { %9856 = vmatmul.mubr.bf16.gmra.mxu0 %v8974_v34  ;;  %9969 = vmatmul.mubr.bf16.gmra.mxu1 %v8976_v53  ;;  %v12644_v14 = vld [vmem:[#allocation8 + $0x3b4] ss:$8 sps:$4 sm:$0xff]   ;;  %v12639_v3 = vld [vmem:[#allocation8 + $0x2b0] ss:$8 sps:$4 sm:$0xff]   ;;  %v12647_v30 = vld [vmem:[#allocation8 + $0x2a4] ss:$8 sps:$4 sm:$0xff]  }
0x1829   : > { %10032 = vmatpush1.bf16.msra.mxu0 %v12603_v61  ;;  %10145 = vmatpush1.bf16.msra.mxu1 %v12606_v39  ;;  %v12642_v38 = vld [vmem:[#allocation8 + $0x3b0] ss:$8 sps:$4 sm:$0xff]   ;;  %v12650_v60 = vld [vmem:[#allocation8 + $0x3a4] ss:$8 sps:$4 sm:$0xff]   ;;  %v12645_v34 = vld [vmem:[#allocation8 + $0x2a0] ss:$8 sps:$4 sm:$0xff]  }
0x182a   : > { %10033 = vmatprep.subr.bf16.mxu0 %v12611_v59  ;;  %10146 = vmatprep.subr.bf16.mxu1 %v12614_v32  ;;  %v12648_v53 = vld [vmem:[#allocation8 + $0x3a0] ss:$8 sps:$4 sm:$0xff]   ;;  %v12653_v39 = vld [vmem:[#allocation8 + $0x294] ss:$8 sps:$4 sm:$0xff]  }
0x182d   : > { %10034 = vmatpush1.bf16.msra.mxu0 %v12609_v46  ;;  %10147 = vmatpush1.bf16.msra.mxu1 %v12612_v23  ;;  %v12656_v46 = vld [vmem:[#allocation8 + $0x394] ss:$8 sps:$4 sm:$0xff]  }
0x182e   : > { %10035 = vmatprep.subr.bf16.mxu0 %v12617_v13  ;;  %10148 = vmatprep.subr.bf16.mxu1 %v12620_v24 }
0x1831   : > { %10036 = vmatpush2.bf16.msra.mxu0 %v12615_v10  ;;  %10149 = vmatpush2.bf16.msra.mxu1 %v12618_v27  ;;  %v12651_v10 = vld [vmem:[#allocation8 + $0x290] ss:$8 sps:$4 sm:$0xff]  }
0x1832   : > { %10037 = vmatprep.subr.bf16.mxu0 %v12623_v42  ;;  %10150 = vmatprep.subr.bf16.mxu1 %v12626_v45 }
0x1835   : > { %10038 = vmatpush2.bf16.msra.mxu0 %v12621_v52  ;;  %10151 = vmatpush2.bf16.msra.mxu1 %v12624_v63  ;;  %v12654_v52 = vld [vmem:[#allocation8 + $0x390] ss:$8 sps:$4 sm:$0xff]   ;;  %v12659_v63 = vld [vmem:[#allocation8 + $0x284] ss:$8 sps:$4 sm:$0xff]  }
0x1836   : > { %10039 = vmatprep.subr.bf16.mxu0 %v12629_v19  ;;  %10152 = vmatprep.subr.bf16.mxu1 %v12632_v43 }
0x1839   : > { %10040 = vmatpush2.bf16.msra.mxu0 %v12627_v8  ;;  %10153 = vmatpush2.bf16.msra.mxu1 %v12630_v58 }
0x183a   : > { %10041 = vmatprep.subr.bf16.mxu0 %v12635_v2  ;;  %10154 = vmatprep.subr.bf16.mxu1 %v12638_v5  ;;  %v12662_v2 = vld [vmem:[#allocation8 + $0x384] ss:$8 sps:$4 sm:$0xff]  }
0x183d   : > { %10042 = vmatpush2.bf16.msra.mxu0 %v12633_v18  ;;  %10155 = vmatpush2.bf16.msra.mxu1 %v12636_v15 }
0x183e   : > { %10043 = vmatprep.subr.bf16.mxu0 %v12641_v17  ;;  %10156 = vmatprep.subr.bf16.mxu1 %v12644_v14 }
0x1841   : > { %v8444_v61 = vpop.f32.mrf.mxu0  ;;  %v8557_v41 = vpop.f32.mrf.mxu1  ;;  %10044 = vmatpush2.bf16.msra.mxu0 %v12639_v3  ;;  %10157 = vmatpush2.bf16.msra.mxu1 %v12642_v38  ;;  %v12657_v38 = vld [vmem:[#allocation8 + $0x280] ss:$8 sps:$4 sm:$0xff]  }
0x1842   : > { %10045 = vmatprep.subr.bf16.mxu0 %v12647_v30  ;;  %10158 = vmatprep.subr.bf16.mxu1 %v12650_v60  ;;  %v8445_v19 = vadd.f32 %v8444_v61, %v17516_v36  ;;  %v8558_v43 = vadd.f32 %v8557_v41, %v17521_v35 }
0x1843   : > { %v8446_v59 = vpop.f32.mrf.mxu0  ;;  %v8559_v32 = vpop.f32.mrf.mxu1 }
0x1844   : > { %v8447_v23 = vadd.f32 %v8446_v59, %v17507_v9  ;;  %v8560_v27 = vadd.f32 %v8559_v32, %v17512_v7  ;;  %v8886_v41 = vmax.f32 %v8445_v19, 0.0 }
0x1845   : > { %v8448_v13 = vpop.f32.mrf.mxu0  ;;  %v8561_v24 = vpop.f32.mrf.mxu1  ;;  %10046 = vmatpush2.bf16.msra.mxu0 %v12645_v34  ;;  %10159 = vmatpush2.bf16.msra.mxu1 %v12648_v53  ;;  %v8888_v53 = vmax.f32 %v8558_v43, 0.0 }
0x1846   : > { %v8449_v42 = vadd.f32 %v8448_v13, %v17516_v36  ;;  %v8562_v45 = vadd.f32 %v8561_v24, %v17521_v35  ;;  %10047 = vmatprep.subr.bf16.mxu0 %v12653_v39  ;;  %10160 = vmatprep.subr.bf16.mxu1 %v12656_v46  ;;  %v8887_v30 = vmax.f32 %v8447_v23, 0.0  ;;  %v8889_v60 = vmax.f32 %v8560_v27, 0.0  ;;  %v12660_v13 = vld [vmem:[#allocation8 + $0x380] ss:$8 sps:$4 sm:$0xff]  }
0x1847   : > { %v8450_v8 = vpop.f32.mrf.mxu0  ;;  %v8563_v58 = vpop.f32.mrf.mxu1 }
0x1848   : > { %v8451_v5 = vadd.f32 %v8450_v8, %v17507_v9  ;;  %v8564_v18 = vadd.f32 %v8563_v58, %v17512_v7  ;;  %v8894_v15 = vmax.f32 %v8449_v42, 0.0  ;;  %v8896_v17 = vmax.f32 %v8562_v45, 0.0 }
0x1849   : > { %v8454_v14 = vpop.f32.mrf.mxu0  ;;  %v8567_v3 = vpop.f32.mrf.mxu1  ;;  %10048 = vmatpush2.bf16.msra.mxu0 %v12651_v10  ;;  %10161 = vmatpush2.bf16.msra.mxu1 %v12654_v52 }
0x184a   : > { %v8895_v34 = vmax.f32 %v8451_v5, 0.0  ;;  %v8897_v61 = vmax.f32 %v8564_v18, 0.0  ;;  %10049 = vmatprep.subr.bf16.mxu0 %v12659_v63  ;;  %10162 = vmatprep.subr.bf16.mxu1 %v12662_v2  ;;  %v8982_v24 = vpack.c.bf16 %v8894_v15, %v8886_v41  ;;  %v8984_v42 = vpack.c.bf16 %v8896_v17, %v8888_v53 }
0x184b   : > { %v8456_v39 = vpop.f32.mrf.mxu0  ;;  %v8569_v59 = vpop.f32.mrf.mxu1  ;;  %v8455_v63 = vadd.f32 %v8454_v14, %v17516_v36  ;;  %v8568_v19 = vadd.f32 %v8567_v3, %v17521_v35 }
0x184c   : > { %v8983_v32 = vpack.c.bf16 %v8895_v34, %v8887_v30  ;;  %v8985_v46 = vpack.c.bf16 %v8897_v61, %v8889_v60  ;;  %v8457_v45 = vadd.f32 %v8456_v39, %v17507_v9  ;;  %v8570_v23 = vadd.f32 %v8569_v59, %v17512_v7 }
0x184d   : > { %v8458_v10 = vpop.f32.mrf.mxu0  ;;  %v8571_v8 = vpop.f32.mrf.mxu1  ;;  %10050 = vmatpush2.bf16.msra.mxu0 %v12657_v38  ;;  %10163 = vmatpush2.bf16.msra.mxu1 %v12660_v13  ;;  %v8902_v14 = vmax.f32 %v8455_v63, 0.0  ;;  %v8904_v41 = vmax.f32 %v8568_v19, 0.0 }
0x184e   : > { %v8459_v27 = vadd.f32 %v8458_v10, %v17516_v36  ;;  %v8572_v52 = vadd.f32 %v8571_v8, %v17521_v35  ;;  %9865 = vmatprep.mubr.bf16.mxu0 %v8983_v32  ;;  %9978 = vmatprep.mubr.bf16.mxu1 %v8985_v46  ;;  %v8903_v30 = vmax.f32 %v8457_v45, 0.0  ;;  %v8905_v60 = vmax.f32 %v8570_v23, 0.0 }
0x184f   : > { %v8460_v43 = vpop.f32.mrf.mxu0  ;;  %v8573_v58 = vpop.f32.mrf.mxu1  ;;  %9866 = vmatmul.mubr.bf16.gmra.mxu0 %v8982_v24  ;;  %9979 = vmatmul.mubr.bf16.gmra.mxu1 %v8984_v42 }
0x1850   : > { %v8461_v2 = vadd.f32 %v8460_v43, %v17507_v9  ;;  %v8574_v5 = vadd.f32 %v8573_v58, %v17512_v7  ;;  %v8910_v18 = vmax.f32 %v8459_v27, 0.0  ;;  %v8912_v15 = vmax.f32 %v8572_v52, 0.0 }
0x1851   : > { %v8464_v17 = vpop.f32.mrf.mxu0  ;;  %v8577_v38 = vpop.f32.mrf.mxu1 }
0x1852   : > { %v8911_v34 = vmax.f32 %v8461_v2, 0.0  ;;  %v8913_v61 = vmax.f32 %v8574_v5, 0.0  ;;  %v8990_v32 = vpack.c.bf16 %v8910_v18, %v8902_v14  ;;  %v8992_v46 = vpack.c.bf16 %v8912_v15, %v8904_v41 }
0x1853   : > { %v8466_v3 = vpop.f32.mrf.mxu0  ;;  %v8579_v53 = vpop.f32.mrf.mxu1  ;;  %v8465_v23 = vadd.f32 %v8464_v17, %v17516_v36  ;;  %v8578_v27 = vadd.f32 %v8577_v38, %v17521_v35 }
0x1854   : > { %v8991_v39 = vpack.c.bf16 %v8911_v34, %v8903_v30  ;;  %v8993_v59 = vpack.c.bf16 %v8913_v61, %v8905_v60  ;;  %v8467_v24 = vadd.f32 %v8466_v3, %v17507_v9  ;;  %v8580_v10 = vadd.f32 %v8579_v53, %v17512_v7 }
0x1855   : > { %v8468_v42 = vpop.f32.mrf.mxu0  ;;  %v8581_v13 = vpop.f32.mrf.mxu1  ;;  %v8918_v61 = vmax.f32 %v8465_v23, 0.0  ;;  %v8920_v17 = vmax.f32 %v8578_v27, 0.0 }
0x1856   : > { %v8469_v8 = vadd.f32 %v8468_v42, %v17516_v36  ;;  %v8582_v45 = vadd.f32 %v8581_v13, %v17521_v35  ;;  %9875 = vmatprep.mubr.bf16.mxu0 %v8991_v39  ;;  %9988 = vmatprep.mubr.bf16.mxu1 %v8993_v59  ;;  %v8919_v15 = vmax.f32 %v8467_v24, 0.0  ;;  %v8921_v30 = vmax.f32 %v8580_v10, 0.0 }
0x1857   : > { %v8470_v52 = vpop.f32.mrf.mxu0  ;;  %v8583_v63 = vpop.f32.mrf.mxu1  ;;  %9876 = vmatmul.mubr.bf16.gmra.mxu0 %v8990_v32  ;;  %9989 = vmatmul.mubr.bf16.gmra.mxu1 %v8992_v46  ;;  %v7720_v42 = vsub.s32 7, %v18837_v20 }
0x1858   : > { %v8471_v19 = vadd.f32 %v8470_v52, %v17507_v9  ;;  %v8584_v43 = vadd.f32 %v8583_v63, %v17512_v7  ;;  %v8926_v58 = vmax.f32 %v8469_v8, 0.0  ;;  %v8928_v2 = vmax.f32 %v8582_v45, 0.0 }
0x1859   : > { %v8474_v5 = vpop.f32.mrf.mxu0  ;;  %v8587_v18 = vpop.f32.mrf.mxu1  ;;  %v7716_v52 = vsub.s32 6, %v18837_v20 }
0x185a   : > { %v8927_v60 = vmax.f32 %v8471_v19, 0.0  ;;  %v8929_v34 = vmax.f32 %v8584_v43, 0.0  ;;  %v8998_v53 = vpack.c.bf16 %v8926_v58, %v8918_v61  ;;  %v9000_v39 = vpack.c.bf16 %v8928_v2, %v8920_v17 }
0x185b   : > { %v8476_v14 = vpop.f32.mrf.mxu0  ;;  %v8589_v38 = vpop.f32.mrf.mxu1  ;;  %v8475_v8 = vadd.f32 %v8474_v5, %v17516_v36  ;;  %v8588_v45 = vadd.f32 %v8587_v18, %v17521_v35 }
0x185c   : > { %v8999_v41 = vpack.c.bf16 %v8927_v60, %v8919_v15  ;;  %v9001_v3 = vpack.c.bf16 %v8929_v34, %v8921_v30  ;;  %v8477_v59 = vadd.f32 %v8476_v14, %v17507_v9  ;;  %v8590_v13 = vadd.f32 %v8589_v38, %v17512_v7 }
0x185d   : > { %v8478_v32 = vpop.f32.mrf.mxu0  ;;  %v8591_v46 = vpop.f32.mrf.mxu1  ;;  %v18840_v30 = vsub.s32 5, %v18837_v20  ;;  %v8934_v61 = vmax.f32 %v8475_v8, 0.0  ;;  %v17603_v14 = vrot.slane %v17503_v12, %v7716_v52 }
0x185e   : > { %v8479_v24 = vadd.f32 %v8478_v32, %v17516_v36  ;;  %v8592_v10 = vadd.f32 %v8591_v46, %v17521_v35  ;;  %9885 = vmatprep.mubr.bf16.mxu0 %v8999_v41  ;;  %9998 = vmatprep.mubr.bf16.mxu1 %v9001_v3  ;;  %v17595_v35 = vrot.slane %v17503_v12, %v7720_v42  ;;  %v8935_v5 = vmax.f32 %v8477_v59, 0.0 }
0x185f   : > { %v8480_v23 = vpop.f32.mrf.mxu0  ;;  %v8593_v27 = vpop.f32.mrf.mxu1  ;;  %9886 = vmatmul.mubr.bf16.gmra.mxu0 %v8998_v53  ;;  %9999 = vmatmul.mubr.bf16.gmra.mxu1 %v9000_v39  ;;  %v17592_v36 = vrot.slane %v17503_v12, %v18840_v30  ;;  %v8937_v18 = vmax.f32 %v8590_v13, 0.0 }
0x1860   : > { %v8481_v63 = vadd.f32 %v8480_v23, %v17507_v9  ;;  %v8594_v19 = vadd.f32 %v8593_v27, %v17512_v7  ;;  %v8942_v43 = vmax.f32 %v8479_v24, 0.0  ;;  %v8944_v58 = vmax.f32 %v8592_v10, 0.0 }
0x1861   : > { %v8630_v2 = vpop.f32.mrf.mxu0  ;;  %v8743_v15 = vpop.f32.mrf.mxu1  ;;  %v8936_v9 = vmax.f32 %v8588_v45, 0.0  ;;  %v18841_v7 = vsub.s32 4, %v18837_v20 }
0x1862   : > { %v8943_v60 = vmax.f32 %v8481_v63, 0.0  ;;  %v8945_v34 = vmax.f32 %v8594_v19, 0.0  ;;  %v9006_v39 = vpack.c.bf16 %v8942_v43, %v8934_v61  ;;  %v8744_v10 = vadd.f32 %v8743_v15, %v17603_v14 }
0x1863   : > { %v17600_v17 = vrot.slane %v17503_v12, %v18841_v7  ;;  %v8632_v38 = vpop.f32.mrf.mxu0  ;;  %v8745_v41 = vpop.f32.mrf.mxu1  ;;  %v9008_v32 = vpack.c.bf16 %v8944_v58, %v8936_v9 }
0x1864   : > { %v9007_v3 = vpack.c.bf16 %v8943_v60, %v8935_v5  ;;  %v9009_v53 = vpack.c.bf16 %v8945_v34, %v8937_v18  ;;  %v8633_v59 = vadd.f32 %v8632_v38, %v17592_v36  ;;  %v8746_v13 = vadd.f32 %v8745_v41, %v17595_v35 }
0x1865   : > { %v8634_v46 = vpop.f32.mrf.mxu0  ;;  %v8747_v42 = vpop.f32.mrf.mxu1  ;;  %v8631_v12 = vadd.f32 %v8630_v2, %v17600_v17  ;;  %v8828_v2 = vmax.f32 %v8744_v10, 0.0 }
0x1866   : > { %v8635_v20 = vadd.f32 %v8634_v46, %v17600_v17  ;;  %v8748_v24 = vadd.f32 %v8747_v42, %v17603_v14  ;;  %9895 = vmatprep.mubr.bf16.mxu0 %v9007_v3  ;;  %10008 = vmatprep.mubr.bf16.mxu1 %v9009_v53  ;;  %v8827_v58 = vmax.f32 %v8633_v59, 0.0  ;;  %v8829_v30 = vmax.f32 %v8746_v13, 0.0 }
0x1867   : > { %v8636_v8 = vpop.f32.mrf.mxu0  ;;  %v8749_v45 = vpop.f32.mrf.mxu1  ;;  %9896 = vmatmul.mubr.bf16.gmra.mxu0 %v9006_v39  ;;  %10009 = vmatmul.mubr.bf16.gmra.mxu1 %v9008_v32  ;;  %v8826_v60 = vmax.f32 %v8631_v12, 0.0 }
0x1868   : > { %v8637_v23 = vadd.f32 %v8636_v8, %v17592_v36  ;;  %v8750_v27 = vadd.f32 %v8749_v45, %v17595_v35  ;;  %v8834_v52 = vmax.f32 %v8635_v20, 0.0  ;;  %v8836_v63 = vmax.f32 %v8748_v24, 0.0 }
0x1869   : > { %v8640_v19 = vpop.f32.mrf.mxu0  ;;  %v8753_v43 = vpop.f32.mrf.mxu1 }
0x186a   : > { %v8835_v5 = vmax.f32 %v8637_v23, 0.0  ;;  %v8837_v18 = vmax.f32 %v8750_v27, 0.0  ;;  %v8954_v7 = vpack.c.bf16 %v8834_v52, %v8826_v60  ;;  %v8956_v38 = vpack.c.bf16 %v8836_v63, %v8828_v2 }
0x186b   : > { %v8642_v34 = vpop.f32.mrf.mxu0  ;;  %v8755_v15 = vpop.f32.mrf.mxu1  ;;  %v8641_v46 = vadd.f32 %v8640_v19, %v17600_v17  ;;  %v8754_v42 = vadd.f32 %v8753_v43, %v17603_v14 }
0x186c   : > { %v8955_v61 = vpack.c.bf16 %v8835_v5, %v8827_v58  ;;  %v8957_v9 = vpack.c.bf16 %v8837_v18, %v8829_v30  ;;  %v8643_v41 = vadd.f32 %v8642_v34, %v17592_v36  ;;  %v8756_v39 = vadd.f32 %v8755_v15, %v17595_v35 }
0x186d   : > { %v8644_v3 = vpop.f32.mrf.mxu0  ;;  %v8757_v53 = vpop.f32.mrf.mxu1  ;;  %v8842_v30 = vmax.f32 %v8641_v46, 0.0  ;;  %v8844_v19 = vmax.f32 %v8754_v42, 0.0 }
0x186e   : > { %v8645_v32 = vadd.f32 %v8644_v3, %v17600_v17  ;;  %v8758_v59 = vadd.f32 %v8757_v53, %v17603_v14  ;;  %10051 = vmatprep.mubr.bf16.mxu0 %v8955_v61  ;;  %10164 = vmatprep.mubr.bf16.mxu1 %v8957_v9  ;;  %v8843_v27 = vmax.f32 %v8643_v41, 0.0  ;;  %v8845_v52 = vmax.f32 %v8756_v39, 0.0 }
0x186f   : > { %v8646_v13 = vpop.f32.mrf.mxu0  ;;  %v8759_v20 = vpop.f32.mrf.mxu1  ;;  %10052 = vmatmul.mubr.bf16.vlgmr.msra.gmra.mxu0 %v8954_v7  ;;  %10165 = vmatmul.mubr.bf16.vlgmr.msra.gmra.mxu1 %v8956_v38 }
0x1870   : > { %v8647_v24 = vadd.f32 %v8646_v13, %v17592_v36  ;;  %v8760_v12 = vadd.f32 %v8759_v20, %v17595_v35  ;;  %v8850_v10 = vmax.f32 %v8645_v32, 0.0  ;;  %v8852_v8 = vmax.f32 %v8758_v59, 0.0 }
0x1871   : > { %v8650_v45 = vpop.f32.mrf.mxu0  ;;  %v8763_v23 = vpop.f32.mrf.mxu1 }
0x1872   : > { %v8851_v63 = vmax.f32 %v8647_v24, 0.0  ;;  %v8853_v58 = vmax.f32 %v8760_v12, 0.0  ;;  %v8962_v2 = vpack.c.bf16 %v8850_v10, %v8842_v30  ;;  %v8964_v34 = vpack.c.bf16 %v8852_v8, %v8844_v19 }
0x1873   : > { %v8652_v5 = vpop.f32.mrf.mxu0  ;;  %v8765_v43 = vpop.f32.mrf.mxu1  ;;  %v8651_v3 = vadd.f32 %v8650_v45, %v17600_v17  ;;  %v8764_v53 = vadd.f32 %v8763_v23, %v17603_v14 }
0x1874   : > { %v8963_v18 = vpack.c.bf16 %v8851_v63, %v8843_v27  ;;  %v8965_v60 = vpack.c.bf16 %v8853_v58, %v8845_v52  ;;  %v8653_v15 = vadd.f32 %v8652_v5, %v17592_v36  ;;  %v8766_v7 = vadd.f32 %v8765_v43, %v17595_v35 }
0x1875   : > { %v8654_v61 = vpop.f32.mrf.mxu0  ;;  %v8767_v9 = vpop.f32.mrf.mxu1  ;;  %v8858_v52 = vmax.f32 %v8651_v3, 0.0  ;;  %v8860_v45 = vmax.f32 %v8764_v53, 0.0 }
0x1876   : > { %v8655_v38 = vadd.f32 %v8654_v61, %v17600_v17  ;;  %v8768_v41 = vadd.f32 %v8767_v9, %v17603_v14  ;;  %10061 = vmatprep.mubr.bf16.mxu0 %v8963_v18  ;;  %10174 = vmatprep.mubr.bf16.mxu1 %v8965_v60  ;;  %v8859_v12 = vmax.f32 %v8653_v15, 0.0  ;;  %v8861_v10 = vmax.f32 %v8766_v7, 0.0 }
0x1877   : > { %v8656_v39 = vpop.f32.mrf.mxu0  ;;  %v8769_v32 = vpop.f32.mrf.mxu1  ;;  %10062 = vmatmul.mubr.bf16.gmra.mxu0 %v8962_v2  ;;  %10175 = vmatmul.mubr.bf16.gmra.mxu1 %v8964_v34 }
0x1878   : > { %v8657_v59 = vadd.f32 %v8656_v39, %v17592_v36  ;;  %v8770_v46 = vadd.f32 %v8769_v32, %v17595_v35  ;;  %v8866_v42 = vmax.f32 %v8655_v38, 0.0  ;;  %v8868_v13 = vmax.f32 %v8768_v41, 0.0 }
0x1879   : > { %v8660_v20 = vpop.f32.mrf.mxu0  ;;  %v8773_v24 = vpop.f32.mrf.mxu1 }
0x187a   : > { %v8867_v8 = vmax.f32 %v8657_v59, 0.0  ;;  %v8869_v27 = vmax.f32 %v8770_v46, 0.0  ;;  %v8970_v19 = vpack.c.bf16 %v8866_v42, %v8858_v52  ;;  %v8972_v5 = vpack.c.bf16 %v8868_v13, %v8860_v45 }
0x187b   : > { %v8662_v63 = vpop.f32.mrf.mxu0  ;;  %v8775_v23 = vpop.f32.mrf.mxu1  ;;  %v8661_v61 = vadd.f32 %v8660_v20, %v17600_v17  ;;  %v8774_v9 = vadd.f32 %v8773_v24, %v17603_v14 }
0x187c   : > { %v8971_v58 = vpack.c.bf16 %v8867_v8, %v8859_v12  ;;  %v8973_v30 = vpack.c.bf16 %v8869_v27, %v8861_v10  ;;  %v8663_v43 = vadd.f32 %v8662_v63, %v17592_v36  ;;  %v8776_v2 = vadd.f32 %v8775_v23, %v17595_v35 }
0x187d   : > { %v8664_v18 = vpop.f32.mrf.mxu0  ;;  %v8777_v60 = vpop.f32.mrf.mxu1  ;;  %v8874_v10 = vmax.f32 %v8661_v61, 0.0  ;;  %v8876_v20 = vmax.f32 %v8774_v9, 0.0 }
0x187e   : > { %v8665_v34 = vadd.f32 %v8664_v18, %v17600_v17  ;;  %v8778_v15 = vadd.f32 %v8777_v60, %v17603_v14  ;;  %10071 = vmatprep.mubr.bf16.mxu0 %v8971_v58  ;;  %10184 = vmatprep.mubr.bf16.mxu1 %v8973_v30  ;;  %v8875_v46 = vmax.f32 %v8663_v43, 0.0  ;;  %v8877_v42 = vmax.f32 %v8776_v2, 0.0 }
0x187f   : > { %v8666_v7 = vpop.f32.mrf.mxu0  ;;  %v8779_v38 = vpop.f32.mrf.mxu1  ;;  %10072 = vmatmul.mubr.bf16.gmra.mxu0 %v8970_v19  ;;  %10185 = vmatmul.mubr.bf16.gmra.mxu1 %v8972_v5 }
0x1880   : > { %v8667_v41 = vadd.f32 %v8666_v7, %v17592_v36  ;;  %v8780_v3 = vadd.f32 %v8779_v38, %v17595_v35  ;;  %v8882_v53 = vmax.f32 %v8665_v34, 0.0  ;;  %v8884_v39 = vmax.f32 %v8778_v15, 0.0 }
0x1881   : > { %v8670_v32 = vpop.f32.mrf.mxu0  ;;  %v8783_v59 = vpop.f32.mrf.mxu1 }
0x1882   : > { %v8883_v13 = vmax.f32 %v8667_v41, 0.0  ;;  %v8885_v12 = vmax.f32 %v8780_v3, 0.0  ;;  %v8978_v45 = vpack.c.bf16 %v8882_v53, %v8874_v10  ;;  %v8980_v63 = vpack.c.bf16 %v8884_v39, %v8876_v20 }
0x1883   : > { %v8672_v8 = vpop.f32.mrf.mxu0  ;;  %v8785_v24 = vpop.f32.mrf.mxu1  ;;  %v8671_v18 = vadd.f32 %v8670_v32, %v17600_v17  ;;  %v8784_v60 = vadd.f32 %v8783_v59, %v17603_v14 }
0x1884   : > { %v8979_v27 = vpack.c.bf16 %v8883_v13, %v8875_v46  ;;  %v8981_v52 = vpack.c.bf16 %v8885_v12, %v8877_v42  ;;  %v8673_v23 = vadd.f32 %v8672_v8, %v17592_v36  ;;  %v8786_v19 = vadd.f32 %v8785_v24, %v17595_v35 }
0x1885   : > { %v8674_v58 = vpop.f32.mrf.mxu0  ;;  %v8787_v30 = vpop.f32.mrf.mxu1  ;;  %v8890_v42 = vmax.f32 %v8671_v18, 0.0  ;;  %v8892_v32 = vmax.f32 %v8784_v60, 0.0 }
0x1886   : > { %v8675_v5 = vadd.f32 %v8674_v58, %v17600_v17  ;;  %v8788_v43 = vadd.f32 %v8787_v30, %v17603_v14  ;;  %10081 = vmatprep.mubr.bf16.mxu0 %v8979_v27  ;;  %10194 = vmatprep.mubr.bf16.mxu1 %v8981_v52  ;;  %v8891_v3 = vmax.f32 %v8673_v23, 0.0  ;;  %v8893_v53 = vmax.f32 %v8786_v19, 0.0 }
0x1887   : > { %v8676_v2 = vpop.f32.mrf.mxu0  ;;  %v8789_v34 = vpop.f32.mrf.mxu1  ;;  %10082 = vmatmul.mubr.bf16.gmra.mxu0 %v8978_v45  ;;  %10195 = vmatmul.mubr.bf16.gmra.mxu1 %v8980_v63 }
0x1888   : > { %v8677_v15 = vadd.f32 %v8676_v2, %v17592_v36  ;;  %v8790_v61 = vadd.f32 %v8789_v34, %v17595_v35  ;;  %v8898_v9 = vmax.f32 %v8675_v5, 0.0  ;;  %v8900_v7 = vmax.f32 %v8788_v43, 0.0 }
0x1889   : > { %v8680_v38 = vpop.f32.mrf.mxu0  ;;  %v8793_v41 = vpop.f32.mrf.mxu1 }
0x188a   : > { %v8899_v39 = vmax.f32 %v8677_v15, 0.0  ;;  %v8901_v46 = vmax.f32 %v8790_v61, 0.0  ;;  %v8986_v20 = vpack.c.bf16 %v8898_v9, %v8890_v42  ;;  %v8988_v8 = vpack.c.bf16 %v8900_v7, %v8892_v32 }
0x188b   : > { %v8682_v13 = vpop.f32.mrf.mxu0  ;;  %v8795_v59 = vpop.f32.mrf.mxu1  ;;  %v8681_v58 = vadd.f32 %v8680_v38, %v17600_v17  ;;  %v8794_v30 = vadd.f32 %v8793_v41, %v17603_v14 }
0x188c   : > { %v8987_v12 = vpack.c.bf16 %v8899_v39, %v8891_v3  ;;  %v8989_v10 = vpack.c.bf16 %v8901_v46, %v8893_v53  ;;  %v8683_v24 = vadd.f32 %v8682_v13, %v17592_v36  ;;  %v8796_v45 = vadd.f32 %v8795_v59, %v17595_v35 }
0x188d   : > { %v8684_v27 = vpop.f32.mrf.mxu0  ;;  %v8797_v52 = vpop.f32.mrf.mxu1  ;;  %v8906_v53 = vmax.f32 %v8681_v58, 0.0  ;;  %v8908_v38 = vmax.f32 %v8794_v30, 0.0 }
0x188e   : > { %v8685_v63 = vadd.f32 %v8684_v27, %v17600_v17  ;;  %v8798_v23 = vadd.f32 %v8797_v52, %v17603_v14  ;;  %10091 = vmatprep.mubr.bf16.mxu0 %v8987_v12  ;;  %10204 = vmatprep.mubr.bf16.mxu1 %v8989_v10  ;;  %v8907_v61 = vmax.f32 %v8683_v24, 0.0  ;;  %v8909_v9 = vmax.f32 %v8796_v45, 0.0 }
0x188f   : > { %v8686_v19 = vpop.f32.mrf.mxu0  ;;  %v8799_v5 = vpop.f32.mrf.mxu1  ;;  %10092 = vmatmul.mubr.bf16.gmra.mxu0 %v8986_v20  ;;  %10205 = vmatmul.mubr.bf16.gmra.mxu1 %v8988_v8 }
0x1890   : > { %v8687_v43 = vadd.f32 %v8686_v19, %v17592_v36  ;;  %v8800_v18 = vadd.f32 %v8799_v5, %v17595_v35  ;;  %v8914_v60 = vmax.f32 %v8685_v63, 0.0  ;;  %v8916_v2 = vmax.f32 %v8798_v23, 0.0 }
0x1891   : > { %v8690_v34 = vpop.f32.mrf.mxu0  ;;  %v8803_v15 = vpop.f32.mrf.mxu1 }
0x1892   : > { %v8915_v7 = vmax.f32 %v8687_v43, 0.0  ;;  %v8917_v3 = vmax.f32 %v8800_v18, 0.0  ;;  %v8994_v32 = vpack.c.bf16 %v8914_v60, %v8906_v53  ;;  %v8996_v13 = vpack.c.bf16 %v8916_v2, %v8908_v38 }
0x1893   : > { %v8692_v39 = vpop.f32.mrf.mxu0  ;;  %v8805_v41 = vpop.f32.mrf.mxu1  ;;  %v8691_v27 = vadd.f32 %v8690_v34, %v17600_v17  ;;  %v8804_v52 = vadd.f32 %v8803_v15, %v17603_v14 }
0x1894   : > { %v8995_v46 = vpack.c.bf16 %v8915_v7, %v8907_v61  ;;  %v8997_v42 = vpack.c.bf16 %v8917_v3, %v8909_v9  ;;  %v8693_v59 = vadd.f32 %v8692_v39, %v17592_v36  ;;  %v8806_v20 = vadd.f32 %v8805_v41, %v17595_v35 }
0x1895   : > { %v8694_v12 = vpop.f32.mrf.mxu0  ;;  %v8807_v10 = vpop.f32.mrf.mxu1  ;;  %v8922_v9 = vmax.f32 %v8691_v27, 0.0  ;;  %v8924_v34 = vmax.f32 %v8804_v52, 0.0 }
0x1896   : > { %v8695_v8 = vadd.f32 %v8694_v12, %v17600_v17  ;;  %v8808_v24 = vadd.f32 %v8807_v10, %v17603_v14  ;;  %10101 = vmatprep.mubr.bf16.mxu0 %v8995_v46  ;;  %10214 = vmatprep.mubr.bf16.mxu1 %v8997_v42  ;;  %v8923_v18 = vmax.f32 %v8693_v59, 0.0  ;;  %v8925_v60 = vmax.f32 %v8806_v20, 0.0 }
0x1897   : > { %v8696_v45 = vpop.f32.mrf.mxu0  ;;  %v8809_v63 = vpop.f32.mrf.mxu1  ;;  %10102 = vmatmul.mubr.bf16.gmra.mxu0 %v8994_v32  ;;  %10215 = vmatmul.mubr.bf16.gmra.mxu1 %v8996_v13 }
0x1898   : > { %v8697_v23 = vadd.f32 %v8696_v45, %v17592_v36  ;;  %v8810_v58 = vadd.f32 %v8809_v63, %v17595_v35  ;;  %v8930_v30 = vmax.f32 %v8695_v8, 0.0  ;;  %v8932_v19 = vmax.f32 %v8808_v24, 0.0 }
0x1899   : > { %v8700_v5 = vpop.f32.mrf.mxu0  ;;  %v8813_v43 = vpop.f32.mrf.mxu1 }
0x189a   : > { %v8931_v2 = vmax.f32 %v8697_v23, 0.0  ;;  %v8933_v61 = vmax.f32 %v8810_v58, 0.0  ;;  %v9002_v38 = vpack.c.bf16 %v8930_v30, %v8922_v9  ;;  %v9004_v39 = vpack.c.bf16 %v8932_v19, %v8924_v34 }
0x189b   : > { %v8702_v7 = vpop.f32.mrf.mxu0  ;;  %v8815_v15 = vpop.f32.mrf.mxu1  ;;  %v8701_v12 = vadd.f32 %v8700_v5, %v17600_v17  ;;  %v8814_v10 = vadd.f32 %v8813_v43, %v17603_v14 }
0x189c   : > { %v9003_v3 = vpack.c.bf16 %v8931_v2, %v8923_v18  ;;  %v9005_v53 = vpack.c.bf16 %v8933_v61, %v8925_v60  ;;  %v8703_v41 = vadd.f32 %v8702_v7, %v17592_v36  ;;  %v8816_v32 = vadd.f32 %v8815_v15, %v17595_v35 }
0x189d   : > { %v8704_v46 = vpop.f32.mrf.mxu0  ;;  %v8817_v42 = vpop.f32.mrf.mxu1  ;;  %v8938_v19 = vmax.f32 %v8701_v12, 0.0  ;;  %v8940_v18 = vmax.f32 %v8814_v10, 0.0 }
0x189e   : > { %v8705_v13 = vadd.f32 %v8704_v46, %v17600_v17  ;;  %v8818_v59 = vadd.f32 %v8817_v42, %v17603_v14  ;;  %10111 = vmatprep.mubr.bf16.mxu0 %v9003_v3  ;;  %10224 = vmatprep.mubr.bf16.mxu1 %v9005_v53  ;;  %v8939_v63 = vmax.f32 %v8703_v41, 0.0  ;;  %v8941_v23 = vmax.f32 %v8816_v32, 0.0 }
0x189f   : > { %v8706_v20 = vpop.f32.mrf.mxu0  ;;  %v8819_v8 = vpop.f32.mrf.mxu1  ;;  %10112 = vmatmul.mubr.bf16.gmra.mxu0 %v9002_v38  ;;  %10225 = vmatmul.mubr.bf16.gmra.mxu1 %v9004_v39 }
0x18a0   : > { %v8707_v24 = vadd.f32 %v8706_v20, %v17592_v36  ;;  %v8820_v27 = vadd.f32 %v8819_v8, %v17595_v35  ;;  %v8946_v52 = vmax.f32 %v8705_v13, 0.0  ;;  %v8948_v45 = vmax.f32 %v8818_v59, 0.0 }
0x18a2   : > { %v8947_v58 = vmax.f32 %v8707_v24, 0.0  ;;  %v8949_v30 = vmax.f32 %v8820_v27, 0.0  ;;  %v9010_v5 = vpack.c.bf16 %v8946_v52, %v8938_v19  ;;  %v9012_v14 = vpack.c.bf16 %v8948_v45, %v8940_v18 }
0x18a4   : > { %v9011_v60 = vpack.c.bf16 %v8947_v58, %v8939_v63  ;;  %v9013_v17 = vpack.c.bf16 %v8949_v30, %v8941_v23 }
0x18a6   : > { %10121 = vmatprep.mubr.bf16.mxu0 %v9011_v60  ;;  %10234 = vmatprep.mubr.bf16.mxu1 %v9013_v17 }
0x18a7   : > { %10122 = vmatmul.mubr.bf16.gmra.mxu0 %v9010_v5  ;;  %10235 = vmatmul.mubr.bf16.gmra.mxu1 %v9012_v14 }
0x18d0   : > { %v17669_v43 = vpop.f32.mrf.mxu0  ;;  %v17671_v36 = vpop.f32.mrf.mxu1 }
0x18d2   : > { %v17673_v35 = vpop.f32.mrf.mxu0  ;;  %v17675_v2 = vpop.f32.mrf.mxu1 }
0x18d4   : > { %v17677_v61 = vpop.f32.mrf.mxu0  ;;  %v17679_v9 = vpop.f32.mrf.mxu1 }
0x18d6   : > { %v17681_v34 = vpop.f32.mrf.mxu0  ;;  %v17683_v7 = vpop.f32.mrf.mxu1 }
0x18d8   : > { %v17685_v15 = vpop.f32.mrf.mxu0  ;;  %v17687_v3 = vpop.f32.mrf.mxu1 }
0x18da   : > { %v17689_v53 = vpop.f32.mrf.mxu0  ;;  %v17691_v38 = vpop.f32.mrf.mxu1 }
0x18dc   : > { %v17693_v39 = vpop.f32.mrf.mxu0  ;;  %v17695_v41 = vpop.f32.mrf.mxu1 }
0x18de   : > { %v17697_v46 = vpop.f32.mrf.mxu0  ;;  %v17699_v42 = vpop.f32.mrf.mxu1 }
0x18e0   : > { %v17701_v32 = vpop.f32.mrf.mxu0  ;;  %v17703_v13 = vpop.f32.mrf.mxu1 }
0x18e2   : > { %v17705_v59 = vpop.f32.mrf.mxu0  ;;  %v17707_v12 = vpop.f32.mrf.mxu1 }
0x18e4   : > { %v17709_v10 = vpop.f32.mrf.mxu0  ;;  %v17711_v20 = vpop.f32.mrf.mxu1 }
0x18e6   : > { %v17713_v8 = vpop.f32.mrf.mxu0  ;;  %v17715_v24 = vpop.f32.mrf.mxu1 }
0x18e8   : > { %v17717_v27 = vpop.f32.mrf.mxu0  ;;  %v17719_v52 = vpop.f32.mrf.mxu1 }
0x18ea   : > { %v17721_v45 = vpop.f32.mrf.mxu0  ;;  %v17723_v63 = vpop.f32.mrf.mxu1 }
0x18ec   : > { %v17725_v23 = vpop.f32.mrf.mxu0  ;;  %v17727_v58 = vpop.f32.mrf.mxu1 }
0x18ee   : > { %v17729_v30 = vpop.f32.mrf.mxu0  ;;  %v17731_v19 = vpop.f32.mrf.mxu1 }
0x190f   : > { %v17733_v18 = vpop.f32.mrf.mxu0  ;;  %v17735_v60 = vpop.f32.mrf.mxu1 }
0x1911   : > { %v17737_v17 = vpop.f32.mrf.mxu0  ;;  %v17739_v5 = vpop.f32.mrf.mxu1 }
0x1913   : > { %v17741_v14 = vpop.f32.mrf.mxu0  ;;  %v17743_v11 = vpop.f32.mrf.mxu1 }
0x1915   : > { %v17745_v33 = vpop.f32.mrf.mxu0  ;;  %v17747_v47 = vpop.f32.mrf.mxu1 }
0x1916   : > { %18842 = vst [vmem:[#allocation68_spill] sm:$0xff] %v17747_v47 }
0x1917   : > { %v17749_v4 = vpop.f32.mrf.mxu0  ;;  %v17751_v16 = vpop.f32.mrf.mxu1 }
0x1918   : > { %18843 = vst [vmem:[#allocation80_spill] sm:$0xff] %v17749_v4  ;;  %18844 = vst [vmem:[#allocation60_spill] sm:$0xff] %v17751_v16 }
0x1919   : > { %v17753_v0 = vpop.f32.mrf.mxu0  ;;  %v17755_v54 = vpop.f32.mrf.mxu1 }
0x191a   : > { %18845 = vst [vmem:[#allocation20_spill] sm:$0xff] %v17753_v0  ;;  %18846 = vst [vmem:[#allocation69_spill] sm:$0xff] %v17755_v54 }
0x191b   : > { %v17757_v49 = vpop.f32.mrf.mxu0  ;;  %v17759_v6 = vpop.f32.mrf.mxu1 }
0x191c   : > { %18847 = vst [vmem:[#allocation58_spill] sm:$0xff] %v17757_v49  ;;  %18848 = vst [vmem:[#allocation82_spill] sm:$0xff] %v17759_v6 }
0x191d   : > { %v17761_v37 = vpop.f32.mrf.mxu0  ;;  %v17763_v28 = vpop.f32.mrf.mxu1 }
0x191e   : > { %18849 = vst [vmem:[#allocation81_spill] sm:$0xff] %v17761_v37  ;;  %18850 = vst [vmem:[#allocation67_spill] sm:$0xff] %v17763_v28  ;;  %v17782_v37 = vrot.slane %v439_v40, %v18812_v25 }
0x191f   : > { %v17765_v1 = vpop.f32.mrf.mxu0  ;;  %v17767_v48 = vpop.f32.mrf.mxu1 }
0x1920   : > { %18851 = vst [vmem:[#allocation23_spill] sm:$0xff] %v17765_v1  ;;  %18852 = vst [vmem:[#allocation70_spill] sm:$0xff] %v17767_v48  ;;  %v17789_v48 = vrot.slane %v439_v40, %v18813_v55  ;;  %v9832_v55 = vadd.f32 %v17677_v61, %v17782_v37 }
0x1921   : > { %v17769_v22 = vpop.f32.mrf.mxu0  ;;  %v17771_v62 = vpop.f32.mrf.mxu1 }
0x1922   : > { %18853 = vst [vmem:[#allocation56_spill] sm:$0xff] %v17769_v22  ;;  %18854 = vst [vmem:[#allocation83_spill] sm:$0xff] %v17771_v62  ;;  %v9830_v25 = vadd.f32 %v17673_v35, %v17789_v48  ;;  %v9838_v35 = vadd.f32 %v17685_v15, %v17782_v37 }
0x1923   : > { %v17773_v16 = vpop.f32.mrf.mxu0  ;;  %v17775_v54 = vpop.f32.mrf.mxu1 }
0x1924   : > { %18855 = vst [vmem:[#allocation38_spill] sm:$0xff] %v17773_v16  ;;  %18856 = vst [vmem:[#allocation61_spill] sm:$0xff] %v17775_v54  ;;  %v9828_v54 = vadd.f32 %v17669_v43, %v17782_v37  ;;  %v9943_v43 = vadd.f32 %v17675_v2, %v9830_v25 }
0x1925   : > { %v17777_v49 = vpop.f32.mrf.mxu0  ;;  %v17779_v6 = vpop.f32.mrf.mxu1 }
0x1926   : > { %18857 = vst [vmem:[#allocation26_spill] sm:$0xff] %v17777_v49  ;;  %18858 = vst [vmem:[#allocation71_spill] sm:$0xff] %v17779_v6  ;;  %v9941_v40 = vadd.f32 %v17671_v36, %v9828_v54  ;;  %v9840_v36 = vadd.f32 %v17689_v53, %v17789_v48 }
0x1927   : > { %v17784_v28 = vpop.f32.mrf.mxu0  ;;  %v17786_v1 = vpop.f32.mrf.mxu1 }
0x1928   : > { %18859 = vst [vmem:[#allocation57_spill] sm:$0xff] %v17784_v28  ;;  %18860 = vst [vmem:[#allocation84_spill] sm:$0xff] %v17786_v1 }
0x1929   : > { %v17791_v62 = vpop.f32.mrf.mxu0  ;;  %v17793_v22 = vpop.f32.mrf.mxu1 }
0x192a   : > { %18861 = vst [vmem:[#allocation49_spill] sm:$0xff] %v17791_v62  ;;  %18862 = vst [vmem:[#allocation65_spill] sm:$0xff] %v17793_v22 }
0x192b   : > { %v17797_v49 = vpop.f32.mrf.mxu0  ;;  %v17799_v6 = vpop.f32.mrf.mxu1 }
0x192c   : > { %18863 = vst [vmem:[#allocation29_spill] sm:$0xff] %v17797_v49  ;;  %18864 = vst [vmem:[#allocation54_spill] sm:$0xff] %v17799_v6  ;;  %v9834_v49 = vadd.f32 %v17681_v34, %v17789_v48  ;;  %v9842_v34 = vadd.f32 %v17693_v39, %v17782_v37 }
0x192d   : > { %v17803_v28 = vpop.f32.mrf.mxu0  ;;  %v17805_v1 = vpop.f32.mrf.mxu1 }
0x192e   : > { %18865 = vst [vmem:[#allocation22_spill] sm:$0xff] %v17803_v28  ;;  %18866 = vst [vmem:[#allocation72_spill] sm:$0xff] %v17805_v1  ;;  %v9945_v1 = vadd.f32 %v17679_v9, %v9832_v55  ;;  %v9947_v25 = vadd.f32 %v17683_v7, %v9834_v49  ;;  %v9953_v9 = vadd.f32 %v17691_v38, %v9840_v36 }
0x192f   : > { %v10053_v22 = vpop.f32.mrf.mxu0  ;;  %v10166_v62 = vpop.f32.mrf.mxu1 }
0x1930   : > { %v10054_v6 = vadd.f32 %v10053_v22, %v9941_v40  ;;  %v9951_v22 = vadd.f32 %v17687_v3, %v9838_v35 }
0x1931   : > { %v10055_v16 = vpop.f32.mrf.mxu0  ;;  %v10168_v28 = vpop.f32.mrf.mxu1 }
0x1932   : > { %v10167_v47 = vadd.f32 %v10166_v62, %v10054_v6  ;;  %v10056_v54 = vadd.f32 %v10055_v16, %v9943_v43  ;;  %v9850_v43 = vadd.f32 %v17705_v59, %v17789_v48 }
0x1933   : > { %v10057_v61 = vpop.f32.mrf.mxu0  ;;  %v10170_v0 = vpop.f32.mrf.mxu1 }
0x1934   : > { %v10169_v2 = vadd.f32 %v10168_v28, %v10056_v54  ;;  %v10058_v4 = vadd.f32 %v10057_v61, %v9945_v1  ;;  %v17823_v55 = vadd.f32 %v10167_v47, %v17041_v44  ;;  %v9844_v1 = vadd.f32 %v17697_v46, %v17789_v48 }
0x1935   : > { %v10059_v15 = vpop.f32.mrf.mxu0  ;;  %v10172_v40 = vpop.f32.mrf.mxu1  ;;  %v9955_v44 = vadd.f32 %v17695_v41, %v9842_v34 }
0x1936   : > { %v17826_v62 = vadd.f32 %v10169_v2, %v17038_v50  ;;  %v10171_v6 = vadd.f32 %v10170_v0, %v10058_v4  ;;  %v10060_v16 = vadd.f32 %v10059_v15, %v9947_v25  ;;  %v9848_v50 = vadd.f32 %v17701_v32, %v17782_v37 }
0x1937   : > { %v10063_v49 = vpop.f32.mrf.mxu0  ;;  %v10176_v28 = vpop.f32.mrf.mxu1  ;;  %v9957_v41 = vadd.f32 %v17699_v42, %v9844_v1  ;;  %v9963_v15 = vadd.f32 %v17707_v12, %v9850_v43 }
0x1938   : > { %v10173_v7 = vadd.f32 %v10172_v40, %v10060_v16  ;;  %v10064_v3 = vadd.f32 %v10063_v49, %v9951_v22  ;;  %v10277_v53 = vadd.f32 %v17826_v62, %v17823_v55  ;;  %v17837_v4 = vadd.f32 %v10171_v6, %v17050_v26 }
0x1939   : > { %v10065_v47 = vpop.f32.mrf.mxu0  ;;  %v10178_v0 = vpop.f32.mrf.mxu1  ;;  %v9961_v26 = vadd.f32 %v17703_v13, %v9848_v50  ;;  %v9854_v13 = vadd.f32 %v17713_v8, %v17789_v48 }
0x193a   : > { %v17840_v38 = vadd.f32 %v10173_v7, %v17047_v31  ;;  %v10177_v39 = vadd.f32 %v10176_v28, %v10064_v3  ;;  %v10066_v46 = vadd.f32 %v10065_v47, %v9953_v9  ;;  %10278 = vadd.xlane.f32.xlu0 %v10277_v53  ;;  %v9852_v31 = vadd.f32 %v17709_v10, %v17782_v37 }
0x193b   : > { %v10067_v35 = vpop.f32.mrf.mxu0  ;;  %v10180_v54 = vpop.f32.mrf.mxu1  ;;  %v9860_v3 = vadd.f32 %v17721_v45, %v17789_v48  ;;  %v18867_v45 = vld [vmem:[#allocation40_spill] sm:$0xff] }
0x193c   : > { %v10179_v36 = vadd.f32 %v10178_v0, %v10066_v46  ;;  %v10068_v32 = vadd.f32 %v10067_v35, %v9955_v44  ;;  %v10280_v61 = vadd.f32 %v17840_v38, %v17837_v4  ;;  %v17851_v22 = vadd.f32 %v10177_v39, %v17097_v57 }
0x193d   : > { %v10069_v25 = vpop.f32.mrf.mxu0  ;;  %v10182_v2 = vpop.f32.mrf.mxu1  ;;  %v9965_v57 = vadd.f32 %v17711_v20, %v9852_v31  ;;  %v9967_v20 = vadd.f32 %v17715_v24, %v9854_v13 }
0x193e   : > { %v17854_v59 = vadd.f32 %v10179_v36, %v17094_v29  ;;  %v10181_v34 = vadd.f32 %v10180_v54, %v10068_v32  ;;  %v10070_v42 = vadd.f32 %v10069_v25, %v9957_v41  ;;  %10281 = vadd.xlane.f32.xlu1 %v10280_v61  ;;  %v9858_v29 = vadd.f32 %v17717_v27, %v17782_v37 }
0x193f   : > { %v10073_v40 = vpop.f32.mrf.mxu0  ;;  %v10186_v6 = vpop.f32.mrf.mxu1  ;;  %v9973_v54 = vadd.f32 %v17723_v63, %v9860_v3  ;;  %v18869_v63 = vld [vmem:[#allocation42_spill] sm:$0xff] }
0x1940   : > { %v10183_v16 = vadd.f32 %v10182_v2, %v10070_v42  ;;  %v10074_v10 = vadd.f32 %v10073_v40, %v9961_v26  ;;  %v10283_v9 = vadd.f32 %v17854_v59, %v17851_v22  ;;  %v17865_v1 = vadd.f32 %v10181_v34, %v17109_v21  ;;  %v18868_v2 = vld [vmem:[#allocation43_spill] sm:$0xff] }
0x1941   : > { %v10075_v49 = vpop.f32.mrf.mxu0  ;;  %v10188_v28 = vpop.f32.mrf.mxu1  ;;  %v9971_v21 = vadd.f32 %v17719_v52, %v9858_v29  ;;  %v9864_v52 = vadd.f32 %v17729_v30, %v17789_v48  ;;  %v9868_v26 = vadd.f32 %v17733_v18, %v17782_v37  ;;  %v9870_v40 = vadd.f32 %v17737_v17, %v17789_v48  ;;  %v18871_v17 = vld [vmem:[#allocation59_spill] sm:$0xff] }
0x1942   : > { %v17868_v12 = vadd.f32 %v10183_v16, %v17106_v51  ;;  %v10187_v7 = vadd.f32 %v10186_v6, %v10074_v10  ;;  %v10076_v8 = vadd.f32 %v10075_v49, %v9963_v15  ;;  %10284 = vadd.xlane.f32.xlu0 %v10283_v9  ;;  %v9862_v51 = vadd.f32 %v17725_v23, %v17782_v37 }
0x1943   : > { %v10077_v53 = vpop.f32.mrf.mxu0  ;;  %v10190_v44 = vpop.f32.mrf.mxu1  ;;  %v9981_v9 = vadd.f32 %v17735_v60, %v9868_v26  ;;  %v9874_v60 = vadd.f32 %v17745_v33, %v17789_v48 }
0x1944   : > { %v10189_v50 = vadd.f32 %v10188_v28, %v10076_v8  ;;  %v10078_v27 = vadd.f32 %v10077_v53, %v9965_v57  ;;  %v10286_v47 = vadd.f32 %v17868_v12, %v17865_v1  ;;  %v17879_v46 = vadd.f32 %v10187_v7, %v17153_v56  ;;  %v18870_v28 = vld [vmem:[#allocation55_spill] sm:$0xff] }
0x1945   : > { %v10079_v0 = vpop.f32.mrf.mxu0  ;;  %v10192_v39 = vpop.f32.mrf.mxu1  ;;  %v9975_v56 = vadd.f32 %v17727_v58, %v9862_v51  ;;  %v9977_v58 = vadd.f32 %v17731_v19, %v9864_v52  ;;  %v9872_v57 = vadd.f32 %v17741_v14, %v17782_v37  ;;  %v9983_v53 = vadd.f32 %v17739_v5, %v9870_v40  ;;  %v18874_v5 = vld [vmem:[#allocation24_spill] sm:$0xff]  ;;  %v18879_v40 = vld [vmem:[#allocation51_spill] sm:$0xff] }
0x1946   : > { %v17882_v43 = vadd.f32 %v10189_v50, %v18867_v45  ;;  %v10191_v35 = vadd.f32 %v10190_v44, %v10078_v27  ;;  %v10080_v24 = vadd.f32 %v10079_v0, %v9967_v20  ;;  %10287 = vadd.xlane.f32.xlu1 %v10286_v47  ;;  %v18873_v45 = vld [vmem:[#allocation52_spill] sm:$0xff] }
0x1947   : > { %v10083_v41 = vpop.f32.mrf.mxu0  ;;  %v10196_v36 = vpop.f32.mrf.mxu1  ;;  %v9985_v47 = vadd.f32 %v17743_v11, %v9872_v57  ;;  %v18876_v11 = vld [vmem:[#allocation68_spill] sm:$0xff] }
0x1948   : > { %v10193_v32 = vadd.f32 %v10192_v39, %v10080_v24  ;;  %v10084_v23 = vadd.f32 %v10083_v41, %v9971_v21  ;;  %v10289_v61 = vadd.f32 %v17882_v43, %v17879_v46  ;;  %v17893_v34 = vadd.f32 %v10191_v35, %v18868_v2  ;;  %v18872_v21 = vld [vmem:[#allocation80_spill] sm:$0xff]  ;;  %v18878_v2 = vld [vmem:[#allocation58_spill] sm:$0xff] }
0x1949   : > { %v10085_v31 = vpop.f32.mrf.mxu0  ;;  %v10198_v25 = vpop.f32.mrf.mxu1  ;;  %v9878_v51 = vadd.f32 %v18872_v21, %v17782_v37  ;;  %v18875_v41 = vld [vmem:[#allocation20_spill] sm:$0xff]  ;;  %v18886_v21 = vld [vmem:[#allocation47_spill] sm:$0xff] }
0x194a   : > { %v17896_v42 = vadd.f32 %v10193_v32, %v18869_v63  ;;  %v10197_v15 = vadd.f32 %v10196_v36, %v10084_v23  ;;  %v10086_v30 = vadd.f32 %v10085_v31, %v9973_v54  ;;  %10290 = vadd.xlane.f32.xlu0 %v10289_v61  ;;  %v9880_v36 = vadd.f32 %v18875_v41, %v17789_v48  ;;  %v18877_v31 = vld [vmem:[#allocation60_spill] sm:$0xff]  ;;  %v18888_v41 = vld [vmem:[#allocation67_spill] sm:$0xff] }
0x194b   : > { %v10087_v6 = vpop.f32.mrf.mxu0  ;;  %v10200_v13 = vpop.f32.mrf.mxu1  ;;  %v9987_v23 = vadd.f32 %v18876_v11, %v9874_v60  ;;  %v9882_v63 = vadd.f32 %v18878_v2, %v17782_v37  ;;  %v18891_v2 = vld [vmem:[#allocation16_spill] sm:$0xff] }
0x194c   : > { %v10199_v16 = vadd.f32 %v10198_v25, %v10086_v30  ;;  %v10088_v18 = vadd.f32 %v10087_v6, %v9975_v56  ;;  %v10292_v10 = vadd.f32 %v17896_v42, %v17893_v34  ;;  %v17907_v7 = vadd.f32 %v10197_v15, %v18870_v28 }
0x194d   : > { %v10089_v29 = vpop.f32.mrf.mxu0  ;;  %v10202_v49 = vpop.f32.mrf.mxu1  ;;  %v9991_v25 = vadd.f32 %v18877_v31, %v9878_v51 }
0x194e   : > { %v17910_v8 = vadd.f32 %v10199_v16, %v18871_v17  ;;  %v10201_v3 = vadd.f32 %v10200_v13, %v10088_v18  ;;  %v10090_v19 = vadd.f32 %v10089_v29, %v9977_v58  ;;  %10293 = vadd.xlane.f32.xlu1 %v10292_v10  ;;  %v18880_v13 = vld [vmem:[#allocation53_spill] sm:$0xff] }
0x194f   : > { %v10093_v44 = vpop.f32.mrf.mxu0  ;;  %v10206_v20 = vpop.f32.mrf.mxu1  ;;  %v18881_v10 = vld [vmem:[#allocation69_spill] sm:$0xff] }
0x1950   : > { %v10203_v50 = vadd.f32 %v10202_v49, %v10090_v19  ;;  %v10094_v14 = vadd.f32 %v10093_v44, %v9981_v9  ;;  %v10295_v27 = vadd.f32 %v17910_v8, %v17907_v7  ;;  %v17921_v35 = vadd.f32 %v10201_v3, %v18873_v45  ;;  %v18882_v49 = vld [vmem:[#allocation81_spill] sm:$0xff]  ;;  %v18887_v45 = vld [vmem:[#allocation56_spill] sm:$0xff] }
0x1951   : > { %v10095_v0 = vpop.f32.mrf.mxu0  ;;  %v10208_v39 = vpop.f32.mrf.mxu1  ;;  %v9993_v9 = vadd.f32 %v18881_v10, %v9880_v36  ;;  %v9884_v28 = vadd.f32 %v18882_v49, %v17789_v48 }
0x1952   : > { %v17924_v24 = vadd.f32 %v10203_v50, %v18874_v5  ;;  %v10207_v54 = vadd.f32 %v10206_v20, %v10094_v14  ;;  %v10096_v33 = vadd.f32 %v10095_v0, %v9983_v53  ;;  %10296 = vadd.xlane.f32.xlu0 %v10295_v27  ;;  %v18883_v53 = vld [vmem:[#allocation82_spill] sm:$0xff]  ;;  %v18884_v20 = vld [vmem:[#allocation23_spill] sm:$0xff]  ;;  %v9890_v5 = vadd.f32 %v18887_v45, %v17789_v48  ;;  %v18899_v45 = vld [vmem:[#allocation49_spill] sm:$0xff] }
0x1953   : > { %v10097_v52 = vpop.f32.mrf.mxu0  ;;  %v10210_v32 = vpop.f32.mrf.mxu1  ;;  %v9995_v44 = vadd.f32 %v18883_v53, %v9882_v63  ;;  %v9888_v60 = vadd.f32 %v18884_v20, %v17782_v37  ;;  %v18885_v27 = vld [vmem:[#allocation86_spill] sm:$0xff]  ;;  %v9997_v36 = vadd.f32 %v18888_v41, %v9884_v28  ;;  %v18896_v53 = vld [vmem:[#allocation57_spill] sm:$0xff]  ;;  %v18900_v41 = vld [vmem:[#allocation71_spill] sm:$0xff] }
0x1954   : > { %v10209_v61 = vadd.f32 %v10208_v39, %v10096_v33  ;;  %v10098_v56 = vadd.f32 %v10097_v52, %v9985_v47  ;;  %v10298_v26 = vadd.f32 %v17924_v24, %v17921_v35  ;;  %v17935_v6 = vadd.f32 %v10207_v54, %v18879_v40 }
0x1955   : > { %v10099_v15 = vpop.f32.mrf.mxu0  ;;  %v10212_v30 = vpop.f32.mrf.mxu1 }
0x1956   : > { %v17938_v58 = vadd.f32 %v10209_v61, %v18880_v13  ;;  %v10211_v16 = vadd.f32 %v10210_v32, %v10098_v56  ;;  %v10100_v18 = vadd.f32 %v10099_v15, %v9987_v23  ;;  %10299 = vadd.xlane.f32.xlu1 %v10298_v26  ;;  %v18889_v23 = vld [vmem:[#allocation70_spill] sm:$0xff]  ;;  %v18892_v15 = vld [vmem:[#allocation36_spill] sm:$0xff] }
0x1957   : > { %v10103_v57 = vpop.f32.mrf.mxu0  ;;  %v10216_v29 = vpop.f32.mrf.mxu1  ;;  %v10001_v61 = vadd.f32 %v18889_v23, %v9888_v60  ;;  %v18890_v56 = vld [vmem:[#allocation38_spill] sm:$0xff]  ;;  %v18901_v23 = vld [vmem:[#allocation84_spill] sm:$0xff] }
0x1958   : > { %v10213_v17 = vadd.f32 %v10212_v30, %v10100_v18  ;;  %v10104_v3 = vadd.f32 %v10103_v57, %v9991_v25  ;;  %v10301_v19 = vadd.f32 %v17938_v58, %v17935_v6  ;;  %v17949_v47 = vadd.f32 %v10211_v16, %v18885_v27  ;;  %v18893_v16 = vld [vmem:[#allocation83_spill] sm:$0xff]  ;;  %v18894_v57 = vld [vmem:[#allocation26_spill] sm:$0xff]  ;;  %v18898_v27 = vld [vmem:[#allocation21_spill] sm:$0xff] }
0x1959   : > { %v10105_v50 = vpop.f32.mrf.mxu0  ;;  %v10218_v14 = vpop.f32.mrf.mxu1  ;;  %v9892_v26 = vadd.f32 %v18890_v56, %v17782_v37  ;;  %v10003_v18 = vadd.f32 %v18893_v16, %v9890_v5  ;;  %v9900_v5 = vadd.f32 %v18899_v45, %v17789_v48  ;;  %v18902_v56 = vld [vmem:[#allocation29_spill] sm:$0xff] }
0x195a   : > { %v17952_v51 = vadd.f32 %v10213_v17, %v18886_v21  ;;  %v10217_v0 = vadd.f32 %v10216_v29, %v10104_v3  ;;  %v10106_v39 = vadd.f32 %v10105_v50, %v9993_v9  ;;  %10302 = vadd.xlane.f32.xlu0 %v10301_v19  ;;  %v9894_v29 = vadd.f32 %v18894_v57, %v17789_v48  ;;  %v18895_v3 = vld [vmem:[#allocation61_spill] sm:$0xff]  ;;  %v18897_v50 = vld [vmem:[#allocation18_spill] sm:$0xff] }
0x195b   : > { %v10107_v54 = vpop.f32.mrf.mxu0  ;;  %v10220_v33 = vpop.f32.mrf.mxu1  ;;  %v10005_v19 = vadd.f32 %v18895_v3, %v9892_v26  ;;  %v9902_v26 = vadd.f32 %v18902_v56, %v17782_v37 }
0x195c   : > { %v10219_v52 = vadd.f32 %v10218_v14, %v10106_v39  ;;  %v10108_v32 = vadd.f32 %v10107_v54, %v9995_v44  ;;  %v10304_v11 = vadd.f32 %v17952_v51, %v17949_v47  ;;  %v17963_v63 = vadd.f32 %v10217_v0, %v18891_v2  ;;  %v18903_v2 = vld [vmem:[#allocation25_spill] sm:$0xff] }
0x195d   : > { %v10109_v31 = vpop.f32.mrf.mxu0  ;;  %v10222_v25 = vpop.f32.mrf.mxu1  ;;  %v9898_v44 = vadd.f32 %v18896_v53, %v17782_v37 }
0x195e   : > { %v17966_v30 = vadd.f32 %v10219_v52, %v18892_v15  ;;  %v10221_v40 = vadd.f32 %v10220_v33, %v10108_v32  ;;  %v10110_v13 = vadd.f32 %v10109_v31, %v9997_v36  ;;  %10305 = vadd.xlane.f32.xlu1 %v10304_v11  ;;  %v10007_v36 = vadd.f32 %v18900_v41, %v9894_v29 }
0x195f   : > { %v10113_v10 = vpop.f32.mrf.mxu0  ;;  %v10226_v9 = vpop.f32.mrf.mxu1 }
0x1960   : > { %v10223_v49 = vadd.f32 %v10222_v25, %v10110_v13  ;;  %v10114_v28 = vadd.f32 %v10113_v10, %v10001_v61  ;;  %v10307_v17 = vadd.f32 %v17966_v30, %v17963_v63  ;;  %v17977_v14 = vadd.f32 %v10221_v40, %v18897_v50  ;;  %v18904_v40 = vld [vmem:[#allocation19_spill] sm:$0xff]  ;;  %v18905_v10 = vld [vmem:[#allocation65_spill] sm:$0xff] }
0x1961   : > { %v10115_v20 = vpop.f32.mrf.mxu0  ;;  %v10228_v60 = vpop.f32.mrf.mxu1  ;;  %v10011_v61 = vadd.f32 %v18901_v23, %v9898_v44 }
0x1962   : > { %v17980_v21 = vadd.f32 %v10223_v49, %v18898_v27  ;;  %v10227_v0 = vadd.f32 %v10226_v9, %v10114_v28  ;;  %v10116_v39 = vadd.f32 %v10115_v20, %v10003_v18  ;;  %10308 = vadd.xlane.f32.xlu0 %v10307_v17  ;;  %v10013_v9 = vadd.f32 %v18905_v10, %v9900_v5  ;;  %v18906_v49 = vld [vmem:[#allocation22_spill] sm:$0xff]  ;;  %v18909_v27 = vld [vmem:[#allocation28_spill] sm:$0xff] }
0x1963   : > { %v10117_v54 = vpop.f32.mrf.mxu0  ;;  %v10230_v33 = vpop.f32.mrf.mxu1  ;;  %v9904_v28 = vadd.f32 %v18906_v49, %v17789_v48  ;;  %v18914_v10 = vld [vmem:[#allocation30_spill] sm:$0xff] }
0x1964   : > { %v10229_v52 = vadd.f32 %v10228_v60, %v10116_v39  ;;  %v10118_v32 = vadd.f32 %v10117_v54, %v10005_v19  ;;  %v10310_v11 = vadd.f32 %v17980_v21, %v17977_v14  ;;  %v17991_v15 = vadd.f32 %v10227_v0, %v18903_v2  ;;  %v18907_v19 = vld [vmem:[#allocation54_spill] sm:$0xff]  ;;  %v18910_v54 = vld [vmem:[#allocation72_spill] sm:$0xff] }
0x1965   : > { %v10119_v31 = vpop.f32.mrf.mxu0  ;;  %v10232_v25 = vpop.f32.mrf.mxu1  ;;  %v10015_v53 = vadd.f32 %v18907_v19, %v9902_v26  ;;  %v18908_v60 = vld [vmem:[#allocation66_spill] sm:$0xff] }
0x1966   : > { %v17994_v13 = vadd.f32 %v10229_v52, %v18904_v40  ;;  %v10231_v16 = vadd.f32 %v10230_v33, %v10118_v32  ;;  %v10120_v18 = vadd.f32 %v10119_v31, %v10007_v36  ;;  %10311 = vadd.xlane.f32.xlu1 %v10310_v11  ;;  %v10017_v33 = vadd.f32 %v18910_v54, %v9904_v28  ;;  %v18911_v11 = vld [vmem:[#allocation34_spill] sm:$0xff] }
0x1967   : > { %v10123_v57 = vpop.f32.mrf.mxu0  ;;  %v10236_v29 = vpop.f32.mrf.mxu1 }
0x1968   : > { %v10233_v17 = vadd.f32 %v10232_v25, %v10120_v18  ;;  %v10124_v37 = vadd.f32 %v10123_v57, %v10011_v61  ;;  %v10313_v3 = vadd.f32 %v17994_v13, %v17991_v15  ;;  %v18003_v50 = vadd.f32 %v10231_v16, %v18908_v60  ;;  %v18912_v61 = vld [vmem:[#allocation31_spill] sm:$0xff]  ;;  %v18913_v16 = vld [vmem:[#allocation77_spill] sm:$0xff] }
0x1969   : > { %v10125_v44 = vpop.f32.mrf.mxu0  ;;  %v10238_v20 = vpop.f32.mrf.mxu1 }
0x196a   : > { %v18006_v0 = vadd.f32 %v10233_v17, %v18909_v27  ;;  %v10237_v39 = vadd.f32 %v10236_v29, %v10124_v37  ;;  %v10126_v45 = vadd.f32 %v10125_v44, %v10013_v9  ;;  %10314 = vadd.xlane.f32.xlu0 %v10313_v3 }
0x196b   : > { %v10127_v5 = vpop.f32.mrf.mxu0  ;;  %v10240_v48 = vpop.f32.mrf.mxu1 }
0x196c   : > { %v10239_v41 = vadd.f32 %v10238_v20, %v10126_v45  ;;  %v10128_v36 = vadd.f32 %v10127_v5, %v10015_v53  ;;  %v10316_v52 = vadd.f32 %v18006_v0, %v18003_v50  ;;  %v18012_v23 = vadd.f32 %v10237_v39, %v18911_v11 }
0x196d   : > { %v10129_v32 = vpop.f32.mrf.mxu0  ;;  %v10242_v25 = vpop.f32.mrf.mxu1 }
0x196e   : > { %v18015_v56 = vadd.f32 %v10239_v41, %v18912_v61  ;;  %v10241_v26 = vadd.f32 %v10240_v48, %v10128_v36  ;;  %v10130_v31 = vadd.f32 %v10129_v32, %v10017_v33  ;;  %10317 = vadd.xlane.f32.xlu1 %v10316_v52 }
0x1970   : > { %v10243_v2 = vadd.f32 %v10242_v25, %v10130_v31  ;;  %v10319_v40 = vadd.f32 %v18015_v56, %v18012_v23  ;;  %v18020_v18 = vadd.f32 %v10241_v26, %v18913_v16 }
0x1972   : > { %v18023_v9 = vadd.f32 %v10243_v2, %v18914_v10  ;;  %10320 = vadd.xlane.f32.xlu0 %v10319_v40 }
0x1974   : > { %v10322_v57 = vadd.f32 %v18023_v9, %v18020_v18 }
0x1976   : > { %10323 = vadd.xlane.f32.xlu1 %v10322_v57 }
0x19c3   : > { %v10279_v29 = vpop.xlane.xlu0 %10278 }
0x19c4   : > { %v10325_v49 = vmul.f32 0.00390625, %v10279_v29 }
0x19c6   : > { %v18028_v28 = vsub.f32 %v17823_v55, %v10325_v49  ;;  %v18031_v17 = vsub.f32 %v17826_v62, %v10325_v49 }
0x19c7   : > { %v10282_v37 = vpop.xlane.xlu1 %10281 }
0x19c8   : > { %v10373_v3 = vmul.f32 %v18028_v28, %v18028_v28  ;;  %v10374_v19 = vmul.f32 %v18031_v17, %v18031_v17  ;;  %v10326_v53 = vmul.f32 0.00390625, %v10282_v37 }
0x19ca   : > { %v18038_v44 = vsub.f32 %v17837_v4, %v10326_v53  ;;  %v18041_v20 = vsub.f32 %v17840_v38, %v10326_v53  ;;  %v10405_v60 = vadd.f32 %v10374_v19, %v10373_v3 }
0x19cb   : > { %v10285_v55 = vpop.xlane.xlu0 %10284 }
0x19cc   : > { %v10375_v62 = vmul.f32 %v18038_v44, %v18038_v44  ;;  %v10376_v27 = vmul.f32 %v18041_v20, %v18041_v20  ;;  %v10327_v39 = vmul.f32 0.00390625, %v10285_v55  ;;  %10406 = vadd.xlane.f32.xlu0 %v10405_v60 }
0x19ce   : > { %v18048_v45 = vsub.f32 %v17851_v22, %v10327_v39  ;;  %v18051_v5 = vsub.f32 %v17854_v59, %v10327_v39  ;;  %v10408_v4 = vadd.f32 %v10376_v27, %v10375_v62 }
0x19cf   : > { %v10288_v48 = vpop.xlane.xlu1 %10287 }
0x19d0   : > { %v10377_v38 = vmul.f32 %v18048_v45, %v18048_v45  ;;  %v10378_v54 = vmul.f32 %v18051_v5, %v18051_v5  ;;  %v10328_v33 = vmul.f32 0.00390625, %v10288_v48  ;;  %10409 = vadd.xlane.f32.xlu1 %v10408_v4 }
0x19d2   : > { %v18058_v41 = vsub.f32 %v17865_v1, %v10328_v33  ;;  %v18061_v36 = vsub.f32 %v17868_v12, %v10328_v33  ;;  %v10411_v22 = vadd.f32 %v10378_v54, %v10377_v38 }
0x19d3   : > { %v10291_v52 = vpop.xlane.xlu0 %10290 }
0x19d4   : > { %v10379_v59 = vmul.f32 %v18058_v41, %v18058_v41  ;;  %v10380_v32 = vmul.f32 %v18061_v36, %v18061_v36  ;;  %v10329_v11 = vmul.f32 0.00390625, %v10291_v52  ;;  %10412 = vadd.xlane.f32.xlu0 %v10411_v22 }
0x19d6   : > { %v18068_v61 = vsub.f32 %v17879_v46, %v10329_v11  ;;  %v18071_v26 = vsub.f32 %v17882_v43, %v10329_v11  ;;  %v10414_v1 = vadd.f32 %v10380_v32, %v10379_v59 }
0x19d7   : > { %v10294_v31 = vpop.xlane.xlu1 %10293 }
0x19d8   : > { %v10381_v12 = vmul.f32 %v18068_v61, %v18068_v61  ;;  %v10382_v25 = vmul.f32 %v18071_v26, %v18071_v26  ;;  %v10330_v2 = vmul.f32 0.00390625, %v10294_v31  ;;  %10415 = vadd.xlane.f32.xlu1 %v10414_v1 }
0x19da   : > { %v18078_v40 = vsub.f32 %v17893_v34, %v10330_v2  ;;  %v18081_v16 = vsub.f32 %v17896_v42, %v10330_v2  ;;  %v10417_v46 = vadd.f32 %v10382_v25, %v10381_v12 }
0x19db   : > { %v10297_v10 = vpop.xlane.xlu0 %10296 }
0x19dc   : > { %v10383_v43 = vmul.f32 %v18078_v40, %v18078_v40  ;;  %v10384_v57 = vmul.f32 %v18081_v16, %v18081_v16  ;;  %v10331_v29 = vmul.f32 0.00390625, %v10297_v10  ;;  %10418 = vadd.xlane.f32.xlu0 %v10417_v46 }
0x19de   : > { %v18088_v49 = vsub.f32 %v17907_v7, %v10331_v29  ;;  %v18091_v37 = vsub.f32 %v17910_v8, %v10331_v29  ;;  %v10420_v34 = vadd.f32 %v10384_v57, %v10383_v43 }
0x19df   : > { %v10300_v3 = vpop.xlane.xlu1 %10299 }
0x19e0   : > { %v10385_v42 = vmul.f32 %v18088_v49, %v18088_v49  ;;  %v10386_v19 = vmul.f32 %v18091_v37, %v18091_v37  ;;  %v10332_v53 = vmul.f32 0.00390625, %v10300_v3  ;;  %10421 = vadd.xlane.f32.xlu1 %v10420_v34 }
0x19e2   : > { %v18098_v60 = vsub.f32 %v17921_v35, %v10332_v53  ;;  %v18101_v55 = vsub.f32 %v17924_v24, %v10332_v53  ;;  %v10423_v7 = vadd.f32 %v10386_v19, %v10385_v42 }
0x19e3   : > { %v10303_v62 = vpop.xlane.xlu0 %10302 }
0x19e4   : > { %v10387_v8 = vmul.f32 %v18098_v60, %v18098_v60  ;;  %v10388_v27 = vmul.f32 %v18101_v55, %v18101_v55  ;;  %v10333_v39 = vmul.f32 0.00390625, %v10303_v62  ;;  %10424 = vadd.xlane.f32.xlu0 %v10423_v7 }
0x19e6   : > { %v18108_v4 = vsub.f32 %v17935_v6, %v10333_v39  ;;  %v18111_v48 = vsub.f32 %v17938_v58, %v10333_v39  ;;  %v10426_v35 = vadd.f32 %v10388_v27, %v10387_v8 }
0x19e7   : > { %v10306_v38 = vpop.xlane.xlu1 %10305 }
0x19e8   : > { %v10389_v24 = vmul.f32 %v18108_v4, %v18108_v4  ;;  %v10390_v54 = vmul.f32 %v18111_v48, %v18111_v48  ;;  %v10334_v33 = vmul.f32 0.00390625, %v10306_v38  ;;  %10427 = vadd.xlane.f32.xlu1 %v10426_v35 }
0x19ea   : > { %v18118_v22 = vsub.f32 %v17949_v47, %v10334_v33  ;;  %v18121_v52 = vsub.f32 %v17952_v51, %v10334_v33  ;;  %v10429_v6 = vadd.f32 %v10390_v54, %v10389_v24 }
0x19eb   : > { %v10309_v59 = vpop.xlane.xlu0 %10308 }
0x19ec   : > { %v10391_v58 = vmul.f32 %v18118_v22, %v18118_v22  ;;  %v10392_v32 = vmul.f32 %v18121_v52, %v18121_v52  ;;  %v10335_v11 = vmul.f32 0.00390625, %v10309_v59  ;;  %10430 = vadd.xlane.f32.xlu0 %v10429_v6 }
0x19ee   : > { %v18128_v1 = vsub.f32 %v17963_v63, %v10335_v11  ;;  %v18131_v31 = vsub.f32 %v17966_v30, %v10335_v11  ;;  %v10432_v47 = vadd.f32 %v10392_v32, %v10391_v58 }
0x19ef   : > { %v10312_v12 = vpop.xlane.xlu1 %10311 }
0x19f0   : > { %v10393_v51 = vmul.f32 %v18128_v1, %v18128_v1  ;;  %v10394_v25 = vmul.f32 %v18131_v31, %v18131_v31  ;;  %v10336_v2 = vmul.f32 0.00390625, %v10312_v12  ;;  %10433 = vadd.xlane.f32.xlu1 %v10432_v47 }
0x19f2   : > { %v18138_v46 = vsub.f32 %v17977_v14, %v10336_v2  ;;  %v18141_v10 = vsub.f32 %v17980_v21, %v10336_v2  ;;  %v10435_v63 = vadd.f32 %v10394_v25, %v10393_v51 }
0x19f3   : > { %v10315_v43 = vpop.xlane.xlu0 %10314 }
0x19f4   : > { %v10395_v30 = vmul.f32 %v18138_v46, %v18138_v46  ;;  %v10396_v57 = vmul.f32 %v18141_v10, %v18141_v10  ;;  %v10337_v29 = vmul.f32 0.00390625, %v10315_v43  ;;  %10436 = vadd.xlane.f32.xlu0 %v10435_v63 }
0x19f6   : > { %v18148_v34 = vsub.f32 %v17991_v15, %v10337_v29  ;;  %v18151_v3 = vsub.f32 %v17994_v13, %v10337_v29  ;;  %v10438_v14 = vadd.f32 %v10396_v57, %v10395_v30  ;;  %v442_v57 = vld [vmem:[#allocation9 + $0x16] sm:$0x3]  ;;  %v443_v29 = vld [vmem:[#allocation9 + $0x18] sm:$0x3] }
0x19f7   : > { %v10318_v42 = vpop.xlane.xlu1 %10317 }
0x19f8   : > { %v10397_v21 = vmul.f32 %v18148_v34, %v18148_v34  ;;  %v10398_v19 = vmul.f32 %v18151_v3, %v18151_v3  ;;  %v10338_v53 = vmul.f32 0.00390625, %v10318_v42  ;;  %10439 = vadd.xlane.f32.xlu1 %v10438_v14 }
0x19fa   : > { %v18158_v7 = vsub.f32 %v18003_v50, %v10338_v53  ;;  %v18161_v62 = vsub.f32 %v18006_v0, %v10338_v53  ;;  %v10441_v15 = vadd.f32 %v10398_v19, %v10397_v21  ;;  %v18915_v21 = vld [vmem:[#allocation17_spill] sm:$0xff]  ;;  %v18916_v53 = vld [vmem:[#allocation76_spill] sm:$0xff] }
0x19fb   : > { %v10321_v8 = vpop.xlane.xlu0 %10320  ;;  %v18188_v19 = vrot.slane %v442_v57, %v18915_v21 }
0x19fc   : > { %v10399_v13 = vmul.f32 %v18158_v7, %v18158_v7  ;;  %v10400_v27 = vmul.f32 %v18161_v62, %v18161_v62  ;;  %v10339_v39 = vmul.f32 0.00390625, %v10321_v8  ;;  %10442 = vadd.xlane.f32.xlu0 %v10441_v15  ;;  %v18191_v15 = vrot.slane %v442_v57, %v18916_v53 }
0x19fe   : > { %v18168_v35 = vsub.f32 %v18012_v23, %v10339_v39  ;;  %v18171_v38 = vsub.f32 %v18015_v56, %v10339_v39  ;;  %v10444_v50 = vadd.f32 %v10400_v27, %v10399_v13  ;;  %v18194_v27 = vrot.slane %v443_v29, %v18915_v21 }
0x19ff   : > { %v10324_v24 = vpop.xlane.xlu1 %10323  ;;  %v18197_v39 = vrot.slane %v443_v29, %v18916_v53 }
0x1a00   : > { %v10401_v0 = vmul.f32 %v18168_v35, %v18168_v35  ;;  %v10402_v54 = vmul.f32 %v18171_v38, %v18171_v38  ;;  %v10340_v33 = vmul.f32 0.00390625, %v10324_v24  ;;  %10445 = vadd.xlane.f32.xlu1 %v10444_v50 }
0x1a02   : > { %v18178_v6 = vsub.f32 %v18020_v18, %v10340_v33  ;;  %v18181_v59 = vsub.f32 %v18023_v9, %v10340_v33  ;;  %v10447_v23 = vadd.f32 %v10402_v54, %v10401_v0 }
0x1a04   : > { %v10403_v56 = vmul.f32 %v18178_v6, %v18178_v6  ;;  %v10404_v58 = vmul.f32 %v18181_v59, %v18181_v59  ;;  %10448 = vadd.xlane.f32.xlu0 %v10447_v23 }
0x1a06   : > { %v10450_v32 = vadd.f32 %v10404_v58, %v10403_v56 }
0x1a08   : > { %10451 = vadd.xlane.f32.xlu1 %v10450_v32 }
0x1a55   : > { %v10407_v11 = vpop.xlane.xlu0 %10406 }
0x1a56   : > { %v10453_v47 = vmul.f32 0.00390625, %v10407_v11 }
0x1a58   : > { %v10469_v12 = vadd.f32 1e-05, %v10453_v47 }
0x1a59   : > { %v10410_v51 = vpop.xlane.xlu1 %10409 }
0x1a5a   : > { %13207 = vrsqrt.f32 %v10469_v12  ;;  %v10454_v18 = vmul.f32 0.00390625, %v10410_v51 }
0x1a5c   : > { %v10470_v25 = vadd.f32 1e-05, %v10454_v18 }
0x1a5d   : > { %v10413_v2 = vpop.xlane.xlu0 %10412 }
0x1a5e   : > { %13209 = vrsqrt.f32 %v10470_v25  ;;  %v10455_v9 = vmul.f32 0.00390625, %v10413_v2 }
0x1a60   : > { %v10471_v63 = vadd.f32 1e-05, %v10455_v9 }
0x1a61   : > { %v10416_v43 = vpop.xlane.xlu1 %10415 }
0x1a62   : > { %13211 = vrsqrt.f32 %v10471_v63  ;;  %v10456_v30 = vmul.f32 0.00390625, %v10416_v43 }
0x1a64   : > { %v10472_v14 = vadd.f32 1e-05, %v10456_v30 }
0x1a65   : > { %v10419_v42 = vpop.xlane.xlu0 %10418 }
0x1a66   : > { %13213 = vrsqrt.f32 %v10472_v14  ;;  %v10457_v8 = vmul.f32 0.00390625, %v10419_v42 }
0x1a67   : > { %v13208_v13 = vpop.eup %13207 }
0x1a68   : > { %v10501_v50 = vmul.f32 %v13208_v13, %v18028_v28  ;;  %v10502_v24 = vmul.f32 %v13208_v13, %v18031_v17  ;;  %v10473_v0 = vadd.f32 1e-05, %v10457_v8 }
0x1a69   : > { %v10422_v54 = vpop.xlane.xlu1 %10421 }
0x1a6a   : > { %v10544_v33 = vmul.f32 %v18188_v19, %v10501_v50  ;;  %v10545_v23 = vmul.f32 %v18191_v15, %v10502_v24  ;;  %13215 = vrsqrt.f32 %v10473_v0  ;;  %v10458_v56 = vmul.f32 0.00390625, %v10422_v54 }
0x1a6b   : > { %v13210_v58 = vpop.eup %13209 }
0x1a6c   : > { %v10587_v32 = vadd.f32 %v18194_v27, %v10544_v33  ;;  %v10588_v11 = vadd.f32 %v18197_v39, %v10545_v23  ;;  %v10503_v47 = vmul.f32 %v13210_v58, %v18038_v44  ;;  %v10504_v12 = vmul.f32 %v13210_v58, %v18041_v20 }
0x1a6d   : > { %v10474_v28 = vadd.f32 1e-05, %v10458_v56  ;;  %v10425_v51 = vpop.xlane.xlu0 %10424 }
0x1a6e   : > { %10619 = vst [vmem:[%s18208_s19] sm:$0xff] %v10587_v32  ;;  %10620 = vst [vmem:[%s18208_s19 + $0x8] sm:$0xff] %v10588_v11  ;;  %v10546_v17 = vmul.f32 %v18188_v19, %v10503_v47  ;;  %v10547_v18 = vmul.f32 %v18191_v15, %v10504_v12  ;;  %v10459_v25 = vmul.f32 0.00390625, %v10425_v51 }
0x1a6f   : > { %v13212_v2 = vpop.eup %13211  ;;  %13217 = vrsqrt.f32 %v10474_v28 }
0x1a70   : > { %v10589_v44 = vadd.f32 %v18194_v27, %v10546_v17  ;;  %v10590_v20 = vadd.f32 %v18197_v39, %v10547_v18  ;;  %v10505_v9 = vmul.f32 %v13212_v2, %v18048_v45  ;;  %v10506_v63 = vmul.f32 %v13212_v2, %v18051_v5 }
0x1a71   : > { %v10475_v43 = vadd.f32 1e-05, %v10459_v25  ;;  %v10428_v30 = vpop.xlane.xlu1 %10427 }
0x1a72   : > { %10621 = vst [vmem:[%s18208_s19 + $0x10] sm:$0xff] %v10589_v44  ;;  %10622 = vst [vmem:[%s18208_s19 + $0x18] sm:$0xff] %v10590_v20  ;;  %v10548_v57 = vmul.f32 %v18188_v19, %v10505_v9  ;;  %v10549_v29 = vmul.f32 %v18191_v15, %v10506_v63  ;;  %v10460_v14 = vmul.f32 0.00390625, %v10428_v30 }
0x1a73   : > { %v13214_v42 = vpop.eup %13213  ;;  %13219 = vrsqrt.f32 %v10475_v43 }
0x1a74   : > { %v10591_v21 = vadd.f32 %v18194_v27, %v10548_v57  ;;  %v10592_v53 = vadd.f32 %v18197_v39, %v10549_v29  ;;  %v10507_v45 = vmul.f32 %v13214_v42, %v18058_v41  ;;  %v10508_v5 = vmul.f32 %v13214_v42, %v18061_v36 }
0x1a75   : > { %v10476_v8 = vadd.f32 1e-05, %v10460_v14  ;;  %v10431_v13 = vpop.xlane.xlu0 %10430 }
0x1a76   : > { %10623 = vst [vmem:[%s18208_s19 + $0x20] sm:$0xff] %v10591_v21  ;;  %10624 = vst [vmem:[%s18208_s19 + $0x28] sm:$0xff] %v10592_v53  ;;  %v10550_v50 = vmul.f32 %v18188_v19, %v10507_v45  ;;  %v10551_v24 = vmul.f32 %v18191_v15, %v10508_v5  ;;  %v10461_v0 = vmul.f32 0.00390625, %v10431_v13 }
0x1a77   : > { %v13216_v54 = vpop.eup %13215  ;;  %13221 = vrsqrt.f32 %v10476_v8 }
0x1a78   : > { %v10593_v33 = vadd.f32 %v18194_v27, %v10550_v50  ;;  %v10594_v23 = vadd.f32 %v18197_v39, %v10551_v24  ;;  %v10509_v41 = vmul.f32 %v13216_v54, %v18068_v61  ;;  %v10510_v36 = vmul.f32 %v13216_v54, %v18071_v26 }
0x1a79   : > { %v10477_v56 = vadd.f32 1e-05, %v10461_v0  ;;  %v10434_v58 = vpop.xlane.xlu1 %10433 }
0x1a7a   : > { %10625 = vst [vmem:[%s18208_s19 + $0x30] sm:$0xff] %v10593_v33  ;;  %10626 = vst [vmem:[%s18208_s19 + $0x38] sm:$0xff] %v10594_v23  ;;  %v10552_v32 = vmul.f32 %v18188_v19, %v10509_v41  ;;  %v10553_v11 = vmul.f32 %v18191_v15, %v10510_v36  ;;  %v10462_v47 = vmul.f32 0.00390625, %v10434_v58 }
0x1a7b   : > { %13223 = vrsqrt.f32 %v10477_v56 }
0x1a7c   : > { %v13218_v12 = vpop.eup %13217  ;;  %v10595_v28 = vadd.f32 %v18194_v27, %v10552_v32  ;;  %v10596_v51 = vadd.f32 %v18197_v39, %v10553_v11  ;;  %v10478_v61 = vadd.f32 1e-05, %v10462_v47 }
0x1a7d   : > { %v10511_v26 = vmul.f32 %v13218_v12, %v18078_v40  ;;  %v10512_v17 = vmul.f32 %v13218_v12, %v18081_v16  ;;  %v10437_v18 = vpop.xlane.xlu0 %10436 }
0x1a7e   : > { %10627 = vst [vmem:[%s18208_s19 + $0x40] sm:$0xff] %v10595_v28  ;;  %10628 = vst [vmem:[%s18208_s19 + $0x48] sm:$0xff] %v10596_v51  ;;  %13225 = vrsqrt.f32 %v10478_v61  ;;  %v10463_v25 = vmul.f32 0.00390625, %v10437_v18 }
0x1a7f   : > { %v10554_v2 = vmul.f32 %v18188_v19, %v10511_v26  ;;  %v10555_v44 = vmul.f32 %v18191_v15, %v10512_v17 }
0x1a80   : > { %v13220_v20 = vpop.eup %13219  ;;  %v10479_v9 = vadd.f32 1e-05, %v10463_v25 }
0x1a81   : > { %v10597_v63 = vadd.f32 %v18194_v27, %v10554_v2  ;;  %v10598_v43 = vadd.f32 %v18197_v39, %v10555_v44  ;;  %v10513_v40 = vmul.f32 %v13220_v20, %v18088_v49  ;;  %v10514_v16 = vmul.f32 %v13220_v20, %v18091_v37  ;;  %v10440_v30 = vpop.xlane.xlu1 %10439 }
0x1a82   : > { %13227 = vrsqrt.f32 %v10479_v9  ;;  %v10464_v57 = vmul.f32 0.00390625, %v10440_v30 }
0x1a83   : > { %10629 = vst [vmem:[%s18208_s19 + $0x50] sm:$0xff] %v10597_v63  ;;  %10630 = vst [vmem:[%s18208_s19 + $0x58] sm:$0xff] %v10598_v43  ;;  %v10556_v29 = vmul.f32 %v18188_v19, %v10513_v40  ;;  %v10557_v14 = vmul.f32 %v18191_v15, %v10514_v16 }
0x1a84   : > { %v13222_v42 = vpop.eup %13221  ;;  %v10480_v21 = vadd.f32 1e-05, %v10464_v57 }
0x1a85   : > { %v10599_v53 = vadd.f32 %v18194_v27, %v10556_v29  ;;  %v10600_v45 = vadd.f32 %v18197_v39, %v10557_v14  ;;  %v10515_v49 = vmul.f32 %v13222_v42, %v18098_v60  ;;  %v10516_v37 = vmul.f32 %v13222_v42, %v18101_v55  ;;  %v10443_v5 = vpop.xlane.xlu0 %10442 }
0x1a86   : > { %13229 = vrsqrt.f32 %v10480_v21  ;;  %v10465_v8 = vmul.f32 0.00390625, %v10443_v5 }
0x1a87   : > { %10631 = vst [vmem:[%s18208_s19 + $0x60] sm:$0xff] %v10599_v53  ;;  %10632 = vst [vmem:[%s18208_s19 + $0x68] sm:$0xff] %v10600_v45  ;;  %v10558_v13 = vmul.f32 %v18188_v19, %v10515_v49  ;;  %v10559_v50 = vmul.f32 %v18191_v15, %v10516_v37 }
0x1a88   : > { %v13224_v24 = vpop.eup %13223  ;;  %v10481_v0 = vadd.f32 1e-05, %v10465_v8 }
0x1a89   : > { %v10601_v54 = vadd.f32 %v18194_v27, %v10558_v13  ;;  %v10602_v33 = vadd.f32 %v18197_v39, %v10559_v50  ;;  %v10517_v60 = vmul.f32 %v13224_v24, %v18108_v4  ;;  %v10518_v55 = vmul.f32 %v13224_v24, %v18111_v48  ;;  %v10446_v23 = vpop.xlane.xlu1 %10445 }
0x1a8a   : > { %13231 = vrsqrt.f32 %v10481_v0  ;;  %v10466_v41 = vmul.f32 0.00390625, %v10446_v23 }
0x1a8b   : > { %v13226_v36 = vpop.eup %13225  ;;  %10633 = vst [vmem:[%s18208_s19 + $0x70] sm:$0xff] %v10601_v54  ;;  %10634 = vst [vmem:[%s18208_s19 + $0x78] sm:$0xff] %v10602_v33  ;;  %v10560_v56 = vmul.f32 %v18188_v19, %v10517_v60  ;;  %v10561_v58 = vmul.f32 %v18191_v15, %v10518_v55 }
0x1a8c   : > { %v10519_v32 = vmul.f32 %v13226_v36, %v18118_v22  ;;  %v10520_v11 = vmul.f32 %v13226_v36, %v18121_v52  ;;  %v10482_v47 = vadd.f32 1e-05, %v10466_v41 }
0x1a8d   : > { %v10603_v4 = vadd.f32 %v18194_v27, %v10560_v56  ;;  %v10604_v48 = vadd.f32 %v18197_v39, %v10561_v58  ;;  %v10449_v12 = vpop.xlane.xlu0 %10448  ;;  %v10685_v58 = vld [vmem:[%s18208_s19 + $0x30] sm:$0xff] (%p13494_p5) }
0x1a8e   : > { %v10562_v28 = vmul.f32 %v18188_v19, %v10519_v32  ;;  %v10563_v51 = vmul.f32 %v18191_v15, %v10520_v11  ;;  %13233 = vrsqrt.f32 %v10482_v47  ;;  %v10467_v61 = vmul.f32 0.00390625, %v10449_v12  ;;  %v10687_v32 = vld [vmem:[%s18208_s19 + $0x38] sm:$0xff] (%p13494_p5)  ;;  %v10689_v11 = vld [vmem:[%s18208_s19 + $0x40] sm:$0xff] (%p13494_p5)  ;;  %10686 = vst [vmem:[%s18339_s15 + $0x60] sm:$0xff] (%p13494_p5), %v10685_v58  ;;  %v10691_v47 = vld [vmem:[%s18208_s19 + $0x48] sm:$0xff] (%p13494_p5) }
0x1a8f   : > { %v13228_v26 = vpop.eup %13227  ;;  %10635 = vst [vmem:[%s18208_s19 + $0x80] sm:$0xff] %v10603_v4  ;;  %10636 = vst [vmem:[%s18208_s19 + $0x88] sm:$0xff] %v10604_v48  ;;  %v10693_v4 = vld [vmem:[%s18208_s19 + $0x50] sm:$0xff] (%p13494_p5)  ;;  %v10695_v48 = vld [vmem:[%s18208_s19 + $0x58] sm:$0xff] (%p13494_p5) }
0x1a90   : > { %v10605_v22 = vadd.f32 %v18194_v27, %v10562_v28  ;;  %v10606_v52 = vadd.f32 %v18197_v39, %v10563_v51  ;;  %v10521_v17 = vmul.f32 %v13228_v26, %v18128_v1  ;;  %v10522_v18 = vmul.f32 %v13228_v26, %v18131_v31  ;;  %10688 = vst [vmem:[%s18339_s15 + $0x68] sm:$0xff] (%p13494_p5), %v10687_v32  ;;  %v10697_v12 = vld [vmem:[%s18208_s19 + $0x60] sm:$0xff] (%p13494_p5)  ;;  %v10699_v28 = vld [vmem:[%s18208_s19 + $0x68] sm:$0xff] (%p13494_p5) }
0x1a91   : > { %v10483_v25 = vadd.f32 1e-05, %v10467_v61  ;;  %v10452_v2 = vpop.xlane.xlu1 %10451  ;;  %10690 = vst [vmem:[%s18339_s15 + $0x80] sm:$0xff] (%p13494_p5), %v10689_v11  ;;  %10692 = vst [vmem:[%s18339_s15 + $0x88] sm:$0xff] (%p13494_p5), %v10691_v47 }
0x1a92   : > { %10637 = vst [vmem:[%s18208_s19 + $0x90] sm:$0xff] %v10605_v22  ;;  %10638 = vst [vmem:[%s18208_s19 + $0x98] sm:$0xff] %v10606_v52  ;;  %v10564_v44 = vmul.f32 %v18188_v19, %v10521_v17  ;;  %v10565_v20 = vmul.f32 %v18191_v15, %v10522_v18  ;;  %v10468_v9 = vmul.f32 0.00390625, %v10452_v2  ;;  %v10701_v51 = vld [vmem:[%s18208_s19 + $0x70] sm:$0xff] (%p13494_p5)  ;;  %v10703_v61 = vld [vmem:[%s18208_s19 + $0x78] sm:$0xff] (%p13494_p5) }
0x1a93   : > { %v13230_v63 = vpop.eup %13229  ;;  %13235 = vrsqrt.f32 %v10483_v25  ;;  %10694 = vst [vmem:[%s18339_s15 + $0xa0] sm:$0xff] (%p13494_p5), %v10693_v4  ;;  %10696 = vst [vmem:[%s18339_s15 + $0xa8] sm:$0xff] (%p13494_p5), %v10695_v48 }
0x1a94   : > { %v10607_v43 = vadd.f32 %v18194_v27, %v10564_v44  ;;  %v10608_v1 = vadd.f32 %v18197_v39, %v10565_v20  ;;  %v10523_v31 = vmul.f32 %v13230_v63, %v18138_v46  ;;  %v10524_v40 = vmul.f32 %v13230_v63, %v18141_v10  ;;  %10698 = vst [vmem:[%s18339_s15 + $0xc0] sm:$0xff] (%p13494_p5), %v10697_v12 }
0x1a95   : > { %v10484_v16 = vadd.f32 1e-05, %v10468_v9  ;;  %10700 = vst [vmem:[%s18339_s15 + $0xc8] sm:$0xff] (%p13494_p5), %v10699_v28  ;;  %10702 = vst [vmem:[%s18339_s15 + $0xe0] sm:$0xff] (%p13494_p5), %v10701_v51 }
0x1a96   : > { %10639 = vst [vmem:[%s18208_s19 + $0xa0] sm:$0xff] %v10607_v43  ;;  %10640 = vst [vmem:[%s18208_s19 + $0xa8] sm:$0xff] %v10608_v1  ;;  %v10566_v30 = vmul.f32 %v18188_v19, %v10523_v31  ;;  %v10567_v57 = vmul.f32 %v18191_v15, %v10524_v40  ;;  %v10705_v26 = vld [vmem:[%s18208_s19 + $0x80] sm:$0xff] (%p13494_p5)  ;;  %v10707_v22 = vld [vmem:[%s18208_s19 + $0x88] sm:$0xff] (%p13494_p5) }
0x1a97   : > { %v13232_v29 = vpop.eup %13231  ;;  %13237 = vrsqrt.f32 %v10484_v16  ;;  %10704 = vst [vmem:[%s18339_s15 + $0xe8] sm:$0xff] (%p13494_p5), %v10703_v61  ;;  %10706 = vst [vmem:[%s18339_s15 + $0x100] sm:$0xff] (%p13494_p5), %v10705_v26 }
0x1a98   : > { %v10609_v14 = vadd.f32 %v18194_v27, %v10566_v30  ;;  %v10610_v42 = vadd.f32 %v18197_v39, %v10567_v57  ;;  %v10525_v21 = vmul.f32 %v13232_v29, %v18148_v34  ;;  %v10526_v46 = vmul.f32 %v13232_v29, %v18151_v3  ;;  %10708 = vst [vmem:[%s18339_s15 + $0x108] sm:$0xff] (%p13494_p5), %v10707_v22 }
0x1a99   : > { %v10709_v52 = vld [vmem:[%s18208_s19 + $0x90] sm:$0xff] (%p13494_p5)  ;;  %v10711_v17 = vld [vmem:[%s18208_s19 + $0x98] sm:$0xff] (%p13494_p5) }
0x1a9a   : > { %10641 = vst [vmem:[%s18208_s19 + $0xb0] sm:$0xff] %v10609_v14  ;;  %10642 = vst [vmem:[%s18208_s19 + $0xb8] sm:$0xff] %v10610_v42  ;;  %v10568_v10 = vmul.f32 %v18188_v19, %v10525_v21  ;;  %v10569_v53 = vmul.f32 %v18191_v15, %v10526_v46 }
0x1a9b   : > { %v13234_v45 = vpop.eup %13233  ;;  %10710 = vst [vmem:[%s18339_s15 + $0x120] sm:$0xff] (%p13494_p5), %v10709_v52  ;;  %10712 = vst [vmem:[%s18339_s15 + $0x128] sm:$0xff] (%p13494_p5), %v10711_v17 }
0x1a9c   : > { %v10611_v49 = vadd.f32 %v18194_v27, %v10568_v10  ;;  %v10612_v37 = vadd.f32 %v18197_v39, %v10569_v53  ;;  %v10527_v5 = vmul.f32 %v13234_v45, %v18158_v7  ;;  %v10528_v8 = vmul.f32 %v13234_v45, %v18161_v62 }
0x1a9d   : > { %v10713_v18 = vld [vmem:[%s18208_s19 + $0xa0] sm:$0xff] (%p13494_p5)  ;;  %v10715_v25 = vld [vmem:[%s18208_s19 + $0xa8] sm:$0xff] (%p13494_p5) }
0x1a9e   : > { %10643 = vst [vmem:[%s18208_s19 + $0xc0] sm:$0xff] %v10611_v49  ;;  %10644 = vst [vmem:[%s18208_s19 + $0xc8] sm:$0xff] %v10612_v37  ;;  %v10570_v34 = vmul.f32 %v18188_v19, %v10527_v5  ;;  %v10571_v3 = vmul.f32 %v18191_v15, %v10528_v8 }
0x1a9f   : > { %10714 = vst [vmem:[%s18339_s15 + $0x140] sm:$0xff] (%p13494_p5), %v10713_v18  ;;  %10716 = vst [vmem:[%s18339_s15 + $0x148] sm:$0xff] (%p13494_p5), %v10715_v25 }
0x1aa0   : > { %v13236_v13 = vpop.eup %13235  ;;  %v10613_v50 = vadd.f32 %v18194_v27, %v10570_v34  ;;  %v10614_v24 = vadd.f32 %v18197_v39, %v10571_v3 }
0x1aa1   : > { %v10529_v0 = vmul.f32 %v13236_v13, %v18168_v35  ;;  %v10530_v54 = vmul.f32 %v13236_v13, %v18171_v38  ;;  %v10717_v2 = vld [vmem:[%s18208_s19 + $0xb0] sm:$0xff] (%p13494_p5)  ;;  %v10719_v44 = vld [vmem:[%s18208_s19 + $0xb8] sm:$0xff] (%p13494_p5) }
0x1aa2   : > { %10645 = vst [vmem:[%s18208_s19 + $0xd0] sm:$0xff] %v10613_v50  ;;  %10646 = vst [vmem:[%s18208_s19 + $0xd8] sm:$0xff] %v10614_v24 }
0x1aa3   : > { %v10572_v7 = vmul.f32 %v18188_v19, %v10529_v0  ;;  %v10573_v62 = vmul.f32 %v18191_v15, %v10530_v54  ;;  %10718 = vst [vmem:[%s18339_s15 + $0x160] sm:$0xff] (%p13494_p5), %v10717_v2  ;;  %10720 = vst [vmem:[%s18339_s15 + $0x168] sm:$0xff] (%p13494_p5), %v10719_v44 }
0x1aa4   : > { %v13238_v33 = vpop.eup %13237 }
0x1aa5   : > { %v10615_v60 = vadd.f32 %v18194_v27, %v10572_v7  ;;  %v10616_v55 = vadd.f32 %v18197_v39, %v10573_v62  ;;  %v10531_v23 = vmul.f32 %v13238_v33, %v18178_v6  ;;  %v10532_v41 = vmul.f32 %v13238_v33, %v18181_v59  ;;  %v10673_v6 = vld [vmem:[%s18208_s19] sm:$0xff] (%p13494_p5)  ;;  %v10675_v59 = vld [vmem:[%s18208_s19 + $0x8] sm:$0xff] (%p13494_p5) }
0x1aa6   : > { %10674 = vst [vmem:[%s18339_s15] sm:$0xff] (%p13494_p5), %v10673_v6  ;;  %10676 = vst [vmem:[%s18339_s15 + $0x8] sm:$0xff] (%p13494_p5), %v10675_v59  ;;  %v10721_v20 = vld [vmem:[%s18208_s19 + $0xc0] sm:$0xff] (%p13494_p5)  ;;  %v10723_v9 = vld [vmem:[%s18208_s19 + $0xc8] sm:$0xff] (%p13494_p5) }
0x1aa7   : > { %10647 = vst [vmem:[%s18208_s19 + $0xe0] sm:$0xff] %v10615_v60  ;;  %10648 = vst [vmem:[%s18208_s19 + $0xe8] sm:$0xff] %v10616_v55  ;;  %v10574_v35 = vmul.f32 %v18188_v19, %v10531_v23  ;;  %v10575_v38 = vmul.f32 %v18191_v15, %v10532_v41  ;;  %10657 = sbr.rel (!%p13494_p5) target bundleno = 6836 (0x1ab4), region = 87  ;;  %v10677_v19 = vld [vmem:[%s18208_s19 + $0x10] sm:$0xff] (%p13494_p5)  ;;  %v10679_v15 = vld [vmem:[%s18208_s19 + $0x18] sm:$0xff] (%p13494_p5) }
0x1aa8   : > { %10678 = vst [vmem:[%s18339_s15 + $0x20] sm:$0xff] (%p13494_p5), %v10677_v19  ;;  %10680 = vst [vmem:[%s18339_s15 + $0x28] sm:$0xff] (%p13494_p5), %v10679_v15 }
0x1aa9   : > { %v10617_v36 = vadd.f32 %v18194_v27, %v10574_v35  ;;  %v10618_v56 = vadd.f32 %v18197_v39, %v10575_v38  ;;  %v10681_v27 = vld [vmem:[%s18208_s19 + $0x20] sm:$0xff] (%p13494_p5)  ;;  %v10683_v39 = vld [vmem:[%s18208_s19 + $0x28] sm:$0xff] (%p13494_p5)  ;;  %v10725_v63 = vld [vmem:[%s18208_s19 + $0xd0] sm:$0xff] (%p13494_p5)  ;;  %10722 = vst [vmem:[%s18339_s15 + $0x180] sm:$0xff] (%p13494_p5), %v10721_v20 }
0x1aaa   : > { %10682 = vst [vmem:[%s18339_s15 + $0x40] sm:$0xff] (%p13494_p5), %v10681_v27  ;;  %10684 = vst [vmem:[%s18339_s15 + $0x48] sm:$0xff] (%p13494_p5), %v10683_v39  ;;  %v10727_v43 = vld [vmem:[%s18208_s19 + $0xd8] sm:$0xff] (%p13494_p5) }
0x1aab   : > { %10649 = vst [vmem:[%s18208_s19 + $0xf0] sm:$0xff] %v10617_v36  ;;  %10650 = vst [vmem:[%s18208_s19 + $0xf8] sm:$0xff] %v10618_v56 }
0x1aac   : > { %10724 = vst [vmem:[%s18339_s15 + $0x188] sm:$0xff] %v10723_v9  ;;  %10726 = vst [vmem:[%s18339_s15 + $0x1a0] sm:$0xff] %v10725_v63 }
0x1aad   : > { %10728 = vst [vmem:[%s18339_s15 + $0x1a8] sm:$0xff] %v10727_v43 }
0x1aae   : > { %v10729_v1 = vld [vmem:[%s18208_s19 + $0xe0] sm:$0xff]  ;;  %v10731_v31 = vld [vmem:[%s18208_s19 + $0xe8] sm:$0xff] }
0x1aaf   : > { %10730 = vst [vmem:[%s18339_s15 + $0x1c0] sm:$0xff] %v10729_v1  ;;  %10732 = vst [vmem:[%s18339_s15 + $0x1c8] sm:$0xff] %v10731_v31 }
0x1ab2   : > { %v10733_v40 = vld [vmem:[%s18208_s19 + $0xf0] sm:$0xff]  ;;  %v10735_v16 = vld [vmem:[%s18208_s19 + $0xf8] sm:$0xff] }
0x1ab3   : > { %10734 = vst [vmem:[%s18339_s15 + $0x1e0] sm:$0xff] %v10733_v40  ;;  %10736 = vst [vmem:[%s18339_s15 + $0x1e8] sm:$0xff] %v10735_v16 }
0x1ab4 PF: > { %p16_p5 = scmp.ge.s32.totalorder %s13478_s25, 4   ;;  %s18917_s21 = smov %s13406_s22 }
0x1ab5   : > { %s18918_s22 = smov %s13488_s28  ;;  %s18919_s23 = smov %s13478_s25 }
0x1ab6   :  { %18 = sbr.rel (!%p16_p5) target bundleno = 4 (0x4), region = 142 }
0x1abb   :  { %10752 = vsyncpa [#allocation5], 1 }
0x1abc   :  { %10754 = vsyncpa [#allocation5 + $0x1], 1 }
0x1abd   :  { %10755 = vsyncpa [#allocation7], 1 }
0x1abe   :  { %10756 = vsyncpa [#allocation10], 1 }

</bundles_post_ra>
